<compile_context>
chip_gen: v7x
topology: tpu7x:2x2x1
jax: 0.10.0
libtpu: 0.0.40
codegen_flags: <defaults>
</compile_context>

<pallas_src>
import functools

import numpy as np
import jax
import jax.numpy as jnp
from jax.experimental import pallas as pl
from jax.experimental.pallas import tpu as pltpu

_CROP = 32  # the module always center-crops 32x32 after fftshift


# ----------------------------------------------------------------------------
# Kernel 1: fused |FFT2| + fftshift + 32x32 center crop via MXU matmuls.
# ----------------------------------------------------------------------------
def _cropped_dft_factors(size, crop):
    """DFT cos/sin factors for only the `crop` post-fftshift center frequencies.

    Output index r of (fftshift + center-crop) corresponds to DFT frequency
    (r - crop // 2) mod size, so shift + crop fold into the factor matrices.
    """
    freqs = (np.arange(crop) - crop // 2) % size
    n = np.arange(size)
    ang = 2.0 * np.pi * np.outer(freqs, n) / size            # (crop, size)
    return np.cos(ang), np.sin(ang)


def _tensorcores_per_chip():
    """Best-effort megacore detection (v4 / v5p / v7x expose 2 TCs per chip)."""
    try:
        kind = jax.devices()[0].device_kind.lower()
    except Exception:
        return 1
    return 2 if any(tag in kind for tag in ("v4", "v5p", "7")) else 1


def _choose_plane_block(num_planes, n_cores, max_pb=32):
    """Planes per grid step.

    Single-TC parts (v5e/v6e): the largest block (fewer per-step overheads,
    larger stacked-matmul M).  Megacore parts: keep >= 2 steps per TensorCore
    so each core still double-buffers its input DMA.  Blocks are multiples of
    8 (or the full plane count) so the lane-dense (planes, 1024) output block
    satisfies the (8, 128) BlockSpec rule; awkward counts are zero-padded.
    """
    min_steps = 2 * n_cores if n_cores > 1 else 1
    if min_steps == 1 and num_planes <= max_pb:
        return num_planes
    best, best_exact = 8, None
    for pb in range(8, max_pb + 1, 8):
        if -(-num_planes // pb) >= min_steps:
            best = pb
            if num_planes % pb == 0:
                best_exact = pb
    return best_exact if best_exact is not None else best


def _dft_mag_kernel(x_ref, cw2_ref, ch2_ref, o_ref, *, crop):
    pb, h, w = x_ref.shape
    two_c = 2 * crop
    # Stage 1 -- W-axis DFT: ONE stacked (pb*h, w) @ (w, 2*crop) bf16 MXU matmul
    # ([cos | sin] concatenated), f32 accumulation.  bf16 input cast in-kernel
    # keeps it a single MXU pass (no Precision.HIGHEST).
    x2 = x_ref[...].astype(jnp.bfloat16).reshape(pb * h, w)
    pcs = jnp.dot(x2, cw2_ref[...], preferred_element_type=jnp.float32)  # (pb*h, 2c)
    # One wide bf16 cast; the plane split is a free leading-dim reshape.
    pcs = pcs.astype(jnp.bfloat16).reshape(pb, h, two_c)
    # Stage 2 -- H-axis DFT: one fat 64x64x64 matmul per plane, all re-using the
    # single (2*crop, h) [cos; sin] tile (no pre-broadcast copies anywhere).
    ch2 = ch2_ref[...]
    q = jnp.stack(
        [jnp.dot(ch2, pcs[i], preferred_element_type=jnp.float32)
         for i in range(pb)],
        axis=0)                                                           # (pb, 2c, 2c)
    # Quadrants of q (per plane): [[ch@pc, ch@ps], [sh@pc, sh@ps]].
    re = q[:, :crop, :crop] - q[:, crop:, crop:]
    im = q[:, crop:, :crop] + q[:, :crop, crop:]
    msq = re * re + im * im                                               # (pb, c, c)
    # Lane-dense epilogue/store: flatten each plane to one 1024-lane row (small
    # VMEM relayout copy on load/store slots while the MXU is busy), so the
    # sqrt runs full-width and every store / the writeback DMA is unmasked.
    o_ref[...] = jnp.sqrt(msq.reshape(pb, crop * crop))


def fft_shift_crop_magnitude_pallas(x_nchw, *, SC_H, SC_W, crop=_CROP):
    """Fused |FFT2| + fftshift2d + center crop.

    NCHW in; returns the lane-dense flat (N*C, crop*crop) magnitude (the
    (N, C, crop, crop) view is a free row-major reshape for the caller).
    """
    n, c, h, w = x_nchw.shape
    assert (h, w) == (SC_H, SC_W) and h >= crop and w >= crop
    num_planes = n * c
    pb = _choose_plane_block(num_planes, _tensorcores_per_chip())
    padded = -(-num_planes // pb) * pb

    planes = x_nchw.reshape(num_planes, h, w)            # free; bf16 cast in-kernel
    if padded != num_planes:                             # awkward counts: zero-pad
        planes = jnp.pad(planes, ((0, padded - num_planes), (0, 0), (0, 0)))

    ch, sh = _cropped_dft_factors(h, crop)               # (crop, h) each
    cw, sw = _cropped_dft_factors(w, crop)               # (crop, w) each
    cw2 = jnp.asarray(np.concatenate([cw.T, sw.T], axis=1), jnp.bfloat16)   # (w, 2c)
    ch2 = jnp.asarray(np.concatenate([ch, sh], axis=0), jnp.bfloat16)       # (2c, h)

    cost = pl.CostEstimate(
        flops=int(padded) * (2 * h * w * 2 * crop + 2 * 2 * crop * h * 2 * crop
                             + 6 * crop * crop),
        transcendentals=int(padded) * crop * crop,
        bytes_accessed=int(padded) * (h * w + crop * crop) * 4
        + 2 * (w * 2 * crop + 2 * crop * h))

    out_flat = pl.pallas_call(
        functools.partial(_dft_mag_kernel, crop=crop),
        out_shape=jax.ShapeDtypeStruct((padded, crop * crop), jnp.float32),
        grid_spec=pltpu.PrefetchScalarGridSpec(
            num_scalar_prefetch=0,
            grid=(padded // pb,),
            in_specs=[
                pl.BlockSpec((pb, h, w), lambda i: (i, 0, 0)),
                # Constant-index factor blocks: DMA'd once, revisited after.
                pl.BlockSpec((w, 2 * crop), lambda i: (0, 0)),
                pl.BlockSpec((2 * crop, h), lambda i: (0, 0)),
            ],
            out_specs=pl.BlockSpec((pb, crop * crop), lambda i: (i, 0)),
        ),
        compiler_params=pltpu.CompilerParams(dimension_semantics=("parallel",)),
        cost_estimate=cost,
    )(planes, cw2, ch2)

    if padded != num_planes:
        out_flat = out_flat[:num_planes]
    return out_flat                                       # (num_planes, crop*crop)


# ----------------------------------------------------------------------------
# Kernel 2: quadruplet loss (PairwiseDistance p=2, eps=1e-6 + hinge + mean).
# ----------------------------------------------------------------------------
def _quad_loss_fused_kernel(x_ref, o_ref, *, bs, g, group_stride,
                            margin_1, margin_2, eps, inv_bs):
    """Single-input variant: slices the 4 overlapping views in-kernel."""
    acc = jnp.zeros((1, 1), jnp.float32)
    for i in range(bs):                                    # static unroll; bs is small
        lo = i * g
        a = x_ref[lo:lo + g, :]
        p = x_ref[group_stride + lo:group_stride + lo + g, :]
        n1 = x_ref[2 * group_stride + lo:2 * group_stride + lo + g, :]
        n2 = x_ref[3 * group_stride + lo:3 * group_stride + lo + g, :]
        # torch.nn.PairwiseDistance(p=2): ||x1 - x2 + eps||_2 along the feature
        # dim (eps is a per-element bias; preserved exactly).
        d_ap = jnp.sqrt(jnp.sum((a - p + eps) ** 2, keepdims=True))
        d_an1 = jnp.sqrt(jnp.sum((a - n1 + eps) ** 2, keepdims=True))
        d_n1n2 = jnp.sqrt(jnp.sum((n1 - n2 + eps) ** 2, keepdims=True))
        acc = acc + jnp.maximum((margin_1 + d_ap - d_an1)
                                + (margin_2 + d_ap - d_n1n2), 0.0)
    o_ref[0, 0] = acc[0, 0] * inv_bs


def _quad_loss_kernel(a_ref, p_ref, n1_ref, n2_ref, o_ref, *,
                      margin_1, margin_2, eps, inv_bs):
    """Generic 4-input fallback (used when rows are not plane aligned)."""
    a, p = a_ref[...], p_ref[...]
    n1, n2 = n1_ref[...], n2_ref[...]
    d_ap = jnp.sqrt(jnp.sum((a - p + eps) ** 2, axis=-1, keepdims=True))
    d_an1 = jnp.sqrt(jnp.sum((a - n1 + eps) ** 2, axis=-1, keepdims=True))
    d_n1n2 = jnp.sqrt(jnp.sum((n1 - n2 + eps) ** 2, axis=-1, keepdims=True))
    loss = jnp.maximum((margin_1 + d_ap - d_an1) + (margin_2 + d_ap - d_n1n2), 0.0)
    o_ref[0, 0] = jnp.sum(loss) * inv_bs


def quad_loss_mean_pallas(fft_flat, *, batch_size, channels, margin_1, margin_2):
    """Quadruplet loss, fed directly from kernel 1's flat (planes, 1024) output."""
    bs, c = int(batch_size), int(channels)
    num_planes, feat = fft_flat.shape
    group = (bs - 1) * c                       # planes per (off-by-one) slice
    assert num_planes == 4 * bs * c and group > 0
    assert (group * feat) % bs == 0, "reference .reshape(batch_size, -1) is ill-formed"
    eps, inv_bs = 1e-6, 1.0 / float(bs)
    smem_out = pl.BlockSpec(memory_space=pltpu.MemorySpace.SMEM)

    if c % bs == 0:
        # Fast path: every (batch, -1) row boundary is plane aligned, so the four
        # overlapping views are sliced inside the kernel -- no slice/reshape
        # copies materialized between the two pallas_calls.
        g = group // bs
        kern = functools.partial(
            _quad_loss_fused_kernel, bs=bs, g=g, group_stride=bs * c,
            margin_1=float(margin_1), margin_2=float(margin_2),
            eps=eps, inv_bs=inv_bs)
        cost = pl.CostEstimate(flops=12 * bs * g * feat + 16 * bs,
                               transcendentals=3 * bs,
                               bytes_accessed=num_planes * feat * 4 + 4)
        out = pl.pallas_call(
            kern,
            out_shape=jax.ShapeDtypeStruct((1, 1), jnp.float32),
            in_specs=[pl.BlockSpec(memory_space=pltpu.MemorySpace.VMEM)],
            out_specs=smem_out,
            cost_estimate=cost,
        )(fft_flat)
        return out[0, 0]

    # General fallback (rows may split planes): materialize the 4 views in JAX.
    d = (group * feat) // bs
    views = [fft_flat[k * bs * c:k * bs * c + group].reshape(bs, d) for k in range(4)]
    kern = functools.partial(_quad_loss_kernel, margin_1=float(margin_1),
                             margin_2=float(margin_2), eps=eps, inv_bs=inv_bs)
    cost = pl.CostEstimate(flops=12 * bs * d + 16 * bs, transcendentals=3 * bs,
                           bytes_accessed=4 * bs * d * 4 + 4)
    out = pl.pallas_call(
        kern,
        out_shape=jax.ShapeDtypeStruct((1, 1), jnp.float32),
        in_specs=[pl.BlockSpec(memory_space=pltpu.MemorySpace.VMEM)] * 4,
        out_specs=smem_out,
        cost_estimate=cost,
    )(*views)
    return out[0, 0]


# ----------------------------------------------------------------------------
# Forward pass (mirrors quad_loss.forward exactly, incl. its odd slicing).
# ----------------------------------------------------------------------------
def quad_loss_forward(radar_feature, *, margin_1, margin_2, lamda,
                      batch_size, SC_H, SC_W):
    del lamda  # unused in the PyTorch forward as well
    n, c, _, _ = radar_feature.shape
    fft_flat = fft_shift_crop_magnitude_pallas(radar_feature, SC_H=SC_H, SC_W=SC_W)
    radar_fft = fft_flat.reshape(n, c, _CROP, _CROP)       # free row-major view
    loss = quad_loss_mean_pallas(fft_flat, batch_size=batch_size, channels=c,
                                 margin_1=margin_1, margin_2=margin_2)
    return loss, radar_fft


# ----------------------------------------------------------------------------
# Pure-JAX references for correctness checks.
# ----------------------------------------------------------------------------
def _reference_fft(radar_feature, SC_H, SC_W):
    fft = jnp.abs(jnp.fft.fft2(radar_feature.astype(jnp.float32)))
    fft = jnp.fft.fftshift(fft, axes=(2, 3))
    return fft[:, :, SC_H // 2 - 16:SC_H // 2 + 16, SC_W // 2 - 16:SC_W // 2 + 16]


def _reference_loss_from_fft(fft, margin_1, margin_2, batch_size):
    a = fft[0:batch_size - 1].reshape(batch_size, -1)
    p = fft[batch_size:2 * batch_size - 1].reshape(batch_size, -1)
    n1 = fft[2 * batch_size:3 * batch_size - 1].reshape(batch_size, -1)
    n2 = fft[3 * batch_size:4 * batch_size - 1].reshape(batch_size, -1)
    eps = 1e-6
    d_ap = jnp.sqrt(jnp.sum((a - p + eps) ** 2, axis=-1))
    d_an1 = jnp.sqrt(jnp.sum((a - n1 + eps) ** 2, axis=-1))
    d_n1n2 = jnp.sqrt(jnp.sum((n1 - n2 + eps) ** 2, axis=-1))
    return jnp.mean(jnp.maximum((margin_1 + d_ap - d_an1)
                                + (margin_2 + d_ap - d_n1n2), 0.0))


if __name__ == "__main__":
    # Small, module-consistent shapes: first dim must cover 4 * batch_size - 1,
    # spatial dims must be >= 32 for the hard-coded +/-16 center crop.
    batch_size, channels, SC_H, SC_W = 2, 4, 64, 64
    margin_1, margin_2, lamda = 0.5, 0.2, 1.0

    key = jax.random.PRNGKey(0)
    radar_feature = jax.random.normal(
        key, (4 * batch_size, channels, SC_H, SC_W), dtype=jnp.float32)

    loss, radar_fft = quad_loss_forward(
        radar_feature, margin_1=margin_1, margin_2=margin_2, lamda=lamda,
        batch_size=batch_size, SC_H=SC_H, SC_W=SC_W)
    loss, radar_fft = jax.block_until_ready((loss, radar_fft))

    # 1) FFT-magnitude kernel vs jnp.fft reference (bf16 single-pass tolerance).
    #    Note: single-pass bf16 MXU operands trade ~0.5% relative error for a
    #    3x cheaper matmul; acceptable for this hinge loss (flagged in review).
    ref_fft = _reference_fft(radar_feature, SC_H, SC_W)
    np.testing.assert_allclose(np.asarray(radar_fft), np.asarray(ref_fft),
                               rtol=2e-2, atol=1.0)

    # 2) Loss kernel vs a pure-JAX recompute from the kernel's own FFT output
    #    (tight; isolates kernel 2 from bf16 error amplification).
    ref_loss = _reference_loss_from_fft(radar_fft, margin_1, margin_2, batch_size)
    np.testing.assert_allclose(np.asarray(loss), np.asarray(ref_loss),
                               rtol=1e-3, atol=0.1)

    print("KERNEL_OK")
</pallas_src>

<mosaic_0001>
module attributes {stable_mosaic.version = 11 : i64} {
  func.func @_dft_mag_kernel(%arg0: i32, %arg1: memref<32x64x64xf32, #tpu.memory_space<vmem>>, %arg2: memref<64x64xbf16, #tpu.memory_space<vmem>>, %arg3: memref<64x64xbf16, #tpu.memory_space<vmem>>, %arg4: memref<32x1024xf32, #tpu.memory_space<vmem>>) attributes {dimension_semantics = [#tpu.dimension_semantics<parallel>], iteration_bounds = array<i64: 1>, scalar_prefetch = 0 : i64, scratch_operands = 0 : i64, tpu.core_type = #tpu.core_type<tc>, window_params = [{transform_indices = @transform_0, window_bounds = array<i64: 32, 64, 64>}, {pipeline_mode = #tpu.pipeline_mode<synchronous>, transform_indices = @transform_1, window_bounds = array<i64: 64, 64>}, {pipeline_mode = #tpu.pipeline_mode<synchronous>, transform_indices = @transform_2, window_bounds = array<i64: 64, 64>}, {transform_indices = @transform_3, window_bounds = array<i64: 32, 1024>}]} {
    %c0 = arith.constant 0 : index
    %c0_0 = arith.constant 0 : index
    %c0_1 = arith.constant 0 : index
    %0 = vector.load %arg1[%c0, %c0_0, %c0_1] : memref<32x64x64xf32, #tpu.memory_space<vmem>>, vector<32x64x64xf32>
    %1 = arith.truncf %0 : vector<32x64x64xf32> to vector<32x64x64xbf16>
    %2 = vector.shape_cast %1 : vector<32x64x64xbf16> to vector<2048x64xbf16>
    %c0_2 = arith.constant 0 : index
    %c0_3 = arith.constant 0 : index
    %3 = vector.load %arg2[%c0_2, %c0_3] : memref<64x64xbf16, #tpu.memory_space<vmem>>, vector<64x64xbf16>
    %cst = arith.constant dense<0.000000e+00> : vector<2048x64xf32>
    %4 = tpu.matmul %2, %3, %cst {dimension_numbers = #tpu.dot_dimension_numbers<[1], [0], [0], [1], [0, 0, 1, 1], [], []>} : vector<2048x64xbf16>, vector<64x64xbf16>, vector<2048x64xf32> -> vector<2048x64xf32>
    %5 = arith.truncf %4 : vector<2048x64xf32> to vector<2048x64xbf16>
    %6 = vector.shape_cast %5 : vector<2048x64xbf16> to vector<32x64x64xbf16>
    %c0_4 = arith.constant 0 : index
    %c0_5 = arith.constant 0 : index
    %7 = vector.load %arg3[%c0_4, %c0_5] : memref<64x64xbf16, #tpu.memory_space<vmem>>, vector<64x64xbf16>
    %8 = vector.extract_strided_slice %6 {offsets = [0, 0, 0], sizes = [1, 64, 64], strides = [1, 1, 1]} : vector<32x64x64xbf16> to vector<1x64x64xbf16>
    %9 = vector.shape_cast %8 : vector<1x64x64xbf16> to vector<64x64xbf16>
    %cst_6 = arith.constant dense<0.000000e+00> : vector<64x64xf32>
    %10 = tpu.matmul %7, %9, %cst_6 {dimension_numbers = #tpu.dot_dimension_numbers<[1], [0], [0], [1], [0, 0, 1, 1], [], []>} : vector<64x64xbf16>, vector<64x64xbf16>, vector<64x64xf32> -> vector<64x64xf32>
    %11 = vector.extract_strided_slice %6 {offsets = [1, 0, 0], sizes = [1, 64, 64], strides = [1, 1, 1]} : vector<32x64x64xbf16> to vector<1x64x64xbf16>
    %12 = vector.shape_cast %11 : vector<1x64x64xbf16> to vector<64x64xbf16>
    %cst_7 = arith.constant dense<0.000000e+00> : vector<64x64xf32>
    %13 = tpu.matmul %7, %12, %cst_7 {dimension_numbers = #tpu.dot_dimension_numbers<[1], [0], [0], [1], [0, 0, 1, 1], [], []>} : vector<64x64xbf16>, vector<64x64xbf16>, vector<64x64xf32> -> vector<64x64xf32>
    %14 = vector.extract_strided_slice %6 {offsets = [2, 0, 0], sizes = [1, 64, 64], strides = [1, 1, 1]} : vector<32x64x64xbf16> to vector<1x64x64xbf16>
    %15 = vector.shape_cast %14 : vector<1x64x64xbf16> to vector<64x64xbf16>
    %cst_8 = arith.constant dense<0.000000e+00> : vector<64x64xf32>
    %16 = tpu.matmul %7, %15, %cst_8 {dimension_numbers = #tpu.dot_dimension_numbers<[1], [0], [0], [1], [0, 0, 1, 1], [], []>} : vector<64x64xbf16>, vector<64x64xbf16>, vector<64x64xf32> -> vector<64x64xf32>
    %17 = vector.extract_strided_slice %6 {offsets = [3, 0, 0], sizes = [1, 64, 64], strides = [1, 1, 1]} : vector<32x64x64xbf16> to vector<1x64x64xbf16>
    %18 = vector.shape_cast %17 : vector<1x64x64xbf16> to vector<64x64xbf16>
    %cst_9 = arith.constant dense<0.000000e+00> : vector<64x64xf32>
    %19 = tpu.matmul %7, %18, %cst_9 {dimension_numbers = #tpu.dot_dimension_numbers<[1], [0], [0], [1], [0, 0, 1, 1], [], []>} : vector<64x64xbf16>, vector<64x64xbf16>, vector<64x64xf32> -> vector<64x64xf32>
    %20 = vector.extract_strided_slice %6 {offsets = [4, 0, 0], sizes = [1, 64, 64], strides = [1, 1, 1]} : vector<32x64x64xbf16> to vector<1x64x64xbf16>
    %21 = vector.shape_cast %20 : vector<1x64x64xbf16> to vector<64x64xbf16>
    %cst_10 = arith.constant dense<0.000000e+00> : vector<64x64xf32>
    %22 = tpu.matmul %7, %21, %cst_10 {dimension_numbers = #tpu.dot_dimension_numbers<[1], [0], [0], [1], [0, 0, 1, 1], [], []>} : vector<64x64xbf16>, vector<64x64xbf16>, vector<64x64xf32> -> vector<64x64xf32>
    %23 = vector.extract_strided_slice %6 {offsets = [5, 0, 0], sizes = [1, 64, 64], strides = [1, 1, 1]} : vector<32x64x64xbf16> to vector<1x64x64xbf16>
    %24 = vector.shape_cast %23 : vector<1x64x64xbf16> to vector<64x64xbf16>
    %cst_11 = arith.constant dense<0.000000e+00> : vector<64x64xf32>
    %25 = tpu.matmul %7, %24, %cst_11 {dimension_numbers = #tpu.dot_dimension_numbers<[1], [0], [0], [1], [0, 0, 1, 1], [], []>} : vector<64x64xbf16>, vector<64x64xbf16>, vector<64x64xf32> -> vector<64x64xf32>
    %26 = vector.extract_strided_slice %6 {offsets = [6, 0, 0], sizes = [1, 64, 64], strides = [1, 1, 1]} : vector<32x64x64xbf16> to vector<1x64x64xbf16>
    %27 = vector.shape_cast %26 : vector<1x64x64xbf16> to vector<64x64xbf16>
    %cst_12 = arith.constant dense<0.000000e+00> : vector<64x64xf32>
    %28 = tpu.matmul %7, %27, %cst_12 {dimension_numbers = #tpu.dot_dimension_numbers<[1], [0], [0], [1], [0, 0, 1, 1], [], []>} : vector<64x64xbf16>, vector<64x64xbf16>, vector<64x64xf32> -> vector<64x64xf32>
    %29 = vector.extract_strided_slice %6 {offsets = [7, 0, 0], sizes = [1, 64, 64], strides = [1, 1, 1]} : vector<32x64x64xbf16> to vector<1x64x64xbf16>
    %30 = vector.shape_cast %29 : vector<1x64x64xbf16> to vector<64x64xbf16>
    %cst_13 = arith.constant dense<0.000000e+00> : vector<64x64xf32>
    %31 = tpu.matmul %7, %30, %cst_13 {dimension_numbers = #tpu.dot_dimension_numbers<[1], [0], [0], [1], [0, 0, 1, 1], [], []>} : vector<64x64xbf16>, vector<64x64xbf16>, vector<64x64xf32> -> vector<64x64xf32>
    %32 = vector.extract_strided_slice %6 {offsets = [8, 0, 0], sizes = [1, 64, 64], strides = [1, 1, 1]} : vector<32x64x64xbf16> to vector<1x64x64xbf16>
    %33 = vector.shape_cast %32 : vector<1x64x64xbf16> to vector<64x64xbf16>
    %cst_14 = arith.constant dense<0.000000e+00> : vector<64x64xf32>
    %34 = tpu.matmul %7, %33, %cst_14 {dimension_numbers = #tpu.dot_dimension_numbers<[1], [0], [0], [1], [0, 0, 1, 1], [], []>} : vector<64x64xbf16>, vector<64x64xbf16>, vector<64x64xf32> -> vector<64x64xf32>
    %35 = vector.extract_strided_slice %6 {offsets = [9, 0, 0], sizes = [1, 64, 64], strides = [1, 1, 1]} : vector<32x64x64xbf16> to vector<1x64x64xbf16>
    %36 = vector.shape_cast %35 : vector<1x64x64xbf16> to vector<64x64xbf16>
    %cst_15 = arith.constant dense<0.000000e+00> : vector<64x64xf32>
    %37 = tpu.matmul %7, %36, %cst_15 {dimension_numbers = #tpu.dot_dimension_numbers<[1], [0], [0], [1], [0, 0, 1, 1], [], []>} : vector<64x64xbf16>, vector<64x64xbf16>, vector<64x64xf32> -> vector<64x64xf32>
    %38 = vector.extract_strided_slice %6 {offsets = [10, 0, 0], sizes = [1, 64, 64], strides = [1, 1, 1]} : vector<32x64x64xbf16> to vector<1x64x64xbf16>
    %39 = vector.shape_cast %38 : vector<1x64x64xbf16> to vector<64x64xbf16>
    %cst_16 = arith.constant dense<0.000000e+00> : vector<64x64xf32>
    %40 = tpu.matmul %7, %39, %cst_16 {dimension_numbers = #tpu.dot_dimension_numbers<[1], [0], [0], [1], [0, 0, 1, 1], [], []>} : vector<64x64xbf16>, vector<64x64xbf16>, vector<64x64xf32> -> vector<64x64xf32>
    %41 = vector.extract_strided_slice %6 {offsets = [11, 0, 0], sizes = [1, 64, 64], strides = [1, 1, 1]} : vector<32x64x64xbf16> to vector<1x64x64xbf16>
    %42 = vector.shape_cast %41 : vector<1x64x64xbf16> to vector<64x64xbf16>
    %cst_17 = arith.constant dense<0.000000e+00> : vector<64x64xf32>
    %43 = tpu.matmul %7, %42, %cst_17 {dimension_numbers = #tpu.dot_dimension_numbers<[1], [0], [0], [1], [0, 0, 1, 1], [], []>} : vector<64x64xbf16>, vector<64x64xbf16>, vector<64x64xf32> -> vector<64x64xf32>
    %44 = vector.extract_strided_slice %6 {offsets = [12, 0, 0], sizes = [1, 64, 64], strides = [1, 1, 1]} : vector<32x64x64xbf16> to vector<1x64x64xbf16>
    %45 = vector.shape_cast %44 : vector<1x64x64xbf16> to vector<64x64xbf16>
    %cst_18 = arith.constant dense<0.000000e+00> : vector<64x64xf32>
    %46 = tpu.matmul %7, %45, %cst_18 {dimension_numbers = #tpu.dot_dimension_numbers<[1], [0], [0], [1], [0, 0, 1, 1], [], []>} : vector<64x64xbf16>, vector<64x64xbf16>, vector<64x64xf32> -> vector<64x64xf32>
    %47 = vector.extract_strided_slice %6 {offsets = [13, 0, 0], sizes = [1, 64, 64], strides = [1, 1, 1]} : vector<32x64x64xbf16> to vector<1x64x64xbf16>
    %48 = vector.shape_cast %47 : vector<1x64x64xbf16> to vector<64x64xbf16>
    %cst_19 = arith.constant dense<0.000000e+00> : vector<64x64xf32>
    %49 = tpu.matmul %7, %48, %cst_19 {dimension_numbers = #tpu.dot_dimension_numbers<[1], [0], [0], [1], [0, 0, 1, 1], [], []>} : vector<64x64xbf16>, vector<64x64xbf16>, vector<64x64xf32> -> vector<64x64xf32>
    %50 = vector.extract_strided_slice %6 {offsets = [14, 0, 0], sizes = [1, 64, 64], strides = [1, 1, 1]} : vector<32x64x64xbf16> to vector<1x64x64xbf16>
    %51 = vector.shape_cast %50 : vector<1x64x64xbf16> to vector<64x64xbf16>
    %cst_20 = arith.constant dense<0.000000e+00> : vector<64x64xf32>
    %52 = tpu.matmul %7, %51, %cst_20 {dimension_numbers = #tpu.dot_dimension_numbers<[1], [0], [0], [1], [0, 0, 1, 1], [], []>} : vector<64x64xbf16>, vector<64x64xbf16>, vector<64x64xf32> -> vector<64x64xf32>
    %53 = vector.extract_strided_slice %6 {offsets = [15, 0, 0], sizes = [1, 64, 64], strides = [1, 1, 1]} : vector<32x64x64xbf16> to vector<1x64x64xbf16>
    %54 = vector.shape_cast %53 : vector<1x64x64xbf16> to vector<64x64xbf16>
    %cst_21 = arith.constant dense<0.000000e+00> : vector<64x64xf32>
    %55 = tpu.matmul %7, %54, %cst_21 {dimension_numbers = #tpu.dot_dimension_numbers<[1], [0], [0], [1], [0, 0, 1, 1], [], []>} : vector<64x64xbf16>, vector<64x64xbf16>, vector<64x64xf32> -> vector<64x64xf32>
    %56 = vector.extract_strided_slice %6 {offsets = [16, 0, 0], sizes = [1, 64, 64], strides = [1, 1, 1]} : vector<32x64x64xbf16> to vector<1x64x64xbf16>
    %57 = vector.shape_cast %56 : vector<1x64x64xbf16> to vector<64x64xbf16>
    %cst_22 = arith.constant dense<0.000000e+00> : vector<64x64xf32>
    %58 = tpu.matmul %7, %57, %cst_22 {dimension_numbers = #tpu.dot_dimension_numbers<[1], [0], [0], [1], [0, 0, 1, 1], [], []>} : vector<64x64xbf16>, vector<64x64xbf16>, vector<64x64xf32> -> vector<64x64xf32>
    %59 = vector.extract_strided_slice %6 {offsets = [17, 0, 0], sizes = [1, 64, 64], strides = [1, 1, 1]} : vector<32x64x64xbf16> to vector<1x64x64xbf16>
    %60 = vector.shape_cast %59 : vector<1x64x64xbf16> to vector<64x64xbf16>
    %cst_23 = arith.constant dense<0.000000e+00> : vector<64x64xf32>
    %61 = tpu.matmul %7, %60, %cst_23 {dimension_numbers = #tpu.dot_dimension_numbers<[1], [0], [0], [1], [0, 0, 1, 1], [], []>} : vector<64x64xbf16>, vector<64x64xbf16>, vector<64x64xf32> -> vector<64x64xf32>
    %62 = vector.extract_strided_slice %6 {offsets = [18, 0, 0], sizes = [1, 64, 64], strides = [1, 1, 1]} : vector<32x64x64xbf16> to vector<1x64x64xbf16>
    %63 = vector.shape_cast %62 : vector<1x64x64xbf16> to vector<64x64xbf16>
    %cst_24 = arith.constant dense<0.000000e+00> : vector<64x64xf32>
    %64 = tpu.matmul %7, %63, %cst_24 {dimension_numbers = #tpu.dot_dimension_numbers<[1], [0], [0], [1], [0, 0, 1, 1], [], []>} : vector<64x64xbf16>, vector<64x64xbf16>, vector<64x64xf32> -> vector<64x64xf32>
    %65 = vector.extract_strided_slice %6 {offsets = [19, 0, 0], sizes = [1, 64, 64], strides = [1, 1, 1]} : vector<32x64x64xbf16> to vector<1x64x64xbf16>
    %66 = vector.shape_cast %65 : vector<1x64x64xbf16> to vector<64x64xbf16>
    %cst_25 = arith.constant dense<0.000000e+00> : vector<64x64xf32>
    %67 = tpu.matmul %7, %66, %cst_25 {dimension_numbers = #tpu.dot_dimension_numbers<[1], [0], [0], [1], [0, 0, 1, 1], [], []>} : vector<64x64xbf16>, vector<64x64xbf16>, vector<64x64xf32> -> vector<64x64xf32>
    %68 = vector.extract_strided_slice %6 {offsets = [20, 0, 0], sizes = [1, 64, 64], strides = [1, 1, 1]} : vector<32x64x64xbf16> to vector<1x64x64xbf16>
    %69 = vector.shape_cast %68 : vector<1x64x64xbf16> to vector<64x64xbf16>
    %cst_26 = arith.constant dense<0.000000e+00> : vector<64x64xf32>
    %70 = tpu.matmul %7, %69, %cst_26 {dimension_numbers = #tpu.dot_dimension_numbers<[1], [0], [0], [1], [0, 0, 1, 1], [], []>} : vector<64x64xbf16>, vector<64x64xbf16>, vector<64x64xf32> -> vector<64x64xf32>
    %71 = vector.extract_strided_slice %6 {offsets = [21, 0, 0], sizes = [1, 64, 64], strides = [1, 1, 1]} : vector<32x64x64xbf16> to vector<1x64x64xbf16>
    %72 = vector.shape_cast %71 : vector<1x64x64xbf16> to vector<64x64xbf16>
    %cst_27 = arith.constant dense<0.000000e+00> : vector<64x64xf32>
    %73 = tpu.matmul %7, %72, %cst_27 {dimension_numbers = #tpu.dot_dimension_numbers<[1], [0], [0], [1], [0, 0, 1, 1], [], []>} : vector<64x64xbf16>, vector<64x64xbf16>, vector<64x64xf32> -> vector<64x64xf32>
    %74 = vector.extract_strided_slice %6 {offsets = [22, 0, 0], sizes = [1, 64, 64], strides = [1, 1, 1]} : vector<32x64x64xbf16> to vector<1x64x64xbf16>
    %75 = vector.shape_cast %74 : vector<1x64x64xbf16> to vector<64x64xbf16>
    %cst_28 = arith.constant dense<0.000000e+00> : vector<64x64xf32>
    %76 = tpu.matmul %7, %75, %cst_28 {dimension_numbers = #tpu.dot_dimension_numbers<[1], [0], [0], [1], [0, 0, 1, 1], [], []>} : vector<64x64xbf16>, vector<64x64xbf16>, vector<64x64xf32> -> vector<64x64xf32>
    %77 = vector.extract_strided_slice %6 {offsets = [23, 0, 0], sizes = [1, 64, 64], strides = [1, 1, 1]} : vector<32x64x64xbf16> to vector<1x64x64xbf16>
    %78 = vector.shape_cast %77 : vector<1x64x64xbf16> to vector<64x64xbf16>
    %cst_29 = arith.constant dense<0.000000e+00> : vector<64x64xf32>
    %79 = tpu.matmul %7, %78, %cst_29 {dimension_numbers = #tpu.dot_dimension_numbers<[1], [0], [0], [1], [0, 0, 1, 1], [], []>} : vector<64x64xbf16>, vector<64x64xbf16>, vector<64x64xf32> -> vector<64x64xf32>
    %80 = vector.extract_strided_slice %6 {offsets = [24, 0, 0], sizes = [1, 64, 64], strides = [1, 1, 1]} : vector<32x64x64xbf16> to vector<1x64x64xbf16>
    %81 = vector.shape_cast %80 : vector<1x64x64xbf16> to vector<64x64xbf16>
    %cst_30 = arith.constant dense<0.000000e+00> : vector<64x64xf32>
    %82 = tpu.matmul %7, %81, %cst_30 {dimension_numbers = #tpu.dot_dimension_numbers<[1], [0], [0], [1], [0, 0, 1, 1], [], []>} : vector<64x64xbf16>, vector<64x64xbf16>, vector<64x64xf32> -> vector<64x64xf32>
    %83 = vector.extract_strided_slice %6 {offsets = [25, 0, 0], sizes = [1, 64, 64], strides = [1, 1, 1]} : vector<32x64x64xbf16> to vector<1x64x64xbf16>
    %84 = vector.shape_cast %83 : vector<1x64x64xbf16> to vector<64x64xbf16>
    %cst_31 = arith.constant dense<0.000000e+00> : vector<64x64xf32>
    %85 = tpu.matmul %7, %84, %cst_31 {dimension_numbers = #tpu.dot_dimension_numbers<[1], [0], [0], [1], [0, 0, 1, 1], [], []>} : vector<64x64xbf16>, vector<64x64xbf16>, vector<64x64xf32> -> vector<64x64xf32>
    %86 = vector.extract_strided_slice %6 {offsets = [26, 0, 0], sizes = [1, 64, 64], strides = [1, 1, 1]} : vector<32x64x64xbf16> to vector<1x64x64xbf16>
    %87 = vector.shape_cast %86 : vector<1x64x64xbf16> to vector<64x64xbf16>
    %cst_32 = arith.constant dense<0.000000e+00> : vector<64x64xf32>
    %88 = tpu.matmul %7, %87, %cst_32 {dimension_numbers = #tpu.dot_dimension_numbers<[1], [0], [0], [1], [0, 0, 1, 1], [], []>} : vector<64x64xbf16>, vector<64x64xbf16>, vector<64x64xf32> -> vector<64x64xf32>
    %89 = vector.extract_strided_slice %6 {offsets = [27, 0, 0], sizes = [1, 64, 64], strides = [1, 1, 1]} : vector<32x64x64xbf16> to vector<1x64x64xbf16>
    %90 = vector.shape_cast %89 : vector<1x64x64xbf16> to vector<64x64xbf16>
    %cst_33 = arith.constant dense<0.000000e+00> : vector<64x64xf32>
    %91 = tpu.matmul %7, %90, %cst_33 {dimension_numbers = #tpu.dot_dimension_numbers<[1], [0], [0], [1], [0, 0, 1, 1], [], []>} : vector<64x64xbf16>, vector<64x64xbf16>, vector<64x64xf32> -> vector<64x64xf32>
    %92 = vector.extract_strided_slice %6 {offsets = [28, 0, 0], sizes = [1, 64, 64], strides = [1, 1, 1]} : vector<32x64x64xbf16> to vector<1x64x64xbf16>
    %93 = vector.shape_cast %92 : vector<1x64x64xbf16> to vector<64x64xbf16>
    %cst_34 = arith.constant dense<0.000000e+00> : vector<64x64xf32>
    %94 = tpu.matmul %7, %93, %cst_34 {dimension_numbers = #tpu.dot_dimension_numbers<[1], [0], [0], [1], [0, 0, 1, 1], [], []>} : vector<64x64xbf16>, vector<64x64xbf16>, vector<64x64xf32> -> vector<64x64xf32>
    %95 = vector.extract_strided_slice %6 {offsets = [29, 0, 0], sizes = [1, 64, 64], strides = [1, 1, 1]} : vector<32x64x64xbf16> to vector<1x64x64xbf16>
    %96 = vector.shape_cast %95 : vector<1x64x64xbf16> to vector<64x64xbf16>
    %cst_35 = arith.constant dense<0.000000e+00> : vector<64x64xf32>
    %97 = tpu.matmul %7, %96, %cst_35 {dimension_numbers = #tpu.dot_dimension_numbers<[1], [0], [0], [1], [0, 0, 1, 1], [], []>} : vector<64x64xbf16>, vector<64x64xbf16>, vector<64x64xf32> -> vector<64x64xf32>
    %98 = vector.extract_strided_slice %6 {offsets = [30, 0, 0], sizes = [1, 64, 64], strides = [1, 1, 1]} : vector<32x64x64xbf16> to vector<1x64x64xbf16>
    %99 = vector.shape_cast %98 : vector<1x64x64xbf16> to vector<64x64xbf16>
    %cst_36 = arith.constant dense<0.000000e+00> : vector<64x64xf32>
    %100 = tpu.matmul %7, %99, %cst_36 {dimension_numbers = #tpu.dot_dimension_numbers<[1], [0], [0], [1], [0, 0, 1, 1], [], []>} : vector<64x64xbf16>, vector<64x64xbf16>, vector<64x64xf32> -> vector<64x64xf32>
    %101 = vector.extract_strided_slice %6 {offsets = [31, 0, 0], sizes = [1, 64, 64], strides = [1, 1, 1]} : vector<32x64x64xbf16> to vector<1x64x64xbf16>
    %102 = vector.shape_cast %101 : vector<1x64x64xbf16> to vector<64x64xbf16>
    %cst_37 = arith.constant dense<0.000000e+00> : vector<64x64xf32>
    %103 = tpu.matmul %7, %102, %cst_37 {dimension_numbers = #tpu.dot_dimension_numbers<[1], [0], [0], [1], [0, 0, 1, 1], [], []>} : vector<64x64xbf16>, vector<64x64xbf16>, vector<64x64xf32> -> vector<64x64xf32>
    %104 = vector.shape_cast %10 : vector<64x64xf32> to vector<1x64x64xf32>
    %105 = vector.shape_cast %13 : vector<64x64xf32> to vector<1x64x64xf32>
    %106 = vector.shape_cast %16 : vector<64x64xf32> to vector<1x64x64xf32>
    %107 = vector.shape_cast %19 : vector<64x64xf32> to vector<1x64x64xf32>
    %108 = vector.shape_cast %22 : vector<64x64xf32> to vector<1x64x64xf32>
    %109 = vector.shape_cast %25 : vector<64x64xf32> to vector<1x64x64xf32>
    %110 = vector.shape_cast %28 : vector<64x64xf32> to vector<1x64x64xf32>
    %111 = vector.shape_cast %31 : vector<64x64xf32> to vector<1x64x64xf32>
    %112 = vector.shape_cast %34 : vector<64x64xf32> to vector<1x64x64xf32>
    %113 = vector.shape_cast %37 : vector<64x64xf32> to vector<1x64x64xf32>
    %114 = vector.shape_cast %40 : vector<64x64xf32> to vector<1x64x64xf32>
    %115 = vector.shape_cast %43 : vector<64x64xf32> to vector<1x64x64xf32>
    %116 = vector.shape_cast %46 : vector<64x64xf32> to vector<1x64x64xf32>
    %117 = vector.shape_cast %49 : vector<64x64xf32> to vector<1x64x64xf32>
    %118 = vector.shape_cast %52 : vector<64x64xf32> to vector<1x64x64xf32>
    %119 = vector.shape_cast %55 : vector<64x64xf32> to vector<1x64x64xf32>
    %120 = vector.shape_cast %58 : vector<64x64xf32> to vector<1x64x64xf32>
    %121 = vector.shape_cast %61 : vector<64x64xf32> to vector<1x64x64xf32>
    %122 = vector.shape_cast %64 : vector<64x64xf32> to vector<1x64x64xf32>
    %123 = vector.shape_cast %67 : vector<64x64xf32> to vector<1x64x64xf32>
    %124 = vector.shape_cast %70 : vector<64x64xf32> to vector<1x64x64xf32>
    %125 = vector.shape_cast %73 : vector<64x64xf32> to vector<1x64x64xf32>
    %126 = vector.shape_cast %76 : vector<64x64xf32> to vector<1x64x64xf32>
    %127 = vector.shape_cast %79 : vector<64x64xf32> to vector<1x64x64xf32>
    %128 = vector.shape_cast %82 : vector<64x64xf32> to vector<1x64x64xf32>
    %129 = vector.shape_cast %85 : vector<64x64xf32> to vector<1x64x64xf32>
    %130 = vector.shape_cast %88 : vector<64x64xf32> to vector<1x64x64xf32>
    %131 = vector.shape_cast %91 : vector<64x64xf32> to vector<1x64x64xf32>
    %132 = vector.shape_cast %94 : vector<64x64xf32> to vector<1x64x64xf32>
    %133 = vector.shape_cast %97 : vector<64x64xf32> to vector<1x64x64xf32>
    %134 = vector.shape_cast %100 : vector<64x64xf32> to vector<1x64x64xf32>
    %135 = vector.shape_cast %103 : vector<64x64xf32> to vector<1x64x64xf32>
    %136 = tpu.concatenate %104, %105, %106, %107, %108, %109, %110, %111, %112, %113, %114, %115, %116, %117, %118, %119 in 0 : vector<1x64x64xf32>, vector<1x64x64xf32>, vector<1x64x64xf32>, vector<1x64x64xf32>, vector<1x64x64xf32>, vector<1x64x64xf32>, vector<1x64x64xf32>, vector<1x64x64xf32>, vector<1x64x64xf32>, vector<1x64x64xf32>, vector<1x64x64xf32>, vector<1x64x64xf32>, vector<1x64x64xf32>, vector<1x64x64xf32>, vector<1x64x64xf32>, vector<1x64x64xf32> -> vector<16x64x64xf32>
    %137 = tpu.concatenate %120, %121, %122, %123, %124, %125, %126, %127, %128, %129, %130, %131, %132, %133, %134, %135 in 0 : vector<1x64x64xf32>, vector<1x64x64xf32>, vector<1x64x64xf32>, vector<1x64x64xf32>, vector<1x64x64xf32>, vector<1x64x64xf32>, vector<1x64x64xf32>, vector<1x64x64xf32>, vector<1x64x64xf32>, vector<1x64x64xf32>, vector<1x64x64xf32>, vector<1x64x64xf32>, vector<1x64x64xf32>, vector<1x64x64xf32>, vector<1x64x64xf32>, vector<1x64x64xf32> -> vector<16x64x64xf32>
    %138 = tpu.concatenate %136, %137 in 0 : vector<16x64x64xf32>, vector<16x64x64xf32> -> vector<32x64x64xf32>
    %139 = vector.extract_strided_slice %138 {offsets = [0, 0, 0], sizes = [32, 32, 32], strides = [1, 1, 1]} : vector<32x64x64xf32> to vector<32x32x32xf32>
    %140 = vector.extract_strided_slice %138 {offsets = [0, 32, 32], sizes = [32, 32, 32], strides = [1, 1, 1]} : vector<32x64x64xf32> to vector<32x32x32xf32>
    %141 = arith.subf %139, %140 : vector<32x32x32xf32>
    %142 = vector.extract_strided_slice %138 {offsets = [0, 32, 0], sizes = [32, 32, 32], strides = [1, 1, 1]} : vector<32x64x64xf32> to vector<32x32x32xf32>
    %143 = vector.extract_strided_slice %138 {offsets = [0, 0, 32], sizes = [32, 32, 32], strides = [1, 1, 1]} : vector<32x64x64xf32> to vector<32x32x32xf32>
    %144 = arith.addf %142, %143 : vector<32x32x32xf32>
    %145 = arith.mulf %141, %141 : vector<32x32x32xf32>
    %146 = arith.mulf %144, %144 : vector<32x32x32xf32>
    %147 = arith.addf %145, %146 : vector<32x32x32xf32>
    %148 = vector.shape_cast %147 : vector<32x32x32xf32> to vector<32x1024xf32>
    %149 = math.sqrt %148 : vector<32x1024xf32>
    %c0_38 = arith.constant 0 : index
    %c0_39 = arith.constant 0 : index
    %150 = vector.load %arg4[%c0_38, %c0_39] : memref<32x1024xf32, #tpu.memory_space<vmem>>, vector<32x1024xf32>
    tpu.vector_store %arg4[%c0_38, %c0_39], %149 {strides = array<i32>} : memref<32x1024xf32, #tpu.memory_space<vmem>>, vector<32x1024xf32>,
    return
  }
  func.func @transform_0(%arg0: i32) -> (i32, i32, i32) {
    %c0_i32 = arith.constant 0 : i32
    %c0_i32_0 = arith.constant 0 : i32
    %c0_i32_1 = arith.constant 0 : i32
    return %arg0, %c0_i32, %c0_i32_0 : i32, i32, i32
  }
  func.func @transform_1(%arg0: i32) -> (i32, i32) {
    %c0_i32 = arith.constant 0 : i32
    %c0_i32_0 = arith.constant 0 : i32
    %c0_i32_1 = arith.constant 0 : i32
    return %c0_i32, %c0_i32_0 : i32, i32
  }
  func.func @transform_2(%arg0: i32) -> (i32, i32) {
    %c0_i32 = arith.constant 0 : i32
    %c0_i32_0 = arith.constant 0 : i32
    %c0_i32_1 = arith.constant 0 : i32
    return %c0_i32, %c0_i32_0 : i32, i32
  }
  func.func @transform_3(%arg0: i32) -> (i32, i32) {
    %c0_i32 = arith.constant 0 : i32
    %c0_i32_0 = arith.constant 0 : i32
    return %arg0, %c0_i32 : i32, i32
  }
}

</mosaic_0001>

<bundles_post_ra>
// kernel: tpu_custom_call.1
= control target key start
LH: loop header
LB: loop body
LE: loop exit
PB: predicated region body
PF: predicated region fallthrough
CT: control target
= control target key end

     0   :  { %8 = vsyncpa [#allocation3], 0  ;;  %s14630_s0 = inlined_call_operand.hbm [shape: f32[32,64,64], index: 0, kind: input, shape index: {}]   ;;  %s14631_s1 = inlined_call_operand.hbm [shape: bf16[64,64], index: 1, kind: input, shape index: {}]   ;;  %s14632_s2 = inlined_call_operand.hbm [shape: bf16[64,64], index: 2, kind: input, shape index: {}]   ;;  %s14633_s3 = inlined_call_operand.hbm [shape: f32[32,1024], index: 3, kind: output, shape index: {}]  }
   0x1   :  { %9 = vsyncpa [#allocation6], 0 }
   0x2   :  { %10 = vsyncpa [#allocation4], 0  ;;  %s10378_s12 = smov [#allocation5]   ;;  %s10284_s16 = scalar_lea.hbm %s14631_s1, 512 }
   0x3   :  { %s28_s13 = sshll.u32 %s10378_s12, 4  ;;  %p10285_p0 = scmp.ne.s32.totalorder %s14631_s1, %s10284_s16  ;;  %s29_s13 = int_to_ptr.vmem [resolvable:$true] %s28_s13 }
   0x4   :  { %p10288_p1 = scmp.lt.u32.totalorder %s10284_s16, %s14631_s1 }
   0x6   :  { %p10290_p2 = pnand %p10288_p1, %p10285_p0 }
   0x8   :  { %10293 = shalt.err (!%p10290_p2)
}
   0x9   :  { %s10294_s21 = scalar_lea.vmem %s29_s13, 512  ;;  %p10299_p4 = scmp.lt.s32.totalorder %s29_s13, %s29_s13 }
   0xa   :  { %p10295_p3 = scmp.ne.s32.totalorder %s29_s13, %s10294_s21  ;;  %p10300_p5 = scmp.lt.s32.totalorder %s10294_s21, %s10294_s21 }
   0xc   :  { %p10301_p6 = por %p10300_p5, %p10299_p4 }
   0xe   :  { %p10302_p7 = pnand %p10301_p6, %p10295_p3 }
  0x10   :  { %10305 = shalt.err (!%p10302_p7)
}
  0x11   :  { %s10379_s22 = smov 64   ;;  %s10380_s23 = smov 4  }
  0x12   :  { %34 = dma.hbm_to_vmem [thread:$0]  %s14631_s1, 512, %s29_s13, [#allocation6], %s10379_s22, %s10379_s22, %s10380_s23  }
  0x13   :  { %s10381_s26 = smov [#allocation2]   ;;  %s10306_s30 = scalar_lea.hbm %s14630_s0, 32768 }
  0x14   :  { %s16_s27 = sshll.u32 %s10381_s26, 4  ;;  %p10307_p8 = scmp.ne.s32.totalorder %s14630_s0, %s10306_s30  ;;  %s17_s27 = int_to_ptr.vmem [resolvable:$true] %s16_s27 }
  0x15   :  { %p10310_p9 = scmp.lt.u32.totalorder %s10306_s30, %s14630_s0 }
  0x17   :  { %p10312_p10 = pnand %p10310_p9, %p10307_p8 }
  0x19   :  { %10315 = shalt.err (!%p10312_p10)
}
  0x1a   :  { %s10316_s8 = scalar_lea.vmem %s17_s27, 32768  ;;  %p10321_p12 = scmp.lt.s32.totalorder %s17_s27, %s17_s27 }
  0x1b   :  { %p10317_p11 = scmp.ne.s32.totalorder %s17_s27, %s10316_s8  ;;  %p10322_p13 = scmp.lt.s32.totalorder %s10316_s8, %s10316_s8 }
  0x1d   :  { %p10323_p0 = por %p10322_p13, %p10321_p12 }
  0x1f   :  { %p10324_p1 = pnand %p10323_p0, %p10317_p11 }
  0x21   :  { %10327 = shalt.err (!%p10324_p1)
}
  0x22   :  { %s10382_s1 = smov 128   ;;  %s10383_s9 = smov 8  }
  0x23   :  { %22 = dma.hbm_to_vmem [thread:$0]  %s14630_s0, 32768, %s17_s27, [#allocation3], %s10382_s1, %s10382_s1, %s10383_s9  }
  0x24   :  { %s10384_s12 = smov [#allocation7]   ;;  %s10328_s16 = scalar_lea.hbm %s14632_s2, 512 }
  0x25   :  { %s40_s13 = sshll.u32 %s10384_s12, 4  ;;  %p10329_p2 = scmp.ne.s32.totalorder %s14632_s2, %s10328_s16  ;;  %s41_s13 = int_to_ptr.vmem [resolvable:$true] %s40_s13 }
  0x26   :  { %p10332_p3 = scmp.lt.u32.totalorder %s10328_s16, %s14632_s2 }
  0x28   :  { %p10334_p4 = pnand %p10332_p3, %p10329_p2 }
  0x2a   :  { %10337 = shalt.err (!%p10334_p4)
}
  0x2b   :  { %s10338_s21 = scalar_lea.vmem %s41_s13, 512  ;;  %p10343_p6 = scmp.lt.s32.totalorder %s41_s13, %s41_s13 }
  0x2c   :  { %p10339_p5 = scmp.ne.s32.totalorder %s41_s13, %s10338_s21  ;;  %p10344_p7 = scmp.lt.s32.totalorder %s10338_s21, %s10338_s21 }
  0x2e   :  { %p10345_p8 = por %p10344_p7, %p10343_p6 }
  0x30   :  { %p10346_p9 = pnand %p10345_p8, %p10339_p5 }
  0x32   :  { %10349 = shalt.err (!%p10346_p9)
}
  0x33   :  { %46 = dma.hbm_to_vmem [thread:$0]  %s14632_s2, 512, %s41_s13, [#allocation6], %s10379_s22, %s10379_s22, %s10380_s23  }
  0x34   :  { %10372 = dma.done.wait [#allocation3], 32768  }
  0x35   :  { %10373 = vsyncadd [#allocation3], 4294934528 }
  0x36   :  { %10374 = dma.done.wait [#allocation6], 1024  }
  0x37   :  { %10375 = vsyncadd [#allocation6], 4294966272  ;;  %v10200_v0 = vld [vmem:[#allocation5] sm:$0xff]   ;;  %v10201_v1 = vld [vmem:[#allocation5 + $0x8] sm:$0xff]   ;;  %vm473_vm0 = vcmask 523264   ;;  %s10385_s2 = smov 96  }
  0x38   :  { %9411 = vmatprep.subr.bf16.mxu0 %v10200_v0  ;;  %v10202_v2 = vld [vmem:[#allocation5 + $0x10] sm:$0xff]   ;;  %v57_v3 = vld [vmem:[#allocation2] sm:$0xff]  ;;  %v58_v4 = vld [vmem:[#allocation2 + $0x8] sm:$0xff]  ;;  %s10388_s23 = smov 32   ;;  %vm8387_vm1 = vcmask 261120   ;;  %vm8396_vm2 = vcmask 785408  }
  0x39   :  { %9412 = vmatpush3.bf16.msra.mxu0 %v10200_v0  ;;  %v313_v5 = vpack.c.bf16 %v58_v4, %v57_v3  ;;  %v10203_v6 = vld [vmem:[#allocation5 + $0x18] sm:$0xff]   ;;  %v59_v7 = vld [vmem:[#allocation2 + $0x10] sm:$0xff]  ;;  %v61_v9 = vld [vmem:[#allocation2 + $0x20] sm:$0xff]  ;;  %s10389_s25 = smov [#allocation8]  }
  0x3a   :  { %9413 = vmatprep.subr.bf16.mxu0 %v10201_v1  ;;  %v60_v8 = vld [vmem:[#allocation2 + $0x18] sm:$0xff]  ;;  %v62_v10 = vld [vmem:[#allocation2 + $0x28] sm:$0xff]  ;;  %v63_v13 = vld [vmem:[#allocation2 + $0x30] sm:$0xff]  ;;  %s8746_s26 = sshll.u32 %s10389_s25, 4  ;;  %s8747_s26 = int_to_ptr.vmem [resolvable:$true] %s8746_s26 }
  0x3b   :  { %9419 = vmatprep.mubr.msk.bf16.mxu0 %vm473_vm0, %v313_v5  ;;  %v314_v11 = vpack.c.bf16 %v60_v8, %v59_v7  ;;  %v315_v12 = vpack.c.bf16 %v62_v10, %v61_v9  ;;  %v64_v14 = vld [vmem:[#allocation2 + $0x38] sm:$0xff]  ;;  %v65_v15 = vld [vmem:[#allocation2 + $0x40] sm:$0xff]  ;;  %v66_v16 = vld [vmem:[#allocation2 + $0x48] sm:$0xff]  ;;  %s10350_s27 = scalar_lea.vmem %s8747_s26, 4096  ;;  %p10355_p11 = scmp.lt.s32.totalorder %s8747_s26, %s8747_s26 }
  0x3c   :  { %v316_v17 = vpack.c.bf16 %v64_v14, %v63_v13  ;;  %v317_v18 = vpack.c.bf16 %v66_v16, %v65_v15  ;;  %v67_v19 = vld [vmem:[#allocation2 + $0x50] sm:$0xff]  ;;  %v68_v20 = vld [vmem:[#allocation2 + $0x58] sm:$0xff]  ;;  %v69_v21 = vld [vmem:[#allocation2 + $0x60] sm:$0xff]  ;;  %p10351_p10 = scmp.ne.s32.totalorder %s8747_s26, %s10350_s27  ;;  %p10356_p12 = scmp.lt.s32.totalorder %s10350_s27, %s10350_s27 }
  0x3d   :  { %9414 = vmatpush3.bf16.msra.mxu0 %v10201_v1  ;;  %v70_v22 = vld [vmem:[#allocation2 + $0x68] sm:$0xff]  ;;  %v318_v23 = vpack.c.bf16 %v68_v20, %v67_v19  ;;  %v71_v25 = vld [vmem:[#allocation2 + $0x70] sm:$0xff]  ;;  %v72_v26 = vld [vmem:[#allocation2 + $0x78] sm:$0xff] }
  0x3e   :  { %9415 = vmatprep.subr.bf16.mxu0 %v10202_v2  ;;  %v319_v24 = vpack.c.bf16 %v70_v22, %v69_v21  ;;  %v73_v27 = vld [vmem:[#allocation2 + $0x80] sm:$0xff]  ;;  %v74_v28 = vld [vmem:[#allocation2 + $0x88] sm:$0xff]  ;;  %v320_v29 = vpack.c.bf16 %v72_v26, %v71_v25  ;;  %v75_v31 = vld [vmem:[#allocation2 + $0x90] sm:$0xff]  ;;  %p10357_p13 = por %p10356_p12, %p10355_p11 }
  0x3f   :  { %v321_v30 = vpack.c.bf16 %v74_v28, %v73_v27  ;;  %v76_v32 = vld [vmem:[#allocation2 + $0x98] sm:$0xff]  ;;  %v77_v33 = vld [vmem:[#allocation2 + $0xa0] sm:$0xff]  ;;  %v78_v34 = vld [vmem:[#allocation2 + $0xa8] sm:$0xff] }
  0x40   :  { %v322_v35 = vpack.c.bf16 %v76_v32, %v75_v31  ;;  %v323_v36 = vpack.c.bf16 %v78_v34, %v77_v33  ;;  %v79_v37 = vld [vmem:[#allocation2 + $0xb0] sm:$0xff]  ;;  %v80_v38 = vld [vmem:[#allocation2 + $0xb8] sm:$0xff]  ;;  %v81_v39 = vld [vmem:[#allocation2 + $0xc0] sm:$0xff]  ;;  %p10358_p0 = pnand %p10357_p13, %p10351_p10 }
  0x41   :  { %9416 = vmatpush3.bf16.msra.mxu0 %v10202_v2  ;;  %v82_v40 = vld [vmem:[#allocation2 + $0xc8] sm:$0xff]  ;;  %v324_v41 = vpack.c.bf16 %v80_v38, %v79_v37  ;;  %v83_v43 = vld [vmem:[#allocation2 + $0xd0] sm:$0xff]  ;;  %v84_v44 = vld [vmem:[#allocation2 + $0xd8] sm:$0xff] }
  0x42   :  { %9417 = vmatprep.subr.bf16.mxu0 %v10203_v6  ;;  %v325_v42 = vpack.c.bf16 %v82_v40, %v81_v39  ;;  %v85_v45 = vld [vmem:[#allocation2 + $0xe0] sm:$0xff]  ;;  %v86_v46 = vld [vmem:[#allocation2 + $0xe8] sm:$0xff]  ;;  %v326_v47 = vpack.c.bf16 %v84_v44, %v83_v43  ;;  %v87_v49 = vld [vmem:[#allocation2 + $0xf0] sm:$0xff] }
  0x43   :  { %v327_v48 = vpack.c.bf16 %v86_v46, %v85_v45  ;;  %v88_v50 = vld [vmem:[#allocation2 + $0xf8] sm:$0xff]  ;;  %v89_v51 = vld [vmem:[#allocation2 + $0x100] sm:$0xff]  ;;  %v90_v52 = vld [vmem:[#allocation2 + $0x108] sm:$0xff] }
  0x44   :  { %v328_v53 = vpack.c.bf16 %v88_v50, %v87_v49  ;;  %v329_v54 = vpack.c.bf16 %v90_v52, %v89_v51  ;;  %v91_v55 = vld [vmem:[#allocation2 + $0x110] sm:$0xff]  ;;  %v92_v56 = vld [vmem:[#allocation2 + $0x118] sm:$0xff]  ;;  %v93_v57 = vld [vmem:[#allocation2 + $0x120] sm:$0xff] }
  0x45   :  { %9418 = vmatpush3.bf16.msra.mxu0 %v10203_v6  ;;  %v94_v58 = vld [vmem:[#allocation2 + $0x128] sm:$0xff]  ;;  %v330_v59 = vpack.c.bf16 %v92_v56, %v91_v55  ;;  %v95_v61 = vld [vmem:[#allocation2 + $0x130] sm:$0xff]  ;;  %v96_v62 = vld [vmem:[#allocation2 + $0x138] sm:$0xff] }
  0x46   :  { %v331_v60 = vpack.c.bf16 %v94_v58, %v93_v57  ;;  %v97_v63 = vld [vmem:[#allocation2 + $0x140] sm:$0xff]  ;;  %v98_v0 = vld [vmem:[#allocation2 + $0x148] sm:$0xff]  ;;  %v332_v1 = vpack.c.bf16 %v96_v62, %v95_v61  ;;  %v99_v3 = vld [vmem:[#allocation2 + $0x150] sm:$0xff] }
  0x47   :  { %v333_v2 = vpack.c.bf16 %v98_v0, %v97_v63  ;;  %v100_v4 = vld [vmem:[#allocation2 + $0x158] sm:$0xff]  ;;  %v101_v5 = vld [vmem:[#allocation2 + $0x160] sm:$0xff]  ;;  %v102_v6 = vld [vmem:[#allocation2 + $0x168] sm:$0xff] }
  0x48   :  { %9420 = vmatmul.mubr.msk.bf16.vlgmr.msra.gmra.mrb[0].mxu0 %vm473_vm0, %v314_v11  ;;  %v334_v7 = vpack.c.bf16 %v100_v4, %v99_v3  ;;  %v335_v8 = vpack.c.bf16 %v102_v6, %v101_v5  ;;  %v103_v9 = vld [vmem:[#allocation2 + $0x170] sm:$0xff]  ;;  %v104_v10 = vld [vmem:[#allocation2 + $0x178] sm:$0xff]  ;;  %v105_v11 = vld [vmem:[#allocation2 + $0x180] sm:$0xff] }
  0x49   :  { %9423 = vmatprep.mubr.msk.bf16.mxu0 %vm473_vm0, %v315_v12  ;;  %v106_v12 = vld [vmem:[#allocation2 + $0x188] sm:$0xff]  ;;  %v336_v13 = vpack.c.bf16 %v104_v10, %v103_v9  ;;  %v107_v15 = vld [vmem:[#allocation2 + $0x190] sm:$0xff]  ;;  %v108_v16 = vld [vmem:[#allocation2 + $0x198] sm:$0xff] }
  0x4a   :  { %v337_v14 = vpack.c.bf16 %v106_v12, %v105_v11  ;;  %v338_v19 = vpack.c.bf16 %v108_v16, %v107_v15  ;;  %v111_v21 = vld [vmem:[#allocation2 + $0x1b0] sm:$0xff]  ;;  %v112_v22 = vld [vmem:[#allocation2 + $0x1b8] sm:$0xff]  ;;  %v10480_v27 = vld [vmem:[#allocation7] sm:$0xff]  }
  0x4b   :  { %v340_v25 = vpack.c.bf16 %v112_v22, %v111_v21  ;;  %9683 = vmatprep.mubr.msk.bf16.mxu1 %vm473_vm0, %v10480_v27  ;;  %v115_v28 = vld [vmem:[#allocation2 + $0x1d0] sm:$0xff]  ;;  %v118_v31 = vld [vmem:[#allocation2 + $0x1e8] sm:$0xff] }
  0x4c   :  { %v119_v34 = vld [vmem:[#allocation2 + $0x1f0] sm:$0xff]  ;;  %v122_v37 = vld [vmem:[#allocation2 + $0x208] sm:$0xff] }
  0x4d   :  { %v123_v40 = vld [vmem:[#allocation2 + $0x210] sm:$0xff]  ;;  %v126_v43 = vld [vmem:[#allocation2 + $0x228] sm:$0xff] }
  0x4e   :  { %v127_v46 = vld [vmem:[#allocation2 + $0x230] sm:$0xff]  ;;  %v130_v49 = vld [vmem:[#allocation2 + $0x248] sm:$0xff] }
  0x4f   :  { %v131_v52 = vld [vmem:[#allocation2 + $0x250] sm:$0xff]  ;;  %v134_v55 = vld [vmem:[#allocation2 + $0x268] sm:$0xff] }
  0x50   :  { %9424 = vmatmul.mubr.msk.bf16.gmra.mrb[4].mxu0 %vm473_vm0, %v316_v17  ;;  %v109_v17 = vld [vmem:[#allocation2 + $0x1a0] sm:$0xff]  ;;  %v135_v58 = vld [vmem:[#allocation2 + $0x270] sm:$0xff]  ;;  %v138_v61 = vld [vmem:[#allocation2 + $0x288] sm:$0xff] }
  0x51   :  { %9427 = vmatprep.mubr.msk.bf16.mxu0 %vm473_vm0, %v317_v18  ;;  %v110_v18 = vld [vmem:[#allocation2 + $0x1a8] sm:$0xff]  ;;  %v139_v0 = vld [vmem:[#allocation2 + $0x290] sm:$0xff] }
  0x52   :  { %v339_v20 = vpack.c.bf16 %v110_v18, %v109_v17  ;;  %v142_v3 = vld [vmem:[#allocation2 + $0x2a8] sm:$0xff]  ;;  %v143_v6 = vld [vmem:[#allocation2 + $0x2b0] sm:$0xff] }
  0x53   :  { %v146_v9 = vld [vmem:[#allocation2 + $0x2c8] sm:$0xff]  ;;  %v147_v12 = vld [vmem:[#allocation2 + $0x2d0] sm:$0xff] }
  0x54   :  { %v150_v15 = vld [vmem:[#allocation2 + $0x2e8] sm:$0xff]  ;;  %v151_v18 = vld [vmem:[#allocation2 + $0x2f0] sm:$0xff] }
  0x55   :  { %v154_v21 = vld [vmem:[#allocation2 + $0x308] sm:$0xff] }
  0x58   :  { %9428 = vmatmul.mubr.msk.bf16.gmra.mrb[8].mxu0 %vm473_vm0, %v318_v23  ;;  %v113_v23 = vld [vmem:[#allocation2 + $0x1c0] sm:$0xff] }
  0x59   :  { %9431 = vmatprep.mubr.msk.bf16.mxu0 %vm473_vm0, %v319_v24  ;;  %v114_v24 = vld [vmem:[#allocation2 + $0x1c8] sm:$0xff] }
  0x5a   :  { %v341_v26 = vpack.c.bf16 %v114_v24, %v113_v23  ;;  %v155_v24 = vld [vmem:[#allocation2 + $0x310] sm:$0xff] }
  0x60   :  { %9432 = vmatmul.mubr.msk.bf16.gmra.mrb[12].mxu0 %vm473_vm0, %v320_v29  ;;  %v116_v29 = vld [vmem:[#allocation2 + $0x1d8] sm:$0xff] }
  0x61   :  { %9435 = vmatprep.mubr.msk.bf16.mxu0 %vm473_vm0, %v321_v30  ;;  %v117_v30 = vld [vmem:[#allocation2 + $0x1e0] sm:$0xff]  ;;  %v342_v32 = vpack.c.bf16 %v116_v29, %v115_v28  ;;  %v158_v28 = vld [vmem:[#allocation2 + $0x328] sm:$0xff] }
  0x62   :  { %v343_v33 = vpack.c.bf16 %v118_v31, %v117_v30  ;;  %v159_v31 = vld [vmem:[#allocation2 + $0x330] sm:$0xff] }
  0x68   :  { %9436 = vmatmul.mubr.msk.bf16.gmra.mrb[16].mxu0 %vm473_vm0, %v322_v35  ;;  %v120_v35 = vld [vmem:[#allocation2 + $0x1f8] sm:$0xff] }
  0x69   :  { %9439 = vmatprep.mubr.msk.bf16.mxu0 %vm473_vm0, %v323_v36  ;;  %v121_v36 = vld [vmem:[#allocation2 + $0x200] sm:$0xff]  ;;  %v344_v38 = vpack.c.bf16 %v120_v35, %v119_v34  ;;  %v162_v34 = vld [vmem:[#allocation2 + $0x348] sm:$0xff] }
  0x6a   :  { %v345_v39 = vpack.c.bf16 %v122_v37, %v121_v36  ;;  %v163_v37 = vld [vmem:[#allocation2 + $0x350] sm:$0xff] }
  0x70   :  { %9440 = vmatmul.mubr.msk.bf16.gmra.mrb[20].mxu0 %vm473_vm0, %v324_v41  ;;  %v124_v41 = vld [vmem:[#allocation2 + $0x218] sm:$0xff] }
  0x71   :  { %9443 = vmatprep.mubr.msk.bf16.mxu0 %vm473_vm0, %v325_v42  ;;  %v125_v42 = vld [vmem:[#allocation2 + $0x220] sm:$0xff]  ;;  %v346_v44 = vpack.c.bf16 %v124_v41, %v123_v40  ;;  %v166_v40 = vld [vmem:[#allocation2 + $0x368] sm:$0xff] }
  0x72   :  { %v347_v45 = vpack.c.bf16 %v126_v43, %v125_v42  ;;  %v167_v43 = vld [vmem:[#allocation2 + $0x370] sm:$0xff] }
  0x78   :  { %9444 = vmatmul.mubr.msk.bf16.gmra.mrb[24].mxu0 %vm473_vm0, %v326_v47  ;;  %v128_v47 = vld [vmem:[#allocation2 + $0x238] sm:$0xff] }
  0x79   :  { %9447 = vmatprep.mubr.msk.bf16.mxu0 %vm473_vm0, %v327_v48  ;;  %v129_v48 = vld [vmem:[#allocation2 + $0x240] sm:$0xff]  ;;  %v348_v50 = vpack.c.bf16 %v128_v47, %v127_v46  ;;  %v170_v46 = vld [vmem:[#allocation2 + $0x388] sm:$0xff] }
  0x7a   :  { %v349_v51 = vpack.c.bf16 %v130_v49, %v129_v48 }
  0x80   :  { %9448 = vmatmul.mubr.msk.bf16.gmra.mrb[28].mxu0 %vm473_vm0, %v328_v53  ;;  %v132_v53 = vld [vmem:[#allocation2 + $0x258] sm:$0xff] }
  0x81   :  { %9451 = vmatprep.mubr.msk.bf16.mxu0 %vm473_vm0, %v329_v54  ;;  %v133_v54 = vld [vmem:[#allocation2 + $0x260] sm:$0xff]  ;;  %v350_v56 = vpack.c.bf16 %v132_v53, %v131_v52 }
  0x82   :  { %v351_v57 = vpack.c.bf16 %v134_v55, %v133_v54  ;;  %v171_v55 = vld [vmem:[#allocation2 + $0x390] sm:$0xff] }
  0x88   :  { %9452 = vmatmul.mubr.msk.bf16.gmra.mrb[32].mxu0 %vm473_vm0, %v330_v59  ;;  %v136_v59 = vld [vmem:[#allocation2 + $0x278] sm:$0xff] }
  0x89   :  { %9455 = vmatprep.mubr.msk.bf16.mxu0 %vm473_vm0, %v331_v60  ;;  %v137_v60 = vld [vmem:[#allocation2 + $0x280] sm:$0xff]  ;;  %v352_v62 = vpack.c.bf16 %v136_v59, %v135_v58  ;;  %v174_v58 = vld [vmem:[#allocation2 + $0x3a8] sm:$0xff] }
  0x8a   :  { %v353_v63 = vpack.c.bf16 %v138_v61, %v137_v60 }
  0x90   :  { %9456 = vmatmul.mubr.msk.bf16.gmra.mrb[36].mxu0 %vm473_vm0, %v332_v1  ;;  %v140_v1 = vld [vmem:[#allocation2 + $0x298] sm:$0xff] }
  0x91   :  { %9459 = vmatprep.mubr.msk.bf16.mxu0 %vm473_vm0, %v333_v2  ;;  %v141_v2 = vld [vmem:[#allocation2 + $0x2a0] sm:$0xff]  ;;  %v354_v4 = vpack.c.bf16 %v140_v1, %v139_v0 }
  0x92   :  { %v355_v5 = vpack.c.bf16 %v142_v3, %v141_v2  ;;  %v175_v3 = vld [vmem:[#allocation2 + $0x3b0] sm:$0xff] }
  0x98   :  { %9460 = vmatmul.mubr.msk.bf16.gmra.mrb[40].mxu0 %vm473_vm0, %v334_v7  ;;  %v144_v7 = vld [vmem:[#allocation2 + $0x2b8] sm:$0xff] }
  0x99   :  { %9463 = vmatprep.mubr.msk.bf16.mxu0 %vm473_vm0, %v335_v8  ;;  %v145_v8 = vld [vmem:[#allocation2 + $0x2c0] sm:$0xff]  ;;  %v356_v10 = vpack.c.bf16 %v144_v7, %v143_v6  ;;  %v178_v7 = vld [vmem:[#allocation2 + $0x3c8] sm:$0xff] }
  0x9a   :  { %v357_v11 = vpack.c.bf16 %v146_v9, %v145_v8  ;;  %v177_v6 = vld [vmem:[#allocation2 + $0x3c0] sm:$0xff] }
  0xa0   :  { %9464 = vmatmul.mubr.msk.bf16.gmra.mrb[44].mxu0 %vm473_vm0, %v336_v13  ;;  %v148_v13 = vld [vmem:[#allocation2 + $0x2d8] sm:$0xff] }
  0xa1   :  { %9467 = vmatprep.mubr.msk.bf16.mxu0 %vm473_vm0, %v337_v14  ;;  %v149_v14 = vld [vmem:[#allocation2 + $0x2e0] sm:$0xff]  ;;  %v358_v16 = vpack.c.bf16 %v148_v13, %v147_v12 }
  0xa2   :  { %v359_v17 = vpack.c.bf16 %v150_v15, %v149_v14  ;;  %v373_v14 = vpack.c.bf16 %v178_v7, %v177_v6  ;;  %v197_v6 = vld [vmem:[#allocation2 + $0x460] sm:$0xff]  ;;  %v198_v7 = vld [vmem:[#allocation2 + $0x468] sm:$0xff] }
  0xa8   :  { %9468 = vmatmul.mubr.msk.bf16.gmra.mrb[48].mxu0 %vm473_vm0, %v338_v19  ;;  %v152_v19 = vld [vmem:[#allocation2 + $0x2f8] sm:$0xff] }
  0xa9   :  { %9471 = vmatprep.mubr.msk.bf16.mxu0 %vm473_vm0, %v339_v20  ;;  %v153_v20 = vld [vmem:[#allocation2 + $0x300] sm:$0xff]  ;;  %v360_v22 = vpack.c.bf16 %v152_v19, %v151_v18  ;;  %v180_v18 = vld [vmem:[#allocation2 + $0x3d8] sm:$0xff] }
  0xaa   :  { %v361_v23 = vpack.c.bf16 %v154_v21, %v153_v20  ;;  %v181_v20 = vld [vmem:[#allocation2 + $0x3e0] sm:$0xff]  ;;  %v182_v21 = vld [vmem:[#allocation2 + $0x3e8] sm:$0xff] }
  0xb0   :  { %9472 = vmatmul.mubr.msk.bf16.gmra.mrb[52].mxu0 %vm473_vm0, %v340_v25  ;;  %v156_v25 = vld [vmem:[#allocation2 + $0x318] sm:$0xff] }
  0xb1   :  { %9475 = vmatprep.mubr.msk.bf16.mxu0 %vm473_vm0, %v341_v26  ;;  %v157_v26 = vld [vmem:[#allocation2 + $0x320] sm:$0xff]  ;;  %v362_v29 = vpack.c.bf16 %v156_v25, %v155_v24  ;;  %v10526_v25 = vld [vmem:[#allocation7 + $0x18] sm:$0xff]  }
  0xb2   :  { %v363_v30 = vpack.c.bf16 %v158_v28, %v157_v26 }
  0xb8   :  { %9476 = vmatmul.mubr.msk.bf16.gmra.mrb[56].mxu0 %vm473_vm0, %v342_v32  ;;  %v160_v32 = vld [vmem:[#allocation2 + $0x338] sm:$0xff] }
  0xb9   :  { %9479 = vmatprep.mubr.msk.bf16.mxu0 %vm473_vm0, %v343_v33  ;;  %v161_v33 = vld [vmem:[#allocation2 + $0x340] sm:$0xff]  ;;  %v364_v35 = vpack.c.bf16 %v160_v32, %v159_v31  ;;  %v183_v31 = vld [vmem:[#allocation2 + $0x3f0] sm:$0xff]  ;;  %v184_v32 = vld [vmem:[#allocation2 + $0x3f8] sm:$0xff] }
  0xba   :  { %v365_v36 = vpack.c.bf16 %v162_v34, %v161_v33  ;;  %v185_v34 = vld [vmem:[#allocation2 + $0x400] sm:$0xff] }
  0xc0   :  { %9480 = vmatmul.mubr.msk.bf16.gmra.mrb[60].mxu0 %vm473_vm0, %v344_v38  ;;  %v164_v38 = vld [vmem:[#allocation2 + $0x358] sm:$0xff] }
  0xc1   :  { %9483 = vmatprep.mubr.msk.bf16.mxu0 %vm473_vm0, %v345_v39  ;;  %v165_v39 = vld [vmem:[#allocation2 + $0x360] sm:$0xff]  ;;  %v366_v41 = vpack.c.bf16 %v164_v38, %v163_v37  ;;  %v376_v37 = vpack.c.bf16 %v184_v32, %v183_v31  ;;  %v203_v31 = vld [vmem:[#allocation2 + $0x490] sm:$0xff]  ;;  %v204_v32 = vld [vmem:[#allocation2 + $0x498] sm:$0xff] }
  0xc2   :  { %v367_v42 = vpack.c.bf16 %v166_v40, %v165_v39 }
  0xc8   :  { %9484 = vmatmul.mubr.msk.bf16.gmra.mrb[64].mxu0 %vm473_vm0, %v346_v44  ;;  %v168_v44 = vld [vmem:[#allocation2 + $0x378] sm:$0xff] }
  0xc9   :  { %9487 = vmatprep.mubr.msk.bf16.mxu0 %vm473_vm0, %v347_v45  ;;  %v169_v45 = vld [vmem:[#allocation2 + $0x380] sm:$0xff]  ;;  %v368_v49 = vpack.c.bf16 %v168_v44, %v167_v43  ;;  %v187_v43 = vld [vmem:[#allocation2 + $0x410] sm:$0xff]  ;;  %v188_v44 = vld [vmem:[#allocation2 + $0x418] sm:$0xff] }
  0xd0   :  { %9488 = vmatmul.mubr.msk.bf16.gmra.mrb[68].mxu0 %vm473_vm0, %v348_v50 }
  0xd1   :  { %9491 = vmatprep.mubr.msk.bf16.mxu0 %vm473_vm0, %v349_v51  ;;  %v369_v51 = vpack.c.bf16 %v170_v46, %v169_v45  ;;  %v189_v46 = vld [vmem:[#allocation2 + $0x420] sm:$0xff] }
  0xd8   :  { %9492 = vmatmul.mubr.msk.bf16.gmra.mrb[72].mxu0 %vm473_vm0, %v350_v56  ;;  %v172_v56 = vld [vmem:[#allocation2 + $0x398] sm:$0xff] }
  0xd9   :  { %9495 = vmatprep.mubr.msk.bf16.mxu0 %vm473_vm0, %v351_v57  ;;  %v173_v57 = vld [vmem:[#allocation2 + $0x3a0] sm:$0xff]  ;;  %v370_v61 = vpack.c.bf16 %v172_v56, %v171_v55  ;;  %v191_v55 = vld [vmem:[#allocation2 + $0x430] sm:$0xff]  ;;  %v192_v56 = vld [vmem:[#allocation2 + $0x438] sm:$0xff] }
  0xe0   :  { %9496 = vmatmul.mubr.msk.bf16.gmra.mrb[76].mxu0 %vm473_vm0, %v352_v62 }
  0xe1   :  { %9499 = vmatprep.mubr.msk.bf16.mxu0 %vm473_vm0, %v353_v63  ;;  %v371_v63 = vpack.c.bf16 %v174_v58, %v173_v57  ;;  %v193_v58 = vld [vmem:[#allocation2 + $0x440] sm:$0xff] }
  0xe8   :  { %9500 = vmatmul.mubr.msk.bf16.gmra.mrb[80].mxu0 %vm473_vm0, %v354_v4  ;;  %v176_v4 = vld [vmem:[#allocation2 + $0x3b8] sm:$0xff] }
  0xe9   :  { %9503 = vmatprep.mubr.msk.bf16.mxu0 %vm473_vm0, %v355_v5  ;;  %v372_v9 = vpack.c.bf16 %v176_v4, %v175_v3  ;;  %v195_v3 = vld [vmem:[#allocation2 + $0x450] sm:$0xff]  ;;  %v196_v4 = vld [vmem:[#allocation2 + $0x458] sm:$0xff] }
  0xf0   :  { %9504 = vmatmul.mubr.msk.bf16.gmra.mrb[84].mxu0 %vm473_vm0, %v356_v10 }
  0xf1   :  { %9507 = vmatprep.mubr.msk.bf16.mxu0 %vm473_vm0, %v357_v11  ;;  %v10516_v11 = vld [vmem:[#allocation7 + $0x8] sm:$0xff]  }
  0xf8   :  { %9508 = vmatmul.mubr.msk.bf16.gmra.mrb[88].mxu0 %vm473_vm0, %v358_v16  ;;  %v10518_v16 = vld [vmem:[#allocation7 + $0x10] sm:$0xff]  }
  0xf9   :  { %9511 = vmatprep.mubr.msk.bf16.mxu0 %vm473_vm0, %v359_v17  ;;  %v179_v17 = vld [vmem:[#allocation2 + $0x3d0] sm:$0xff] }
 0x100   :  { %9512 = vmatmul.mubr.msk.bf16.gmra.mrb[92].mxu0 %vm473_vm0, %v360_v22 }
 0x101   :  { %9515 = vmatprep.mubr.msk.bf16.mxu0 %vm473_vm0, %v361_v23  ;;  %v374_v23 = vpack.c.bf16 %v180_v18, %v179_v17  ;;  %v199_v17 = vld [vmem:[#allocation2 + $0x470] sm:$0xff]  ;;  %v200_v18 = vld [vmem:[#allocation2 + $0x478] sm:$0xff] }
 0x108   :  { %9516 = vmatmul.mubr.msk.bf16.gmra.mrb[96].mxu0 %vm473_vm0, %v362_v29  ;;  %v375_v29 = vpack.c.bf16 %v182_v21, %v181_v20  ;;  %v201_v20 = vld [vmem:[#allocation2 + $0x480] sm:$0xff]  ;;  %v202_v21 = vld [vmem:[#allocation2 + $0x488] sm:$0xff] }
 0x109   :  { %9519 = vmatprep.mubr.msk.bf16.mxu0 %vm473_vm0, %v363_v30 }
 0x110   :  { %9520 = vmatmul.mubr.msk.bf16.gmra.mrb[100].mxu0 %vm473_vm0, %v364_v35  ;;  %v186_v35 = vld [vmem:[#allocation2 + $0x408] sm:$0xff] }
 0x111   :  { %9523 = vmatprep.mubr.msk.bf16.mxu0 %vm473_vm0, %v365_v36 }
 0x118   :  { %9524 = vmatmul.mubr.msk.bf16.gmra.mrb[104].mxu0 %vm473_vm0, %v366_v41  ;;  %v377_v41 = vpack.c.bf16 %v186_v35, %v185_v34  ;;  %v205_v34 = vld [vmem:[#allocation2 + $0x4a0] sm:$0xff]  ;;  %v206_v35 = vld [vmem:[#allocation2 + $0x4a8] sm:$0xff] }
 0x119   :  { %9527 = vmatprep.mubr.msk.bf16.mxu0 %vm473_vm0, %v367_v42 }
 0x11b   :  { %v9421_v47 = vpop.f32.mrb[0].mxu0 }
 0x11c   :  { %v892_v48 = vpop.f32.mrb[1].mxu0 }
 0x11d   :  { %v9422_v50 = vpop.f32.mrb[2].mxu0 }
 0x11e   :  { %v1916_v52 = vpack.c.bf16 %v9422_v50, %v9421_v47  ;;  %v895_v53 = vpop.f32.mrb[3].mxu0  ;;  %v190_v47 = vld [vmem:[#allocation2 + $0x428] sm:$0xff] }
 0x11f   :  { %v1915_v54 = vpack.c.bf16 %v895_v53, %v892_v48  ;;  %v379_v53 = vpack.c.bf16 %v190_v47, %v189_v46  ;;  %v209_v46 = vld [vmem:[#allocation2 + $0x4c0] sm:$0xff]  ;;  %v210_v47 = vld [vmem:[#allocation2 + $0x4c8] sm:$0xff] }
 0x120   :  { %9528 = vmatmul.mubr.msk.bf16.gmra.mrb[108].mxu0 %vm473_vm0, %v368_v49  ;;  %v378_v49 = vpack.c.bf16 %v188_v44, %v187_v43  ;;  %v207_v43 = vld [vmem:[#allocation2 + $0x4b0] sm:$0xff]  ;;  %v208_v44 = vld [vmem:[#allocation2 + $0x4b8] sm:$0xff] }
 0x121   :  { %9675 = vmatprep.subr.bf16.mxu1 %v1915_v54  ;;  %9531 = vmatprep.mubr.msk.bf16.mxu0 %vm473_vm0, %v369_v51 }
 0x122   :  { %9676 = vmatpush3.bf16.msra.mxu1 %v1915_v54 }
 0x123   :  { %v9425_v59 = vpop.f32.mrb[4].mxu0  ;;  %9677 = vmatprep.subr.bf16.mxu1 %v1916_v52 }
 0x124   :  { %v908_v60 = vpop.f32.mrb[5].mxu0 }
 0x125   :  { %v9426_v62 = vpop.f32.mrb[6].mxu0 }
 0x126   :  { %v1918_v0 = vpack.c.bf16 %v9426_v62, %v9425_v59  ;;  %v911_v1 = vpop.f32.mrb[7].mxu0  ;;  %9678 = vmatpush3.bf16.msra.mxu1 %v1916_v52  ;;  %v194_v59 = vld [vmem:[#allocation2 + $0x448] sm:$0xff] }
 0x127   :  { %v1917_v2 = vpack.c.bf16 %v911_v1, %v908_v60  ;;  %v381_v1 = vpack.c.bf16 %v194_v59, %v193_v58  ;;  %v213_v58 = vld [vmem:[#allocation2 + $0x4e0] sm:$0xff]  ;;  %v214_v59 = vld [vmem:[#allocation2 + $0x4e8] sm:$0xff] }
 0x128   :  { %9532 = vmatmul.mubr.msk.bf16.gmra.mrb[112].mxu0 %vm473_vm0, %v370_v61  ;;  %v380_v61 = vpack.c.bf16 %v192_v56, %v191_v55  ;;  %v211_v55 = vld [vmem:[#allocation2 + $0x4d0] sm:$0xff]  ;;  %v212_v56 = vld [vmem:[#allocation2 + $0x4d8] sm:$0xff] }
 0x129   :  { %9679 = vmatprep.subr.bf16.mxu1 %v1917_v2  ;;  %9535 = vmatprep.mubr.msk.bf16.mxu0 %vm473_vm0, %v371_v63 }
 0x12a   :  { %9680 = vmatpush3.bf16.msra.mxu1 %v1917_v2 }
 0x12b   :  { %v9429_v5 = vpop.f32.mrb[8].mxu0  ;;  %9681 = vmatprep.subr.bf16.mxu1 %v1918_v0 }
 0x12c   :  { %v924_v8 = vpop.f32.mrb[9].mxu0 }
 0x12d   :  { %v9430_v10 = vpop.f32.mrb[10].mxu0 }
 0x12e   :  { %v1920_v12 = vpack.c.bf16 %v9430_v10, %v9429_v5  ;;  %v927_v13 = vpop.f32.mrb[11].mxu0  ;;  %9682 = vmatpush3.bf16.msra.mxu1 %v1918_v0 }
 0x12f   :  { %v1919_v15 = vpack.c.bf16 %v927_v13, %v924_v8 }
 0x130   :  { %9536 = vmatmul.mubr.msk.bf16.gmra.mrb[116].mxu0 %vm473_vm0, %v372_v9  ;;  %v382_v9 = vpack.c.bf16 %v196_v4, %v195_v3  ;;  %v215_v3 = vld [vmem:[#allocation2 + $0x4f0] sm:$0xff]  ;;  %v216_v4 = vld [vmem:[#allocation2 + $0x4f8] sm:$0xff] }
 0x131   :  { %9684 = vmatmul.mubr.msk.bf16.vlgmr.msra.gmra.mrb[0].mxu1 %vm473_vm0, %v10516_v11  ;;  %9691 = vmatprep.subr.bf16.mxu1 %v1919_v15 }
 0x132   :  { %9692 = vmatpush3.bf16.msra.mxu1 %v1919_v15  ;;  %9539 = vmatprep.mubr.msk.bf16.mxu0 %vm473_vm0, %v373_v14  ;;  %v383_v14 = vpack.c.bf16 %v198_v7, %v197_v6  ;;  %v217_v6 = vld [vmem:[#allocation2 + $0x500] sm:$0xff]  ;;  %v218_v7 = vld [vmem:[#allocation2 + $0x508] sm:$0xff] }
 0x133   :  { %v9433_v19 = vpop.f32.mrb[12].mxu0  ;;  %9693 = vmatprep.subr.bf16.mxu1 %v1920_v12  ;;  %9687 = vmatprep.mubr.msk.bf16.mxu1 %vm473_vm0, %v10518_v16 }
 0x134   :  { %v940_v22 = vpop.f32.mrb[13].mxu0 }
 0x135   :  { %v9434_v24 = vpop.f32.mrb[14].mxu0 }
 0x136   :  { %v1922_v26 = vpack.c.bf16 %v9434_v24, %v9433_v19  ;;  %v943_v28 = vpop.f32.mrb[15].mxu0  ;;  %9694 = vmatpush3.bf16.msra.mxu1 %v1920_v12 }
 0x137   :  { %v1921_v30 = vpack.c.bf16 %v943_v28, %v940_v22 }
 0x138   :  { %9540 = vmatmul.mubr.msk.bf16.gmra.mrb[120].mxu0 %vm473_vm0, %v374_v23  ;;  %v384_v23 = vpack.c.bf16 %v200_v18, %v199_v17  ;;  %v219_v17 = vld [vmem:[#allocation2 + $0x510] sm:$0xff]  ;;  %v220_v18 = vld [vmem:[#allocation2 + $0x518] sm:$0xff] }
 0x139   :  { %9688 = vmatmul.mubr.msk.bf16.gmra.mrb[4].mxu1 %vm473_vm0, %v10526_v25  ;;  %9695 = vmatprep.subr.bf16.mxu1 %v1921_v30 }
 0x13a   :  { %9696 = vmatpush3.bf16.msra.mxu1 %v1921_v30  ;;  %9543 = vmatprep.mubr.msk.bf16.mxu0 %vm473_vm0, %v375_v29  ;;  %v385_v29 = vpack.c.bf16 %v202_v21, %v201_v20  ;;  %v221_v20 = vld [vmem:[#allocation2 + $0x520] sm:$0xff]  ;;  %v222_v21 = vld [vmem:[#allocation2 + $0x528] sm:$0xff] }
 0x13b   :  { %v9437_v33 = vpop.f32.mrb[16].mxu0  ;;  %9697 = vmatprep.subr.bf16.mxu1 %v1922_v26  ;;  %9699 = vmatprep.mubr.msk.bf16.mxu1 %vm473_vm0, %v10480_v27 }
 0x13c   :  { %v956_v36 = vpop.f32.mrb[17].mxu0 }
 0x13d   :  { %v9438_v38 = vpop.f32.mrb[18].mxu0 }
 0x13e   :  { %v1924_v39 = vpack.c.bf16 %v9438_v38, %v9437_v33  ;;  %v959_v40 = vpop.f32.mrb[19].mxu0  ;;  %9698 = vmatpush3.bf16.msra.mxu1 %v1922_v26 }
 0x13f   :  { %v1923_v42 = vpack.c.bf16 %v959_v40, %v956_v36 }
 0x140   :  { %9544 = vmatmul.mubr.msk.bf16.gmra.mrb[124].mxu0 %vm473_vm0, %v376_v37  ;;  %v386_v37 = vpack.c.bf16 %v204_v32, %v203_v31  ;;  %v223_v31 = vld [vmem:[#allocation2 + $0x530] sm:$0xff]  ;;  %v224_v32 = vld [vmem:[#allocation2 + $0x538] sm:$0xff] }
 0x141   :  { %9700 = vmatmul.mubr.msk.bf16.vlgmr.msra.gmra.mrb[8].mxu1 %vm473_vm0, %v10516_v11  ;;  %9707 = vmatprep.subr.bf16.mxu1 %v1923_v42 }
 0x142   :  { %9708 = vmatpush3.bf16.msra.mxu1 %v1923_v42  ;;  %9547 = vmatprep.mubr.msk.bf16.mxu0 %vm473_vm0, %v377_v41  ;;  %v387_v41 = vpack.c.bf16 %v206_v35, %v205_v34  ;;  %v225_v34 = vld [vmem:[#allocation2 + $0x540] sm:$0xff]  ;;  %v226_v35 = vld [vmem:[#allocation2 + $0x548] sm:$0xff] }
 0x143   :  { %v9441_v45 = vpop.f32.mrb[20].mxu0  ;;  %9709 = vmatprep.subr.bf16.mxu1 %v1924_v39  ;;  %9703 = vmatprep.mubr.msk.bf16.mxu1 %vm473_vm0, %v10518_v16 }
 0x144   :  { %v972_v48 = vpop.f32.mrb[21].mxu0 }
 0x145   :  { %v9442_v50 = vpop.f32.mrb[22].mxu0 }
 0x146   :  { %v1926_v51 = vpack.c.bf16 %v9442_v50, %v9441_v45  ;;  %v975_v52 = vpop.f32.mrb[23].mxu0  ;;  %9710 = vmatpush3.bf16.msra.mxu1 %v1924_v39 }
 0x147   :  { %v1925_v54 = vpack.c.bf16 %v975_v52, %v972_v48 }
 0x148   :  { %9548 = vmatmul.mubr.msk.bf16.gmra.mrb[128].mxu0 %vm473_vm0, %v378_v49  ;;  %v388_v49 = vpack.c.bf16 %v208_v44, %v207_v43  ;;  %v227_v43 = vld [vmem:[#allocation2 + $0x550] sm:$0xff]  ;;  %v228_v44 = vld [vmem:[#allocation2 + $0x558] sm:$0xff] }
 0x149   :  { %9704 = vmatmul.mubr.msk.bf16.gmra.mrb[12].mxu1 %vm473_vm0, %v10526_v25  ;;  %9711 = vmatprep.subr.bf16.mxu1 %v1925_v54 }
 0x14a   :  { %9712 = vmatpush3.bf16.msra.mxu1 %v1925_v54  ;;  %9551 = vmatprep.mubr.msk.bf16.mxu0 %vm473_vm0, %v379_v53  ;;  %v389_v53 = vpack.c.bf16 %v210_v47, %v209_v46  ;;  %v229_v46 = vld [vmem:[#allocation2 + $0x560] sm:$0xff]  ;;  %v230_v47 = vld [vmem:[#allocation2 + $0x568] sm:$0xff] }
 0x14b   :  { %v9445_v57 = vpop.f32.mrb[24].mxu0  ;;  %9713 = vmatprep.subr.bf16.mxu1 %v1926_v51  ;;  %9715 = vmatprep.mubr.msk.bf16.mxu1 %vm473_vm0, %v10480_v27 }
 0x14c   :  { %v988_v60 = vpop.f32.mrb[25].mxu0 }
 0x14d   :  { %v9446_v62 = vpop.f32.mrb[26].mxu0 }
 0x14e   :  { %v1928_v63 = vpack.c.bf16 %v9446_v62, %v9445_v57  ;;  %v991_v0 = vpop.f32.mrb[27].mxu0  ;;  %9714 = vmatpush3.bf16.msra.mxu1 %v1926_v51 }
 0x14f   :  { %v1927_v2 = vpack.c.bf16 %v991_v0, %v988_v60 }
 0x150   :  { %9552 = vmatmul.mubr.msk.bf16.gmra.mrb[132].mxu0 %vm473_vm0, %v380_v61  ;;  %v390_v61 = vpack.c.bf16 %v212_v56, %v211_v55  ;;  %v231_v55 = vld [vmem:[#allocation2 + $0x570] sm:$0xff]  ;;  %v232_v56 = vld [vmem:[#allocation2 + $0x578] sm:$0xff] }
 0x151   :  { %9716 = vmatmul.mubr.msk.bf16.vlgmr.msra.gmra.mrb[16].mxu1 %vm473_vm0, %v10516_v11  ;;  %9723 = vmatprep.subr.bf16.mxu1 %v1927_v2 }
 0x152   :  { %9724 = vmatpush3.bf16.msra.mxu1 %v1927_v2  ;;  %9555 = vmatprep.mubr.msk.bf16.mxu0 %vm473_vm0, %v381_v1  ;;  %v391_v1 = vpack.c.bf16 %v214_v59, %v213_v58  ;;  %v233_v58 = vld [vmem:[#allocation2 + $0x580] sm:$0xff]  ;;  %v234_v59 = vld [vmem:[#allocation2 + $0x588] sm:$0xff] }
 0x153   :  { %v9449_v5 = vpop.f32.mrb[28].mxu0  ;;  %9725 = vmatprep.subr.bf16.mxu1 %v1928_v63  ;;  %9719 = vmatprep.mubr.msk.bf16.mxu1 %vm473_vm0, %v10518_v16 }
 0x154   :  { %v1004_v8 = vpop.f32.mrb[29].mxu0 }
 0x155   :  { %v9450_v10 = vpop.f32.mrb[30].mxu0 }
 0x156   :  { %v1930_v12 = vpack.c.bf16 %v9450_v10, %v9449_v5  ;;  %v1007_v13 = vpop.f32.mrb[31].mxu0  ;;  %9726 = vmatpush3.bf16.msra.mxu1 %v1928_v63 }
 0x157   :  { %v1929_v15 = vpack.c.bf16 %v1007_v13, %v1004_v8 }
 0x158   :  { %9556 = vmatmul.mubr.msk.bf16.gmra.mrb[136].mxu0 %vm473_vm0, %v382_v9  ;;  %v392_v9 = vpack.c.bf16 %v216_v4, %v215_v3  ;;  %v235_v3 = vld [vmem:[#allocation2 + $0x590] sm:$0xff]  ;;  %v236_v4 = vld [vmem:[#allocation2 + $0x598] sm:$0xff] }
 0x159   :  { %9720 = vmatmul.mubr.msk.bf16.gmra.mrb[20].mxu1 %vm473_vm0, %v10526_v25  ;;  %9727 = vmatprep.subr.bf16.mxu1 %v1929_v15 }
 0x15a   :  { %9728 = vmatpush3.bf16.msra.mxu1 %v1929_v15  ;;  %9559 = vmatprep.mubr.msk.bf16.mxu0 %vm473_vm0, %v383_v14  ;;  %v393_v14 = vpack.c.bf16 %v218_v7, %v217_v6  ;;  %v237_v6 = vld [vmem:[#allocation2 + $0x5a0] sm:$0xff]  ;;  %v238_v7 = vld [vmem:[#allocation2 + $0x5a8] sm:$0xff] }
 0x15b   :  { %v9453_v19 = vpop.f32.mrb[32].mxu0  ;;  %9729 = vmatprep.subr.bf16.mxu1 %v1930_v12  ;;  %9731 = vmatprep.mubr.msk.bf16.mxu1 %vm473_vm0, %v10480_v27 }
 0x15c   :  { %v1020_v22 = vpop.f32.mrb[33].mxu0 }
 0x15d   :  { %v9454_v24 = vpop.f32.mrb[34].mxu0 }
 0x15e   :  { %v1932_v26 = vpack.c.bf16 %v9454_v24, %v9453_v19  ;;  %v1023_v28 = vpop.f32.mrb[35].mxu0  ;;  %9730 = vmatpush3.bf16.msra.mxu1 %v1930_v12 }
 0x15f   :  { %v1931_v30 = vpack.c.bf16 %v1023_v28, %v1020_v22 }
 0x160   :  { %9560 = vmatmul.mubr.msk.bf16.gmra.mrb[140].mxu0 %vm473_vm0, %v384_v23  ;;  %v394_v23 = vpack.c.bf16 %v220_v18, %v219_v17  ;;  %v239_v17 = vld [vmem:[#allocation2 + $0x5b0] sm:$0xff]  ;;  %v240_v18 = vld [vmem:[#allocation2 + $0x5b8] sm:$0xff] }
 0x161   :  { %9732 = vmatmul.mubr.msk.bf16.vlgmr.msra.gmra.mrb[24].mxu1 %vm473_vm0, %v10516_v11  ;;  %9739 = vmatprep.subr.bf16.mxu1 %v1931_v30 }
 0x162   :  { %9740 = vmatpush3.bf16.msra.mxu1 %v1931_v30  ;;  %9563 = vmatprep.mubr.msk.bf16.mxu0 %vm473_vm0, %v385_v29  ;;  %v395_v29 = vpack.c.bf16 %v222_v21, %v221_v20  ;;  %v241_v20 = vld [vmem:[#allocation2 + $0x5c0] sm:$0xff]  ;;  %v242_v21 = vld [vmem:[#allocation2 + $0x5c8] sm:$0xff] }
 0x163   :  { %v9457_v33 = vpop.f32.mrb[36].mxu0  ;;  %9741 = vmatprep.subr.bf16.mxu1 %v1932_v26  ;;  %9735 = vmatprep.mubr.msk.bf16.mxu1 %vm473_vm0, %v10518_v16 }
 0x164   :  { %v1036_v36 = vpop.f32.mrb[37].mxu0 }
 0x165   :  { %v9458_v38 = vpop.f32.mrb[38].mxu0 }
 0x166   :  { %v1934_v39 = vpack.c.bf16 %v9458_v38, %v9457_v33  ;;  %v1039_v40 = vpop.f32.mrb[39].mxu0  ;;  %9742 = vmatpush3.bf16.msra.mxu1 %v1932_v26 }
 0x167   :  { %v1933_v42 = vpack.c.bf16 %v1039_v40, %v1036_v36 }
 0x168   :  { %9564 = vmatmul.mubr.msk.bf16.gmra.mrb[144].mxu0 %vm473_vm0, %v386_v37  ;;  %v396_v37 = vpack.c.bf16 %v224_v32, %v223_v31  ;;  %v243_v31 = vld [vmem:[#allocation2 + $0x5d0] sm:$0xff]  ;;  %v244_v32 = vld [vmem:[#allocation2 + $0x5d8] sm:$0xff] }
 0x169   :  { %9736 = vmatmul.mubr.msk.bf16.gmra.mrb[28].mxu1 %vm473_vm0, %v10526_v25  ;;  %9743 = vmatprep.subr.bf16.mxu1 %v1933_v42 }
 0x16a   :  { %9744 = vmatpush3.bf16.msra.mxu1 %v1933_v42  ;;  %9567 = vmatprep.mubr.msk.bf16.mxu0 %vm473_vm0, %v387_v41  ;;  %v397_v41 = vpack.c.bf16 %v226_v35, %v225_v34  ;;  %v245_v34 = vld [vmem:[#allocation2 + $0x5e0] sm:$0xff]  ;;  %v246_v35 = vld [vmem:[#allocation2 + $0x5e8] sm:$0xff] }
 0x16b   :  { %v9461_v45 = vpop.f32.mrb[40].mxu0  ;;  %9745 = vmatprep.subr.bf16.mxu1 %v1934_v39  ;;  %9747 = vmatprep.mubr.msk.bf16.mxu1 %vm473_vm0, %v10480_v27 }
 0x16c   :  { %v1052_v48 = vpop.f32.mrb[41].mxu0 }
 0x16d   :  { %v9462_v50 = vpop.f32.mrb[42].mxu0 }
 0x16e   :  { %v1936_v51 = vpack.c.bf16 %v9462_v50, %v9461_v45  ;;  %v1055_v52 = vpop.f32.mrb[43].mxu0  ;;  %9746 = vmatpush3.bf16.msra.mxu1 %v1934_v39 }
 0x16f   :  { %v1935_v54 = vpack.c.bf16 %v1055_v52, %v1052_v48 }
 0x170   :  { %9568 = vmatmul.mubr.msk.bf16.gmra.mrb[148].mxu0 %vm473_vm0, %v388_v49  ;;  %v398_v49 = vpack.c.bf16 %v228_v44, %v227_v43  ;;  %v247_v43 = vld [vmem:[#allocation2 + $0x5f0] sm:$0xff]  ;;  %v248_v44 = vld [vmem:[#allocation2 + $0x5f8] sm:$0xff] }
 0x171   :  { %9748 = vmatmul.mubr.msk.bf16.vlgmr.msra.gmra.mrb[32].mxu1 %vm473_vm0, %v10516_v11  ;;  %9755 = vmatprep.subr.bf16.mxu1 %v1935_v54 }
 0x172   :  { %9756 = vmatpush3.bf16.msra.mxu1 %v1935_v54  ;;  %9571 = vmatprep.mubr.msk.bf16.mxu0 %vm473_vm0, %v389_v53  ;;  %v399_v53 = vpack.c.bf16 %v230_v47, %v229_v46  ;;  %v408_v47 = vpack.c.bf16 %v248_v44, %v247_v43  ;;  %v267_v43 = vld [vmem:[#allocation2 + $0x690] sm:$0xff]  ;;  %v268_v44 = vld [vmem:[#allocation2 + $0x698] sm:$0xff] }
 0x173   :  { %v9465_v57 = vpop.f32.mrb[44].mxu0  ;;  %9757 = vmatprep.subr.bf16.mxu1 %v1936_v51  ;;  %9751 = vmatprep.mubr.msk.bf16.mxu1 %vm473_vm0, %v10518_v16 }
 0x174   :  { %v1068_v60 = vpop.f32.mrb[45].mxu0 }
 0x175   :  { %v9466_v62 = vpop.f32.mrb[46].mxu0 }
 0x176   :  { %v1938_v63 = vpack.c.bf16 %v9466_v62, %v9465_v57  ;;  %v1071_v0 = vpop.f32.mrb[47].mxu0  ;;  %9758 = vmatpush3.bf16.msra.mxu1 %v1936_v51 }
 0x177   :  { %v1937_v2 = vpack.c.bf16 %v1071_v0, %v1068_v60 }
 0x178   :  { %9572 = vmatmul.mubr.msk.bf16.gmra.mrb[152].mxu0 %vm473_vm0, %v390_v61  ;;  %v400_v61 = vpack.c.bf16 %v232_v56, %v231_v55  ;;  %v251_v55 = vld [vmem:[#allocation2 + $0x610] sm:$0xff]  ;;  %v252_v56 = vld [vmem:[#allocation2 + $0x618] sm:$0xff] }
 0x179   :  { %9752 = vmatmul.mubr.msk.bf16.gmra.mrb[36].mxu1 %vm473_vm0, %v10526_v25  ;;  %9759 = vmatprep.subr.bf16.mxu1 %v1937_v2 }
 0x17a   :  { %9760 = vmatpush3.bf16.msra.mxu1 %v1937_v2  ;;  %9575 = vmatprep.mubr.msk.bf16.mxu0 %vm473_vm0, %v391_v1  ;;  %v401_v1 = vpack.c.bf16 %v234_v59, %v233_v58  ;;  %v410_v58 = vpack.c.bf16 %v252_v56, %v251_v55  ;;  %v253_v59 = vld [vmem:[#allocation2 + $0x620] sm:$0xff]  ;;  %v271_v55 = vld [vmem:[#allocation2 + $0x6b0] sm:$0xff]  ;;  %v272_v56 = vld [vmem:[#allocation2 + $0x6b8] sm:$0xff] }
 0x17b   :  { %v9469_v5 = vpop.f32.mrb[48].mxu0  ;;  %9761 = vmatprep.subr.bf16.mxu1 %v1938_v63  ;;  %9763 = vmatprep.mubr.msk.bf16.mxu1 %vm473_vm0, %v10480_v27 }
 0x17c   :  { %v1084_v8 = vpop.f32.mrb[49].mxu0 }
 0x17d   :  { %v9470_v10 = vpop.f32.mrb[50].mxu0 }
 0x17e   :  { %v1940_v12 = vpack.c.bf16 %v9470_v10, %v9469_v5  ;;  %v1087_v13 = vpop.f32.mrb[51].mxu0  ;;  %9762 = vmatpush3.bf16.msra.mxu1 %v1938_v63 }
 0x17f   :  { %v1939_v15 = vpack.c.bf16 %v1087_v13, %v1084_v8 }
 0x180   :  { %9576 = vmatmul.mubr.msk.bf16.gmra.mrb[156].mxu0 %vm473_vm0, %v392_v9  ;;  %v402_v9 = vpack.c.bf16 %v236_v4, %v235_v3  ;;  %v256_v3 = vld [vmem:[#allocation2 + $0x638] sm:$0xff]  ;;  %v10639_v4 = vld [vmem:[#allocation7] sm:$0xff]  }
 0x181   :  { %9764 = vmatmul.mubr.msk.bf16.vlgmr.msra.gmra.mrb[40].mxu1 %vm473_vm0, %v10516_v11  ;;  %9771 = vmatprep.subr.bf16.mxu1 %v1939_v15 }
 0x182   :  { %9772 = vmatpush3.bf16.msra.mxu1 %v1939_v15  ;;  %9579 = vmatprep.mubr.msk.bf16.mxu0 %vm473_vm0, %v393_v14  ;;  %v403_v14 = vpack.c.bf16 %v238_v7, %v237_v6 }
 0x183   :  { %v9473_v19 = vpop.f32.mrb[52].mxu0  ;;  %9773 = vmatprep.subr.bf16.mxu1 %v1940_v12  ;;  %9767 = vmatprep.mubr.msk.bf16.mxu1 %vm473_vm0, %v10518_v16 }
 0x184   :  { %v1100_v22 = vpop.f32.mrb[53].mxu0 }
 0x185   :  { %v9474_v24 = vpop.f32.mrb[54].mxu0 }
 0x186   :  { %v1942_v26 = vpack.c.bf16 %v9474_v24, %v9473_v19  ;;  %v1103_v28 = vpop.f32.mrb[55].mxu0  ;;  %9774 = vmatpush3.bf16.msra.mxu1 %v1940_v12 }
 0x187   :  { %v1941_v30 = vpack.c.bf16 %v1103_v28, %v1100_v22 }
 0x188   :  { %9580 = vmatmul.mubr.msk.bf16.gmra.mrb[160].mxu0 %vm473_vm0, %v394_v23  ;;  %v404_v23 = vpack.c.bf16 %v240_v18, %v239_v17  ;;  %v259_v17 = vld [vmem:[#allocation2 + $0x650] sm:$0xff]  ;;  %v260_v18 = vld [vmem:[#allocation2 + $0x658] sm:$0xff] }
 0x189   :  { %9768 = vmatmul.mubr.msk.bf16.gmra.mrb[44].mxu1 %vm473_vm0, %v10526_v25  ;;  %9775 = vmatprep.subr.bf16.mxu1 %v1941_v30 }
 0x18a   :  { %9776 = vmatpush3.bf16.msra.mxu1 %v1941_v30  ;;  %9583 = vmatprep.mubr.msk.bf16.mxu0 %vm473_vm0, %v395_v29  ;;  %v405_v29 = vpack.c.bf16 %v242_v21, %v241_v20  ;;  %v414_v21 = vpack.c.bf16 %v260_v18, %v259_v17 }
 0x18b   :  { %v9477_v33 = vpop.f32.mrb[56].mxu0  ;;  %9777 = vmatprep.subr.bf16.mxu1 %v1942_v26  ;;  %9779 = vmatprep.mubr.msk.bf16.mxu1 %vm473_vm0, %v10480_v27 }
 0x18c   :  { %v1116_v36 = vpop.f32.mrb[57].mxu0 }
 0x18d   :  { %v9478_v38 = vpop.f32.mrb[58].mxu0 }
 0x18e   :  { %v1944_v39 = vpack.c.bf16 %v9478_v38, %v9477_v33  ;;  %v1119_v40 = vpop.f32.mrb[59].mxu0  ;;  %9778 = vmatpush3.bf16.msra.mxu1 %v1942_v26 }
 0x18f   :  { %v1943_v42 = vpack.c.bf16 %v1119_v40, %v1116_v36 }
 0x190   :  { %9584 = vmatmul.mubr.msk.bf16.gmra.mrb[164].mxu0 %vm473_vm0, %v396_v37  ;;  %v406_v37 = vpack.c.bf16 %v244_v32, %v243_v31  ;;  %v263_v31 = vld [vmem:[#allocation2 + $0x670] sm:$0xff]  ;;  %v264_v32 = vld [vmem:[#allocation2 + $0x678] sm:$0xff] }
 0x191   :  { %9780 = vmatmul.mubr.msk.bf16.vlgmr.msra.gmra.mrb[48].mxu1 %vm473_vm0, %v10516_v11  ;;  %9787 = vmatprep.subr.bf16.mxu1 %v1943_v42 }
 0x192   :  { %9788 = vmatpush3.bf16.msra.mxu1 %v1943_v42  ;;  %9587 = vmatprep.mubr.msk.bf16.mxu0 %vm473_vm0, %v397_v41  ;;  %v407_v41 = vpack.c.bf16 %v246_v35, %v245_v34  ;;  %v416_v35 = vpack.c.bf16 %v264_v32, %v263_v31  ;;  %v10685_v31 = vld [vmem:[#allocation7 + $0x10] sm:$0xff]  }
 0x193   :  { %v9481_v45 = vpop.f32.mrb[60].mxu0  ;;  %9789 = vmatprep.subr.bf16.mxu1 %v1944_v39  ;;  %9783 = vmatprep.mubr.msk.bf16.mxu1 %vm473_vm0, %v10518_v16 }
 0x194   :  { %v1132_v48 = vpop.f32.mrb[61].mxu0 }
 0x195   :  { %v9482_v50 = vpop.f32.mrb[62].mxu0 }
 0x196   :  { %v1946_v51 = vpack.c.bf16 %v9482_v50, %v9481_v45  ;;  %v1135_v52 = vpop.f32.mrb[63].mxu0  ;;  %9790 = vmatpush3.bf16.msra.mxu1 %v1944_v39 }
 0x197   :  { %v1945_v54 = vpack.c.bf16 %v1135_v52, %v1132_v48  ;;  %v249_v48 = vld [vmem:[#allocation2 + $0x600] sm:$0xff] }
 0x198   :  { %9588 = vmatmul.mubr.msk.bf16.gmra.mrb[168].mxu0 %vm473_vm0, %v398_v49  ;;  %v250_v49 = vld [vmem:[#allocation2 + $0x608] sm:$0xff] }
 0x199   :  { %9784 = vmatmul.mubr.msk.bf16.gmra.mrb[52].mxu1 %vm473_vm0, %v10526_v25  ;;  %9791 = vmatprep.subr.bf16.mxu1 %v1945_v54 }
 0x19a   :  { %9792 = vmatpush3.bf16.msra.mxu1 %v1945_v54  ;;  %9591 = vmatprep.mubr.msk.bf16.mxu0 %vm473_vm0, %v399_v53  ;;  %v409_v54 = vpack.c.bf16 %v250_v49, %v249_v48  ;;  %v269_v48 = vld [vmem:[#allocation2 + $0x6a0] sm:$0xff]  ;;  %v270_v49 = vld [vmem:[#allocation2 + $0x6a8] sm:$0xff] }
 0x19b   :  { %v9485_v57 = vpop.f32.mrb[64].mxu0  ;;  %9793 = vmatprep.subr.bf16.mxu1 %v1946_v51  ;;  %9795 = vmatprep.mubr.msk.bf16.mxu1 %vm473_vm0, %v10480_v27 }
 0x19c   :  { %v1148_v60 = vpop.f32.mrb[65].mxu0 }
 0x19d   :  { %v9486_v62 = vpop.f32.mrb[66].mxu0 }
 0x19e   :  { %v1948_v63 = vpack.c.bf16 %v9486_v62, %v9485_v57  ;;  %v1151_v0 = vpop.f32.mrb[67].mxu0  ;;  %9794 = vmatpush3.bf16.msra.mxu1 %v1946_v51 }
 0x19f   :  { %v1947_v2 = vpack.c.bf16 %v1151_v0, %v1148_v60  ;;  %v254_v60 = vld [vmem:[#allocation2 + $0x628] sm:$0xff] }
 0x1a0   :  { %9592 = vmatmul.mubr.msk.bf16.gmra.mrb[172].mxu0 %vm473_vm0, %v400_v61 }
 0x1a1   :  { %9796 = vmatmul.mubr.msk.bf16.vlgmr.msra.gmra.mrb[56].mxu1 %vm473_vm0, %v10516_v11  ;;  %9803 = vmatprep.subr.bf16.mxu1 %v1947_v2 }
 0x1a2   :  { %9804 = vmatpush3.bf16.msra.mxu1 %v1947_v2  ;;  %9595 = vmatprep.mubr.msk.bf16.mxu0 %vm473_vm0, %v401_v1  ;;  %v411_v1 = vpack.c.bf16 %v254_v60, %v253_v59  ;;  %v255_v2 = vld [vmem:[#allocation2 + $0x630] sm:$0xff]  ;;  %v273_v59 = vld [vmem:[#allocation2 + $0x6c0] sm:$0xff]  ;;  %v274_v60 = vld [vmem:[#allocation2 + $0x6c8] sm:$0xff] }
 0x1a3   :  { %v9489_v5 = vpop.f32.mrb[68].mxu0  ;;  %9805 = vmatprep.subr.bf16.mxu1 %v1948_v63  ;;  %9799 = vmatprep.mubr.msk.bf16.mxu1 %vm473_vm0, %v10518_v16  ;;  %v412_v7 = vpack.c.bf16 %v256_v3, %v255_v2  ;;  %v275_v2 = vld [vmem:[#allocation2 + $0x6d0] sm:$0xff]  ;;  %v276_v3 = vld [vmem:[#allocation2 + $0x6d8] sm:$0xff] }
 0x1a4   :  { %v1164_v8 = vpop.f32.mrb[69].mxu0 }
 0x1a5   :  { %v9490_v10 = vpop.f32.mrb[70].mxu0 }
 0x1a6   :  { %v1950_v12 = vpack.c.bf16 %v9490_v10, %v9489_v5  ;;  %v1167_v13 = vpop.f32.mrb[71].mxu0  ;;  %9806 = vmatpush3.bf16.msra.mxu1 %v1948_v63 }
 0x1a7   :  { %v1949_v15 = vpack.c.bf16 %v1167_v13, %v1164_v8  ;;  %v257_v8 = vld [vmem:[#allocation2 + $0x640] sm:$0xff] }
 0x1a8   :  { %9596 = vmatmul.mubr.msk.bf16.gmra.mrb[176].mxu0 %vm473_vm0, %v402_v9  ;;  %v258_v9 = vld [vmem:[#allocation2 + $0x648] sm:$0xff] }
 0x1a9   :  { %9800 = vmatmul.mubr.msk.bf16.gmra.mrb[60].mxu1 %vm473_vm0, %v10526_v25  ;;  %9807 = vmatprep.subr.bf16.mxu1 %v1949_v15 }
 0x1aa   :  { %9808 = vmatpush3.bf16.msra.mxu1 %v1949_v15  ;;  %9599 = vmatprep.mubr.msk.bf16.mxu0 %vm473_vm0, %v403_v14  ;;  %v413_v15 = vpack.c.bf16 %v258_v9, %v257_v8  ;;  %v277_v8 = vld [vmem:[#allocation2 + $0x6e0] sm:$0xff]  ;;  %v278_v9 = vld [vmem:[#allocation2 + $0x6e8] sm:$0xff] }
 0x1ab   :  { %v9493_v19 = vpop.f32.mrb[72].mxu0  ;;  %9809 = vmatprep.subr.bf16.mxu1 %v1950_v12  ;;  %9811 = vmatprep.mubr.msk.bf16.mxu1 %vm473_vm0, %v10480_v27 }
 0x1ac   :  { %v1180_v22 = vpop.f32.mrb[73].mxu0 }
 0x1ad   :  { %v9494_v24 = vpop.f32.mrb[74].mxu0 }
 0x1ae   :  { %v1952_v26 = vpack.c.bf16 %v9494_v24, %v9493_v19  ;;  %v1183_v28 = vpop.f32.mrb[75].mxu0  ;;  %9810 = vmatpush3.bf16.msra.mxu1 %v1950_v12 }
 0x1af   :  { %v1951_v30 = vpack.c.bf16 %v1183_v28, %v1180_v22  ;;  %v261_v22 = vld [vmem:[#allocation2 + $0x660] sm:$0xff] }
 0x1b0   :  { %9600 = vmatmul.mubr.msk.bf16.gmra.mrb[180].mxu0 %vm473_vm0, %v404_v23  ;;  %v262_v23 = vld [vmem:[#allocation2 + $0x668] sm:$0xff] }
 0x1b1   :  { %9812 = vmatmul.mubr.msk.bf16.vlgmr.msra.gmra.mrb[64].mxu1 %vm473_vm0, %v10516_v11  ;;  %9819 = vmatprep.subr.bf16.mxu1 %v1951_v30 }
 0x1b2   :  { %9820 = vmatpush3.bf16.msra.mxu1 %v1951_v30  ;;  %9603 = vmatprep.mubr.msk.bf16.mxu0 %vm473_vm0, %v405_v29  ;;  %v415_v30 = vpack.c.bf16 %v262_v23, %v261_v22 }
 0x1b3   :  { %v9497_v33 = vpop.f32.mrb[76].mxu0  ;;  %9821 = vmatprep.subr.bf16.mxu1 %v1952_v26  ;;  %9815 = vmatprep.mubr.msk.bf16.mxu1 %vm473_vm0, %v10518_v16 }
 0x1b4   :  { %v1196_v36 = vpop.f32.mrb[77].mxu0 }
 0x1b5   :  { %v9498_v38 = vpop.f32.mrb[78].mxu0 }
 0x1b6   :  { %v1954_v39 = vpack.c.bf16 %v9498_v38, %v9497_v33  ;;  %v1199_v40 = vpop.f32.mrb[79].mxu0  ;;  %9822 = vmatpush3.bf16.msra.mxu1 %v1952_v26 }
 0x1b7   :  { %v1953_v42 = vpack.c.bf16 %v1199_v40, %v1196_v36  ;;  %v265_v36 = vld [vmem:[#allocation2 + $0x680] sm:$0xff] }
 0x1b8   :  { %9604 = vmatmul.mubr.msk.bf16.gmra.mrb[184].mxu0 %vm473_vm0, %v406_v37  ;;  %v266_v37 = vld [vmem:[#allocation2 + $0x688] sm:$0xff] }
 0x1b9   :  { %9816 = vmatmul.mubr.msk.bf16.gmra.mrb[68].mxu1 %vm473_vm0, %v10526_v25  ;;  %9823 = vmatprep.subr.bf16.mxu1 %v1953_v42 }
 0x1ba   :  { %9824 = vmatpush3.bf16.msra.mxu1 %v1953_v42  ;;  %9607 = vmatprep.mubr.msk.bf16.mxu0 %vm473_vm0, %v407_v41  ;;  %v417_v42 = vpack.c.bf16 %v266_v37, %v265_v36 }
 0x1bb   :  { %v9501_v45 = vpop.f32.mrb[80].mxu0  ;;  %9825 = vmatprep.subr.bf16.mxu1 %v1954_v39  ;;  %9827 = vmatprep.mubr.msk.bf16.mxu1 %vm473_vm0, %v10480_v27 }
 0x1bc   :  { %v1212_v46 = vpop.f32.mrb[81].mxu0 }
 0x1bd   :  { %v9502_v50 = vpop.f32.mrb[82].mxu0 }
 0x1be   :  { %v1956_v51 = vpack.c.bf16 %v9502_v50, %v9501_v45  ;;  %v1215_v52 = vpop.f32.mrb[83].mxu0  ;;  %9826 = vmatpush3.bf16.msra.mxu1 %v1954_v39 }
 0x1bf   :  { %v1955_v53 = vpack.c.bf16 %v1215_v52, %v1212_v46 }
 0x1c0   :  { %9608 = vmatmul.mubr.msk.bf16.gmra.mrb[188].mxu0 %vm473_vm0, %v408_v47  ;;  %v418_v47 = vpack.c.bf16 %v268_v44, %v267_v43 }
 0x1c1   :  { %9828 = vmatmul.mubr.msk.bf16.vlgmr.msra.gmra.mrb[72].mxu1 %vm473_vm0, %v10516_v11  ;;  %9835 = vmatprep.subr.bf16.mxu1 %v1955_v53 }
 0x1c2   :  { %9836 = vmatpush3.bf16.msra.mxu1 %v1955_v53  ;;  %9831 = vmatprep.mubr.msk.bf16.mxu1 %vm473_vm0, %v10518_v16 }
 0x1c3   :  { %v9505_v27 = vpop.f32.mrb[84].mxu0  ;;  %9837 = vmatprep.subr.bf16.mxu1 %v1956_v51  ;;  %9611 = vmatprep.mubr.msk.bf16.mxu0 %vm473_vm0, %v409_v54  ;;  %v419_v54 = vpack.c.bf16 %v270_v49, %v269_v48  ;;  %v288_v48 = vld [vmem:[#allocation2 + $0x738] sm:$0xff]  ;;  %v289_v49 = vld [vmem:[#allocation2 + $0x740] sm:$0xff] }
 0x1c4   :  { %v1228_v57 = vpop.f32.mrb[85].mxu0 }
 0x1c5   :  { %v9506_v61 = vpop.f32.mrb[86].mxu0 }
 0x1c6   :  { %v1958_v62 = vpack.c.bf16 %v9506_v61, %v9505_v27  ;;  %v1231_v63 = vpop.f32.mrb[87].mxu0  ;;  %9838 = vmatpush3.bf16.msra.mxu1 %v1956_v51 }
 0x1c7   :  { %v1957_v0 = vpack.c.bf16 %v1231_v63, %v1228_v57 }
 0x1c8   :  { %9612 = vmatmul.mubr.msk.bf16.gmra.mrb[192].mxu0 %vm473_vm0, %v410_v58  ;;  %v420_v58 = vpack.c.bf16 %v272_v56, %v271_v55 }
 0x1c9   :  { %9832 = vmatmul.mubr.msk.bf16.gmra.mrb[76].mxu1 %vm473_vm0, %v10526_v25  ;;  %9839 = vmatprep.subr.bf16.mxu1 %v1957_v0 }
 0x1ca   :  { %9840 = vmatpush3.bf16.msra.mxu1 %v1957_v0  ;;  %9843 = vmatprep.mubr.msk.bf16.mxu1 %vm473_vm0, %v10639_v4 }
 0x1cb   :  { %v9509_v5 = vpop.f32.mrb[88].mxu0  ;;  %9841 = vmatprep.subr.bf16.mxu1 %v1958_v62  ;;  %9615 = vmatprep.mubr.msk.bf16.mxu0 %vm473_vm0, %v411_v1  ;;  %v421_v1 = vpack.c.bf16 %v274_v60, %v273_v59 }
 0x1cc   :  { %v1244_v6 = vpop.f32.mrb[89].mxu0 }
 0x1cd   :  { %v9510_v10 = vpop.f32.mrb[90].mxu0 }
 0x1ce   :  { %v1960_v12 = vpack.c.bf16 %v9510_v10, %v9509_v5  ;;  %v1247_v13 = vpop.f32.mrb[91].mxu0  ;;  %9842 = vmatpush3.bf16.msra.mxu1 %v1958_v62 }
 0x1cf   :  { %v1959_v14 = vpack.c.bf16 %v1247_v13, %v1244_v6 }
 0x1d0   :  { %9616 = vmatmul.mubr.msk.bf16.gmra.mrb[196].mxu0 %vm473_vm0, %v412_v7  ;;  %v422_v7 = vpack.c.bf16 %v276_v3, %v275_v2 }
 0x1d1   :  { %9844 = vmatmul.mubr.msk.bf16.vlgmr.msra.gmra.mrb[80].mxu1 %vm473_vm0, %v10516_v11  ;;  %9851 = vmatprep.subr.bf16.mxu1 %v1959_v14 }
 0x1d2   :  { %9852 = vmatpush3.bf16.msra.mxu1 %v1959_v14  ;;  %9847 = vmatprep.mubr.msk.bf16.mxu1 %vm473_vm0, %v10518_v16  ;;  %v423_v14 = vpack.c.bf16 %v278_v9, %v277_v8 }
 0x1d3   :  { %v9513_v19 = vpop.f32.mrb[92].mxu0  ;;  %9853 = vmatprep.subr.bf16.mxu1 %v1960_v12  ;;  %9619 = vmatprep.mubr.msk.bf16.mxu0 %vm473_vm0, %v413_v15  ;;  %v280_v15 = vld [vmem:[#allocation2 + $0x6f8] sm:$0xff] }
 0x1d4   :  { %v1260_v20 = vpop.f32.mrb[93].mxu0 }
 0x1d5   :  { %v9514_v24 = vpop.f32.mrb[94].mxu0 }
 0x1d6   :  { %v1962_v26 = vpack.c.bf16 %v9514_v24, %v9513_v19  ;;  %v1263_v28 = vpop.f32.mrb[95].mxu0  ;;  %9854 = vmatpush3.bf16.msra.mxu1 %v1960_v12 }
 0x1d7   :  { %v1961_v29 = vpack.c.bf16 %v1263_v28, %v1260_v20  ;;  %v281_v20 = vld [vmem:[#allocation2 + $0x700] sm:$0xff]  ;;  %v10681_v28 = vld [vmem:[#allocation7 + $0x8] sm:$0xff]  }
 0x1d8   :  { %9620 = vmatmul.mubr.msk.bf16.gmra.mrb[200].mxu0 %vm473_vm0, %v414_v21  ;;  %v282_v21 = vld [vmem:[#allocation2 + $0x708] sm:$0xff] }
 0x1d9   :  { %9848 = vmatmul.mubr.msk.bf16.gmra.mrb[84].mxu1 %vm473_vm0, %v10526_v25  ;;  %9855 = vmatprep.subr.bf16.mxu1 %v1961_v29 }
 0x1da   :  { %9856 = vmatpush3.bf16.msra.mxu1 %v1961_v29  ;;  %9859 = vmatprep.mubr.msk.bf16.mxu1 %vm473_vm0, %v10639_v4  ;;  %v283_v29 = vld [vmem:[#allocation2 + $0x710] sm:$0xff] }
 0x1db   :  { %v9517_v33 = vpop.f32.mrb[96].mxu0  ;;  %9857 = vmatprep.subr.bf16.mxu1 %v1962_v26  ;;  %9623 = vmatprep.mubr.msk.bf16.mxu0 %vm473_vm0, %v415_v30  ;;  %v284_v30 = vld [vmem:[#allocation2 + $0x718] sm:$0xff] }
 0x1dc   :  { %v1276_v34 = vpop.f32.mrb[97].mxu0 }
 0x1dd   :  { %v9518_v38 = vpop.f32.mrb[98].mxu0 }
 0x1de   :  { %v1964_v39 = vpack.c.bf16 %v9518_v38, %v9517_v33  ;;  %v1279_v40 = vpop.f32.mrb[99].mxu0  ;;  %9858 = vmatpush3.bf16.msra.mxu1 %v1962_v26  ;;  %v425_v26 = vpack.c.bf16 %v282_v21, %v281_v20  ;;  %v285_v38 = vld [vmem:[#allocation2 + $0x720] sm:$0xff] }
 0x1df   :  { %v1963_v41 = vpack.c.bf16 %v1279_v40, %v1276_v34 }
 0x1e0   :  { %9624 = vmatmul.mubr.msk.bf16.gmra.mrb[204].mxu0 %vm473_vm0, %v416_v35  ;;  %v426_v35 = vpack.c.bf16 %v284_v30, %v283_v29 }
 0x1e1   :  { %9860 = vmatmul.mubr.msk.bf16.vlgmr.msra.gmra.mrb[88].mxu1 %vm473_vm0, %v10516_v11  ;;  %9867 = vmatprep.subr.bf16.mxu1 %v1963_v41 }
 0x1e2   :  { %9868 = vmatpush3.bf16.msra.mxu1 %v1963_v41  ;;  %9863 = vmatprep.mubr.msk.bf16.mxu1 %vm473_vm0, %v10518_v16 }
 0x1e3   :  { %v9521_v45 = vpop.f32.mrb[100].mxu0  ;;  %9869 = vmatprep.subr.bf16.mxu1 %v1964_v39  ;;  %9627 = vmatprep.mubr.msk.bf16.mxu0 %vm473_vm0, %v417_v42 }
 0x1e4   :  { %v1292_v46 = vpop.f32.mrb[101].mxu0 }
 0x1e5   :  { %v9522_v50 = vpop.f32.mrb[102].mxu0 }
 0x1e6   :  { %v1966_v51 = vpack.c.bf16 %v9522_v50, %v9521_v45  ;;  %v1295_v52 = vpop.f32.mrb[103].mxu0  ;;  %9870 = vmatpush3.bf16.msra.mxu1 %v1964_v39  ;;  %v286_v39 = vld [vmem:[#allocation2 + $0x728] sm:$0xff] }
 0x1e7   :  { %v1965_v53 = vpack.c.bf16 %v1295_v52, %v1292_v46  ;;  %v427_v45 = vpack.c.bf16 %v286_v39, %v285_v38  ;;  %v10705_v46 = vld [vmem:[#allocation7 + $0x18] sm:$0xff]   ;;  %v290_v50 = vld [vmem:[#allocation2 + $0x748] sm:$0xff]  ;;  %v301_v38 = vld [vmem:[#allocation2 + $0x7a0] sm:$0xff] }
 0x1e8   :  { %9628 = vmatmul.mubr.msk.bf16.gmra.mrb[208].mxu0 %vm473_vm0, %v418_v47  ;;  %v287_v47 = vld [vmem:[#allocation2 + $0x730] sm:$0xff]  ;;  %v302_v39 = vld [vmem:[#allocation2 + $0x7a8] sm:$0xff] }
 0x1e9   :  { %9864 = vmatmul.mubr.msk.bf16.gmra.mrb[92].mxu1 %vm473_vm0, %v10526_v25  ;;  %9871 = vmatprep.subr.bf16.mxu1 %v1965_v53 }
 0x1ea   :  { %9872 = vmatpush3.bf16.msra.mxu1 %v1965_v53  ;;  %9875 = vmatprep.mubr.msk.bf16.mxu1 %vm473_vm0, %v10639_v4 }
 0x1eb   :  { %v9525_v27 = vpop.f32.mrb[104].mxu0  ;;  %9873 = vmatprep.subr.bf16.mxu1 %v1966_v51  ;;  %9631 = vmatprep.mubr.msk.bf16.mxu0 %vm473_vm0, %v419_v54  ;;  %v428_v54 = vpack.c.bf16 %v288_v48, %v287_v47 }
 0x1ec   :  { %v1308_v57 = vpop.f32.mrb[105].mxu0 }
 0x1ed   :  { %v9526_v61 = vpop.f32.mrb[106].mxu0 }
 0x1ee   :  { %v1968_v62 = vpack.c.bf16 %v9526_v61, %v9525_v27  ;;  %v1311_v63 = vpop.f32.mrb[107].mxu0  ;;  %9874 = vmatpush3.bf16.msra.mxu1 %v1966_v51  ;;  %v429_v27 = vpack.c.bf16 %v290_v50, %v289_v49  ;;  %v435_v49 = vpack.c.bf16 %v302_v39, %v301_v38 }
 0x1ef   :  { %v1967_v0 = vpack.c.bf16 %v1311_v63, %v1308_v57  ;;  %v292_v63 = vld [vmem:[#allocation2 + $0x758] sm:$0xff] }
 0x1f0   :  { %9632 = vmatmul.mubr.msk.bf16.gmra.mrb[212].mxu0 %vm473_vm0, %v420_v58 }
 0x1f1   :  { %9876 = vmatmul.mubr.msk.bf16.vlgmr.msra.gmra.mrb[96].mxu1 %vm473_vm0, %v10516_v11  ;;  %9883 = vmatprep.subr.bf16.mxu1 %v1967_v0 }
 0x1f2   :  { %9884 = vmatpush3.bf16.msra.mxu1 %v1967_v0  ;;  %9879 = vmatprep.mubr.msk.bf16.mxu1 %vm473_vm0, %v10518_v16  ;;  %v279_v16 = vld [vmem:[#allocation2 + $0x6f0] sm:$0xff]  ;;  %v293_v0 = vld [vmem:[#allocation2 + $0x760] sm:$0xff] }
 0x1f3   :  { %v9529_v5 = vpop.f32.mrb[108].mxu0  ;;  %9885 = vmatprep.subr.bf16.mxu1 %v1968_v62  ;;  %9635 = vmatprep.mubr.msk.bf16.mxu0 %vm473_vm0, %v421_v1  ;;  %v424_v19 = vpack.c.bf16 %v280_v15, %v279_v16  ;;  %v294_v1 = vld [vmem:[#allocation2 + $0x768] sm:$0xff]  ;;  %v295_v16 = vld [vmem:[#allocation2 + $0x770] sm:$0xff]  ;;  %v296_v15 = vld [vmem:[#allocation2 + $0x778] sm:$0xff] }
 0x1f4   :  { %v1324_v6 = vpop.f32.mrb[109].mxu0  ;;  %v431_v9 = vpack.c.bf16 %v294_v1, %v293_v0 }
 0x1f5   :  { %v9530_v10 = vpop.f32.mrb[110].mxu0 }
 0x1f6   :  { %v1970_v12 = vpack.c.bf16 %v9530_v10, %v9529_v5  ;;  %v1327_v13 = vpop.f32.mrb[111].mxu0  ;;  %9886 = vmatpush3.bf16.msra.mxu1 %v1968_v62  ;;  %v291_v62 = vld [vmem:[#allocation2 + $0x750] sm:$0xff] }
 0x1f7   :  { %v1969_v11 = vpack.c.bf16 %v1327_v13, %v1324_v6  ;;  %v430_v6 = vpack.c.bf16 %v292_v63, %v291_v62 }
 0x1f8   :  { %9636 = vmatmul.mubr.msk.bf16.gmra.mrb[216].mxu0 %vm473_vm0, %v422_v7 }
 0x1f9   :  { %9880 = vmatmul.mubr.msk.bf16.gmra.mrb[100].mxu1 %vm473_vm0, %v10526_v25  ;;  %9887 = vmatprep.subr.bf16.mxu1 %v1969_v11 }
 0x1fa   :  { %9888 = vmatpush3.bf16.msra.mxu1 %v1969_v11  ;;  %9891 = vmatprep.mubr.msk.bf16.mxu1 %vm473_vm0, %v10639_v4 }
 0x1fb   :  { %v9533_v17 = vpop.f32.mrb[112].mxu0  ;;  %9889 = vmatprep.subr.bf16.mxu1 %v1970_v12  ;;  %9639 = vmatprep.mubr.msk.bf16.mxu0 %vm473_vm0, %v423_v14 }
 0x1fc   :  { %v1340_v18 = vpop.f32.mrb[113].mxu0 }
 0x1fd   :  { %v9534_v22 = vpop.f32.mrb[114].mxu0 }
 0x1fe   :  { %v1972_v23 = vpack.c.bf16 %v9534_v22, %v9533_v17  ;;  %v1343_v24 = vpop.f32.mrb[115].mxu0  ;;  %9890 = vmatpush3.bf16.msra.mxu1 %v1970_v12  ;;  %v297_v17 = vld [vmem:[#allocation2 + $0x780] sm:$0xff]  ;;  %v432_v22 = vpack.c.bf16 %v296_v15, %v295_v16  ;;  %v307_v16 = vld [vmem:[#allocation2 + $0x7d0] sm:$0xff]  ;;  %v308_v15 = vld [vmem:[#allocation2 + $0x7d8] sm:$0xff] }
 0x1ff   :  { %v1971_v25 = vpack.c.bf16 %v1343_v24, %v1340_v18  ;;  %v298_v18 = vld [vmem:[#allocation2 + $0x788] sm:$0xff] }
 0x200   :  { %9640 = vmatmul.mubr.msk.bf16.gmra.mrb[220].mxu0 %vm473_vm0, %v424_v19 }
 0x201   :  { %9892 = vmatmul.mubr.msk.bf16.vlgmr.msra.gmra.mrb[104].mxu1 %vm473_vm0, %v10681_v28  ;;  %9899 = vmatprep.subr.bf16.mxu1 %v1971_v25 }
 0x202   :  { %9900 = vmatpush3.bf16.msra.mxu1 %v1971_v25  ;;  %9895 = vmatprep.mubr.msk.bf16.mxu1 %vm473_vm0, %v10685_v31  ;;  %v433_v25 = vpack.c.bf16 %v298_v18, %v297_v17  ;;  %v309_v17 = vld [vmem:[#allocation2 + $0x7e0] sm:$0xff]  ;;  %v310_v18 = vld [vmem:[#allocation2 + $0x7e8] sm:$0xff] }
 0x203   :  { %v9537_v32 = vpop.f32.mrb[116].mxu0  ;;  %9901 = vmatprep.subr.bf16.mxu1 %v1972_v23  ;;  %9643 = vmatprep.mubr.msk.bf16.mxu0 %vm473_vm0, %v425_v26 }
 0x204   :  { %v1356_v33 = vpop.f32.mrb[117].mxu0  ;;  %v10690_v34 = vpop.f32.mrb[0].mxu1 }
 0x205   :  { %4935 = vrot.lane.b32.xlu0 %v10690_v34, %s10385_s2  ;;  %v9538_v36 = vpop.f32.mrb[118].mxu0  ;;  %v10694_v37 = vpop.f32.mrb[1].mxu1 }
 0x206   :  { %v1974_v40 = vpack.c.bf16 %v9538_v36, %v9537_v32  ;;  %v1359_v41 = vpop.f32.mrb[119].mxu0  ;;  %v10696_v42 = vpop.f32.mrb[2].mxu1  ;;  %9902 = vmatpush3.bf16.msra.mxu1 %v1972_v23  ;;  %v300_v36 = vld [vmem:[#allocation2 + $0x798] sm:$0xff] }
 0x207   :  { %v1973_v43 = vpack.c.bf16 %v1359_v41, %v1356_v33  ;;  %4937 = vrot.lane.b32.xlu1 %v10696_v42, %s10385_s2  ;;  %v10700_v44 = vpop.f32.mrb[3].mxu1 }
 0x208   :  { %9644 = vmatmul.mubr.msk.bf16.gmra.mrb[224].mxu0 %vm473_vm0, %v426_v35  ;;  %v299_v35 = vld [vmem:[#allocation2 + $0x790] sm:$0xff] }
 0x209   :  { %4931 = vrot.lane.b32.xlu0 %v10694_v37, %s10385_s2  ;;  %9896 = vmatmul.mubr.msk.bf16.gmra.mrb[108].mxu1 %vm473_vm0, %v10705_v46 }
 0x20a   :  { %9903 = vmatprep.subr.bf16.mxu1 %v1973_v43  ;;  %9907 = vmatprep.mubr.msk.bf16.mxu1 %vm473_vm0, %v10639_v4 }
 0x20b   :  { %9904 = vmatpush3.bf16.msra.mxu1 %v1973_v43  ;;  %4933 = vrot.lane.b32.xlu1 %v10700_v44, %s10385_s2  ;;  %v9541_v51 = vpop.f32.mrb[120].mxu0 }
 0x20c   :  { %9905 = vmatprep.subr.bf16.mxu1 %v1974_v40  ;;  %v1372_v52 = vpop.f32.mrb[121].mxu0  ;;  %v10713_v53 = vpop.f32.mrb[4].mxu1  ;;  %9647 = vmatprep.mubr.msk.bf16.mxu0 %vm473_vm0, %v427_v45  ;;  %v434_v45 = vpack.c.bf16 %v300_v36, %v299_v35 }
 0x20d   :  { %v9542_v55 = vpop.f32.mrb[122].mxu0  ;;  %v10716_v56 = vpop.f32.mrb[5].mxu1 }
 0x20e   :  { %v1976_v57 = vpack.c.bf16 %v9542_v55, %v9541_v51  ;;  %4291 = vrot.lane.b32.xlu0 %v10716_v56, %s10385_s2  ;;  %v1375_v58 = vpop.f32.mrb[123].mxu0  ;;  %v10720_v59 = vpop.f32.mrb[6].mxu1 }
 0x20f   :  { %v1975_v60 = vpack.c.bf16 %v1375_v58, %v1372_v52  ;;  %9906 = vmatpush3.bf16.msra.mxu1 %v1974_v40  ;;  %4295 = vrot.lane.b32.xlu1 %v10713_v53, %s10385_s2  ;;  %v10724_v61 = vpop.f32.mrb[7].mxu1  ;;  %v305_v58 = vld [vmem:[#allocation2 + $0x7c0] sm:$0xff] }
 0x210   :  { %9648 = vmatmul.mubr.msk.bf16.gmra.mrb[228].mxu0 %vm473_vm0, %v428_v54 }
 0x211   :  { %9915 = vmatprep.subr.bf16.mxu1 %v1975_v60  ;;  %9651 = vmatprep.mubr.msk.bf16.mxu0 %vm473_vm0, %v429_v27  ;;  %v303_v27 = vld [vmem:[#allocation2 + $0x7b0] sm:$0xff] }
 0x212   :  { %9908 = vmatmul.mubr.msk.bf16.vlgmr.msra.gmra.mrb[112].mxu1 %vm473_vm0, %v10681_v28  ;;  %4293 = vrot.lane.b32.xlu0 %v10724_v61, %s10385_s2 }
 0x213   :  { %9916 = vmatpush3.bf16.msra.mxu1 %v1975_v60  ;;  %4297 = vrot.lane.b32.xlu1 %v10720_v59, %s10385_s2  ;;  %v9545_v2 = vpop.f32.mrb[124].mxu0  ;;  %v306_v60 = vld [vmem:[#allocation2 + $0x7c8] sm:$0xff] }
 0x214   :  { %9917 = vmatprep.subr.bf16.mxu1 %v1976_v57  ;;  %v1388_v3 = vpop.f32.mrb[125].mxu0  ;;  %v10734_v5 = vpop.f32.mrb[8].mxu1  ;;  %9911 = vmatprep.mubr.msk.bf16.mxu1 %vm473_vm0, %v10685_v31 }
 0x215   :  { %v9546_v7 = vpop.f32.mrb[126].mxu0  ;;  %v10738_v8 = vpop.f32.mrb[9].mxu1 }
 0x216   :  { %v1978_v10 = vpack.c.bf16 %v9546_v7, %v9545_v2  ;;  %4943 = vrot.lane.b32.xlu0 %v10734_v5, %s10385_s2  ;;  %v1391_v12 = vpop.f32.mrb[127].mxu0  ;;  %v10742_v13 = vpop.f32.mrb[10].mxu1 }
 0x217   :  { %v1977_v11 = vpack.c.bf16 %v1391_v12, %v1388_v3  ;;  %9918 = vmatpush3.bf16.msra.mxu1 %v1976_v57  ;;  %4945 = vrot.lane.b32.xlu1 %v10742_v13, %s10385_s2  ;;  %v10746_v14 = vpop.f32.mrb[11].mxu1  ;;  %v304_v57 = vld [vmem:[#allocation2 + $0x7b8] sm:$0xff] }
 0x218   :  { %9652 = vmatmul.mubr.msk.bf16.gmra.mrb[232].mxu0 %vm473_vm0, %v430_v6  ;;  %v436_v1 = vpack.c.bf16 %v304_v57, %v303_v27  ;;  %v437_v6 = vpack.c.bf16 %v306_v60, %v305_v58 }
 0x219   :  { %9919 = vmatprep.subr.bf16.mxu1 %v1977_v11  ;;  %9655 = vmatprep.mubr.msk.bf16.mxu0 %vm473_vm0, %v431_v9 }
 0x21a   :  { %9912 = vmatmul.mubr.msk.bf16.gmra.mrb[116].mxu1 %vm473_vm0, %v10705_v46  ;;  %4939 = vrot.lane.b32.xlu0 %v10738_v8, %s10385_s2 }
 0x21b   :  { %9920 = vmatpush3.bf16.msra.mxu1 %v1977_v11  ;;  %4941 = vrot.lane.b32.xlu1 %v10746_v14, %s10385_s2  ;;  %v9549_v19 = vpop.f32.mrb[128].mxu0 }
 0x21c   :  { %9921 = vmatprep.subr.bf16.mxu1 %v1978_v10  ;;  %v1404_v20 = vpop.f32.mrb[129].mxu0  ;;  %v10756_v21 = vpop.f32.mrb[12].mxu1  ;;  %9923 = vmatprep.mubr.msk.bf16.mxu1 %vm473_vm0, %v10639_v4 }
 0x21d   :  { %v9550_v23 = vpop.f32.mrb[130].mxu0  ;;  %v10760_v24 = vpop.f32.mrb[13].mxu1 }
 0x21e   :  { %v1980_v26 = vpack.c.bf16 %v9550_v23, %v9549_v19  ;;  %4303 = vrot.lane.b32.xlu0 %v10756_v21, %s10385_s2  ;;  %v1407_v29 = vpop.f32.mrb[131].mxu0  ;;  %v10764_v30 = vpop.f32.mrb[14].mxu1  ;;  %v438_v23 = vpack.c.bf16 %v308_v15, %v307_v16 }
 0x21f   :  { %v1979_v32 = vpack.c.bf16 %v1407_v29, %v1404_v20  ;;  %9922 = vmatpush3.bf16.msra.mxu1 %v1978_v10  ;;  %4305 = vrot.lane.b32.xlu1 %v10764_v30, %s10385_s2  ;;  %v10768_v33 = vpop.f32.mrb[15].mxu1  ;;  %v439_v29 = vpack.c.bf16 %v310_v18, %v309_v17 }
 0x220   :  { %9656 = vmatmul.mubr.msk.bf16.gmra.mrb[236].mxu0 %vm473_vm0, %v432_v22 }
 0x221   :  { %9931 = vmatprep.subr.bf16.mxu1 %v1979_v32  ;;  %9659 = vmatprep.mubr.msk.bf16.mxu0 %vm473_vm0, %v433_v25 }
 0x222   :  { %9924 = vmatmul.mubr.msk.bf16.vlgmr.msra.gmra.mrb[120].mxu1 %vm473_vm0, %v10681_v28  ;;  %4299 = vrot.lane.b32.xlu0 %v10760_v24, %s10385_s2 }
 0x223   :  { %9932 = vmatpush3.bf16.msra.mxu1 %v1979_v32  ;;  %4301 = vrot.lane.b32.xlu1 %v10768_v33, %s10385_s2  ;;  %v9553_v40 = vpop.f32.mrb[132].mxu0 }
 0x224   :  { %v1420_v41 = vpop.f32.mrb[133].mxu0  ;;  %v10778_v43 = vpop.f32.mrb[16].mxu1  ;;  %9933 = vmatprep.subr.bf16.mxu1 %v1980_v26  ;;  %9927 = vmatprep.mubr.msk.bf16.mxu1 %vm473_vm0, %v10685_v31 }
 0x225   :  { %v9554_v47 = vpop.f32.mrb[134].mxu0  ;;  %v10782_v48 = vpop.f32.mrb[17].mxu1 }
 0x226   :  { %v1982_v50 = vpack.c.bf16 %v9554_v47, %v9553_v40  ;;  %4951 = vrot.lane.b32.xlu0 %v10778_v43, %s10385_s2  ;;  %v1423_v51 = vpop.f32.mrb[135].mxu0  ;;  %v10786_v52 = vpop.f32.mrb[18].mxu1  ;;  %v311_v40 = vld [vmem:[#allocation2 + $0x7f0] sm:$0xff] }
 0x227   :  { %v1981_v54 = vpack.c.bf16 %v1423_v51, %v1420_v41  ;;  %9934 = vmatpush3.bf16.msra.mxu1 %v1980_v26  ;;  %4953 = vrot.lane.b32.xlu1 %v10786_v52, %s10385_s2  ;;  %v10790_v55 = vpop.f32.mrb[19].mxu1  ;;  %v312_v41 = vld [vmem:[#allocation2 + $0x7f8] sm:$0xff] }
 0x228   :  { %9660 = vmatmul.mubr.msk.bf16.gmra.mrb[240].mxu0 %vm473_vm0, %v434_v45 }
 0x229   :  { %9935 = vmatprep.subr.bf16.mxu1 %v1981_v54  ;;  %9663 = vmatprep.mubr.msk.bf16.mxu0 %vm473_vm0, %v435_v49 }
 0x22a   :  { %9928 = vmatmul.mubr.msk.bf16.gmra.mrb[124].mxu1 %vm473_vm0, %v10705_v46  ;;  %4947 = vrot.lane.b32.xlu0 %v10782_v48, %s10385_s2 }
 0x22b   :  { %9936 = vmatpush3.bf16.msra.mxu1 %v1981_v54  ;;  %4949 = vrot.lane.b32.xlu1 %v10790_v55, %s10385_s2  ;;  %v9557_v62 = vpop.f32.mrb[136].mxu0 }
 0x22c   :  { %v1436_v63 = vpop.f32.mrb[137].mxu0  ;;  %v10800_v0 = vpop.f32.mrb[20].mxu1  ;;  %9937 = vmatprep.subr.bf16.mxu1 %v1982_v50  ;;  %9939 = vmatprep.mubr.msk.bf16.mxu1 %vm473_vm0, %v10639_v4 }
 0x22d   :  { %v9558_v2 = vpop.f32.mrb[138].mxu0  ;;  %v10804_v3 = vpop.f32.mrb[21].mxu1 }
 0x22e   :  { %v1984_v7 = vpack.c.bf16 %v9558_v2, %v9557_v62  ;;  %4311 = vrot.lane.b32.xlu0 %v10800_v0, %s10385_s2  ;;  %v1439_v9 = vpop.f32.mrb[139].mxu0  ;;  %v10808_v10 = vpop.f32.mrb[22].mxu1 }
 0x22f   :  { %v1983_v12 = vpack.c.bf16 %v1439_v9, %v1436_v63  ;;  %9938 = vmatpush3.bf16.msra.mxu1 %v1982_v50  ;;  %4313 = vrot.lane.b32.xlu1 %v10808_v10, %s10385_s2  ;;  %v10812_v11 = vpop.f32.mrb[23].mxu1  ;;  %v440_v50 = vpack.c.bf16 %v312_v41, %v311_v40 }
 0x230   :  { %9664 = vmatmul.mubr.msk.bf16.gmra.mrb[244].mxu0 %vm473_vm0, %v436_v1 }
 0x231   :  { %9947 = vmatprep.subr.bf16.mxu1 %v1983_v12  ;;  %9667 = vmatprep.mubr.msk.bf16.mxu0 %vm473_vm0, %v437_v6 }
 0x232   :  { %9940 = vmatmul.mubr.msk.bf16.vlgmr.msra.gmra.mrb[128].mxu1 %vm473_vm0, %v10681_v28  ;;  %4307 = vrot.lane.b32.xlu0 %v10804_v3, %s10385_s2 }
 0x233   :  { %9948 = vmatpush3.bf16.msra.mxu1 %v1983_v12  ;;  %4309 = vrot.lane.b32.xlu1 %v10812_v11, %s10385_s2  ;;  %v9561_v19 = vpop.f32.mrb[140].mxu0 }
 0x234   :  { %v1452_v20 = vpop.f32.mrb[141].mxu0  ;;  %v10822_v22 = vpop.f32.mrb[24].mxu1  ;;  %9949 = vmatprep.subr.bf16.mxu1 %v1984_v7  ;;  %9943 = vmatprep.mubr.msk.bf16.mxu1 %vm473_vm0, %v10685_v31 }
 0x235   :  { %v9562_v25 = vpop.f32.mrb[142].mxu0  ;;  %v10826_v26 = vpop.f32.mrb[25].mxu1 }
 0x236   :  { %v1986_v32 = vpack.c.bf16 %v9562_v25, %v9561_v19  ;;  %4959 = vrot.lane.b32.xlu0 %v10822_v22, %s10385_s2  ;;  %v1455_v35 = vpop.f32.mrb[143].mxu0  ;;  %v10830_v36 = vpop.f32.mrb[26].mxu1 }
 0x237   :  { %v1985_v38 = vpack.c.bf16 %v1455_v35, %v1452_v20  ;;  %9950 = vmatpush3.bf16.msra.mxu1 %v1984_v7  ;;  %4961 = vrot.lane.b32.xlu1 %v10830_v36, %s10385_s2  ;;  %v10834_v39 = vpop.f32.mrb[27].mxu1 }
 0x238   :  { %9668 = vmatmul.mubr.msk.bf16.gmra.mrb[248].mxu0 %vm473_vm0, %v438_v23 }
 0x239   :  { %9951 = vmatprep.subr.bf16.mxu1 %v1985_v38  ;;  %9671 = vmatprep.mubr.msk.bf16.mxu0 %vm473_vm0, %v439_v29 }
 0x23a   :  { %9944 = vmatmul.mubr.msk.bf16.gmra.mrb[132].mxu1 %vm473_vm0, %v10705_v46  ;;  %4955 = vrot.lane.b32.xlu0 %v10826_v26, %s10385_s2 }
 0x23b   :  { %9952 = vmatpush3.bf16.msra.mxu1 %v1985_v38  ;;  %4957 = vrot.lane.b32.xlu1 %v10834_v39, %s10385_s2  ;;  %v9565_v45 = vpop.f32.mrb[144].mxu0 }
 0x23c   :  { %v1468_v47 = vpop.f32.mrb[145].mxu0  ;;  %v10844_v49 = vpop.f32.mrb[28].mxu1  ;;  %9953 = vmatprep.subr.bf16.mxu1 %v1986_v32  ;;  %9955 = vmatprep.mubr.msk.bf16.mxu1 %vm473_vm0, %v10639_v4 }
 0x23d   :  { %v9566_v51 = vpop.f32.mrb[146].mxu0  ;;  %v10848_v54 = vpop.f32.mrb[29].mxu1 }
 0x23e   :  { %v1988_v27 = vpack.c.bf16 %v9566_v51, %v9565_v45  ;;  %4319 = vrot.lane.b32.xlu0 %v10844_v49, %s10385_s2  ;;  %v1471_v57 = vpop.f32.mrb[147].mxu0  ;;  %v10852_v58 = vpop.f32.mrb[30].mxu1 }
 0x23f   :  { %v1987_v60 = vpack.c.bf16 %v1471_v57, %v1468_v47  ;;  %9954 = vmatpush3.bf16.msra.mxu1 %v1986_v32  ;;  %4321 = vrot.lane.b32.xlu1 %v10852_v58, %s10385_s2  ;;  %v10856_v62 = vpop.f32.mrb[31].mxu1 }
 0x240   :  { %9672 = vmatmul.mubr.msk.bf16.gmra.mrb[252].mxu0 %vm473_vm0, %v440_v50 }
 0x241   :  { %9963 = vmatprep.subr.bf16.mxu1 %v1987_v60 }
 0x242   :  { %9956 = vmatmul.mubr.msk.bf16.vlgmr.msra.gmra.mrb[136].mxu1 %vm473_vm0, %v10681_v28  ;;  %4315 = vrot.lane.b32.xlu0 %v10848_v54, %s10385_s2 }
 0x243   :  { %9964 = vmatpush3.bf16.msra.mxu1 %v1987_v60  ;;  %4317 = vrot.lane.b32.xlu1 %v10856_v62, %s10385_s2  ;;  %v9569_v63 = vpop.f32.mrb[148].mxu0 }
 0x244   :  { %v1484_v1 = vpop.f32.mrb[149].mxu0  ;;  %v10865_v2 = vpop.f32.mrb[32].mxu1  ;;  %9965 = vmatprep.subr.bf16.mxu1 %v1988_v27  ;;  %9959 = vmatprep.mubr.msk.bf16.mxu1 %vm473_vm0, %v10685_v31 }
 0x245   :  { %v9570_v6 = vpop.f32.mrb[150].mxu0  ;;  %v10869_v7 = vpop.f32.mrb[33].mxu1 }
 0x246   :  { %v1990_v9 = vpack.c.bf16 %v9570_v6, %v9569_v63  ;;  %4967 = vrot.lane.b32.xlu0 %v10865_v2, %s10385_s2  ;;  %v1487_v12 = vpop.f32.mrb[151].mxu0  ;;  %v10873_v16 = vpop.f32.mrb[34].mxu1 }
 0x247   :  { %v1989_v15 = vpack.c.bf16 %v1487_v12, %v1484_v1  ;;  %9966 = vmatpush3.bf16.msra.mxu1 %v1988_v27  ;;  %4969 = vrot.lane.b32.xlu1 %v10873_v16, %s10385_s2  ;;  %v10877_v17 = vpop.f32.mrb[35].mxu1 }
 0x249   :  { %9967 = vmatprep.subr.bf16.mxu1 %v1989_v15 }
 0x24a   :  { %9960 = vmatmul.mubr.msk.bf16.gmra.mrb[140].mxu1 %vm473_vm0, %v10705_v46  ;;  %4963 = vrot.lane.b32.xlu0 %v10869_v7, %s10385_s2 }
 0x24b   :  { %9968 = vmatpush3.bf16.msra.mxu1 %v1989_v15  ;;  %4965 = vrot.lane.b32.xlu1 %v10877_v17, %s10385_s2  ;;  %v9573_v18 = vpop.f32.mrb[152].mxu0 }
 0x24c   :  { %v1500_v19 = vpop.f32.mrb[153].mxu0  ;;  %v10885_v20 = vpop.f32.mrb[36].mxu1  ;;  %9969 = vmatprep.subr.bf16.mxu1 %v1990_v9  ;;  %9971 = vmatprep.mubr.msk.bf16.mxu1 %vm473_vm0, %v10639_v4 }
 0x24d   :  { %v9574_v23 = vpop.f32.mrb[154].mxu0  ;;  %v10889_v25 = vpop.f32.mrb[37].mxu1 }
 0x24e   :  { %v1992_v29 = vpack.c.bf16 %v9574_v23, %v9573_v18  ;;  %4327 = vrot.lane.b32.xlu0 %v10885_v20, %s10385_s2  ;;  %v1503_v32 = vpop.f32.mrb[155].mxu0  ;;  %v10893_v35 = vpop.f32.mrb[38].mxu1 }
 0x24f   :  { %v1991_v38 = vpack.c.bf16 %v1503_v32, %v1500_v19  ;;  %9970 = vmatpush3.bf16.msra.mxu1 %v1990_v9  ;;  %4329 = vrot.lane.b32.xlu1 %v10893_v35, %s10385_s2  ;;  %v10897_v40 = vpop.f32.mrb[39].mxu1 }
 0x251   :  { %9979 = vmatprep.subr.bf16.mxu1 %v1991_v38 }
 0x252   :  { %9972 = vmatmul.mubr.msk.bf16.vlgmr.msra.gmra.mrb[144].mxu1 %vm473_vm0, %v10681_v28  ;;  %4323 = vrot.lane.b32.xlu0 %v10889_v25, %s10385_s2 }
 0x253   :  { %9980 = vmatpush3.bf16.msra.mxu1 %v1991_v38  ;;  %4325 = vrot.lane.b32.xlu1 %v10897_v40, %s10385_s2  ;;  %v9577_v41 = vpop.f32.mrb[156].mxu0 }
 0x254   :  { %v1516_v45 = vpop.f32.mrb[157].mxu0  ;;  %v10905_v47 = vpop.f32.mrb[40].mxu1  ;;  %9981 = vmatprep.subr.bf16.mxu1 %v1992_v29  ;;  %9975 = vmatprep.mubr.msk.bf16.mxu1 %vm473_vm0, %v10685_v31 }
 0x255   :  { %v9578_v50 = vpop.f32.mrb[158].mxu0  ;;  %v10909_v51 = vpop.f32.mrb[41].mxu1 }
 0x256   :  { %14891 = vst [vmem:[#allocation12_spill] sm:$0xff] %v10909_v51  ;;  %v1994_v27 = vpack.c.bf16 %v9578_v50, %v9577_v41  ;;  %4975 = vrot.lane.b32.xlu0 %v10905_v47, %s10385_s2  ;;  %v1519_v57 = vpop.f32.mrb[159].mxu0  ;;  %v10913_v60 = vpop.f32.mrb[42].mxu1 }
 0x257   :  { %14892 = vst [vmem:[#allocation13_spill] sm:$0xff] %v10913_v60  ;;  %v1993_v63 = vpack.c.bf16 %v1519_v57, %v1516_v45  ;;  %9982 = vmatpush3.bf16.msra.mxu1 %v1992_v29  ;;  %4977 = vrot.lane.b32.xlu1 %v10913_v60, %s10385_s2  ;;  %v10917_v1 = vpop.f32.mrb[43].mxu1 }
 0x258   :  { %14893 = vst [vmem:[#allocation14_spill] sm:$0xff] %v10917_v1 }
 0x259   :  { %9983 = vmatprep.subr.bf16.mxu1 %v1993_v63 }
 0x25a   :  { %9976 = vmatmul.mubr.msk.bf16.gmra.mrb[148].mxu1 %vm473_vm0, %v10705_v46  ;;  %4971 = vrot.lane.b32.xlu0 %v10909_v51, %s10385_s2 }
 0x25b   :  { %9984 = vmatpush3.bf16.msra.mxu1 %v1993_v63  ;;  %4973 = vrot.lane.b32.xlu1 %v10917_v1, %s10385_s2  ;;  %v9581_v6 = vpop.f32.mrb[160].mxu0 }
 0x25c   :  { %v1532_v9 = vpop.f32.mrb[161].mxu0  ;;  %v10925_v12 = vpop.f32.mrb[44].mxu1  ;;  %9985 = vmatprep.subr.bf16.mxu1 %v1994_v27  ;;  %9987 = vmatprep.mubr.msk.bf16.mxu1 %vm473_vm0, %v10639_v4 }
 0x25d   :  { %v9582_v15 = vpop.f32.mrb[162].mxu0  ;;  %v10929_v18 = vpop.f32.mrb[45].mxu1 }
 0x25e   :  { %14894 = vst [vmem:[#allocation15_spill] sm:$0xff] %v10929_v18  ;;  %v1996_v19 = vpack.c.bf16 %v9582_v15, %v9581_v6  ;;  %4335 = vrot.lane.b32.xlu0 %v10925_v12, %s10385_s2  ;;  %v1535_v23 = vpop.f32.mrb[163].mxu0  ;;  %v10933_v29 = vpop.f32.mrb[46].mxu1 }
 0x25f   :  { %v1995_v32 = vpack.c.bf16 %v1535_v23, %v1532_v9  ;;  %9986 = vmatpush3.bf16.msra.mxu1 %v1994_v27  ;;  %4337 = vrot.lane.b32.xlu1 %v10933_v29, %s10385_s2  ;;  %v10937_v38 = vpop.f32.mrb[47].mxu1 }
 0x260   :  { %14895 = vst [vmem:[#allocation16_spill] sm:$0xff] %v10937_v38 }
 0x261   :  { %9995 = vmatprep.subr.bf16.mxu1 %v1995_v32 }
 0x262   :  { %9988 = vmatmul.mubr.msk.bf16.vlgmr.msra.gmra.mrb[152].mxu1 %vm473_vm0, %v10681_v28  ;;  %4331 = vrot.lane.b32.xlu0 %v10929_v18, %s10385_s2 }
 0x263   :  { %9996 = vmatpush3.bf16.msra.mxu1 %v1995_v32  ;;  %4333 = vrot.lane.b32.xlu1 %v10937_v38, %s10385_s2  ;;  %v9585_v41 = vpop.f32.mrb[164].mxu0 }
 0x264   :  { %v1548_v45 = vpop.f32.mrb[165].mxu0  ;;  %v10945_v50 = vpop.f32.mrb[48].mxu1  ;;  %9997 = vmatprep.subr.bf16.mxu1 %v1996_v19  ;;  %9991 = vmatprep.mubr.msk.bf16.mxu1 %vm473_vm0, %v10685_v31 }
 0x265   :  { %14896 = vst [vmem:[#allocation17_spill] sm:$0xff] %v10945_v50  ;;  %v9586_v27 = vpop.f32.mrb[166].mxu0  ;;  %v10949_v57 = vpop.f32.mrb[49].mxu1 }
 0x266   :  { %14897 = vst [vmem:[#allocation18_spill] sm:$0xff] %v10949_v57  ;;  %v1998_v63 = vpack.c.bf16 %v9586_v27, %v9585_v41  ;;  %4983 = vrot.lane.b32.xlu0 %v10945_v50, %s10385_s2  ;;  %v1551_v6 = vpop.f32.mrb[167].mxu0  ;;  %v10953_v9 = vpop.f32.mrb[50].mxu1 }
 0x267   :  { %14898 = vst [vmem:[#allocation19_spill] sm:$0xff] %v10953_v9  ;;  %v1997_v15 = vpack.c.bf16 %v1551_v6, %v1548_v45  ;;  %9998 = vmatpush3.bf16.msra.mxu1 %v1996_v19  ;;  %4985 = vrot.lane.b32.xlu1 %v10953_v9, %s10385_s2  ;;  %v10957_v23 = vpop.f32.mrb[51].mxu1 }
 0x268   :  { %14899 = vst [vmem:[#allocation20_spill] sm:$0xff] %v10957_v23 }
 0x269   :  { %9999 = vmatprep.subr.bf16.mxu1 %v1997_v15 }
 0x26a   :  { %9992 = vmatmul.mubr.msk.bf16.gmra.mrb[156].mxu1 %vm473_vm0, %v10705_v46  ;;  %4979 = vrot.lane.b32.xlu0 %v10949_v57, %s10385_s2 }
 0x26b   :  { %10000 = vmatpush3.bf16.msra.mxu1 %v1997_v15  ;;  %4981 = vrot.lane.b32.xlu1 %v10957_v23, %s10385_s2  ;;  %v9589_v32 = vpop.f32.mrb[168].mxu0 }
 0x26c   :  { %v1564_v41 = vpop.f32.mrb[169].mxu0  ;;  %v10965_v45 = vpop.f32.mrb[52].mxu1  ;;  %10001 = vmatprep.subr.bf16.mxu1 %v1998_v63  ;;  %10003 = vmatprep.mubr.msk.bf16.mxu1 %vm473_vm0, %v10639_v4 }
 0x26d   :  { %14900 = vst [vmem:[#allocation21_spill] sm:$0xff] %v10965_v45  ;;  %v9590_v19 = vpop.f32.mrb[170].mxu0  ;;  %v10969_v27 = vpop.f32.mrb[53].mxu1 }
 0x26e   :  { %14901 = vst [vmem:[#allocation22_spill] sm:$0xff] %v10969_v27  ;;  %v2000_v6 = vpack.c.bf16 %v9590_v19, %v9589_v32  ;;  %4343 = vrot.lane.b32.xlu0 %v10965_v45, %s10385_s2  ;;  %v1567_v57 = vpop.f32.mrb[171].mxu0  ;;  %v10973_v15 = vpop.f32.mrb[54].mxu1 }
 0x26f   :  { %14902 = vst [vmem:[#allocation23_spill] sm:$0xff] %v10973_v15  ;;  %v1999_v9 = vpack.c.bf16 %v1567_v57, %v1564_v41  ;;  %10002 = vmatpush3.bf16.msra.mxu1 %v1998_v63  ;;  %4345 = vrot.lane.b32.xlu1 %v10973_v15, %s10385_s2  ;;  %v10977_v23 = vpop.f32.mrb[55].mxu1 }
 0x270   :  { %14903 = vst [vmem:[#allocation24_spill] sm:$0xff] %v10977_v23 }
 0x271   :  { %10011 = vmatprep.subr.bf16.mxu1 %v1999_v9 }
 0x272   :  { %10004 = vmatmul.mubr.msk.bf16.vlgmr.msra.gmra.mrb[160].mxu1 %vm473_vm0, %v10681_v28  ;;  %4339 = vrot.lane.b32.xlu0 %v10969_v27, %s10385_s2 }
 0x273   :  { %10012 = vmatpush3.bf16.msra.mxu1 %v1999_v9  ;;  %4341 = vrot.lane.b32.xlu1 %v10977_v23, %s10385_s2  ;;  %v9593_v32 = vpop.f32.mrb[172].mxu0 }
 0x274   :  { %v1580_v19 = vpop.f32.mrb[173].mxu0  ;;  %v10985_v57 = vpop.f32.mrb[56].mxu1  ;;  %10013 = vmatprep.subr.bf16.mxu1 %v2000_v6  ;;  %10007 = vmatprep.mubr.msk.bf16.mxu1 %vm473_vm0, %v10685_v31 }
 0x275   :  { %14904 = vst [vmem:[#allocation25_spill] sm:$0xff] %v10985_v57  ;;  %v9594_v63 = vpop.f32.mrb[174].mxu0  ;;  %v10989_v41 = vpop.f32.mrb[57].mxu1 }
 0x276   :  { %14905 = vst [vmem:[#allocation26_spill] sm:$0xff] %v10989_v41  ;;  %v2002_v50 = vpack.c.bf16 %v9594_v63, %v9593_v32  ;;  %4991 = vrot.lane.b32.xlu0 %v10985_v57, %s10385_s2  ;;  %v1583_v27 = vpop.f32.mrb[175].mxu0  ;;  %v10993_v9 = vpop.f32.mrb[58].mxu1 }
 0x277   :  { %14906 = vst [vmem:[#allocation27_spill] sm:$0xff] %v10993_v9  ;;  %v2001_v15 = vpack.c.bf16 %v1583_v27, %v1580_v19  ;;  %10014 = vmatpush3.bf16.msra.mxu1 %v2000_v6  ;;  %v4936_v23 = vpop.permute.xlu0 %4935  ;;  %4993 = vrot.lane.b32.xlu1 %v10993_v9, %s10385_s2  ;;  %v10997_v45 = vpop.f32.mrb[59].mxu1 }
 0x278   :  { %14907 = vst [vmem:[#allocation28_spill] sm:$0xff] %v10997_v45  ;;  %v5317_v18 = vadd.f32 %v10713_v53, %v4936_v23 }
 0x279   :  { %v4938_v1 = vpop.permute.xlu1 %4937  ;;  %10015 = vmatprep.subr.bf16.mxu1 %v2001_v15 }
 0x27a   :  { %10008 = vmatmul.mubr.msk.bf16.gmra.mrb[164].mxu1 %vm473_vm0, %v10705_v46  ;;  %4987 = vrot.lane.b32.xlu0 %v10989_v41, %s10385_s2 }
 0x27b   :  { %10016 = vmatpush3.bf16.msra.mxu1 %v2001_v15  ;;  %v4932_v32 = vpop.permute.xlu0 %4931  ;;  %4989 = vrot.lane.b32.xlu1 %v10997_v45, %s10385_s2  ;;  %v9597_v27 = vpop.f32.mrb[176].mxu0 }
 0x27c   :  { %v1596_v6 = vpop.f32.mrb[177].mxu0  ;;  %v11005_v19 = vpop.f32.mrb[60].mxu1  ;;  %10017 = vmatprep.subr.bf16.mxu1 %v2002_v50  ;;  %10019 = vmatprep.mubr.msk.bf16.mxu1 %vm473_vm0, %v10639_v4  ;;  %v5315_v41 = vadd.f32 %v4932_v32, %v10716_v56  ;;  %v5318_v32 = vadd.f32 %v10720_v59, %v4938_v1 }
 0x27d   :  { %14908 = vst [vmem:[#allocation29_spill] sm:$0xff] %v11005_v19  ;;  %v4934_v63 = vpop.permute.xlu1 %4933  ;;  %v9598_v9 = vpop.f32.mrb[178].mxu0 }
 0x27e   :  { %v2004_v57 = vpack.c.bf16 %v9598_v9, %v9597_v27  ;;  %v11009_v51 = vpop.f32.mrb[61].mxu1  ;;  %4351 = vrot.lane.b32.xlu0 %v11005_v19, %s10385_s2  ;;  %v1599_v15 = vpop.f32.mrb[179].mxu0  ;;  %v5571_v56 = vmul.f32 %v5315_v41, %v5315_v41  ;;  %v5316_v53 = vadd.f32 %v4934_v63, %v10724_v61 }
 0x27f   :  { %v2003_v45 = vpack.c.bf16 %v1599_v15, %v1596_v6  ;;  %v11014_v38 = vpop.f32.mrb[62].mxu1  ;;  %10018 = vmatpush3.bf16.msra.mxu1 %v2002_v50 }
 0x280   :  { %4353 = vrot.lane.b32.xlu1 %v11014_v38, %s10385_s2  ;;  %v11019_v4 = vpop.f32.mrb[63].mxu1  ;;  %v4292_v9 = vpop.permute.xlu0 %4291  ;;  %v5572_v1 = vmul.f32 %v5316_v53, %v5316_v53 }
 0x281   :  { %14909 = vst [vmem:[#allocation30_spill] sm:$0xff] %v11019_v4  ;;  %v4675_v27 = vsub.f32 %v10694_v37, %v4292_v9  ;;  %v4296_v60 = vpop.permute.xlu1 %4295  ;;  %10027 = vmatprep.subr.bf16.mxu1 %v2003_v45  ;;  %v5573_v37 = vmul.f32 %v5317_v18, %v5317_v18 }
 0x282   :  { %v4677_v19 = vsub.f32 %v10690_v34, %v4296_v60  ;;  %10020 = vmatmul.mubr.msk.bf16.vlgmr.msra.gmra.mrb[168].mxu1 %vm473_vm0, %v10681_v28  ;;  %4347 = vrot.lane.b32.xlu0 %v11009_v51, %s10385_s2 }
 0x283   :  { %v5443_v50 = vmul.f32 %v4675_v27, %v4675_v27  ;;  %10028 = vmatpush3.bf16.msra.mxu1 %v2003_v45  ;;  %v9601_v23 = vpop.f32.mrb[180].mxu0  ;;  %10023 = vmatprep.mubr.msk.bf16.mxu1 %vm473_vm0, %v10685_v31 }
 0x284   :  { %v5445_v6 = vmul.f32 %v4677_v19, %v4677_v19  ;;  %4349 = vrot.lane.b32.xlu1 %v11019_v4, %s10385_s2  ;;  %v4294_v34 = vpop.permute.xlu0 %4293  ;;  %v1612_v60 = vpop.f32.mrb[181].mxu0  ;;  %10029 = vmatprep.subr.bf16.mxu1 %v2004_v57 }
 0x285   :  { %v11033_v15 = vadd.f32 %v5571_v56, %v5443_v50  ;;  %v4676_v61 = vsub.f32 %v10700_v44, %v4294_v34  ;;  %v11036_v41 = vpop.f32.mrb[64].mxu1  ;;  %v4298_v45 = vpop.permute.xlu1 %4297  ;;  %v5574_v44 = vmul.f32 %v5318_v32, %v5318_v32 }
 0x286   :  { %14910 = vst [vmem:[#allocation31_spill] sm:$0xff] %v11036_v41  ;;  %v11038_v63 = vadd.f32 %v5573_v37, %v5445_v6  ;;  %v4678_v18 = vsub.f32 %v10696_v42, %v4298_v45  ;;  %v9602_v9 = vpop.f32.mrb[182].mxu0  ;;  %v11041_v59 = vpop.f32.mrb[65].mxu1  ;;  %4999 = vrot.lane.b32.xlu0 %v11036_v41, %s10385_s2 }
 0x287   :  { %14911 = vst [vmem:[#allocation32_spill] sm:$0xff] %v11041_v59  ;;  %v5444_v19 = vmul.f32 %v4676_v61, %v4676_v61  ;;  %v2006_v27 = vpack.c.bf16 %v9602_v9, %v9601_v23  ;;  %v1615_v56 = vpop.f32.mrb[183].mxu0  ;;  %v11045_v50 = vpop.f32.mrb[66].mxu1  ;;  %10030 = vmatpush3.bf16.msra.mxu1 %v2004_v57  ;;  %v11063_v61 = vld [vmem:[#allocation7] sm:$0xff]  }
 0x288   :  { %14912 = vst [vmem:[#allocation33_spill] sm:$0xff] %v11045_v50  ;;  %v5446_v34 = vmul.f32 %v4678_v18, %v4678_v18  ;;  %v2005_v4 = vpack.c.bf16 %v1615_v56, %v1612_v60  ;;  %5001 = vrot.lane.b32.xlu1 %v11045_v50, %s10385_s2  ;;  %v11049_v42 = vpop.f32.mrb[67].mxu1  ;;  %v4944_v37 = vpop.permute.xlu0 %4943 }
 0x289   :  { %14913 = vst [vmem:[#allocation34_spill] sm:$0xff] %v11049_v42  ;;  %v11051_v6 = vadd.f32 %v5572_v1, %v5444_v19  ;;  %v4946_v45 = vpop.permute.xlu1 %4945 }
 0x28a   :  { %v11053_v41 = vadd.f32 %v5574_v44, %v5446_v34  ;;  %10024 = vmatmul.mubr.msk.bf16.gmra.mrb[172].mxu1 %vm473_vm0, %v10705_v46  ;;  %10031 = vmatprep.subr.bf16.mxu1 %v2005_v4  ;;  %v5322_v44 = vadd.f32 %v10764_v30, %v4946_v45 }
 0x28b   :  { %4995 = vrot.lane.b32.xlu0 %v11041_v59, %s10385_s2  ;;  %10032 = vmatpush3.bf16.msra.mxu1 %v2005_v4  ;;  %v9605_v57 = vpop.f32.mrb[184].mxu0  ;;  %v5321_v4 = vadd.f32 %v10756_v21, %v4944_v37 }
 0x28c   :  { %4997 = vrot.lane.b32.xlu1 %v11049_v42, %s10385_s2  ;;  %v4940_v53 = vpop.permute.xlu0 %4939  ;;  %v1628_v23 = vpop.f32.mrb[185].mxu0  ;;  %10033 = vmatprep.subr.bf16.mxu1 %v2006_v27 }
 0x28d   :  { %v11061_v32 = vpop.f32.mrb[68].mxu1  ;;  %v4942_v60 = vpop.permute.xlu1 %4941  ;;  %10035 = vmatprep.mubr.msk.bf16.mxu1 %vm473_vm0, %v11063_v61 }
 0x28e   :  { %v9606_v18 = vpop.f32.mrb[186].mxu0  ;;  %v11067_v9 = vpop.f32.mrb[69].mxu1 }
 0x28f   :  { %14914 = vst [vmem:[#allocation35_spill] sm:$0xff] %v11067_v9  ;;  %v2008_v1 = vpack.c.bf16 %v9606_v18, %v9605_v57  ;;  %4359 = vrot.lane.b32.xlu0 %v11061_v32, %s10385_s2  ;;  %v1631_v19 = vpop.f32.mrb[187].mxu0  ;;  %v11072_v56 = vpop.f32.mrb[70].mxu1  ;;  %10034 = vmatpush3.bf16.msra.mxu1 %v2006_v27  ;;  %v5577_v57 = vmul.f32 %v5321_v4, %v5321_v4 }
 0x290   :  { %v2007_v34 = vpack.c.bf16 %v1631_v19, %v1628_v23  ;;  %4361 = vrot.lane.b32.xlu1 %v11072_v56, %s10385_s2  ;;  %v11077_v42 = vpop.f32.mrb[71].mxu1  ;;  %v4304_v59 = vpop.permute.xlu0 %4303  ;;  %v5319_v27 = vadd.f32 %v4940_v53, %v10760_v24  ;;  %v5578_v23 = vmul.f32 %v5322_v44, %v5322_v44  ;;  %v5320_v18 = vadd.f32 %v4942_v60, %v10768_v33 }
 0x291   :  { %14915 = vst [vmem:[#allocation36_spill] sm:$0xff] %v11077_v42  ;;  %v4681_v50 = vsub.f32 %v10734_v5, %v4304_v59  ;;  %v4306_v21 = vpop.permute.xlu1 %4305 }
 0x292   :  { %v4682_v37 = vsub.f32 %v10742_v13, %v4306_v21  ;;  %10036 = vmatmul.mubr.msk.bf16.vlgmr.msra.gmra.mrb[176].mxu1 %vm473_vm0, %v10681_v28  ;;  %10043 = vmatprep.subr.bf16.mxu1 %v2007_v34  ;;  %v5575_v44 = vmul.f32 %v5319_v27, %v5319_v27 }
 0x293   :  { %v5449_v30 = vmul.f32 %v4681_v50, %v4681_v50  ;;  %4355 = vrot.lane.b32.xlu0 %v11067_v9, %s10385_s2  ;;  %10044 = vmatpush3.bf16.msra.mxu1 %v2007_v34  ;;  %v9609_v45 = vpop.f32.mrb[188].mxu0 }
 0x294   :  { %v5450_v5 = vmul.f32 %v4682_v37, %v4682_v37  ;;  %4357 = vrot.lane.b32.xlu1 %v11077_v42, %s10385_s2  ;;  %v4300_v13 = vpop.permute.xlu0 %4299  ;;  %v1644_v59 = vpop.f32.mrb[189].mxu0  ;;  %10045 = vmatprep.subr.bf16.mxu1 %v2008_v1 }
 0x295   :  { %v11089_v28 = vadd.f32 %v5577_v57, %v5449_v30  ;;  %v4679_v24 = vsub.f32 %v10738_v8, %v4300_v13  ;;  %v11092_v50 = vpop.f32.mrb[72].mxu1  ;;  %v4302_v53 = vpop.permute.xlu1 %4301  ;;  %10039 = vmatprep.mubr.msk.bf16.mxu1 %vm473_vm0, %v10685_v31  ;;  %v5576_v57 = vmul.f32 %v5320_v18, %v5320_v18 }
 0x296   :  { %14916 = vst [vmem:[#allocation37_spill] sm:$0xff] %v11092_v50  ;;  %v11096_v4 = vadd.f32 %v5578_v23, %v5450_v5  ;;  %v4680_v33 = vsub.f32 %v10746_v14, %v4302_v53  ;;  %v9610_v60 = vpop.f32.mrb[190].mxu0  ;;  %v11099_v19 = vpop.f32.mrb[73].mxu1 }
 0x297   :  { %14917 = vst [vmem:[#allocation38_spill] sm:$0xff] %v11099_v19  ;;  %v5447_v34 = vmul.f32 %v4679_v24, %v4679_v24  ;;  %v2010_v21 = vpack.c.bf16 %v9610_v60, %v9609_v45  ;;  %5007 = vrot.lane.b32.xlu0 %v11092_v50, %s10385_s2  ;;  %v1647_v8 = vpop.f32.mrb[191].mxu0  ;;  %v11103_v37 = vpop.f32.mrb[74].mxu1  ;;  %10046 = vmatpush3.bf16.msra.mxu1 %v2008_v1 }
 0x298   :  { %14918 = vst [vmem:[#allocation39_spill] sm:$0xff] %v11103_v37  ;;  %v5448_v30 = vmul.f32 %v4680_v33, %v4680_v33  ;;  %v2009_v31 = vpack.c.bf16 %v1647_v8, %v1644_v59  ;;  %5009 = vrot.lane.b32.xlu1 %v11103_v37, %s10385_s2  ;;  %v11107_v14 = vpop.f32.mrb[75].mxu1  ;;  %v4952_v23 = vpop.permute.xlu0 %4951 }
 0x299   :  { %14919 = vst [vmem:[#allocation40_spill] sm:$0xff] %v11107_v14  ;;  %v11109_v5 = vadd.f32 %v5575_v44, %v5447_v34  ;;  %v4954_v27 = vpop.permute.xlu1 %4953  ;;  %v5325_v33 = vadd.f32 %v10800_v0, %v4952_v23 }
 0x29a   :  { %v11111_v45 = vadd.f32 %v5576_v57, %v5448_v30  ;;  %10040 = vmatmul.mubr.msk.bf16.gmra.mrb[180].mxu1 %vm473_vm0, %v10705_v46  ;;  %10047 = vmatprep.subr.bf16.mxu1 %v2009_v31  ;;  %v5326_v34 = vadd.f32 %v10808_v10, %v4954_v27 }
 0x29b   :  { %5003 = vrot.lane.b32.xlu0 %v11099_v19, %s10385_s2  ;;  %10048 = vmatpush3.bf16.msra.mxu1 %v2009_v31  ;;  %v9613_v1 = vpop.f32.mrb[192].mxu0  ;;  %v5581_v10 = vmul.f32 %v5325_v33, %v5325_v33 }
 0x29c   :  { %5005 = vrot.lane.b32.xlu1 %v11107_v14, %s10385_s2  ;;  %v4948_v18 = vpop.permute.xlu0 %4947  ;;  %v11119_v13 = vpop.f32.mrb[76].mxu1  ;;  %10049 = vmatprep.subr.bf16.mxu1 %v2010_v21 }
 0x29d   :  { %14920 = vst [vmem:[#allocation41_spill] sm:$0xff] %v11119_v13  ;;  %v4950_v59 = vpop.permute.xlu1 %4949  ;;  %v11121_v24 = vpop.f32.mrb[77].mxu1  ;;  %10051 = vmatprep.mubr.msk.bf16.mxu1 %vm473_vm0, %v11063_v61  ;;  %v5323_v0 = vadd.f32 %v4948_v18, %v10804_v3  ;;  %v5582_v3 = vmul.f32 %v5326_v34, %v5326_v34 }
 0x29e   :  { %14921 = vst [vmem:[#allocation42_spill] sm:$0xff] %v11121_v24  ;;  %v11125_v46 = vpop.f32.mrb[78].mxu1  ;;  %v1660_v53 = vpop.f32.mrb[193].mxu0  ;;  %v5324_v27 = vadd.f32 %v4950_v59, %v10812_v11  ;;  %v5832_v11 = vlaneseq }
 0x29f   :  { %14922 = vst [vmem:[#allocation43_spill] sm:$0xff] %v11125_v46  ;;  %4367 = vrot.lane.b32.xlu0 %v11119_v13, %s10385_s2  ;;  %10050 = vmatpush3.bf16.msra.mxu1 %v2010_v21  ;;  %v11130_v60 = vpop.f32.mrb[79].mxu1  ;;  %v9614_v44 = vpop.f32.mrb[194].mxu0  ;;  %v11138_v21 = vld [vmem:[#allocation7 + $0x8] sm:$0xff]  }
 0x2a0   :  { %14923 = vst [vmem:[#allocation44_spill] sm:$0xff] %v11130_v60  ;;  %4369 = vrot.lane.b32.xlu1 %v11125_v46, %s10385_s2  ;;  %v4312_v8 = vpop.permute.xlu0 %4311  ;;  %v2012_v57 = vpack.c.bf16 %v9614_v44, %v9613_v1  ;;  %v1663_v30 = vpop.f32.mrb[195].mxu0  ;;  %v11145_v1 = vld [vmem:[#allocation7 + $0x10] sm:$0xff]  }
 0x2a1   :  { %v4685_v31 = vsub.f32 %v10778_v43, %v4312_v8  ;;  %v4314_v14 = vpop.permute.xlu1 %4313  ;;  %v2011_v19 = vpack.c.bf16 %v1663_v30, %v1660_v53  ;;  %v5579_v8 = vmul.f32 %v5323_v0, %v5323_v0  ;;  %v10386_v30 = vmov 1983009808  }
 0x2a2   :  { %v4686_v23 = vsub.f32 %v10786_v52, %v4314_v14  ;;  %10052 = vmatmul.mubr.msk.bf16.vlgmr.msra.gmra.mrb[184].mxu1 %vm473_vm0, %v11138_v21  ;;  %v5830_v34 = vunpack.c.l.s4 %v10386_v30  ;;  %v11181_v30 = vld [vmem:[#allocation7 + $0x18] sm:$0xff]  }
 0x2a3   :  { %v5453_v37 = vmul.f32 %v4685_v31, %v4685_v31  ;;  %4363 = vrot.lane.b32.xlu0 %v11121_v24, %s10385_s2  ;;  %10055 = vmatprep.mubr.msk.bf16.mxu1 %vm473_vm0, %v11145_v1  ;;  %v9617_v43 = vpop.f32.mrb[196].mxu0  ;;  %v5580_v24 = vmul.f32 %v5324_v27, %v5324_v27 }
 0x2a4   :  { %v5454_v52 = vmul.f32 %v4686_v23, %v4686_v23  ;;  %4365 = vrot.lane.b32.xlu1 %v11130_v60, %s10385_s2  ;;  %v4308_v14 = vpop.permute.xlu0 %4307  ;;  %v11151_v18 = vpop.f32.mrb[80].mxu1  ;;  %10059 = vmatprep.subr.bf16.mxu1 %v2011_v19 }
 0x2a5   :  { %14924 = vst [vmem:[#allocation45_spill] sm:$0xff] %v11151_v18  ;;  %v11153_v59 = vadd.f32 %v5581_v10, %v5453_v37  ;;  %v4683_v53 = vsub.f32 %v10782_v48, %v4308_v14  ;;  %v4310_v33 = vpop.permute.xlu1 %4309  ;;  %v11156_v44 = vpop.f32.mrb[81].mxu1  ;;  %10060 = vmatpush3.bf16.msra.mxu1 %v2011_v19 }
 0x2a6   :  { %14925 = vst [vmem:[#allocation46_spill] sm:$0xff] %v11156_v44  ;;  %v11158_v31 = vadd.f32 %v5582_v3, %v5454_v52  ;;  %v4684_v23 = vsub.f32 %v10790_v55, %v4310_v33  ;;  %v11161_v50 = vpop.f32.mrb[82].mxu1  ;;  %v1676_v60 = vpop.f32.mrb[197].mxu0  ;;  %10061 = vmatprep.subr.bf16.mxu1 %v2012_v57 }
 0x2a7   :  { %14926 = vst [vmem:[#allocation47_spill] sm:$0xff] %v11161_v50  ;;  %v6915_v37 = vcombine.low %v11038_v63, %v11153_v59  ;;  %v6916_v48 = vcombine.high %v11038_v63, %v11153_v59  ;;  %v5451_v10 = vmul.f32 %v4683_v53, %v4683_v53  ;;  %5015 = vrot.lane.b32.xlu0 %v11151_v18, %s10385_s2  ;;  %v11169_v19 = vpop.f32.mrb[83].mxu1  ;;  %v9618_v0 = vpop.f32.mrb[198].mxu0 }
 0x2a8   :  { %14927 = vst [vmem:[#allocation48_spill] sm:$0xff] %v11169_v19  ;;  %v7459_v55 = vcombine.low %v11053_v41, %v11158_v31  ;;  %v5452_v27 = vmul.f32 %v4684_v23, %v4684_v23  ;;  %5017 = vrot.lane.b32.xlu1 %v11161_v50, %s10385_s2  ;;  %v4960_v52 = vpop.permute.xlu0 %4959  ;;  %v2014_v14 = vpack.c.bf16 %v9618_v0, %v9617_v43  ;;  %v1679_v63 = vpop.f32.mrb[199].mxu0 }
 0x2a9   :  { %v11177_v59 = vadd.f32 %v5579_v8, %v5451_v10  ;;  %v4962_v53 = vpop.permute.xlu1 %4961  ;;  %10062 = vmatpush3.bf16.msra.mxu1 %v2012_v57  ;;  %v2013_v43 = vpack.c.bf16 %v1679_v63, %v1676_v60  ;;  %v5831_v10 = vunpack.c.0.s8 %v5830_v34  ;;  %v11191_v57 = vshrl.u32 %v5832_v11, 7 }
 0x2aa   :  { %v11179_v33 = vadd.f32 %v5580_v24, %v5452_v27  ;;  %10056 = vmatmul.mubr.msk.bf16.gmra.mrb[188].mxu1 %vm473_vm0, %v11181_v30  ;;  %v5329_v24 = vadd.f32 %v10844_v49, %v4960_v52 }
 0x2ab   :  { %5011 = vrot.lane.b32.xlu0 %v11156_v44, %s10385_s2  ;;  %v9621_v8 = vpop.f32.mrb[200].mxu0  ;;  %10067 = vmatprep.mubr.msk.bf16.mxu1 %vm473_vm0, %v11063_v61  ;;  %v5330_v44 = vadd.f32 %v10852_v58, %v4962_v53 }
 0x2ac   :  { %5013 = vrot.lane.b32.xlu1 %v11169_v19, %s10385_s2  ;;  %v4956_v27 = vpop.permute.xlu0 %4955  ;;  %v11199_v23 = vpop.f32.mrb[84].mxu1  ;;  %10063 = vmatprep.subr.bf16.mxu1 %v2013_v43  ;;  %v11213_v19 = vsub.s32 %v5831_v10, %v11191_v57  ;;  %v5585_v10 = vmul.f32 %v5329_v24, %v5329_v24 }
 0x2ad   :  { %14928 = vst [vmem:[#allocation49_spill] sm:$0xff] %v11199_v23  ;;  %v4958_v60 = vpop.permute.xlu1 %4957  ;;  %v11203_v63 = vpop.f32.mrb[85].mxu1  ;;  %10064 = vmatpush3.bf16.msra.mxu1 %v2013_v43  ;;  %v5327_v49 = vadd.f32 %v4956_v27, %v10848_v54 }
 0x2ae   :  { %14929 = vst [vmem:[#allocation50_spill] sm:$0xff] %v11203_v63  ;;  %v11205_v11 = vpop.f32.mrb[86].mxu1  ;;  %v1692_v34 = vpop.f32.mrb[201].mxu0  ;;  %10065 = vmatprep.subr.bf16.mxu1 %v2014_v14  ;;  %14931 = vst [vmem:[#allocation52_spill] sm:$0xff] %v11213_v19  ;;  %v5328_v13 = vadd.f32 %v4958_v60, %v10856_v62  ;;  %v11228_v54 = vrot.slane %v6916_v48, %v11213_v19 }
 0x2af   :  { %4375 = vrot.lane.b32.xlu0 %v11199_v23, %s10385_s2  ;;  %v11210_v0 = vpop.f32.mrb[87].mxu1  ;;  %v9622_v3 = vpop.f32.mrb[202].mxu0 }
 0x2b0   :  { %14930 = vst [vmem:[#allocation51_spill] sm:$0xff] %v11210_v0  ;;  %4377 = vrot.lane.b32.xlu1 %v11205_v11, %s10385_s2  ;;  %v4320_v50 = vpop.permute.xlu0 %4319  ;;  %v2016_v43 = vpack.c.bf16 %v9622_v3, %v9621_v8  ;;  %v1695_v18 = vpop.f32.mrb[203].mxu0  ;;  %v11225_v3 = vrot.slane %v6915_v37, %v11213_v19 }
 0x2b1   :  { %v4689_v52 = vsub.f32 %v10822_v22, %v4320_v50  ;;  %v4322_v23 = vpop.permute.xlu1 %4321  ;;  %v2015_v46 = vpack.c.bf16 %v1695_v18, %v1692_v34  ;;  %10066 = vmatpush3.bf16.msra.mxu1 %v2014_v14  ;;  %v5586_v22 = vmul.f32 %v5330_v44, %v5330_v44  ;;  %v11235_v18 = vrot.slane %v7459_v55, %v11213_v19 }
 0x2b2   :  { %v4690_v42 = vsub.f32 %v10830_v36, %v4322_v23  ;;  %v5583_v14 = vmul.f32 %v5327_v49, %v5327_v49 }
 0x2b3   :  { %v5457_v9 = vmul.f32 %v4689_v52, %v4689_v52  ;;  %4371 = vrot.lane.b32.xlu0 %v11203_v63, %s10385_s2  ;;  %10075 = vmatprep.subr.bf16.mxu1 %v2015_v46  ;;  %v9625_v58 = vpop.f32.mrb[204].mxu0 }
 0x2b4   :  { %v5458_v50 = vmul.f32 %v4690_v42, %v4690_v42  ;;  %4373 = vrot.lane.b32.xlu1 %v11210_v0, %s10385_s2  ;;  %v4316_v36 = vpop.permute.xlu0 %4315  ;;  %v11232_v62 = vpop.f32.mrb[88].mxu1  ;;  %10068 = vmatmul.mubr.msk.bf16.vlgmr.msra.gmra.mrb[192].mxu1 %vm473_vm0, %v11138_v21  ;;  %v5584_v42 = vmul.f32 %v5328_v13, %v5328_v13 }
 0x2b5   :  { %14932 = vst [vmem:[#allocation53_spill] sm:$0xff] %v11232_v62  ;;  %v5713_v53 = vadd.f32 %v5585_v10, %v5457_v9  ;;  %v4687_v23 = vsub.f32 %v10826_v26, %v4316_v36  ;;  %v4318_v37 = vpop.permute.xlu1 %4317  ;;  %v11238_v8 = vpop.f32.mrb[89].mxu1  ;;  %10076 = vmatpush3.bf16.msra.mxu1 %v2015_v46  ;;  %10071 = vmatprep.mubr.msk.bf16.mxu1 %vm473_vm0, %v11145_v1 }
 0x2b6   :  { %14933 = vst [vmem:[#allocation54_spill] sm:$0xff] %v11238_v8  ;;  %v5714_v44 = vadd.f32 %v5586_v22, %v5458_v50  ;;  %v4688_v48 = vsub.f32 %v10834_v39, %v4318_v37  ;;  %v11243_v24 = vpop.f32.mrb[90].mxu1  ;;  %v11245_v27 = vpop.f32.mrb[205].mxu0  ;;  %10077 = vmatprep.subr.bf16.mxu1 %v2016_v43  ;;  %v14936_v10 = vcombine.high %v11053_v41, %v11158_v31 }
 0x2b7   :  { %14934 = vst [vmem:[#allocation55_spill] sm:$0xff] %v11243_v24  ;;  %v6931_v26 = vcombine.low %v11089_v28, %v5713_v53  ;;  %v6932_v9 = vcombine.high %v11089_v28, %v5713_v53  ;;  %v5455_v55 = vmul.f32 %v4687_v23, %v4687_v23  ;;  %5023 = vrot.lane.b32.xlu0 %v11232_v62, %s10385_s2  ;;  %v11253_v13 = vpop.f32.mrb[91].mxu1  ;;  %v9626_v60 = vpop.f32.mrb[206].mxu0 }
 0x2b8   :  { %14935 = vst [vmem:[#allocation56_spill] sm:$0xff] %v11253_v13  ;;  %v7475_v39 = vcombine.low %v11096_v4, %v5714_v44  ;;  %v7476_v46 = vcombine.high %v11096_v4, %v5714_v44  ;;  %v5456_v34 = vmul.f32 %v4688_v48, %v4688_v48  ;;  %5025 = vrot.lane.b32.xlu1 %v11243_v24, %s10385_s2  ;;  %v4968_v49 = vpop.permute.xlu0 %4967  ;;  %v1711_v28 = vpop.f32.mrb[207].mxu0 }
 0x2b9   :  { %v11259_v52 = vpack.c.bf16 %v9626_v60, %v9625_v58  ;;  %v11265_v22 = vrot.slane %v14936_v10, %v11213_v19  ;;  %v11268_v50 = vrot.slane %v6931_v26, %v11213_v19  ;;  %v11271_v36 = vrot.slane %v6932_v9, %v11213_v19  ;;  %v4970_v53 = vpop.permute.xlu1 %4969  ;;  %10078 = vmatpush3.bf16.msra.mxu1 %v2016_v43 }
 0x2ba   :  { %v5711_v4 = vadd.f32 %v5583_v14, %v5455_v55  ;;  %v14937_v58 = vcombine.low %v11033_v15, %v11177_v59  ;;  %v11280_v37 = vrot.slane %v7475_v39, %v11213_v19  ;;  %v11283_v41 = vrot.slane %v7476_v46, %v11213_v19 }
 0x2bb   :  { %v5712_v31 = vadd.f32 %v5584_v42, %v5456_v34  ;;  %5019 = vrot.lane.b32.xlu0 %v11238_v8, %s10385_s2  ;;  %v9629_v9 = vpop.f32.mrb[208].mxu0 }
 0x2bc   :  { %v11277_v23 = vrot.slane %v14937_v58, %v11213_v19  ;;  %v5843_v48 = vcombine.low %v11109_v5, %v5711_v4  ;;  %v5844_v26 = vcombine.high %v11109_v5, %v5711_v4  ;;  %5021 = vrot.lane.b32.xlu1 %v11253_v13, %s10385_s2  ;;  %v4964_v39 = vpop.permute.xlu0 %4963  ;;  %v11301_v46 = vpop.f32.mrb[92].mxu1  ;;  %v14939_v5 = vcombine.high %v11033_v15, %v11177_v59 }
 0x2bd   :  { %v6387_v42 = vcombine.low %v11111_v45, %v5712_v31  ;;  %v6388_v60 = vcombine.high %v11111_v45, %v5712_v31  ;;  %14938 = vst [vmem:[#allocation57_spill] sm:$0xff] %v11301_v46  ;;  %v5333_v45 = vadd.f32 %v10885_v20, %v4968_v49  ;;  %v4966_v58 = vpop.permute.xlu1 %4965  ;;  %v11316_v31 = vpop.f32.mrb[93].mxu1  ;;  %10072 = vmatmul.mubr.msk.bf16.gmra.mrb[196].mxu1 %vm473_vm0, %v11181_v30 }
 0x2be   :  { %v11307_v34 = vrot.slane %v14939_v5, %v11213_v19  ;;  %v11310_v10 = vrot.slane %v5843_v48, %v11213_v19  ;;  %v11313_v4 = vrot.slane %v5844_v26, %v11213_v19  ;;  %14940 = vst [vmem:[#allocation58_spill] sm:$0xff] %v11316_v31  ;;  %v14941_v15 = vcombine.low %v11051_v6, %v11179_v33  ;;  %v11338_v5 = vpop.f32.mrb[94].mxu1  ;;  %v1724_v43 = vpop.f32.mrb[209].mxu0 }
 0x2bf   :  { %v14942_v48 = vcombine.high %v11051_v6, %v11179_v33  ;;  %v11333_v20 = vrot.slane %v6387_v42, %v11213_v19  ;;  %v11336_v49 = vrot.slane %v6388_v60, %v11213_v19  ;;  %14943 = vst [vmem:[#allocation59_spill] sm:$0xff] %v11338_v5  ;;  %10083 = vmatprep.mubr.msk.bf16.mxu1 %vm473_vm0, %v11063_v61  ;;  %v11348_v33 = vpop.f32.mrb[95].mxu1  ;;  %v9630_v60 = vpop.f32.mrb[210].mxu0 }
 0x2c0   :  { %v11324_v59 = vrot.slane %v14941_v15, %v11213_v19  ;;  %4383 = vrot.lane.b32.xlu0 %v11301_v46, %s10385_s2  ;;  %14944 = vst [vmem:[#allocation60_spill] sm:$0xff] %v11348_v33  ;;  %v5334_v15 = vadd.f32 %v10893_v35, %v4970_v53  ;;  %4385 = vrot.lane.b32.xlu1 %v11338_v5, %s10385_s2  ;;  %v4328_v6 = vpop.permute.xlu0 %4327  ;;  %v1727_v14 = vpop.f32.mrb[211].mxu0  ;;  %v14970_v46 = vld [vmem:[#allocation24_spill] sm:$0xff] }
 0x2c1   :  { %v11330_v26 = vrot.slane %v14942_v48, %v11213_v19  ;;  %v5589_v44 = vmul.f32 %v5333_v45, %v5333_v45  ;;  %v4693_v13 = vsub.f32 %v10865_v2, %v4328_v6  ;;  %v4330_v8 = vpop.permute.xlu1 %4329  ;;  %v2017_v42 = vpack.c.bf16 %v1711_v28, %v11245_v27 }
 0x2c2   :  { %v4694_v24 = vsub.f32 %v10873_v16, %v4330_v8  ;;  %v11362_v62 = vpack.c.bf16 %v9630_v60, %v9629_v9  ;;  %v2019_v48 = vpack.c.bf16 %v1727_v14, %v1724_v43  ;;  %v5331_v35 = vadd.f32 %v4964_v39, %v10889_v25 }
 0x2c3   :  { %v5461_v53 = vmul.f32 %v4693_v13, %v4693_v13  ;;  %10079 = vmatprep.subr.bf16.mxu1 %v2017_v42  ;;  %v9633_v45 = vpop.f32.mrb[212].mxu0  ;;  %v5590_v27 = vmul.f32 %v5334_v15, %v5334_v15  ;;  %v5332_v16 = vadd.f32 %v4966_v58, %v10897_v40 }
 0x2c4   :  { %4379 = vrot.lane.b32.xlu0 %v11316_v31, %s10385_s2  ;;  %v5462_v8 = vmul.f32 %v4694_v24, %v4694_v24  ;;  %4381 = vrot.lane.b32.xlu1 %v11348_v33, %s10385_s2  ;;  %v4324_v28 = vpop.permute.xlu0 %4323  ;;  %v11374_v14 = vpop.f32.mrb[96].mxu1  ;;  %v5587_v6 = vmul.f32 %v5331_v35, %v5331_v35  ;;  %v14969_v31 = vld [vmem:[#allocation22_spill] sm:$0xff] }
 0x2c5   :  { %14945 = vst [vmem:[#allocation61_spill] sm:$0xff] %v11374_v14  ;;  %10080 = vmatpush3.bf16.msra.mxu1 %v2017_v42  ;;  %v11376_v25 = vadd.f32 %v5589_v44, %v5461_v53  ;;  %v4691_v13 = vsub.f32 %v10869_v7, %v4324_v28  ;;  %v4326_v9 = vpop.permute.xlu1 %4325  ;;  %v11379_v43 = vpop.f32.mrb[97].mxu1 }
 0x2c6   :  { %14946 = vst [vmem:[#allocation62_spill] sm:$0xff] %v11379_v43  ;;  %10081 = vmatprep.subr.bf16.mxu1 %v11259_v52  ;;  %v11384_v24 = vadd.f32 %v5590_v27, %v5462_v8  ;;  %v4692_v39 = vsub.f32 %v10877_v17, %v4326_v9  ;;  %v11387_v58 = vpop.f32.mrb[98].mxu1  ;;  %v1740_v15 = vpop.f32.mrb[213].mxu0  ;;  %v5588_v27 = vmul.f32 %v5332_v16, %v5332_v16 }
 0x2c7   :  { %14947 = vst [vmem:[#allocation63_spill] sm:$0xff] %v11387_v58  ;;  %v5459_v44 = vmul.f32 %v4691_v13, %v4691_v13  ;;  %v11391_v7 = vpop.f32.mrb[99].mxu1  ;;  %v9634_v42 = vpop.f32.mrb[214].mxu0 }
 0x2c8   :  { %5031 = vrot.lane.b32.xlu0 %v11374_v14, %s10385_s2  ;;  %14948 = vst [vmem:[#allocation64_spill] sm:$0xff] %v11391_v7  ;;  %v5460_v8 = vmul.f32 %v4692_v39, %v4692_v39  ;;  %5033 = vrot.lane.b32.xlu1 %v11387_v58, %s10385_s2  ;;  %v4976_v17 = vpop.permute.xlu0 %4975  ;;  %v11400_v35 = vpack.c.bf16 %v9634_v42, %v9633_v45  ;;  %v1743_v28 = vpop.f32.mrb[215].mxu0  ;;  %v14954_v14 = vld [vmem:[#allocation15_spill] sm:$0xff] }
 0x2c9   :  { %10082 = vmatpush3.bf16.msra.mxu1 %v11259_v52  ;;  %v11402_v13 = vadd.f32 %v5587_v6, %v5459_v44  ;;  %v4978_v9 = vpop.permute.xlu1 %4977  ;;  %v2021_v40 = vpack.c.bf16 %v1743_v28, %v1740_v15 }
 0x2ca   :  { %10091 = vmatprep.subr.bf16.mxu1 %v2019_v48  ;;  %v11404_v60 = vadd.f32 %v5588_v27, %v5460_v8  ;;  %v5337_v8 = vadd.f32 %v10925_v12, %v4976_v17 }
 0x2cb   :  { %v9637_v52 = vpop.f32.mrb[216].mxu0 }
 0x2cc   :  { %5027 = vrot.lane.b32.xlu0 %v11379_v43, %s10385_s2  ;;  %10084 = vmatmul.mubr.msk.bf16.vlgmr.msra.gmra.mrb[200].mxu1 %vm473_vm0, %v11138_v21  ;;  %v4972_v39 = vpop.permute.xlu0 %4971  ;;  %v11416_v15 = vpop.f32.mrb[100].mxu1  ;;  %v5593_v58 = vmul.f32 %v5337_v8, %v5337_v8 }
 0x2cd   :  { %5029 = vrot.lane.b32.xlu1 %v11391_v7, %s10385_s2  ;;  %14949 = vst [vmem:[#allocation65_spill] sm:$0xff] %v11416_v15  ;;  %10092 = vmatpush3.bf16.msra.mxu1 %v2019_v48  ;;  %v4974_v6 = vpop.permute.xlu1 %4973  ;;  %v11418_v44 = vpop.f32.mrb[101].mxu1  ;;  %v5338_v48 = vadd.f32 %v10933_v29, %v4978_v9  ;;  %v14953_v7 = vld [vmem:[#allocation13_spill] sm:$0xff] }
 0x2ce   :  { %14950 = vst [vmem:[#allocation66_spill] sm:$0xff] %v11418_v44  ;;  %10093 = vmatprep.subr.bf16.mxu1 %v11362_v62  ;;  %10087 = vmatprep.mubr.msk.bf16.mxu1 %vm473_vm0, %v11145_v1  ;;  %v11423_v42 = vpop.f32.mrb[102].mxu1  ;;  %v1756_v27 = vpop.f32.mrb[217].mxu0 }
 0x2cf   :  { %14951 = vst [vmem:[#allocation67_spill] sm:$0xff] %v11423_v42  ;;  %v11428_v28 = vpop.f32.mrb[103].mxu1  ;;  %v9638_v45 = vpop.f32.mrb[218].mxu0  ;;  %v5594_v9 = vmul.f32 %v5338_v48, %v5338_v48 }
 0x2d0   :  { %4391 = vrot.lane.b32.xlu0 %v11416_v15, %s10385_s2  ;;  %14952 = vst [vmem:[#allocation68_spill] sm:$0xff] %v11428_v28  ;;  %v4336_v16 = vpop.permute.xlu0 %4335  ;;  %v11434_v53 = vpack.c.bf16 %v9638_v45, %v9637_v52  ;;  %v1759_v2 = vpop.f32.mrb[219].mxu0  ;;  %v5335_v15 = vadd.f32 %v4972_v39, %v14954_v14  ;;  %v14955_v52 = vld [vmem:[#allocation16_spill] sm:$0xff] }
 0x2d1   :  { %4393 = vrot.lane.b32.xlu1 %v11423_v42, %s10385_s2  ;;  %10094 = vmatpush3.bf16.msra.mxu1 %v11362_v62  ;;  %v4697_v55 = vsub.f32 %v10905_v47, %v4336_v16  ;;  %v4338_v12 = vpop.permute.xlu1 %4337  ;;  %v2023_v17 = vpack.c.bf16 %v1759_v2, %v1756_v27  ;;  %v5336_v45 = vadd.f32 %v4974_v6, %v14955_v52  ;;  %v14959_v6 = vld [vmem:[#allocation14_spill] sm:$0xff]  ;;  %v14968_v42 = vld [vmem:[#allocation17_spill] sm:$0xff] }
 0x2d2   :  { %10095 = vmatprep.subr.bf16.mxu1 %v2021_v40  ;;  %v4698_v43 = vsub.f32 %v14953_v7, %v4338_v12 }
 0x2d3   :  { %v5465_v29 = vmul.f32 %v4697_v55, %v4697_v55  ;;  %v9641_v62 = vpop.f32.mrb[220].mxu0  ;;  %v14957_v55 = vld [vmem:[#allocation12_spill] sm:$0xff] }
 0x2d4   :  { %4387 = vrot.lane.b32.xlu0 %v11418_v44, %s10385_s2  ;;  %10088 = vmatmul.mubr.msk.bf16.gmra.mrb[204].mxu1 %vm473_vm0, %v11181_v30  ;;  %v5466_v47 = vmul.f32 %v4698_v43, %v4698_v43  ;;  %v4332_v2 = vpop.permute.xlu0 %4331  ;;  %v11446_v7 = vpop.f32.mrb[104].mxu1 }
 0x2d5   :  { %4389 = vrot.lane.b32.xlu1 %v11428_v28, %s10385_s2  ;;  %14956 = vst [vmem:[#allocation13_spill] sm:$0xff] %v11446_v7  ;;  %10096 = vmatpush3.bf16.msra.mxu1 %v2021_v40  ;;  %v11448_v14 = vadd.f32 %v5593_v58, %v5465_v29  ;;  %v4695_v16 = vsub.f32 %v14957_v55, %v4332_v2  ;;  %v4334_v39 = vpop.permute.xlu1 %4333  ;;  %v11451_v27 = vpop.f32.mrb[105].mxu1 }
 0x2d6   :  { %14958 = vst [vmem:[#allocation15_spill] sm:$0xff] %v11451_v27  ;;  %10097 = vmatprep.subr.bf16.mxu1 %v11400_v35  ;;  %10099 = vmatprep.mubr.msk.bf16.mxu1 %vm473_vm0, %v11063_v61  ;;  %v11456_v43 = vadd.f32 %v5594_v9, %v5466_v47  ;;  %v4696_v8 = vsub.f32 %v14959_v6, %v4334_v39  ;;  %v11459_v48 = vpop.f32.mrb[106].mxu1  ;;  %v1772_v12 = vpop.f32.mrb[221].mxu0 }
 0x2d7   :  { %14960 = vst [vmem:[#allocation16_spill] sm:$0xff] %v11459_v48  ;;  %v5591_v40 = vmul.f32 %v5335_v15, %v5335_v15  ;;  %v5463_v58 = vmul.f32 %v4695_v16, %v4695_v16  ;;  %v11463_v29 = vpop.f32.mrb[107].mxu1  ;;  %v9642_v52 = vpop.f32.mrb[222].mxu0  ;;  %v5592_v2 = vmul.f32 %v5336_v45, %v5336_v45 }
 0x2d8   :  { %5039 = vrot.lane.b32.xlu0 %v11446_v7, %s10385_s2  ;;  %14961 = vst [vmem:[#allocation12_spill] sm:$0xff] %v11463_v29  ;;  %v5464_v55 = vmul.f32 %v4696_v8, %v4696_v8  ;;  %v4984_v9 = vpop.permute.xlu0 %4983  ;;  %v11468_v47 = vpack.c.bf16 %v9642_v52, %v9641_v62  ;;  %v1775_v39 = vpop.f32.mrb[223].mxu0 }
 0x2d9   :  { %5041 = vrot.lane.b32.xlu1 %v11459_v48, %s10385_s2  ;;  %10098 = vmatpush3.bf16.msra.mxu1 %v11400_v35  ;;  %v11470_v6 = vadd.f32 %v5591_v40, %v5463_v58  ;;  %v4986_v15 = vpop.permute.xlu1 %4985  ;;  %v2025_v16 = vpack.c.bf16 %v1775_v39, %v1772_v12  ;;  %v10387_v12 = vmov 1934713408  }
 0x2da   :  { %10107 = vmatprep.subr.bf16.mxu1 %v2023_v17  ;;  %v11472_v7 = vadd.f32 %v5592_v2, %v5464_v55  ;;  %v5894_v58 = vunpack.c.l.s4 %v10387_v12  ;;  %v14965_v55 = vld [vmem:[#allocation21_spill] sm:$0xff] }
 0x2db   :  { %v9645_v45 = vpop.f32.mrb[224].mxu0  ;;  %v5341_v39 = vadd.f32 %v14965_v55, %v4984_v9 }
 0x2dc   :  { %5035 = vrot.lane.b32.xlu0 %v11451_v27, %s10385_s2  ;;  %10100 = vmatmul.mubr.msk.bf16.vlgmr.msra.gmra.mrb[208].mxu1 %vm473_vm0, %v11138_v21  ;;  %v4980_v35 = vpop.permute.xlu0 %4979  ;;  %v11480_v62 = vpop.f32.mrb[108].mxu1  ;;  %v14967_v27 = vld [vmem:[#allocation23_spill] sm:$0xff]  ;;  %v5895_v55 = vunpack.c.0.s8 %v5894_v58 }
 0x2dd   :  { %5037 = vrot.lane.b32.xlu1 %v11463_v29, %s10385_s2  ;;  %14962 = vst [vmem:[#allocation14_spill] sm:$0xff] %v11480_v62  ;;  %10108 = vmatpush3.bf16.msra.mxu1 %v2023_v17  ;;  %v4982_v8 = vpop.permute.xlu1 %4981  ;;  %v11482_v40 = vpop.f32.mrb[109].mxu1  ;;  %v5342_v48 = vadd.f32 %v14967_v27, %v4986_v15  ;;  %v5339_v5 = vadd.f32 %v4980_v35, %v14969_v31  ;;  %v14971_v27 = vld [vmem:[#allocation19_spill] sm:$0xff]  ;;  %v14972_v35 = vld [vmem:[#allocation18_spill] sm:$0xff] }
 0x2de   :  { %14963 = vst [vmem:[#allocation69_spill] sm:$0xff] %v11482_v40  ;;  %10109 = vmatprep.subr.bf16.mxu1 %v11434_v53  ;;  %10103 = vmatprep.mubr.msk.bf16.mxu1 %vm473_vm0, %v11145_v1  ;;  %v11487_v52 = vpop.f32.mrb[110].mxu1  ;;  %v1788_v2 = vpop.f32.mrb[225].mxu0  ;;  %v5340_v0 = vadd.f32 %v4982_v8, %v14970_v46  ;;  %v5597_v63 = vmul.f32 %v5341_v39, %v5341_v39 }
 0x2df   :  { %14964 = vst [vmem:[#allocation70_spill] sm:$0xff] %v11487_v52  ;;  %v11492_v29 = vpop.f32.mrb[111].mxu1  ;;  %v9646_v17 = vpop.f32.mrb[226].mxu0 }
 0x2e0   :  { %4399 = vrot.lane.b32.xlu0 %v11480_v62, %s10385_s2  ;;  %14966 = vst [vmem:[#allocation21_spill] sm:$0xff] %v11492_v29  ;;  %v4344_v12 = vpop.permute.xlu0 %4343  ;;  %v11498_v28 = vpack.c.bf16 %v9646_v17, %v9645_v45  ;;  %v1791_v44 = vpop.f32.mrb[227].mxu0  ;;  %v5596_v39 = vmul.f32 %v5340_v0, %v5340_v0 }
 0x2e1   :  { %4401 = vrot.lane.b32.xlu1 %v11487_v52, %s10385_s2  ;;  %10110 = vmatpush3.bf16.msra.mxu1 %v11434_v53  ;;  %v4701_v33 = vsub.f32 %v14968_v42, %v4344_v12  ;;  %v4346_v9 = vpop.permute.xlu1 %4345  ;;  %v2027_v62 = vpack.c.bf16 %v1791_v44, %v1788_v2  ;;  %v5598_v42 = vmul.f32 %v5342_v48, %v5342_v48 }
 0x2e2   :  { %10111 = vmatprep.subr.bf16.mxu1 %v2025_v16  ;;  %v4702_v15 = vsub.f32 %v14971_v27, %v4346_v9  ;;  %v11516_v2 = vsub.s32 %v5895_v55, %v11191_v57  ;;  %v5595_v48 = vmul.f32 %v5339_v5, %v5339_v5 }
 0x2e3   :  { %v5469_v52 = vmul.f32 %v4701_v33, %v4701_v33  ;;  %v9649_v53 = vpop.f32.mrb[228].mxu0 }
 0x2e4   :  { %4395 = vrot.lane.b32.xlu0 %v11482_v40, %s10385_s2  ;;  %10104 = vmatmul.mubr.msk.bf16.gmra.mrb[212].mxu1 %vm473_vm0, %v11181_v30  ;;  %v5470_v45 = vmul.f32 %v4702_v15, %v4702_v15  ;;  %v4340_v44 = vpop.permute.xlu0 %4339  ;;  %v1804_v31 = vpop.f32.mrb[229].mxu0  ;;  %v15034_v40 = vld [vmem:[#allocation34_spill] sm:$0xff] }
 0x2e5   :  { %4397 = vrot.lane.b32.xlu1 %v11492_v29, %s10385_s2  ;;  %10112 = vmatpush3.bf16.msra.mxu1 %v2025_v16  ;;  %v11510_v46 = vadd.f32 %v5597_v63, %v5469_v52  ;;  %v4699_v8 = vsub.f32 %v14972_v35, %v4340_v44  ;;  %v11513_v33 = vpop.f32.mrb[112].mxu1  ;;  %v4342_v58 = vpop.permute.xlu1 %4341  ;;  %v14974_v16 = vld [vmem:[#allocation20_spill] sm:$0xff] }
 0x2e6   :  { %14973 = vst [vmem:[#allocation23_spill] sm:$0xff] %v11513_v33  ;;  %10113 = vmatprep.subr.bf16.mxu1 %v11468_v47  ;;  %10115 = vmatprep.mubr.msk.bf16.mxu1 %vm473_vm0, %v11063_v61  ;;  %v11521_v17 = vadd.f32 %v5598_v42, %v5470_v45  ;;  %v4700_v63 = vsub.f32 %v14974_v16, %v4342_v58  ;;  %v11524_v52 = vpop.f32.mrb[113].mxu1  ;;  %v9650_v12 = vpop.f32.mrb[230].mxu0 }
 0x2e7   :  { %14975 = vst [vmem:[#allocation17_spill] sm:$0xff] %v11524_v52  ;;  %v6947_v9 = vcombine.low %v11376_v25, %v11510_v46  ;;  %v5467_v55 = vmul.f32 %v4699_v8, %v4699_v8  ;;  %v11532_v61 = vpop.f32.mrb[114].mxu1  ;;  %v11534_v0 = vpack.c.bf16 %v9650_v12, %v9649_v53  ;;  %v1807_v5 = vpop.f32.mrb[231].mxu0  ;;  %v14978_v58 = vcombine.low %v11225_v3, %v11268_v50 }
 0x2e8   :  { %5047 = vrot.lane.b32.xlu0 %v11513_v33, %s10385_s2  ;;  %14976 = vst [vmem:[#allocation22_spill] sm:$0xff] %v11532_v61  ;;  %v7491_v27 = vcombine.low %v11384_v24, %v11521_v17  ;;  %v7492_v15 = vcombine.high %v11384_v24, %v11521_v17  ;;  %v5468_v42 = vmul.f32 %v4700_v63, %v4700_v63  ;;  %v11542_v45 = vpop.f32.mrb[115].mxu1  ;;  %v4992_v44 = vpop.permute.xlu0 %4991 }
 0x2e9   :  { %5049 = vrot.lane.b32.xlu1 %v11532_v61, %s10385_s2  ;;  %14977 = vst [vmem:[#allocation24_spill] sm:$0xff] %v11542_v45  ;;  %10114 = vmatpush3.bf16.msra.mxu1 %v11468_v47  ;;  %v11545_v35 = vadd.f32 %v5595_v48, %v5467_v55  ;;  %v4994_v53 = vpop.permute.xlu1 %4993  ;;  %v11553_v24 = vrot.slane %v14978_v58, %v11516_v2 }
 0x2ea   :  { %10123 = vmatprep.subr.bf16.mxu1 %v2027_v62  ;;  %v11547_v8 = vadd.f32 %v5596_v39, %v5468_v42  ;;  %v14979_v17 = vcombine.high %v11225_v3, %v11268_v50  ;;  %v14980_v39 = vcombine.low %v11228_v54, %v11271_v36  ;;  %v14982_v55 = vcombine.low %v11277_v23, %v11310_v10 }
 0x2eb   :  { %v5859_v47 = vcombine.low %v11402_v13, %v11545_v35  ;;  %v5860_v48 = vcombine.high %v11402_v13, %v11545_v35  ;;  %v9653_v3 = vpop.f32.mrb[232].mxu0  ;;  %v14986_v50 = vcombine.high %v11277_v23, %v11310_v10  ;;  %v14992_v10 = vcombine.low %v11235_v18, %v11280_v37 }
 0x2ec   :  { %v11559_v16 = vrot.slane %v14979_v17, %v11516_v2  ;;  %5043 = vrot.lane.b32.xlu0 %v11524_v52, %s10385_s2  ;;  %v11571_v63 = vrot.slane %v14980_v39, %v11516_v2  ;;  %10116 = vmatmul.mubr.msk.bf16.vlgmr.msra.gmra.mrb[216].mxu1 %vm473_vm0, %v11138_v21  ;;  %v4988_v13 = vpop.permute.xlu0 %4987  ;;  %v11585_v42 = vrot.slane %v14982_v55, %v11516_v2  ;;  %v1820_v35 = vpop.f32.mrb[233].mxu0  ;;  %v14989_v52 = vld [vmem:[#allocation29_spill] sm:$0xff] }
 0x2ed   :  { %5045 = vrot.lane.b32.xlu1 %v11542_v45, %s10385_s2  ;;  %10124 = vmatpush3.bf16.msra.mxu1 %v2027_v62  ;;  %v11587_v58 = vpop.f32.mrb[116].mxu1  ;;  %v4990_v17 = vpop.permute.xlu1 %4989  ;;  %v14985_v39 = vcombine.high %v11228_v54, %v11271_v36  ;;  %v11599_v57 = vrot.slane %v14986_v50, %v11516_v2  ;;  %v14987_v62 = vcombine.low %v11307_v34, %v11313_v4 }
 0x2ee   :  { %14981 = vst [vmem:[#allocation19_spill] sm:$0xff] %v11571_v63  ;;  %14983 = vst [vmem:[#allocation18_spill] sm:$0xff] %v11585_v42  ;;  %10125 = vmatprep.subr.bf16.mxu1 %v11498_v28  ;;  %v2029_v45 = vpack.c.bf16 %v1807_v5, %v1804_v31  ;;  %v5345_v61 = vadd.f32 %v14989_v52, %v4992_v44  ;;  %v11609_v54 = vpop.f32.mrb[117].mxu1  ;;  %v14991_v36 = vcombine.high %v11307_v34, %v11313_v4  ;;  %v9654_v52 = vpop.f32.mrb[234].mxu0 }
 0x2ef   :  { %14984 = vst [vmem:[#allocation20_spill] sm:$0xff] %v11587_v58  ;;  %v11593_v12 = vrot.slane %v14985_v39, %v11516_v2  ;;  %v11605_v55 = vrot.slane %v14987_v62, %v11516_v2  ;;  %14990 = vst [vmem:[#allocation29_spill] sm:$0xff] %v11609_v54  ;;  %v11621_v50 = vrot.slane %v14992_v10, %v11516_v2  ;;  %10119 = vmatprep.mubr.msk.bf16.mxu1 %vm473_vm0, %v11145_v1  ;;  %v11634_v4 = vpop.f32.mrb[118].mxu1 }
 0x2f0   :  { %v11615_v23 = vrot.slane %v14991_v36, %v11516_v2  ;;  %v14994_v31 = vcombine.low %v11265_v22, %v11283_v41  ;;  %v5346_v34 = vadd.f32 %v11014_v38, %v4994_v53  ;;  %4407 = vrot.lane.b32.xlu0 %v11587_v58, %s10385_s2  ;;  %14996 = vst [vmem:[#allocation74_spill] sm:$0xff] %v11634_v4  ;;  %v1823_v36 = vpop.f32.mrb[235].mxu0  ;;  %v11652_v38 = vpop.f32.mrb[119].mxu1  ;;  %v15025_v58 = vld [vmem:[#allocation31_spill] sm:$0xff] }
 0x2f1   :  { %14988 = vst [vmem:[#allocation71_spill] sm:$0xff] %v11605_v55  ;;  %14993 = vst [vmem:[#allocation72_spill] sm:$0xff] %v11621_v50  ;;  %v14997_v44 = vcombine.high %v11235_v18, %v11280_v37  ;;  %v11642_v62 = vpack.c.bf16 %v9654_v52, %v9653_v3  ;;  %v14998_v1 = vcombine.low %v11324_v59, %v11333_v20  ;;  %4409 = vrot.lane.b32.xlu1 %v11634_v4, %s10385_s2  ;;  %v4352_v53 = vpop.permute.xlu0 %4351 }
 0x2f2   :  { %v11627_v5 = vrot.slane %v14994_v31, %v11516_v2  ;;  %15000 = vst [vmem:[#allocation76_spill] sm:$0xff] %v11652_v38  ;;  %10126 = vmatpush3.bf16.msra.mxu1 %v11498_v28  ;;  %v15001_v18 = vcombine.high %v11265_v22, %v11283_v41  ;;  %v11661_v3 = vpack.c.bf16 %v1823_v36, %v1820_v35 }
 0x2f3   :  { %v11640_v39 = vrot.slane %v14997_v44, %v11516_v2  ;;  %v11648_v10 = vrot.slane %v14998_v1, %v11516_v2  ;;  %v15002_v31 = vcombine.low %v11330_v26, %v11336_v49  ;;  %v11670_v44 = vrot.slane %v6947_v9, %v11213_v19  ;;  %v15004_v1 = vld [vmem:[#allocation25_spill] sm:$0xff]  ;;  %10127 = vmatprep.subr.bf16.mxu1 %v2029_v45 }
 0x2f4   :  { %14995 = vst [vmem:[#allocation73_spill] sm:$0xff] %v11627_v5  ;;  %v11659_v37 = vrot.slane %v15001_v18, %v11516_v2  ;;  %v4705_v33 = vsub.f32 %v15004_v1, %v4352_v53  ;;  %v15005_v22 = vcombine.high %v11324_v59, %v11333_v20  ;;  %v15006_v28 = vcombine.high %v11330_v26, %v11336_v49  ;;  %v4354_v20 = vpop.permute.xlu1 %4353  ;;  %v9657_v49 = vpop.f32.mrb[236].mxu0 }
 0x2f5   :  { %14999 = vst [vmem:[#allocation75_spill] sm:$0xff] %v11648_v10  ;;  %v11667_v52 = vrot.slane %v15002_v31, %v11516_v2  ;;  %v15007_v9 = vcombine.high %v11376_v25, %v11510_v46  ;;  %v11692_v53 = vrot.slane %v7491_v27, %v11213_v19  ;;  %v11695_v18 = vrot.slane %v7492_v15, %v11213_v19  ;;  %v1836_v27 = vpop.f32.mrb[237].mxu0 }
 0x2f6   :  { %v11677_v41 = vrot.slane %v15005_v22, %v11516_v2  ;;  %v11683_v35 = vrot.slane %v15006_v28, %v11516_v2  ;;  %v5601_v59 = vmul.f32 %v5345_v61, %v5345_v61  ;;  %v5602_v31 = vmul.f32 %v5346_v34, %v5346_v34  ;;  %v15008_v22 = vld [vmem:[#allocation27_spill] sm:$0xff]  ;;  %4403 = vrot.lane.b32.xlu0 %v11609_v54, %s10385_s2  ;;  %v15009_v28 = vld [vmem:[#allocation26_spill] sm:$0xff] }
 0x2f7   :  { %15003 = vst [vmem:[#allocation77_spill] sm:$0xff] %v11667_v52  ;;  %v11689_v36 = vrot.slane %v15007_v9, %v11213_v19  ;;  %v5473_v1 = vmul.f32 %v4705_v33, %v4705_v33  ;;  %v4706_v26 = vsub.f32 %v15008_v22, %v4354_v20  ;;  %10120 = vmatmul.mubr.msk.bf16.gmra.mrb[220].mxu1 %vm473_vm0, %v11181_v30  ;;  %v4348_v33 = vpop.permute.xlu0 %4347  ;;  %v11712_v30 = vpop.f32.mrb[120].mxu1  ;;  %v15013_v20 = vld [vmem:[#allocation30_spill] sm:$0xff] }
 0x2f8   :  { %v11703_v25 = vrot.slane %v5859_v47, %v11213_v19  ;;  %v11706_v46 = vrot.slane %v5860_v48, %v11213_v19  ;;  %v5343_v61 = vadd.f32 %v4988_v13, %v11009_v51  ;;  %4405 = vrot.lane.b32.xlu1 %v11652_v38, %s10385_s2  ;;  %10128 = vmatpush3.bf16.msra.mxu1 %v2029_v45  ;;  %v11715_v47 = vld [vmem:[#allocation7] sm:$0xff]   ;;  %v9658_v51 = vpop.f32.mrb[238].mxu0  ;;  %v4350_v22 = vpop.permute.xlu1 %4349 }
 0x2f9   :  { %v5729_v15 = vadd.f32 %v5601_v59, %v5473_v1  ;;  %v5474_v34 = vmul.f32 %v4706_v26, %v4706_v26  ;;  %v4703_v9 = vsub.f32 %v15009_v28, %v4348_v33  ;;  %15010 = vst [vmem:[#allocation25_spill] sm:$0xff] %v11712_v30  ;;  %10129 = vmatprep.subr.bf16.mxu1 %v11534_v0  ;;  %v11732_v26 = vpop.f32.mrb[121].mxu1 }
 0x2fa   :  { %10131 = vmatprep.mubr.msk.bf16.mxu1 %vm473_vm0, %v11715_v47  ;;  %v15011_v48 = vcombine.low %v11404_v60, %v11547_v8  ;;  %v15012_v13 = vcombine.high %v11404_v60, %v11547_v8  ;;  %v5344_v1 = vadd.f32 %v4990_v17, %v15013_v20  ;;  %15014 = vst [vmem:[#allocation27_spill] sm:$0xff] %v11732_v26  ;;  %v11740_v4 = vpop.f32.mrb[122].mxu1  ;;  %v1839_v60 = vpop.f32.mrb[239].mxu0 }
 0x2fb   :  { %v11734_v33 = vpack.c.bf16 %v9658_v51, %v9657_v49  ;;  %v6963_v28 = vcombine.low %v11448_v14, %v5729_v15  ;;  %v6964_v38 = vcombine.high %v11448_v14, %v5729_v15  ;;  %v5730_v54 = vadd.f32 %v5602_v31, %v5474_v34  ;;  %5055 = vrot.lane.b32.xlu0 %v11712_v30, %s10385_s2  ;;  %v11745_v49 = vpop.f32.mrb[123].mxu1  ;;  %v5000_v51 = vpop.permute.xlu0 %4999 }
 0x2fc   :  { %v11723_v45 = vrot.slane %v15011_v48, %v11213_v19  ;;  %v11729_v59 = vrot.slane %v15012_v13, %v11213_v19  ;;  %v5471_v48 = vmul.f32 %v4703_v9, %v4703_v9  ;;  %15015 = vst [vmem:[#allocation26_spill] sm:$0xff] %v11740_v4  ;;  %v5599_v8 = vmul.f32 %v5343_v61, %v5343_v61  ;;  %v15016_v13 = vld [vmem:[#allocation28_spill] sm:$0xff] }
 0x2fd   :  { %v4704_v17 = vsub.f32 %v15016_v13, %v4350_v22  ;;  %5057 = vrot.lane.b32.xlu1 %v11740_v4, %s10385_s2  ;;  %15017 = vst [vmem:[#allocation30_spill] sm:$0xff] %v11745_v49  ;;  %10130 = vmatpush3.bf16.msra.mxu1 %v11534_v0  ;;  %v11748_v14 = vpack.c.bf16 %v1839_v60, %v1836_v27  ;;  %v5002_v0 = vpop.permute.xlu1 %5001 }
 0x2fe   :  { %v11751_v31 = vrot.slane %v6963_v28, %v11213_v19  ;;  %v11754_v15 = vrot.slane %v6964_v38, %v11213_v19  ;;  %v7507_v61 = vcombine.low %v11456_v43, %v5730_v54  ;;  %v7508_v34 = vcombine.high %v11456_v43, %v5730_v54  ;;  %10139 = vmatprep.subr.bf16.mxu1 %v11661_v3  ;;  %v11772_v43 = vpop.f32.mrb[240].mxu0 }
 0x2ff   :  { %v5600_v9 = vmul.f32 %v5344_v1, %v5344_v1  ;;  %v5727_v20 = vadd.f32 %v5599_v8, %v5471_v48  ;;  %v5472_v22 = vmul.f32 %v4704_v17, %v4704_v17  ;;  %v5349_v13 = vadd.f32 %v11061_v32, %v5000_v51  ;;  %5051 = vrot.lane.b32.xlu0 %v11732_v26, %s10385_s2  ;;  %v11780_v8 = vpop.f32.mrb[241].mxu0  ;;  %v11787_v26 = vpop.f32.mrb[124].mxu1  ;;  %v15020_v51 = vld [vmem:[#allocation35_spill] sm:$0xff] }
 0x300   :  { %v7011_v27 = vcombine.low %v11670_v44, %v11751_v31  ;;  %v7027_v28 = vcombine.low %v11689_v36, %v11754_v15  ;;  %v11765_v38 = vrot.slane %v7507_v61, %v11213_v19  ;;  %v11768_v60 = vrot.slane %v7508_v34, %v11213_v19  ;;  %v4996_v34 = vpop.permute.xlu0 %4995  ;;  %15018 = vst [vmem:[#allocation28_spill] sm:$0xff] %v11787_v26  ;;  %v11813_v4 = vpop.f32.mrb[242].mxu0 }
 0x301   :  { %v5875_v32 = vcombine.low %v11470_v6, %v5727_v20  ;;  %v5876_v54 = vcombine.high %v11470_v6, %v5727_v20  ;;  %v5728_v1 = vadd.f32 %v5600_v9, %v5472_v22  ;;  %v11776_v48 = vmul.f32 %v5349_v13, %v5349_v13  ;;  %5053 = vrot.lane.b32.xlu1 %v11745_v49, %s10385_s2  ;;  %v15021_v49 = vld [vmem:[#allocation36_spill] sm:$0xff] }
 0x302   :  { %v5350_v61 = vadd.f32 %v11072_v56, %v5002_v0  ;;  %v11790_v6 = vrot.slane %v7011_v27, %v11516_v2  ;;  %10132 = vmatmul.mubr.msk.bf16.vlgmr.msra.gmra.mrb[224].mxu1 %vm473_vm0, %v11138_v21  ;;  %v4998_v56 = vpop.permute.xlu1 %4997  ;;  %v11802_v0 = vpop.f32.mrb[125].mxu1  ;;  %v5347_v17 = vadd.f32 %v4996_v34, %v15020_v51 }
 0x303   :  { %v11795_v9 = vrot.slane %v5875_v32, %v11213_v19  ;;  %v11798_v20 = vrot.slane %v5876_v54, %v11213_v19  ;;  %v6419_v22 = vcombine.low %v11472_v7, %v5728_v1  ;;  %v6420_v13 = vcombine.high %v11472_v7, %v5728_v1  ;;  %15019 = vst [vmem:[#allocation78_spill] sm:$0xff] %v11802_v0  ;;  %v11809_v32 = vpop.f32.mrb[126].mxu1 }
 0x304   :  { %10140 = vmatpush3.bf16.msra.mxu1 %v11661_v3  ;;  %v5606_v27 = vmul.f32 %v5350_v61, %v5350_v61  ;;  %v5348_v21 = vadd.f32 %v4998_v56, %v15021_v49  ;;  %4415 = vrot.lane.b32.xlu0 %v11787_v26, %s10385_s2  ;;  %15022 = vst [vmem:[#allocation35_spill] sm:$0xff] %v11809_v32  ;;  %v11827_v51 = vpop.f32.mrb[127].mxu1  ;;  %v11829_v61 = vpop.f32.mrb[243].mxu0 }
 0x305   :  { %v7044_v54 = vcombine.high %v11553_v24, %v11790_v6  ;;  %v5923_v7 = vcombine.low %v11703_v25, %v11795_v9  ;;  %v5939_v3 = vcombine.low %v11706_v46, %v11798_v20  ;;  %v11820_v1 = vrot.slane %v6419_v22, %v11213_v19  ;;  %4417 = vrot.lane.b32.xlu1 %v11809_v32, %s10385_s2  ;;  %v4360_v30 = vpop.permute.xlu0 %4359 }
 0x306   :  { %v11823_v49 = vrot.slane %v6420_v13, %v11213_v19  ;;  %15023 = vst [vmem:[#allocation36_spill] sm:$0xff] %v11827_v51  ;;  %v5603_v34 = vmul.f32 %v5347_v17, %v5347_v17  ;;  %v11831_v56 = vmul.f32 %v5348_v21, %v5348_v21  ;;  %v7012_v26 = vcombine.high %v11670_v44, %v11751_v31  ;;  %v4362_v17 = vpop.permute.xlu1 %4361  ;;  %v15026_v44 = vld [vmem:[#allocation33_spill] sm:$0xff] }
 0x307   :  { %v11836_v22 = vrot.slane %v7027_v28, %v11516_v2  ;;  %10141 = vmatprep.subr.bf16.mxu1 %v11642_v62  ;;  %v4709_v29 = vsub.f32 %v15025_v58, %v4360_v30  ;;  %v7028_v21 = vcombine.high %v11689_v36, %v11754_v15  ;;  %v4710_v31 = vsub.f32 %v15026_v44, %v4362_v17  ;;  %v11858_v58 = vpop.f32.mrb[244].mxu0  ;;  %v11872_v44 = vpop.f32.mrb[128].mxu1 }
 0x308   :  { %10142 = vmatpush3.bf16.msra.mxu1 %v11642_v62  ;;  %4411 = vrot.lane.b32.xlu0 %v11802_v0, %s10385_s2  ;;  %v11851_v28 = vrot.slane %v7012_v26, %v11516_v2  ;;  %v11856_v32 = vrot.slane %v5923_v7, %v11516_v2  ;;  %v5924_v36 = vcombine.high %v11703_v25, %v11795_v9  ;;  %v11870_v15 = vpop.f32.mrb[245].mxu0  ;;  %v15031_v9 = vld [vmem:[#allocation32_spill] sm:$0xff]  ;;  %v11888_v0 = vpop.f32.mrb[129].mxu1 }
 0x309   :  { %15024 = vst [vmem:[#allocation79_spill] sm:$0xff] %v11836_v22  ;;  %v5477_v30 = vmul.f32 %v4709_v29, %v4709_v29  ;;  %4413 = vrot.lane.b32.xlu1 %v11827_v51, %s10385_s2  ;;  %v11863_v62 = vrot.slane %v7028_v21, %v11516_v2  ;;  %v11868_v26 = vrot.slane %v5939_v3, %v11516_v2  ;;  %v4356_v7 = vpop.permute.xlu0 %4355  ;;  %15029 = vst [vmem:[#allocation80_spill] sm:$0xff] %v11872_v44  ;;  %v11880_v51 = vld [vmem:[#allocation7 + $0x10] sm:$0xff]  }
 0x30a   :  { %15027 = vst [vmem:[#allocation31_spill] sm:$0xff] %v11856_v32  ;;  %v5478_v17 = vmul.f32 %v4710_v31, %v4710_v31  ;;  %v7045_v29 = vcombine.low %v11559_v16, %v11851_v28  ;;  %10135 = vmatprep.mubr.msk.bf16.mxu1 %vm473_vm0, %v11880_v51  ;;  %v4707_v3 = vsub.f32 %v15031_v9, %v4356_v7  ;;  %v4358_v31 = vpop.permute.xlu1 %4357  ;;  %15032 = vst [vmem:[#allocation32_spill] sm:$0xff] %v11888_v0  ;;  %v11906_v9 = vpop.f32.mrb[246].mxu0  ;;  %v15041_v0 = vld [vmem:[#allocation41_spill] sm:$0xff] }
 0x30b   :  { %15028 = vst [vmem:[#allocation33_spill] sm:$0xff] %v11868_v26  ;;  %v11885_v25 = vadd.f32 %v11776_v48, %v5477_v30  ;;  %10143 = vmatprep.subr.bf16.mxu1 %v11748_v14  ;;  %v4708_v19 = vsub.f32 %v15034_v40, %v4358_v31  ;;  %v11899_v48 = vpop.f32.mrb[130].mxu1  ;;  %v11902_v30 = vrot.slane %v5924_v36, %v11516_v2 }
 0x30c   :  { %v11895_v21 = vadd.f32 %v5606_v27, %v5478_v17  ;;  %8199 = vrot.lane.b32.xlu0 %v7044_v54, %s10388_s23  ;;  %15035 = vst [vmem:[#allocation34_spill] sm:$0xff] %v11899_v48  ;;  %v5475_v13 = vmul.f32 %v4707_v3, %v4707_v3  ;;  %v11910_v27 = vpop.f32.mrb[131].mxu1  ;;  %v5940_v40 = vcombine.high %v11706_v46, %v11798_v20  ;;  %v11926_v3 = vpop.f32.mrb[247].mxu0 }
 0x30d   :  { %15030 = vst [vmem:[#allocation81_spill] sm:$0xff] %v11885_v25  ;;  %5065 = vrot.lane.b32.xlu1 %v11899_v48, %s10385_s2  ;;  %15036 = vst [vmem:[#allocation83_spill] sm:$0xff] %v11910_v27  ;;  %v15037_v54 = vcombine.low %v11692_v53, %v11765_v38  ;;  %v15039_v17 = vcombine.low %v11695_v18, %v11768_v60  ;;  %v5476_v7 = vmul.f32 %v4708_v19, %v4708_v19  ;;  %v5008_v44 = vpop.permute.xlu0 %5007 }
 0x30e   :  { %15033 = vst [vmem:[#allocation82_spill] sm:$0xff] %v11895_v21  ;;  %v7556_v20 = vcombine.high %v11692_v53, %v11765_v38  ;;  %v5353_v21 = vadd.f32 %v15041_v0, %v5008_v44  ;;  %v5010_v19 = vpop.permute.xlu1 %5009  ;;  %v11942_v25 = vrot.slane %v5940_v40, %v11516_v2  ;;  %10144 = vmatpush3.bf16.msra.mxu1 %v11748_v14  ;;  %v15042_v38 = vld [vmem:[#allocation43_spill] sm:$0xff] }
 0x30f   :  { %v11918_v36 = vrot.slane %v15037_v54, %v11516_v2  ;;  %v11924_v31 = vrot.slane %v15039_v17, %v11516_v2  ;;  %v11934_v54 = vld [vmem:[#allocation7 + $0x18] sm:$0xff]   ;;  %v11938_v17 = vadd.f32 %v5603_v34, %v5475_v13  ;;  %v11948_v53 = vadd.f32 %v11831_v56, %v5476_v7  ;;  %v9669_v13 = vpop.f32.mrb[248].mxu0  ;;  %10145 = vmatprep.subr.bf16.mxu1 %v11734_v33 }
 0x310   :  { %10136 = vmatmul.mubr.msk.bf16.gmra.mrb[228].mxu1 %vm473_vm0, %v11934_v54  ;;  %v5354_v46 = vadd.f32 %v15042_v38, %v5010_v19  ;;  %8215 = vrot.lane.b32.xlu0 %v7045_v29, %s10379_s22  ;;  %v11955_v0 = vrot.slane %v7556_v20, %v11516_v2  ;;  %v11957_v44 = vmul.f32 %v5353_v21, %v5353_v21  ;;  %v1884_v7 = vpop.f32.mrb[249].mxu0  ;;  %v11969_v19 = vpop.f32.mrb[132].mxu1 }
 0x311   :  { %15038 = vst [vmem:[#allocation84_spill] sm:$0xff] %v11918_v36  ;;  %15040 = vst [vmem:[#allocation85_spill] sm:$0xff] %v11924_v31  ;;  %5061 = vrot.lane.b32.xlu1 %v11910_v27, %s10385_s2  ;;  %v7572_v29 = vcombine.high %v11695_v18, %v11768_v60  ;;  %v5004_v20 = vpop.permute.xlu0 %5003  ;;  %v15044_v34 = vcombine.low %v11723_v45, %v11820_v1  ;;  %v15046_v18 = vld [vmem:[#allocation42_spill] sm:$0xff]  ;;  %v11983_v56 = vpop.f32.mrb[133].mxu1  ;;  %v6468_v21 = vcombine.high %v11723_v45, %v11820_v1 }
 0x312   :  { %v11967_v40 = vmul.f32 %v5354_v46, %v5354_v46  ;;  %15043 = vst [vmem:[#allocation41_spill] sm:$0xff] %v11969_v19  ;;  %v5351_v60 = vadd.f32 %v5004_v20, %v15046_v18  ;;  %v5006_v46 = vpop.permute.xlu1 %5005  ;;  %15047 = vst [vmem:[#allocation42_spill] sm:$0xff] %v11983_v56  ;;  %v2036_v38 = vpack.c.bf16 %v11813_v4, %v11772_v43  ;;  %10146 = vmatpush3.bf16.msra.mxu1 %v11734_v33  ;;  %v11998_v18 = vpop.f32.mrb[134].mxu1  ;;  %v15055_v56 = vld [vmem:[#allocation39_spill] sm:$0xff] }
 0x313   :  { %v11979_v48 = vrot.slane %v15044_v34, %v11516_v2  ;;  %v11986_v14 = vrot.slane %v7572_v29, %v11516_v2  ;;  %v15048_v34 = vld [vmem:[#allocation44_spill] sm:$0xff]  ;;  %v15049_v20 = vcombine.high %v11559_v16, %v11851_v28  ;;  %v2035_v45 = vpack.c.bf16 %v11829_v61, %v11780_v8  ;;  %10147 = vmatprep.mubr.msk.bf16.mxu1 %vm473_vm0, %v11715_v47  ;;  %v9670_v4 = vpop.f32.mrb[250].mxu0  ;;  %v12010_v43 = vpop.f32.mrb[135].mxu1  ;;  %v15054_v29 = vld [vmem:[#allocation37_spill] sm:$0xff] }
 0x314   :  { %v5352_v27 = vadd.f32 %v5006_v46, %v15048_v34  ;;  %15050 = vst [vmem:[#allocation44_spill] sm:$0xff] %v11998_v18  ;;  %v12006_v33 = vmul.f32 %v5351_v60, %v5351_v60  ;;  %15051 = vst [vmem:[#allocation86_spill] sm:$0xff] %v12010_v43  ;;  %v12017_v28 = vrot.slane %v6468_v21, %v11516_v2  ;;  %v1887_v8 = vpop.f32.mrb[251].mxu0 }
 0x315   :  { %15045 = vst [vmem:[#allocation43_spill] sm:$0xff] %v11979_v48  ;;  %8231 = vrot.lane.b32.xlu0 %v15049_v20, %s10385_s2  ;;  %4425 = vrot.lane.b32.xlu1 %v11998_v18, %s10385_s2  ;;  %v4368_v46 = vpop.permute.xlu0 %4367  ;;  %v15052_v60 = vcombine.low %v11729_v59, %v11823_v49  ;;  %v12027_v20 = vld [vmem:[#allocation7 + $0x8] sm:$0xff]   ;;  %v12033_v21 = vpack.c.bf16 %v11906_v9, %v11858_v58 }
 0x316   :  { %v12019_v61 = vmul.f32 %v5352_v27, %v5352_v27  ;;  %10155 = vmatprep.subr.bf16.mxu1 %v2035_v45  ;;  %v4713_v27 = vsub.f32 %v15054_v29, %v4368_v46  ;;  %v4370_v1 = vpop.permute.xlu1 %4369  ;;  %v15056_v58 = vcombine.high %v11571_v63, %v11836_v22  ;;  %v2037_v29 = vpack.c.bf16 %v11926_v3, %v11870_v15  ;;  %v9673_v46 = vpop.f32.mrb[252].mxu0 }
 0x317   :  { %v12025_v34 = vrot.slane %v15052_v60, %v11516_v2  ;;  %v6484_v60 = vcombine.high %v11729_v59, %v11823_v49  ;;  %v4714_v19 = vsub.f32 %v15055_v56, %v4370_v1  ;;  %v12058_v49 = vpack.c.bf16 %v9670_v4, %v9669_v13  ;;  %v1900_v56 = vpop.f32.mrb[253].mxu0 }
 0x318   :  { %10148 = vmatmul.mubr.msk.bf16.vlgmr.msra.gmra.mrb[232].mxu1 %vm473_vm0, %v12027_v20  ;;  %v5481_v18 = vmul.f32 %v4713_v27, %v4713_v27  ;;  %v2039_v9 = vpack.c.bf16 %v1887_v8, %v1884_v7  ;;  %v15060_v8 = vld [vmem:[#allocation40_spill] sm:$0xff] }
 0x319   :  { %15053 = vst [vmem:[#allocation87_spill] sm:$0xff] %v12025_v34  ;;  %10156 = vmatpush3.bf16.msra.mxu1 %v2035_v45  ;;  %8247 = vrot.lane.b32.xlu0 %v15056_v58, %s10388_s23  ;;  %v12054_v59 = vrot.slane %v6484_v60, %v11516_v2  ;;  %v5482_v45 = vmul.f32 %v4714_v19, %v4714_v19  ;;  %v4364_v1 = vpop.permute.xlu0 %4363  ;;  %v12060_v58 = vpop.f32.mrb[136].mxu1  ;;  %v15058_v60 = vld [vmem:[#allocation38_spill] sm:$0xff] }
 0x31a   :  { %10157 = vmatprep.subr.bf16.mxu1 %v2036_v38  ;;  %4421 = vrot.lane.b32.xlu1 %v12010_v43, %s10385_s2  ;;  %15057 = vst [vmem:[#allocation37_spill] sm:$0xff] %v12060_v58  ;;  %v12067_v27 = vadd.f32 %v11957_v44, %v5481_v18  ;;  %v4711_v16 = vsub.f32 %v15058_v60, %v4364_v1  ;;  %v4366_v43 = vpop.permute.xlu1 %4365  ;;  %v12070_v13 = vpop.f32.mrb[137].mxu1 }
 0x31b   :  { %10151 = vmatprep.mubr.msk.bf16.mxu1 %vm473_vm0, %v11880_v51  ;;  %15059 = vst [vmem:[#allocation39_spill] sm:$0xff] %v12070_v13  ;;  %v12077_v4 = vadd.f32 %v11967_v40, %v5482_v45  ;;  %v4712_v3 = vsub.f32 %v15060_v8, %v4366_v43  ;;  %v15061_v44 = vcombine.low %v11593_v12, %v11863_v62  ;;  %v12084_v18 = vpop.f32.mrb[138].mxu1  ;;  %v9674_v1 = vpop.f32.mrb[254].mxu0 }
 0x31c   :  { %15062 = vst [vmem:[#allocation38_spill] sm:$0xff] %v12084_v18  ;;  %v5479_v60 = vmul.f32 %v4711_v16, %v4711_v16  ;;  %v12090_v40 = vpop.f32.mrb[139].mxu1  ;;  %v12092_v45 = vpack.c.bf16 %v9674_v1, %v9673_v46  ;;  %v1903_v43 = vpop.f32.mrb[255].mxu0 }
 0x31d   :  { %10158 = vmatpush3.bf16.msra.mxu1 %v2036_v38  ;;  %8263 = vrot.lane.b32.xlu0 %v15061_v44, %s10379_s22  ;;  %15063 = vst [vmem:[#allocation40_spill] sm:$0xff] %v12090_v40  ;;  %v5480_v15 = vmul.f32 %v4712_v3, %v4712_v3  ;;  %v5016_v7 = vpop.permute.xlu0 %5015  ;;  %v12100_v16 = vpack.c.bf16 %v1903_v43, %v1900_v56 }
 0x31e   :  { %10159 = vmatprep.subr.bf16.mxu1 %v2037_v29  ;;  %5073 = vrot.lane.b32.xlu1 %v12084_v18, %s10385_s2  ;;  %v12107_v1 = vadd.f32 %v12006_v33, %v5479_v60  ;;  %v5018_v8 = vpop.permute.xlu1 %5017  ;;  %v15064_v43 = vcombine.high %v11593_v12, %v11863_v62  ;;  %v15069_v62 = vld [vmem:[#allocation49_spill] sm:$0xff] }
 0x31f   :  { %v12114_v56 = vadd.f32 %v12019_v61, %v5480_v15  ;;  %v15067_v61 = vcombine.high %v11585_v42, %v11856_v32  ;;  %v5357_v15 = vadd.f32 %v15069_v62, %v5016_v7  ;;  %v5358_v3 = vadd.f32 %v11205_v11, %v5018_v8  ;;  %v15073_v8 = vld [vmem:[#allocation50_spill] sm:$0xff] }
 0x320   :  { %10152 = vmatmul.mubr.msk.bf16.gmra.mrb[236].mxu1 %vm473_vm0, %v11934_v54  ;;  %v15072_v62 = vcombine.low %v11599_v57, %v11902_v30 }
 0x321   :  { %10160 = vmatpush3.bf16.msra.mxu1 %v2037_v29  ;;  %10163 = vmatprep.mubr.msk.bf16.mxu1 %vm473_vm0, %v11715_v47  ;;  %v5012_v33 = vpop.permute.xlu0 %5011  ;;  %v12123_v29 = vpop.f32.mrb[140].mxu1  ;;  %v5613_v11 = vmul.f32 %v5357_v15, %v5357_v15 }
 0x322   :  { %8279 = vrot.lane.b32.xlu0 %v15064_v43, %s10385_s2  ;;  %10161 = vmatprep.subr.bf16.mxu1 %v12033_v21  ;;  %15065 = vst [vmem:[#allocation88_spill] sm:$0xff] %v12123_v29  ;;  %v5014_v60 = vpop.permute.xlu1 %5013  ;;  %v12125_v46 = vpop.f32.mrb[141].mxu1  ;;  %v5355_v32 = vadd.f32 %v5012_v33, %v15073_v8  ;;  %v15078_v33 = vld [vmem:[#allocation48_spill] sm:$0xff] }
 0x323   :  { %5069 = vrot.lane.b32.xlu1 %v12090_v40, %s10385_s2  ;;  %15066 = vst [vmem:[#allocation89_spill] sm:$0xff] %v12125_v46  ;;  %v12132_v12 = vpop.f32.mrb[142].mxu1 }
 0x324   :  { %15068 = vst [vmem:[#allocation90_spill] sm:$0xff] %v12132_v12  ;;  %v12137_v43 = vpop.f32.mrb[143].mxu1 }
 0x325   :  { %10162 = vmatpush3.bf16.msra.mxu1 %v12033_v21  ;;  %v4376_v38 = vpop.permute.xlu0 %4375  ;;  %v15070_v21 = vld [vmem:[#allocation45_spill] sm:$0xff] }
 0x326   :  { %8007 = vrot.lane.b32.xlu0 %v15067_v61, %s10388_s23  ;;  %10171 = vmatprep.subr.bf16.mxu1 %v2039_v9  ;;  %v4717_v44 = vsub.f32 %v15070_v21, %v4376_v38  ;;  %v4378_v19 = vpop.permute.xlu1 %4377  ;;  %v15071_v61 = vld [vmem:[#allocation47_spill] sm:$0xff] }
 0x327   :  { %4433 = vrot.lane.b32.xlu1 %v12132_v12, %s10385_s2  ;;  %v4718_v7 = vsub.f32 %v15071_v61, %v4378_v19  ;;  %v15074_v38 = vld [vmem:[#allocation51_spill] sm:$0xff]  ;;  %v12155_v19 = vpop.f32.mrb[144].mxu1  ;;  %v15076_v12 = vld [vmem:[#allocation46_spill] sm:$0xff] }
 0x328   :  { %10164 = vmatmul.mubr.msk.bf16.vlgmr.msra.gmra.mrb[240].mxu1 %vm473_vm0, %v12027_v20  ;;  %v5485_v42 = vmul.f32 %v4717_v44, %v4717_v44  ;;  %v5356_v21 = vadd.f32 %v5014_v60, %v15074_v38  ;;  %15075 = vst [vmem:[#allocation49_spill] sm:$0xff] %v12155_v19  ;;  %v12160_v63 = vpop.f32.mrb[145].mxu1 }
 0x329   :  { %10172 = vmatpush3.bf16.msra.mxu1 %v2039_v9  ;;  %10167 = vmatprep.mubr.msk.bf16.mxu1 %vm473_vm0, %v11880_v51  ;;  %v5614_v9 = vmul.f32 %v5358_v3, %v5358_v3  ;;  %v5486_v40 = vmul.f32 %v4718_v7, %v4718_v7  ;;  %v4372_v18 = vpop.permute.xlu0 %4371  ;;  %15077 = vst [vmem:[#allocation45_spill] sm:$0xff] %v12160_v63  ;;  %v12170_v60 = vpop.f32.mrb[146].mxu1 }
 0x32a   :  { %8023 = vrot.lane.b32.xlu0 %v15072_v62, %s10379_s22  ;;  %10173 = vmatprep.subr.bf16.mxu1 %v12058_v49  ;;  %v12157_v61 = vadd.f32 %v5613_v11, %v5485_v42  ;;  %v4715_v62 = vsub.f32 %v15076_v12, %v4372_v18  ;;  %v4374_v22 = vpop.permute.xlu1 %4373  ;;  %v15079_v3 = vcombine.high %v11599_v57, %v11902_v30  ;;  %v15081_v18 = vld [vmem:[#allocation81_spill] sm:$0xff]  ;;  %v15083_v57 = vld [vmem:[#allocation82_spill] sm:$0xff] }
 0x32b   :  { %4429 = vrot.lane.b32.xlu1 %v12137_v43, %s10385_s2  ;;  %v12163_v44 = vadd.f32 %v5614_v9, %v5486_v40  ;;  %v4716_v15 = vsub.f32 %v15078_v33, %v4374_v22  ;;  %15080 = vst [vmem:[#allocation47_spill] sm:$0xff] %v12170_v60  ;;  %v5611_v42 = vmul.f32 %v5355_v32, %v5355_v32  ;;  %v12179_v22 = vpop.f32.mrb[147].mxu1 }
 0x32c   :  { %v7051_v12 = vcombine.low %v15081_v18, %v12157_v61  ;;  %v5483_v40 = vmul.f32 %v4715_v62, %v4715_v62  ;;  %15082 = vst [vmem:[#allocation50_spill] sm:$0xff] %v12179_v22  ;;  %v5612_v7 = vmul.f32 %v5356_v21, %v5356_v21  ;;  %v15084_v21 = vcombine.high %v11605_v55, %v11868_v26  ;;  %v15094_v26 = vld [vmem:[#allocation58_spill] sm:$0xff] }
 0x32d   :  { %10174 = vmatpush3.bf16.msra.mxu1 %v12058_v49  ;;  %v7052_v49 = vcombine.high %v15081_v18, %v12157_v61  ;;  %v5484_v32 = vmul.f32 %v4716_v15, %v4716_v15  ;;  %v5024_v8 = vpop.permute.xlu0 %5023 }
 0x32e   :  { %8039 = vrot.lane.b32.xlu0 %v15079_v3, %s10385_s2  ;;  %10175 = vmatprep.subr.bf16.mxu1 %v12100_v16  ;;  %v12187_v9 = vadd.f32 %v5611_v42, %v5483_v40  ;;  %v5026_v38 = vpop.permute.xlu1 %5025  ;;  %v12207_v42 = vpop.f32.mrb[148].mxu1 }
 0x32f   :  { %5081 = vrot.lane.b32.xlu1 %v12170_v60, %s10385_s2  ;;  %v12190_v61 = vadd.f32 %v5612_v7, %v5484_v32  ;;  %v12211_v40 = vpop.f32.mrb[149].mxu1  ;;  %v15086_v7 = vcombine.low %v11615_v23, %v11942_v25 }
 0x330   :  { %10168 = vmatmul.mubr.msk.bf16.gmra.mrb[244].mxu1 %vm473_vm0, %v11934_v54  ;;  %15085 = vst [vmem:[#allocation51_spill] sm:$0xff] %v12211_v40  ;;  %v12218_v32 = vpop.f32.mrb[150].mxu1 }
 0x331   :  { %10176 = vmatpush3.bf16.msra.mxu1 %v12100_v16  ;;  %v5020_v3 = vpop.permute.xlu0 %5019  ;;  %10179 = vmatprep.mubr.msk.bf16.mxu1 %vm473_vm0, %v11715_v47  ;;  %15087 = vst [vmem:[#allocation46_spill] sm:$0xff] %v12218_v32  ;;  %v12223_v16 = vpop.f32.mrb[151].mxu1  ;;  %v15090_v47 = vld [vmem:[#allocation59_spill] sm:$0xff] }
 0x332   :  { %8055 = vrot.lane.b32.xlu0 %v15084_v21, %s10388_s23  ;;  %10177 = vmatprep.subr.bf16.mxu1 %v12092_v45  ;;  %v5022_v18 = vpop.permute.xlu1 %5021  ;;  %v15088_v21 = vld [vmem:[#allocation57_spill] sm:$0xff]  ;;  %15089 = vst [vmem:[#allocation48_spill] sm:$0xff] %v12223_v16  ;;  %v5362_v33 = vadd.f32 %v15090_v47, %v5026_v38  ;;  %v5359_v38 = vadd.f32 %v5020_v3, %v15094_v26 }
 0x333   :  { %5077 = vrot.lane.b32.xlu1 %v12179_v22, %s10385_s2  ;;  %v5361_v15 = vadd.f32 %v15088_v21, %v5024_v8  ;;  %v15093_v8 = vcombine.high %v11615_v23, %v11942_v25  ;;  %v15099_v25 = vld [vmem:[#allocation52_spill] sm:$0xff] }
 0x334   :  { %v12249_v26 = vrot.slane %v7052_v49, %v15099_v25 }
 0x335   :  { %10178 = vmatpush3.bf16.msra.mxu1 %v12092_v45  ;;  %v4384_v62 = vpop.permute.xlu0 %4383  ;;  %v15091_v45 = vld [vmem:[#allocation53_spill] sm:$0xff]  ;;  %v5617_v21 = vmul.f32 %v5361_v15, %v5361_v15  ;;  %v12246_v15 = vrot.slane %v7051_v12, %v15099_v25 }
 0x336   :  { %8071 = vrot.lane.b32.xlu0 %v15086_v7, %s10379_s22  ;;  %v4721_v11 = vsub.f32 %v15091_v45, %v4384_v62  ;;  %v4386_v30 = vpop.permute.xlu1 %4385  ;;  %v15092_v7 = vld [vmem:[#allocation55_spill] sm:$0xff]  ;;  %v15095_v62 = vld [vmem:[#allocation60_spill] sm:$0xff] }
 0x337   :  { %4441 = vrot.lane.b32.xlu1 %v12218_v32, %s10385_s2  ;;  %v4722_v22 = vsub.f32 %v15092_v7, %v4386_v30  ;;  %v5360_v45 = vadd.f32 %v5022_v18, %v15095_v62  ;;  %v15097_v7 = vld [vmem:[#allocation54_spill] sm:$0xff] }
 0x338   :  { %10180 = vmatmul.mubr.msk.bf16.vlgmr.msra.gmra.mrb[248].mxu1 %vm473_vm0, %v12027_v20  ;;  %v5489_v47 = vmul.f32 %v4721_v11, %v4721_v11  ;;  %v5618_v20 = vmul.f32 %v5362_v33, %v5362_v33  ;;  %v15100_v33 = vld [vmem:[#allocation56_spill] sm:$0xff] }
 0x339   :  { %10183 = vmatprep.mubr.msk.bf16.mxu1 %vm473_vm0, %v11880_v51  ;;  %v5490_v55 = vmul.f32 %v4722_v22, %v4722_v22  ;;  %v4380_v60 = vpop.permute.xlu0 %4379  ;;  %v12240_v51 = vpop.f32.mrb[152].mxu1  ;;  %v15101_v22 = vcombine.high %v11621_v50, %v11918_v36  ;;  %v15119_v50 = vld [vmem:[#allocation63_spill] sm:$0xff] }
 0x33a   :  { %8087 = vrot.lane.b32.xlu0 %v15093_v8, %s10385_s2  ;;  %15096 = vst [vmem:[#allocation81_spill] sm:$0xff] %v12240_v51  ;;  %v5745_v30 = vadd.f32 %v5617_v21, %v5489_v47  ;;  %v4719_v32 = vsub.f32 %v15097_v7, %v4380_v60  ;;  %v4382_v40 = vpop.permute.xlu1 %4381  ;;  %v12243_v23 = vpop.f32.mrb[153].mxu1  ;;  %v5615_v60 = vmul.f32 %v5359_v38, %v5359_v38 }
 0x33b   :  { %4437 = vrot.lane.b32.xlu1 %v12223_v16, %s10385_s2  ;;  %15098 = vst [vmem:[#allocation82_spill] sm:$0xff] %v12243_v23  ;;  %v5746_v11 = vadd.f32 %v5618_v20, %v5490_v55  ;;  %v4720_v3 = vsub.f32 %v15100_v33, %v4382_v40  ;;  %v12256_v18 = vpop.f32.mrb[154].mxu1  ;;  %v5616_v55 = vmul.f32 %v5360_v45, %v5360_v45 }
 0x33c   :  { %15102 = vst [vmem:[#allocation57_spill] sm:$0xff] %v12256_v18  ;;  %v7067_v8 = vcombine.low %v12067_v27, %v5745_v30  ;;  %v7068_v21 = vcombine.high %v12067_v27, %v5745_v30  ;;  %v5487_v12 = vmul.f32 %v4719_v32, %v4719_v32  ;;  %v12262_v49 = vpop.f32.mrb[155].mxu1  ;;  %v15104_v27 = vcombine.low %v15083_v57, %v12163_v44 }
 0x33d   :  { %15103 = vst [vmem:[#allocation59_spill] sm:$0xff] %v12262_v49  ;;  %v7611_v40 = vcombine.low %v12077_v4, %v5746_v11  ;;  %v7612_v47 = vcombine.high %v12077_v4, %v5746_v11  ;;  %v5488_v20 = vmul.f32 %v4720_v3, %v4720_v3  ;;  %v5032_v62 = vpop.permute.xlu0 %5031  ;;  %v15105_v4 = vcombine.high %v15083_v57, %v12163_v44 }
 0x33e   :  { %8295 = vrot.lane.b32.xlu0 %v15101_v22, %s10388_s23  ;;  %v12272_v32 = vrot.slane %v15104_v27, %v15099_v25  ;;  %v12275_v38 = vrot.slane %v7067_v8, %v15099_v25  ;;  %v12278_v45 = vrot.slane %v7068_v21, %v15099_v25  ;;  %v5743_v30 = vadd.f32 %v5615_v60, %v5487_v12  ;;  %v5034_v7 = vpop.permute.xlu1 %5033 }
 0x33f   :  { %5089 = vrot.lane.b32.xlu1 %v12256_v18, %s10385_s2  ;;  %v12284_v11 = vrot.slane %v15105_v4, %v15099_v25  ;;  %v12290_v33 = vrot.slane %v7612_v47, %v15099_v25  ;;  %v5744_v3 = vadd.f32 %v5616_v55, %v5488_v20  ;;  %v15106_v22 = vcombine.high %v11627_v5, %v11924_v31  ;;  %v12310_v20 = vpop.f32.mrb[156].mxu1  ;;  %v15121_v18 = vld [vmem:[#allocation66_spill] sm:$0xff] }
 0x340   :  { %10184 = vmatmul.mubr.msk.bf16.gmra.mrb[252].mxu1 %vm473_vm0, %v11934_v54  ;;  %v12287_v54 = vrot.slane %v7611_v40, %v15099_v25  ;;  %v5979_v57 = vcombine.low %v12107_v1, %v5743_v30  ;;  %v5980_v8 = vcombine.high %v12107_v1, %v5743_v30  ;;  %15107 = vst [vmem:[#allocation53_spill] sm:$0xff] %v12310_v20  ;;  %v12330_v12 = vpop.f32.mrb[157].mxu1 }
 0x341   :  { %v6523_v55 = vcombine.low %v12114_v56, %v5744_v3  ;;  %v6524_v40 = vcombine.high %v12114_v56, %v5744_v3  ;;  %v5028_v47 = vpop.permute.xlu0 %5027  ;;  %v15108_v1 = vcombine.low %v11938_v17, %v12187_v9  ;;  %v15109_v30 = vcombine.high %v11938_v17, %v12187_v9  ;;  %15110 = vst [vmem:[#allocation55_spill] sm:$0xff] %v12330_v12  ;;  %v12354_v44 = vpop.f32.mrb[158].mxu1 }
 0x342   :  { %8343 = vrot.lane.b32.xlu0 %v15106_v22, %s10388_s23  ;;  %v12325_v22 = vrot.slane %v5979_v57, %v15099_v25  ;;  %v12328_v56 = vrot.slane %v5980_v8, %v15099_v25  ;;  %v5030_v3 = vpop.permute.xlu1 %5029  ;;  %v15112_v17 = vcombine.high %v11948_v53, %v12190_v61  ;;  %15114 = vst [vmem:[#allocation58_spill] sm:$0xff] %v12354_v44 }
 0x343   :  { %5085 = vrot.lane.b32.xlu1 %v12262_v49, %s10385_s2  ;;  %v12316_v27 = vrot.slane %v15108_v1, %v15099_v25  ;;  %v12322_v4 = vrot.slane %v15109_v30, %v15099_v25  ;;  %v15111_v1 = vcombine.low %v11948_v53, %v12190_v61  ;;  %v12345_v57 = vrot.slane %v6523_v55, %v15099_v25  ;;  %v15115_v61 = vld [vmem:[#allocation65_spill] sm:$0xff]  ;;  %v12363_v55 = vpop.f32.mrb[159].mxu1 }
 0x344   :  { %v12342_v9 = vrot.slane %v15112_v17, %v15099_v25  ;;  %v12348_v8 = vrot.slane %v6524_v40, %v15099_v25  ;;  %v15113_v30 = vcombine.low %v11640_v39, %v11955_v0  ;;  %v5365_v17 = vadd.f32 %v15115_v61, %v5032_v62  ;;  %15116 = vst [vmem:[#allocation60_spill] sm:$0xff] %v12363_v55  ;;  %v15118_v53 = vld [vmem:[#allocation61_spill] sm:$0xff] }
 0x345   :  { %v12336_v21 = vrot.slane %v15111_v1, %v15099_v25  ;;  %v15117_v1 = vld [vmem:[#allocation67_spill] sm:$0xff]  ;;  %v4392_v5 = vpop.permute.xlu0 %4391  ;;  %v15120_v40 = vcombine.low %v11659_v37, %v11986_v14  ;;  %v12388_v16 = vpop.f32.mrb[160].mxu1 }
 0x346   :  { %8311 = vrot.lane.b32.xlu0 %v15113_v30, %s10379_s22  ;;  %v5366_v31 = vadd.f32 %v15117_v1, %v5034_v7  ;;  %v4725_v36 = vsub.f32 %v15118_v53, %v4392_v5  ;;  %v4394_v62 = vpop.permute.xlu1 %4393  ;;  %v5621_v60 = vmul.f32 %v5365_v17, %v5365_v17  ;;  %v5363_v7 = vadd.f32 %v5028_v47, %v15121_v18  ;;  %v15124_v18 = vld [vmem:[#allocation62_spill] sm:$0xff]  ;;  %v12395_v30 = vpop.f32.mrb[161].mxu1  ;;  %v15138_v5 = vld [vmem:[#allocation13_spill] sm:$0xff] }
 0x347   :  { %4449 = vrot.lane.b32.xlu1 %v12354_v44, %s10385_s2  ;;  %v4726_v49 = vsub.f32 %v15119_v50, %v4394_v62  ;;  %v15122_v50 = vld [vmem:[#allocation68_spill] sm:$0xff]  ;;  %15123 = vst [vmem:[#allocation54_spill] sm:$0xff] %v12388_v16  ;;  %15125 = vst [vmem:[#allocation52_spill] sm:$0xff] %v12395_v30 }
 0x348   :  { %v5493_v1 = vmul.f32 %v4725_v36, %v4725_v36  ;;  %v5622_v53 = vmul.f32 %v5366_v31, %v5366_v31  ;;  %v5364_v62 = vadd.f32 %v5030_v3, %v15122_v50  ;;  %v15126_v3 = vld [vmem:[#allocation64_spill] sm:$0xff]  ;;  %v15127_v50 = vcombine.high %v11640_v39, %v11955_v0 }
 0x349   :  { %v5494_v61 = vmul.f32 %v4726_v49, %v4726_v49  ;;  %v4388_v44 = vpop.permute.xlu0 %4387 }
 0x34a   :  { %8359 = vrot.lane.b32.xlu0 %v15120_v40, %s10379_s22  ;;  %v12392_v17 = vadd.f32 %v5621_v60, %v5493_v1  ;;  %v4723_v36 = vsub.f32 %v15124_v18, %v4388_v44  ;;  %v4390_v47 = vpop.permute.xlu1 %4389  ;;  %v12406_v40 = vpop.f32.mrb[162].mxu1  ;;  %v5619_v60 = vmul.f32 %v5363_v7, %v5363_v7  ;;  %v15130_v7 = vcombine.high %v11659_v37, %v11986_v14  ;;  %v15137_v14 = vld [vmem:[#allocation70_spill] sm:$0xff] }
 0x34b   :  { %4445 = vrot.lane.b32.xlu1 %v12363_v55, %s10385_s2  ;;  %v12399_v31 = vadd.f32 %v5622_v53, %v5494_v61  ;;  %v4724_v49 = vsub.f32 %v15126_v3, %v4390_v47  ;;  %15128 = vst [vmem:[#allocation56_spill] sm:$0xff] %v12406_v40  ;;  %v12410_v44 = vpop.f32.mrb[163].mxu1  ;;  %v5620_v53 = vmul.f32 %v5364_v62, %v5364_v62  ;;  %v15139_v55 = vld [vmem:[#allocation16_spill] sm:$0xff] }
 0x34c   :  { %v5491_v1 = vmul.f32 %v4723_v36, %v4723_v36  ;;  %15129 = vst [vmem:[#allocation65_spill] sm:$0xff] %v12410_v44 }
 0x34d   :  { %v5492_v18 = vmul.f32 %v4724_v49, %v4724_v49  ;;  %v5040_v47 = vpop.permute.xlu0 %5039  ;;  %v12426_v62 = vpop.f32.mrb[164].mxu1 }
 0x34e   :  { %8327 = vrot.lane.b32.xlu0 %v15127_v50, %s10385_s2  ;;  %v12416_v39 = vadd.f32 %v5619_v60, %v5491_v1  ;;  %v5042_v0 = vpop.permute.xlu1 %5041  ;;  %15131 = vst [vmem:[#allocation67_spill] sm:$0xff] %v12426_v62  ;;  %v12428_v61 = vpop.f32.mrb[165].mxu1  ;;  %v15133_v60 = vcombine.high %v11648_v10, %v11979_v48 }
 0x34f   :  { %5097 = vrot.lane.b32.xlu1 %v12406_v40, %s10385_s2  ;;  %v12418_v50 = vadd.f32 %v5620_v53, %v5492_v18  ;;  %15132 = vst [vmem:[#allocation61_spill] sm:$0xff] %v12428_v61  ;;  %v12434_v1 = vpop.f32.mrb[166].mxu1  ;;  %v15135_v53 = vld [vmem:[#allocation14_spill] sm:$0xff] }
 0x350   :  { %15134 = vst [vmem:[#allocation63_spill] sm:$0xff] %v12434_v1  ;;  %v5369_v18 = vadd.f32 %v15135_v53, %v5040_v47  ;;  %v12439_v37 = vpop.f32.mrb[167].mxu1  ;;  %v15141_v47 = vld [vmem:[#allocation69_spill] sm:$0xff] }
 0x351   :  { %v5036_v36 = vpop.permute.xlu0 %5035  ;;  %15136 = vst [vmem:[#allocation66_spill] sm:$0xff] %v12439_v37 }
 0x352   :  { %8375 = vrot.lane.b32.xlu0 %v15130_v7, %s10385_s2  ;;  %v5038_v49 = vpop.permute.xlu1 %5037  ;;  %v5370_v7 = vadd.f32 %v15137_v14, %v5042_v0  ;;  %v5625_v48 = vmul.f32 %v5369_v18, %v5369_v18  ;;  %v5367_v53 = vadd.f32 %v5036_v36, %v15141_v47  ;;  %v15142_v0 = vld [vmem:[#allocation21_spill] sm:$0xff] }
 0x353   :  { %5093 = vrot.lane.b32.xlu1 %v12410_v44, %s10385_s2  ;;  %v5368_v14 = vadd.f32 %v5038_v49, %v15142_v0 }
 0x354   :  { %v5623_v49 = vmul.f32 %v5367_v53, %v5367_v53 }
 0x355   :  { %v4400_v3 = vpop.permute.xlu0 %4399 }
 0x356   :  { %8103 = vrot.lane.b32.xlu0 %v15133_v60, %s10388_s23  ;;  %v4729_v44 = vsub.f32 %v15138_v5, %v4400_v3  ;;  %v4402_v40 = vpop.permute.xlu1 %4401  ;;  %v15140_v60 = vcombine.low %v11677_v41, %v12017_v28  ;;  %v12452_v3 = vpop.f32.mrb[168].mxu1 }
 0x357   :  { %4457 = vrot.lane.b32.xlu1 %v12434_v1, %s10385_s2  ;;  %v4730_v61 = vsub.f32 %v15139_v55, %v4402_v40  ;;  %v5626_v1 = vmul.f32 %v5370_v7, %v5370_v7  ;;  %15143 = vst [vmem:[#allocation68_spill] sm:$0xff] %v12452_v3  ;;  %v15144_v40 = vld [vmem:[#allocation15_spill] sm:$0xff]  ;;  %v15147_v7 = vcombine.high %v11677_v41, %v12017_v28 }
 0x358   :  { %v5497_v10 = vmul.f32 %v4729_v44, %v4729_v44  ;;  %v15146_v44 = vld [vmem:[#allocation12_spill] sm:$0xff]  ;;  %v15150_v41 = vcombine.high %v11667_v52, %v12025_v34  ;;  %v15159_v52 = vld [vmem:[#allocation22_spill] sm:$0xff] }
 0x359   :  { %v5498_v62 = vmul.f32 %v4730_v61, %v4730_v61  ;;  %v4396_v5 = vpop.permute.xlu0 %4395 }
 0x35a   :  { %8119 = vrot.lane.b32.xlu0 %v15140_v60, %s10379_s22  ;;  %v12454_v55 = vadd.f32 %v5625_v48, %v5497_v10  ;;  %v4727_v30 = vsub.f32 %v15144_v40, %v4396_v5  ;;  %v4398_v16 = vpop.permute.xlu1 %4397  ;;  %v12457_v60 = vpop.f32.mrb[169].mxu1  ;;  %v5624_v48 = vmul.f32 %v5368_v14, %v5368_v14  ;;  %v15153_v40 = vcombine.low %v11683_v35, %v12054_v59 }
 0x35b   :  { %4453 = vrot.lane.b32.xlu1 %v12439_v37, %s10385_s2  ;;  %15145 = vst [vmem:[#allocation62_spill] sm:$0xff] %v12457_v60  ;;  %v12459_v18 = vadd.f32 %v5626_v1, %v5498_v62  ;;  %v4728_v36 = vsub.f32 %v15146_v44, %v4398_v16  ;;  %v12466_v61 = vpop.f32.mrb[170].mxu1 }
 0x35c   :  { %15148 = vst [vmem:[#allocation64_spill] sm:$0xff] %v12466_v61  ;;  %v5495_v47 = vmul.f32 %v4727_v30, %v4727_v30  ;;  %v12470_v10 = vpop.f32.mrb[171].mxu1 }
 0x35d   :  { %15149 = vst [vmem:[#allocation14_spill] sm:$0xff] %v12470_v10  ;;  %v5496_v0 = vmul.f32 %v4728_v36, %v4728_v36  ;;  %v5048_v62 = vpop.permute.xlu0 %5047  ;;  %v12482_v30 = vpop.f32.mrb[172].mxu1  ;;  %v15155_v36 = vld [vmem:[#allocation20_spill] sm:$0xff] }
 0x35e   :  { %8135 = vrot.lane.b32.xlu0 %v15147_v7, %s10385_s2  ;;  %v12472_v1 = vadd.f32 %v5623_v49, %v5495_v47  ;;  %v5050_v16 = vpop.permute.xlu1 %5049  ;;  %15151 = vst [vmem:[#allocation70_spill] sm:$0xff] %v12482_v30  ;;  %v12484_v14 = vpop.f32.mrb[173].mxu1  ;;  %v5373_v7 = vadd.f32 %v15155_v36, %v5048_v62  ;;  %v15157_v47 = vld [vmem:[#allocation74_spill] sm:$0xff]  ;;  %v15161_v62 = vld [vmem:[#allocation29_spill] sm:$0xff] }
 0x35f   :  { %5105 = vrot.lane.b32.xlu1 %v12466_v61, %s10385_s2  ;;  %v12474_v5 = vadd.f32 %v5624_v48, %v5496_v0  ;;  %15152 = vst [vmem:[#allocation13_spill] sm:$0xff] %v12484_v14  ;;  %v12490_v44 = vpop.f32.mrb[174].mxu1  ;;  %v5374_v48 = vadd.f32 %v15157_v47, %v5050_v16  ;;  %v15162_v16 = vld [vmem:[#allocation76_spill] sm:$0xff] }
 0x360   :  { %15154 = vst [vmem:[#allocation16_spill] sm:$0xff] %v12490_v44  ;;  %v12495_v49 = vpop.f32.mrb[175].mxu1  ;;  %v5629_v37 = vmul.f32 %v5373_v7, %v5373_v7 }
 0x361   :  { %v5044_v28 = vpop.permute.xlu0 %5043  ;;  %15156 = vst [vmem:[#allocation69_spill] sm:$0xff] %v12495_v49 }
 0x362   :  { %8151 = vrot.lane.b32.xlu0 %v15150_v41, %s10388_s23  ;;  %v5046_v53 = vpop.permute.xlu1 %5045  ;;  %v15158_v41 = vld [vmem:[#allocation23_spill] sm:$0xff]  ;;  %v5371_v36 = vadd.f32 %v5044_v28, %v15161_v62 }
 0x363   :  { %5101 = vrot.lane.b32.xlu1 %v12470_v10, %s10385_s2  ;;  %v5372_v47 = vadd.f32 %v5046_v53, %v15162_v16 }
 0x365   :  { %v4408_v0 = vpop.permute.xlu0 %4407 }
 0x366   :  { %8167 = vrot.lane.b32.xlu0 %v15153_v40, %s10379_s22  ;;  %v4733_v10 = vsub.f32 %v15158_v41, %v4408_v0  ;;  %v4410_v34 = vpop.permute.xlu1 %4409  ;;  %v15160_v40 = vcombine.high %v11683_v35, %v12054_v59  ;;  %v12508_v41 = vpop.f32.mrb[176].mxu1 }
 0x367   :  { %4465 = vrot.lane.b32.xlu1 %v12490_v44, %s10385_s2  ;;  %v4734_v61 = vsub.f32 %v15159_v52, %v4410_v34  ;;  %v5630_v44 = vmul.f32 %v5374_v48, %v5374_v48  ;;  %15163 = vst [vmem:[#allocation21_spill] sm:$0xff] %v12508_v41  ;;  %v15164_v34 = vld [vmem:[#allocation17_spill] sm:$0xff]  ;;  %v12513_v59 = vpop.f32.mrb[177].mxu1  ;;  %v15195_v41 = vld [vmem:[#allocation42_spill] sm:$0xff] }
 0x368   :  { %v5501_v14 = vmul.f32 %v4733_v10, %v4733_v10  ;;  %15165 = vst [vmem:[#allocation15_spill] sm:$0xff] %v12513_v59  ;;  %v15166_v10 = vld [vmem:[#allocation24_spill] sm:$0xff]  ;;  %v12520_v48 = vpop.f32.mrb[178].mxu1 }
 0x369   :  { %v5502_v30 = vmul.f32 %v4734_v61, %v4734_v61  ;;  %v4404_v0 = vpop.permute.xlu0 %4403  ;;  %15168 = vst [vmem:[#allocation12_spill] sm:$0xff] %v12520_v48  ;;  %v5627_v61 = vmul.f32 %v5371_v36, %v5371_v36 }
 0x36a   :  { %8183 = vrot.lane.b32.xlu0 %v15160_v40, %s10385_s2  ;;  %v12510_v52 = vadd.f32 %v5629_v37, %v5501_v14  ;;  %v4731_v60 = vsub.f32 %v15164_v34, %v4404_v0  ;;  %v4406_v35 = vpop.permute.xlu1 %4405  ;;  %v15167_v40 = vld [vmem:[#allocation80_spill] sm:$0xff] }
 0x36b   :  { %4461 = vrot.lane.b32.xlu1 %v12495_v49, %s10385_s2  ;;  %v12515_v7 = vadd.f32 %v5630_v44, %v5502_v30  ;;  %v4732_v28 = vsub.f32 %v15166_v10, %v4406_v35  ;;  %v12528_v30 = vpop.f32.mrb[179].mxu1  ;;  %v5628_v44 = vmul.f32 %v5372_v47, %v5372_v47  ;;  %v15176_v47 = vld [vmem:[#allocation28_spill] sm:$0xff] }
 0x36c   :  { %v7083_v53 = vcombine.low %v12392_v17, %v12510_v52  ;;  %v7084_v37 = vcombine.high %v12392_v17, %v12510_v52  ;;  %v5499_v14 = vmul.f32 %v4731_v60, %v4731_v60  ;;  %15169 = vst [vmem:[#allocation20_spill] sm:$0xff] %v12528_v30  ;;  %v15170_v17 = vld [vmem:[#allocation32_spill] sm:$0xff] }
 0x36d   :  { %v7627_v62 = vcombine.low %v12399_v31, %v12515_v7  ;;  %v7628_v16 = vcombine.high %v12399_v31, %v12515_v7  ;;  %v5500_v36 = vmul.f32 %v4732_v28, %v4732_v28  ;;  %v5056_v0 = vpop.permute.xlu0 %5055  ;;  %v12546_v28 = vpop.f32.mrb[180].mxu1 }
 0x36e   :  { %5063 = vrot.lane.b32.xlu0 %v15167_v40, %s10385_s2  ;;  %v5755_v34 = vadd.f32 %v5627_v61, %v5499_v14  ;;  %15171 = vst [vmem:[#allocation74_spill] sm:$0xff] %v12546_v28  ;;  %v12548_v14 = vpop.f32.mrb[181].mxu1  ;;  %v15179_v40 = vcombine.low %v12249_v26, %v12278_v45 }
 0x36f   :  { %5113 = vrot.lane.b32.xlu1 %v12520_v48, %s10385_s2  ;;  %v5058_v35 = vpop.permute.xlu1 %5057  ;;  %v12534_v10 = vadd.f32 %v5628_v44, %v5500_v36  ;;  %15172 = vst [vmem:[#allocation23_spill] sm:$0xff] %v12548_v14  ;;  %v15173_v44 = vld [vmem:[#allocation41_spill] sm:$0xff]  ;;  %v12552_v36 = vpop.f32.mrb[182].mxu1 }
 0x370   :  { %v5995_v60 = vcombine.low %v12416_v39, %v5755_v34  ;;  %v5996_v52 = vcombine.high %v12416_v39, %v5755_v34  ;;  %15174 = vst [vmem:[#allocation22_spill] sm:$0xff] %v12552_v36  ;;  %v15175_v39 = vcombine.low %v12246_v15, %v12275_v38  ;;  %v12563_v31 = vpop.f32.mrb[183].mxu1 }
 0x371   :  { %v5052_v7 = vpop.permute.xlu0 %5051  ;;  %15177 = vst [vmem:[#allocation29_spill] sm:$0xff] %v12563_v31 }
 0x372   :  { %5059 = vrot.lane.b32.xlu0 %v15170_v17, %s10385_s2  ;;  %v12558_v34 = vrot.slane %v15175_v39, %v11516_v2  ;;  %v15178_v17 = vcombine.high %v12246_v15, %v12275_v38  ;;  %v15183_v39 = vld [vmem:[#allocation35_spill] sm:$0xff]  ;;  %v15184_v15 = vcombine.high %v12249_v26, %v12278_v45  ;;  %v15190_v26 = vcombine.high %v12316_v27, %v12325_v22 }
 0x373   :  { %5109 = vrot.lane.b32.xlu1 %v12528_v30, %s10385_s2  ;;  %v5054_v61 = vpop.permute.xlu1 %5053  ;;  %v5377_v30 = vadd.f32 %v15176_v47, %v5056_v0  ;;  %v15181_v0 = vcombine.low %v12316_v27, %v12325_v22  ;;  %v15196_v27 = vcombine.high %v12272_v32, %v12287_v54 }
 0x374   :  { %v12569_v48 = vrot.slane %v15178_v17, %v11516_v2  ;;  %v12588_v38 = vrot.slane %v15184_v15, %v11516_v2  ;;  %v12607_v45 = vrot.slane %v15190_v26, %v11516_v2  ;;  %v15191_v15 = vcombine.high %v12322_v4, %v12328_v56 }
 0x375   :  { %v12581_v47 = vrot.slane %v15181_v0, %v11516_v2  ;;  %v15187_v0 = vcombine.low %v12272_v32, %v12287_v54  ;;  %v12628_v22 = vrot.slane %v15196_v27, %v11516_v2  ;;  %v15201_v27 = vld [vmem:[#allocation36_spill] sm:$0xff] }
 0x376   :  { %4423 = vrot.lane.b32.xlu0 %v15173_v44, %s10385_s2  ;;  %v12575_v44 = vrot.slane %v15179_v40, %v11516_v2  ;;  %v4416_v49 = vpop.permute.xlu0 %4415  ;;  %v15185_v40 = vcombine.low %v12322_v4, %v12328_v56  ;;  %v15197_v4 = vcombine.high %v12284_v11, %v12290_v33 }
 0x377   :  { %4473 = vrot.lane.b32.xlu1 %v12552_v36, %s10385_s2  ;;  %15182 = vst [vmem:[#allocation17_spill] sm:$0xff] %v12581_v47  ;;  %v5378_v36 = vadd.f32 %v15183_v39, %v5058_v35  ;;  %v12600_v14 = vrot.slane %v15187_v0, %v11516_v2  ;;  %v15189_v35 = vld [vmem:[#allocation25_spill] sm:$0xff]  ;;  %v4418_v28 = vpop.permute.xlu1 %4417  ;;  %v15192_v0 = vcombine.low %v12284_v11, %v12290_v33 }
 0x378   :  { %15180 = vst [vmem:[#allocation76_spill] sm:$0xff] %v12575_v44  ;;  %v12594_v17 = vrot.slane %v15185_v40, %v11516_v2  ;;  %v4737_v39 = vsub.f32 %v15189_v35, %v4416_v49  ;;  %v12613_v40 = vrot.slane %v15191_v15, %v11516_v2  ;;  %v15194_v49 = vld [vmem:[#allocation26_spill] sm:$0xff]  ;;  %v12634_v56 = vrot.slane %v15197_v4, %v11516_v2 }
 0x379   :  { %15188 = vst [vmem:[#allocation28_spill] sm:$0xff] %v12600_v14  ;;  %v12619_v59 = vrot.slane %v15192_v0, %v11516_v2  ;;  %v4738_v35 = vsub.f32 %v15194_v49, %v4418_v28  ;;  %v15198_v28 = vcombine.low %v12336_v21, %v12345_v57  ;;  %v12643_v15 = vrot.slane %v7083_v53, %v15099_v25  ;;  %v15200_v49 = vld [vmem:[#allocation78_spill] sm:$0xff] }
 0x37a   :  { %15186 = vst [vmem:[#allocation24_spill] sm:$0xff] %v12594_v17  ;;  %4419 = vrot.lane.b32.xlu0 %v15195_v41, %s10385_s2  ;;  %v5633_v0 = vmul.f32 %v5377_v30, %v5377_v30  ;;  %v5375_v32 = vadd.f32 %v5052_v7, %v15200_v49  ;;  %v5505_v54 = vmul.f32 %v4737_v39, %v4737_v39  ;;  %v4412_v3 = vpop.permute.xlu0 %4411  ;;  %v15203_v39 = vld [vmem:[#allocation27_spill] sm:$0xff] }
 0x37b   :  { %15193 = vst [vmem:[#allocation35_spill] sm:$0xff] %v12619_v59  ;;  %v12640_v26 = vrot.slane %v15198_v28, %v11516_v2  ;;  %4469 = vrot.lane.b32.xlu1 %v12563_v31, %s10385_s2  ;;  %v12649_v11 = vrot.slane %v7084_v37, %v15099_v25  ;;  %v5634_v33 = vmul.f32 %v5378_v36, %v5378_v36  ;;  %v12652_v28 = vpop.f32.mrb[184].mxu1  ;;  %v4414_v31 = vpop.permute.xlu1 %4413 }
 0x37c   :  { %v5376_v4 = vadd.f32 %v5054_v61, %v15201_v27  ;;  %v5506_v41 = vmul.f32 %v4738_v35, %v4738_v35  ;;  %15202 = vst [vmem:[#allocation26_spill] sm:$0xff] %v12652_v28  ;;  %v12655_v53 = vrot.slane %v7627_v62, %v15099_v25  ;;  %v12658_v30 = vrot.slane %v7628_v16, %v15099_v25  ;;  %v12661_v12 = vpop.f32.mrb[185].mxu1  ;;  %v15205_v35 = vld [vmem:[#allocation30_spill] sm:$0xff] }
 0x37d   :  { %15199 = vst [vmem:[#allocation25_spill] sm:$0xff] %v12640_v26  ;;  %v5761_v7 = vadd.f32 %v5633_v0, %v5505_v54  ;;  %v4735_v49 = vsub.f32 %v15203_v39, %v4412_v3  ;;  %15204 = vst [vmem:[#allocation78_spill] sm:$0xff] %v12661_v12  ;;  %v12664_v37 = vrot.slane %v5995_v60, %v15099_v25  ;;  %v12672_v62 = vpop.f32.mrb[186].mxu1 }
 0x37e   :  { %v12667_v61 = vrot.slane %v5996_v52, %v15099_v25  ;;  %v5762_v36 = vadd.f32 %v5634_v33, %v5506_v41  ;;  %v4736_v27 = vsub.f32 %v15205_v35, %v4414_v31  ;;  %5071 = vrot.lane.b32.xlu0 %v12060_v58, %s10385_s2  ;;  %15206 = vst [vmem:[#allocation36_spill] sm:$0xff] %v12672_v62  ;;  %v12678_v60 = vpop.f32.mrb[187].mxu1  ;;  %v8200_v39 = vpop.permute.xlu0 %8199 }
 0x37f   :  { %v5631_v16 = vmul.f32 %v5375_v32, %v5375_v32  ;;  %v7099_v3 = vcombine.low %v12454_v55, %v5761_v7  ;;  %v7100_v0 = vcombine.high %v12454_v55, %v5761_v7  ;;  %v5503_v54 = vmul.f32 %v4735_v49, %v4735_v49  ;;  %5121 = vrot.lane.b32.xlu1 %v12672_v62, %s10385_s2  ;;  %v5066_v62 = vpop.permute.xlu1 %5065 }
 0x380   :  { %15207 = vst [vmem:[#allocation27_spill] sm:$0xff] %v12678_v60  ;;  %v5632_v41 = vmul.f32 %v5376_v4, %v5376_v4  ;;  %v7643_v52 = vcombine.low %v12459_v18, %v5762_v36  ;;  %v7644_v31 = vcombine.high %v12459_v18, %v5762_v36  ;;  %v5504_v33 = vmul.f32 %v4736_v27, %v4736_v27 }
 0x381   :  { %v15208_v32 = vcombine.low %v12418_v50, %v12534_v10  ;;  %v7107_v55 = vrot.slane %v7099_v3, %v15099_v25  ;;  %v7114_v7 = vrot.slane %v7100_v0, %v15099_v25  ;;  %v5759_v49 = vadd.f32 %v5631_v16, %v5503_v54 }
 0x382   :  { %v15209_v4 = vcombine.high %v12418_v50, %v12534_v10  ;;  %v12697_v18 = vrot.slane %v7643_v52, %v15099_v25  ;;  %v12700_v36 = vrot.slane %v7644_v31, %v15099_v25  ;;  %v5760_v27 = vadd.f32 %v5632_v41, %v5504_v33  ;;  %5067 = vrot.lane.b32.xlu0 %v12070_v13, %s10385_s2  ;;  %v8216_v31 = vpop.permute.xlu0 %8215  ;;  %v12716_v33 = vpop.f32.mrb[188].mxu1 }
 0x383   :  { %v12686_v35 = vrot.slane %v15208_v32, %v15099_v25  ;;  %v7147_v3 = vcombine.low %v12643_v15, %v7107_v55  ;;  %v7163_v16 = vcombine.low %v12649_v11, %v7114_v7  ;;  %v6011_v0 = vcombine.low %v12472_v1, %v5759_v49  ;;  %5117 = vrot.lane.b32.xlu1 %v12678_v60, %s10385_s2  ;;  %v15212_v60 = vld [vmem:[#allocation44_spill] sm:$0xff]  ;;  %v5062_v12 = vpop.permute.xlu1 %5061  ;;  %v12725_v28 = vpop.f32.mrb[189].mxu1 }
 0x384   :  { %v12694_v58 = vrot.slane %v15209_v4, %v15099_v25  ;;  %v6012_v50 = vcombine.high %v12472_v1, %v5759_v49  ;;  %v7691_v10 = vcombine.low %v12655_v53, %v12697_v18  ;;  %v7707_v54 = vcombine.low %v12658_v30, %v12700_v36  ;;  %15210 = vst [vmem:[#allocation30_spill] sm:$0xff] %v12716_v33 }
 0x385   :  { %v6555_v41 = vcombine.low %v12474_v5, %v5760_v27  ;;  %v6556_v52 = vcombine.high %v12474_v5, %v5760_v27  ;;  %v6019_v32 = vrot.slane %v6011_v0, %v15099_v25  ;;  %v15211_v49 = vcombine.low %v11553_v24, %v11790_v6  ;;  %15213 = vst [vmem:[#allocation44_spill] sm:$0xff] %v12725_v28  ;;  %v12736_v0 = vpop.f32.mrb[190].mxu1 }
 0x386   :  { %v6026_v1 = vrot.slane %v6012_v50, %v15099_v25  ;;  %v5382_v13 = vadd.f32 %v15212_v60, %v5066_v62  ;;  %4431 = vrot.lane.b32.xlu0 %v12123_v29, %s10385_s2  ;;  %15214 = vst [vmem:[#allocation91_spill] sm:$0xff] %v12736_v0  ;;  %v12739_v24 = vrot.slane %v7147_v3, %v11516_v2  ;;  %v12745_v60 = vpop.f32.mrb[191].mxu1 }
 0x387   :  { %v8437_v4 = vsel %vm8387_vm1, %v15211_v49, %v8200_v39  ;;  %v12728_v20 = vrot.slane %v6555_v41, %v15099_v25  ;;  %v12731_v5 = vrot.slane %v6556_v52, %v15099_v25  ;;  %v6059_v6 = vcombine.low %v12664_v37, %v6019_v32  ;;  %4481 = vrot.lane.b32.xlu1 %v12736_v0, %s10385_s2  ;;  %v15217_v52 = vld [vmem:[#allocation86_spill] sm:$0xff]  ;;  %v8232_v49 = vpop.permute.xlu0 %8231  ;;  %v4426_v29 = vpop.permute.xlu1 %4425 }
 0x388   :  { %v8441_v27 = vsel %vm473_vm0, %v8437_v4, %v8216_v31  ;;  %v6075_v62 = vcombine.low %v12667_v61, %v6026_v1  ;;  %15215 = vst [vmem:[#allocation92_spill] sm:$0xff] %v12745_v60  ;;  %v7148_v39 = vcombine.high %v12643_v15, %v7107_v55  ;;  %v12749_v50 = vrot.slane %v7163_v16, %v11516_v2 }
 0x389   :  { %v6603_v41 = vcombine.low %v12686_v35, %v12728_v20  ;;  %v5380_v31 = vadd.f32 %v5062_v12, %v15217_v52  ;;  %v7180_v4 = vcombine.high %v12558_v34, %v12739_v24  ;;  %v12759_v0 = vsel %vm8396_vm2, %v8441_v27, %v8232_v49  ;;  %v15221_v49 = vld [vmem:[#allocation34_spill] sm:$0xff] }
 0x38a   :  { %15216 = vst [vmem:[#allocation93_spill] sm:$0xff] %v12749_v50  ;;  %v12762_v15 = vrot.slane %v7148_v39, %v11516_v2  ;;  %v7164_v16 = vcombine.high %v12649_v11, %v7114_v7  ;;  %v5638_v28 = vmul.f32 %v5382_v13, %v5382_v13  ;;  %10208 = vrsqrt.f32 %v12759_v0  ;;  %4427 = vrot.lane.b32.xlu0 %v12125_v46, %s10385_s2  ;;  %v15224_v46 = vld [vmem:[#allocation83_spill] sm:$0xff] }
 0x38b   :  { %v15218_v12 = vcombine.high %v12336_v21, %v12345_v57  ;;  %v15219_v39 = vcombine.low %v12342_v9, %v12348_v8  ;;  %v4742_v11 = vsub.f32 %v15221_v49, %v4426_v29  ;;  %4477 = vrot.lane.b32.xlu1 %v12745_v60, %s10385_s2  ;;  %v8248_v57 = vpop.permute.xlu0 %8247  ;;  %v12797_v29 = vrot.slane %v6075_v62, %v11516_v2 }
 0x38c   :  { %v7181_v13 = vcombine.low %v12569_v48, %v12762_v15  ;;  %v12790_v21 = vrot.slane %v7164_v16, %v11516_v2  ;;  %v6076_v49 = vcombine.high %v12667_v61, %v6026_v1  ;;  %v5636_v55 = vmul.f32 %v5380_v31, %v5380_v31  ;;  %v4422_v60 = vpop.permute.xlu1 %4421 }
 0x38d   :  { %v12774_v27 = vrot.slane %v15218_v12, %v11516_v2  ;;  %v12780_v52 = vrot.slane %v15219_v39, %v11516_v2  ;;  %v12793_v12 = vrot.slane %v6059_v6, %v11516_v2  ;;  %v6060_v39 = vcombine.high %v12664_v37, %v6019_v32  ;;  %15223 = vst [vmem:[#allocation94_spill] sm:$0xff] %v12797_v29 }
 0x38e   :  { %v5510_v3 = vmul.f32 %v4742_v11, %v4742_v11  ;;  %v4740_v33 = vsub.f32 %v15224_v46, %v4422_v60  ;;  %5079 = vrot.lane.b32.xlu0 %v12155_v19, %s10385_s2  ;;  %v12818_v6 = vrot.slane %v6076_v49, %v11516_v2  ;;  %v12821_v46 = vrot.slane %v7691_v10, %v11516_v2  ;;  %v12826_v60 = vpop.f32.mrb[192].mxu1  ;;  %v15229_v10 = vld [vmem:[#allocation19_spill] sm:$0xff] }
 0x38f   :  { %15220 = vst [vmem:[#allocation86_spill] sm:$0xff] %v12780_v52  ;;  %15222 = vst [vmem:[#allocation34_spill] sm:$0xff] %v12793_v12  ;;  %v12810_v32 = vrot.slane %v6060_v39, %v11516_v2  ;;  %8201 = vrot.lane.b32.xlu1 %v7180_v4, %s10388_s23  ;;  %v12824_v62 = vrot.slane %v7707_v54, %v11516_v2  ;;  %v8264_v11 = vpop.permute.xlu0 %8263  ;;  %v12834_v4 = vpop.f32.mrb[193].mxu1  ;;  %v15230_v49 = vld [vmem:[#allocation79_spill] sm:$0xff]  ;;  %vm8515_vm3 = vcmp.eq.f32.partialorder %v12759_v0, inf  ;;  %vm8517_vm4 = vcmp.eq.f32.partialorder %v12759_v0, 0.0 }
 0x390   :  { %v12814_v1 = vadd.f32 %v5638_v28, %v5510_v3  ;;  %15225 = vst [vmem:[#allocation83_spill] sm:$0xff] %v12821_v46  ;;  %15227 = vst [vmem:[#allocation96_spill] sm:$0xff] %v12826_v60  ;;  %v5508_v31 = vmul.f32 %v4740_v33, %v4740_v33  ;;  %v7692_v3 = vcombine.high %v12655_v53, %v12697_v18  ;;  %v5074_v37 = vpop.permute.xlu1 %5073  ;;  %v12846_v16 = vpop.f32.mrb[194].mxu1 }
 0x391   :  { %15226 = vst [vmem:[#allocation95_spill] sm:$0xff] %v12824_v62  ;;  %15228 = vst [vmem:[#allocation97_spill] sm:$0xff] %v12834_v4  ;;  %v15231_v61 = vcombine.low %v15229_v10, %v15230_v49  ;;  %v12858_v10 = vpop.f32.mrb[195].mxu1  ;;  %v15234_v49 = vld [vmem:[#allocation90_spill] sm:$0xff] }
 0x392   :  { %15232 = vst [vmem:[#allocation19_spill] sm:$0xff] %v12846_v16  ;;  %v12848_v53 = vadd.f32 %v5636_v55, %v5508_v31  ;;  %5075 = vrot.lane.b32.xlu0 %v12160_v63, %s10385_s2  ;;  %15233 = vst [vmem:[#allocation79_spill] sm:$0xff] %v12858_v10  ;;  %v5386_v39 = vadd.f32 %v15234_v49, %v5074_v37  ;;  %v7708_v55 = vcombine.high %v12658_v30, %v12700_v36  ;;  %v12911_v49 = vpop.f32.mrb[196].mxu1 }
 0x393   :  { %v8449_v54 = vsel %vm8387_vm1, %v15231_v61, %v8248_v57  ;;  %v12856_v61 = vrot.slane %v7692_v3, %v11516_v2  ;;  %8217 = vrot.lane.b32.xlu1 %v7181_v13, %s10379_s22  ;;  %v12865_v31 = vrot.slane %v6603_v41, %v11516_v2  ;;  %v15236_v13 = vcombine.low %v12694_v58, %v12731_v5 }
 0x394   :  { %v8453_v18 = vsel %vm473_vm0, %v8449_v54, %v8264_v11  ;;  %v6604_v11 = vcombine.high %v12686_v35, %v12728_v20  ;;  %v10209_v54 = vpop.eup %10208  ;;  %v8280_v57 = vpop.permute.xlu0 %8279  ;;  %v6620_v30 = vcombine.high %v12694_v58, %v12731_v5  ;;  %v12886_v41 = vrot.slane %v7708_v55, %v11516_v2  ;;  %15240 = vst [vmem:[#allocation99_spill] sm:$0xff] %v12911_v49 }
 0x395   :  { %15235 = vst [vmem:[#allocation90_spill] sm:$0xff] %v12865_v31  ;;  %v12877_v37 = vrot.slane %v15236_v13, %v11516_v2  ;;  %v8514_v36 = vmul.f32 %v10209_v54, %v12759_v0  ;;  %v12883_v20 = vsel %vm8396_vm2, %v8453_v18, %v8280_v57  ;;  %v5070_v35 = vpop.permute.xlu1 %5069  ;;  %v8518_v13 = vand.u32 2147483648, %v12759_v0 }
 0x396   :  { %10210 = vrsqrt.f32 %v12883_v20  ;;  %4439 = vrot.lane.b32.xlu0 %v12207_v42, %s10385_s2  ;;  %v15238_v58 = vcombine.high %v12342_v9, %v12348_v8  ;;  %v15239_v57 = vcombine.high %v12569_v48, %v12762_v15  ;;  %v12921_v48 = vpop.f32.mrb[197].mxu1  ;;  %v5642_v15 = vmul.f32 %v5386_v39, %v5386_v39 }
 0x397   :  { %15237 = vst [vmem:[#allocation98_spill] sm:$0xff] %v12877_v37  ;;  %v8516_v18 = vsel %vm8515_vm3, %v12759_v0, %v8514_v36  ;;  %v12919_v36 = vrot.slane %v6620_v30, %v11516_v2  ;;  %15241 = vst [vmem:[#allocation100_spill] sm:$0xff] %v12921_v48  ;;  %v12924_v28 = vpop.f32.mrb[198].mxu1  ;;  %v15244_v30 = vld [vmem:[#allocation51_spill] sm:$0xff]  ;;  %vm8522_vm5 = vcmp.eq.f32.partialorder %v12883_v20, inf  ;;  %vm8524_vm6 = vcmp.eq.f32.partialorder %v12883_v20, 0.0 }
 0x398   :  { %v12899_v5 = vrot.slane %v15238_v58, %v11516_v2  ;;  %8233 = vrot.lane.b32.xlu1 %v15239_v57, %s10385_s2  ;;  %v8519_v9 = vsel %vm8517_vm4, %v8518_v13, %v8516_v18  ;;  %v8008_v8 = vpop.permute.xlu0 %8007  ;;  %v12914_v58 = vrot.slane %v6604_v11, %v11516_v2  ;;  %v5384_v57 = vadd.f32 %v5070_v35, %v12137_v43  ;;  %v15243_v18 = vld [vmem:[#allocation38_spill] sm:$0xff]  ;;  %v12939_v35 = vpop.f32.mrb[199].mxu1 }
 0x399   :  { %8713 = vst [vmem:[#allocation8 + $0x20] sm:$0xff] %v8519_v9  ;;  %v4434_v54 = vpop.permute.xlu1 %4433  ;;  %15242 = vst [vmem:[#allocation101_spill] sm:$0xff] %v12924_v28  ;;  %v15246_v11 = vcombine.high %v12575_v44, %v12749_v50  ;;  %v15248_v43 = vld [vmem:[#allocation18_spill] sm:$0xff] }
 0x39a   :  { %v4746_v0 = vsub.f32 %v15243_v18, %v4434_v54  ;;  %4435 = vrot.lane.b32.xlu0 %v15244_v30, %s10385_s2  ;;  %15245 = vst [vmem:[#allocation38_spill] sm:$0xff] %v12939_v35  ;;  %v15247_v18 = vld [vmem:[#allocation40_spill] sm:$0xff]  ;;  %v5640_v54 = vmul.f32 %v5384_v57, %v5384_v57 }
 0x39c   :  { %8249 = vrot.lane.b32.xlu1 %v15246_v11, %s10388_s23  ;;  %v5514_v39 = vmul.f32 %v4746_v0, %v4746_v0  ;;  %v8024_v9 = vpop.permute.xlu0 %8023  ;;  %v15249_v0 = vld [vmem:[#allocation31_spill] sm:$0xff]  ;;  %v15251_v11 = vcombine.low %v12588_v38, %v12790_v21 }
 0x39d   :  { %v4430_v3 = vpop.permute.xlu1 %4429  ;;  %v15250_v13 = vcombine.low %v15248_v43, %v15249_v0  ;;  %v15254_v43 = vld [vmem:[#allocation53_spill] sm:$0xff] }
 0x39e   :  { %v12959_v33 = vadd.f32 %v5642_v15, %v5514_v39  ;;  %v4744_v7 = vsub.f32 %v15247_v18, %v4430_v3  ;;  %5087 = vrot.lane.b32.xlu0 %v12240_v51, %s10385_s2 }
 0x39f   :  { %v8388_v50 = vsel %vm8387_vm1, %v15250_v13, %v8008_v8  ;;  %v8525_v8 = vand.u32 2147483648, %v12883_v20 }
 0x3a0   :  { %8265 = vrot.lane.b32.xlu1 %v15251_v11, %s10379_s22  ;;  %v10211_v55 = vpop.eup %10210  ;;  %v8392_v15 = vsel %vm473_vm0, %v8388_v50, %v8024_v9  ;;  %v5512_v39 = vmul.f32 %v4744_v7, %v4744_v7  ;;  %v8040_v44 = vpop.permute.xlu0 %8039  ;;  %v15252_v50 = vcombine.high %v12588_v38, %v12790_v21  ;;  %v15258_v38 = vld [vmem:[#allocation46_spill] sm:$0xff] }
 0x3a1   :  { %v8521_v3 = vmul.f32 %v10211_v55, %v12883_v20  ;;  %v8397_v18 = vsel %vm8396_vm2, %v8392_v15, %v8040_v44  ;;  %v5082_v51 = vpop.permute.xlu1 %5081  ;;  %v12987_v9 = vpop.f32.mrb[200].mxu1 }
 0x3a2   :  { %v12977_v13 = vadd.f32 %v5640_v54, %v5512_v39  ;;  %10212 = vrsqrt.f32 %v8397_v18  ;;  %5083 = vrot.lane.b32.xlu0 %v12243_v23, %s10385_s2  ;;  %15253 = vst [vmem:[#allocation40_spill] sm:$0xff] %v12987_v9  ;;  %v12991_v54 = vpop.f32.mrb[201].mxu1  ;;  %v5390_v21 = vadd.f32 %v15258_v38, %v5082_v51  ;;  %vm8487_vm7 = vcmp.eq.f32.partialorder %v8397_v18, inf }
 0x3a3   :  { %v8523_v57 = vsel %vm8522_vm5, %v12883_v20, %v8521_v3  ;;  %15255 = vst [vmem:[#allocation18_spill] sm:$0xff] %v12991_v54  ;;  %v15256_v20 = vcombine.high %v12581_v47, %v12793_v12  ;;  %v12997_v11 = vpop.f32.mrb[202].mxu1  ;;  %v15260_v3 = vld [vmem:[#allocation47_spill] sm:$0xff]  ;;  %vm8489_vm8 = vcmp.eq.f32.partialorder %v8397_v18, 0.0 }
 0x3a4   :  { %8281 = vrot.lane.b32.xlu1 %v15252_v50, %s10385_s2  ;;  %v8526_v44 = vsel %vm8524_vm6, %v8525_v8, %v8523_v57  ;;  %v8056_v7 = vpop.permute.xlu0 %8055  ;;  %15257 = vst [vmem:[#allocation31_spill] sm:$0xff] %v12997_v11  ;;  %v13000_v15 = vpop.f32.mrb[203].mxu1  ;;  %v15261_v57 = vld [vmem:[#allocation55_spill] sm:$0xff]  ;;  %v5646_v38 = vmul.f32 %v5390_v21, %v5390_v21 }
 0x3a5   :  { %8714 = vst [vmem:[#allocation8 + $0x28] sm:$0xff] %v8526_v44  ;;  %v5078_v55 = vpop.permute.xlu1 %5077  ;;  %15259 = vst [vmem:[#allocation46_spill] sm:$0xff] %v13000_v15  ;;  %v15262_v50 = vld [vmem:[#allocation71_spill] sm:$0xff]  ;;  %v15263_v44 = vld [vmem:[#allocation33_spill] sm:$0xff] }
 0x3a6   :  { %4447 = vrot.lane.b32.xlu0 %v15254_v43, %s10385_s2  ;;  %v15264_v23 = vcombine.low %v15262_v50, %v15263_v44  ;;  %v15268_v44 = vld [vmem:[#allocation54_spill] sm:$0xff] }
 0x3a7   :  { %v13016_v50 = vpop.f32.mrb[204].mxu1 }
 0x3a8   :  { %8009 = vrot.lane.b32.xlu1 %v15256_v20, %s10388_s23  ;;  %v8072_v0 = vpop.permute.xlu0 %8071  ;;  %v8401_v43 = vsel %vm8387_vm1, %v15264_v23, %v8056_v7  ;;  %v15265_v20 = vcombine.low %v12607_v45, %v12810_v32  ;;  %15267 = vst [vmem:[#allocation47_spill] sm:$0xff] %v13016_v50  ;;  %v8490_v23 = vand.u32 2147483648, %v8397_v18  ;;  %v13022_v21 = vpop.f32.mrb[205].mxu1 }
 0x3a9   :  { %v4442_v39 = vpop.permute.xlu1 %4441  ;;  %v8405_v12 = vsel %vm473_vm0, %v8401_v43, %v8072_v0  ;;  %15269 = vst [vmem:[#allocation71_spill] sm:$0xff] %v13022_v21  ;;  %v15270_v0 = vld [vmem:[#allocation50_spill] sm:$0xff] }
 0x3aa   :  { %v4750_v8 = vsub.f32 %v15260_v3, %v4442_v39  ;;  %4443 = vrot.lane.b32.xlu0 %v15261_v57, %s10385_s2  ;;  %v15266_v3 = vld [vmem:[#allocation48_spill] sm:$0xff] }
 0x3ab   :  { %v5388_v19 = vadd.f32 %v5078_v55, %v15266_v3  ;;  %v15274_v3 = vld [vmem:[#allocation52_spill] sm:$0xff] }
 0x3ac   :  { %8025 = vrot.lane.b32.xlu1 %v15265_v20, %s10379_s22  ;;  %v10213_v51 = vpop.eup %10212  ;;  %v5518_v47 = vmul.f32 %v4750_v8, %v4750_v8  ;;  %v8088_v63 = vpop.permute.xlu0 %8087 }
 0x3ad   :  { %v8486_v39 = vmul.f32 %v10213_v51, %v8397_v18  ;;  %v8409_v57 = vsel %vm8396_vm2, %v8405_v12, %v8088_v63  ;;  %v4438_v30 = vpop.permute.xlu1 %4437  ;;  %v15271_v63 = vcombine.high %v12607_v45, %v12810_v32  ;;  %v13029_v12 = vpop.f32.mrb[206].mxu1  ;;  %v15275_v32 = vcombine.high %v12594_v17, %v12797_v29 }
 0x3ae   :  { %v13018_v7 = vadd.f32 %v5646_v38, %v5518_v47  ;;  %10214 = vrsqrt.f32 %v8409_v57  ;;  %5095 = vrot.lane.b32.xlu0 %v15268_v44, %s10385_s2  ;;  %v4748_v8 = vsub.f32 %v15270_v0, %v4438_v30  ;;  %15272 = vst [vmem:[#allocation33_spill] sm:$0xff] %v13029_v12  ;;  %v13035_v38 = vpop.f32.mrb[207].mxu1  ;;  %v15277_v0 = vld [vmem:[#allocation67_spill] sm:$0xff]  ;;  %vm8494_vm9 = vcmp.eq.f32.partialorder %v8409_v57, inf }
 0x3af   :  { %v8488_v43 = vsel %vm8487_vm7, %v8397_v18, %v8486_v39  ;;  %15273 = vst [vmem:[#allocation48_spill] sm:$0xff] %v13035_v38  ;;  %v5644_v18 = vmul.f32 %v5388_v19, %v5388_v19  ;;  %v8497_v44 = vand.u32 2147483648, %v8409_v57  ;;  %vm8496_vm10 = vcmp.eq.f32.partialorder %v8409_v57, 0.0 }
 0x3b0   :  { %8041 = vrot.lane.b32.xlu1 %v15271_v63, %s10385_s2  ;;  %v8491_v55 = vsel %vm8489_vm8, %v8490_v23, %v8488_v43  ;;  %v7731_v47 = vcombine.low %v12814_v1, %v13018_v7  ;;  %v7732_v20 = vcombine.high %v12814_v1, %v13018_v7  ;;  %v8296_v51 = vpop.permute.xlu0 %8295  ;;  %v5516_v30 = vmul.f32 %v4748_v8, %v4748_v8  ;;  %v13049_v43 = vpop.f32.mrb[208].mxu1 }
 0x3b1   :  { %8709 = vst [vmem:[#allocation8] sm:$0xff] %v8491_v55  ;;  %v5090_v39 = vpop.permute.xlu1 %5089  ;;  %15276 = vst [vmem:[#allocation50_spill] sm:$0xff] %v13049_v43  ;;  %v13053_v8 = vpop.f32.mrb[209].mxu1  ;;  %v15279_v63 = vcombine.low %v12613_v40, %v12818_v6 }
 0x3b2   :  { %5091 = vrot.lane.b32.xlu0 %v15274_v3, %s10385_s2  ;;  %v13039_v45 = vadd.f32 %v5644_v18, %v5516_v30  ;;  %15278 = vst [vmem:[#allocation102_spill] sm:$0xff] %v13053_v8  ;;  %v13059_v55 = vpop.f32.mrb[210].mxu1  ;;  %v15281_v30 = vld [vmem:[#allocation58_spill] sm:$0xff]  ;;  %v15284_v8 = vld [vmem:[#allocation61_spill] sm:$0xff] }
 0x3b3   :  { %15280 = vst [vmem:[#allocation103_spill] sm:$0xff] %v13059_v55  ;;  %v13062_v7 = vpop.f32.mrb[211].mxu1 }
 0x3b4   :  { %8057 = vrot.lane.b32.xlu1 %v15275_v32, %s10388_s23  ;;  %v8344_v23 = vpop.permute.xlu0 %8343  ;;  %v6643_v1 = vcombine.low %v12848_v53, %v13039_v45  ;;  %v5394_v32 = vadd.f32 %v15281_v30, %v5090_v39  ;;  %15282 = vst [vmem:[#allocation58_spill] sm:$0xff] %v13062_v7  ;;  %v15286_v39 = vcombine.high %v12613_v40, %v12818_v6 }
 0x3b5   :  { %v5086_v19 = vpop.permute.xlu1 %5085 }
 0x3b6   :  { %4455 = vrot.lane.b32.xlu0 %v15277_v0, %s10385_s2  ;;  %v15283_v0 = vld [vmem:[#allocation57_spill] sm:$0xff]  ;;  %v5650_v7 = vmul.f32 %v5394_v32, %v5394_v32 }
 0x3b7   :  { %v13072_v50 = vpop.f32.mrb[212].mxu1 }
 0x3b8   :  { %8073 = vrot.lane.b32.xlu1 %v15279_v63, %s10379_s22  ;;  %v10215_v18 = vpop.eup %10214  ;;  %v8312_v3 = vpop.permute.xlu0 %8311  ;;  %v15285_v63 = vld [vmem:[#allocation60_spill] sm:$0xff] }
 0x3b9   :  { %v8493_v29 = vmul.f32 %v10215_v18, %v8409_v57  ;;  %v4450_v17 = vpop.permute.xlu1 %4449  ;;  %v5392_v21 = vadd.f32 %v5086_v19, %v15285_v63  ;;  %v15289_v19 = vld [vmem:[#allocation72_spill] sm:$0xff] }
 0x3ba   :  { %v4754_v43 = vsub.f32 %v15283_v0, %v4450_v17  ;;  %4451 = vrot.lane.b32.xlu0 %v15284_v8, %s10385_s2  ;;  %v15287_v0 = vld [vmem:[#allocation59_spill] sm:$0xff]  ;;  %v15290_v63 = vld [vmem:[#allocation84_spill] sm:$0xff] }
 0x3bb   :  { %v8495_v38 = vsel %vm8494_vm9, %v8409_v57, %v8493_v29  ;;  %v15288_v29 = vld [vmem:[#allocation68_spill] sm:$0xff]  ;;  %v13077_v57 = vpop.f32.mrb[213].mxu1  ;;  %v15291_v40 = vcombine.low %v15289_v19, %v15290_v63  ;;  %v15294_v19 = vld [vmem:[#allocation85_spill] sm:$0xff] }
 0x3bc   :  { %8089 = vrot.lane.b32.xlu1 %v15286_v39, %s10385_s2  ;;  %v8498_v30 = vsel %vm8496_vm10, %v8497_v44, %v8495_v38  ;;  %v5522_v18 = vmul.f32 %v4754_v43, %v4754_v43  ;;  %v8360_v55 = vpop.permute.xlu0 %8359  ;;  %v5648_v44 = vmul.f32 %v5392_v21, %v5392_v21  ;;  %v15292_v38 = vcombine.high %v12600_v14, %v12821_v46  ;;  %v13087_v43 = vpop.f32.mrb[214].mxu1  ;;  %v15309_v46 = vld [vmem:[#allocation66_spill] sm:$0xff] }
 0x3bd   :  { %8710 = vst [vmem:[#allocation8 + $0x8] sm:$0xff] %v8498_v30  ;;  %v4446_v12 = vpop.permute.xlu1 %4445  ;;  %v8461_v6 = vsel %vm8387_vm1, %v15291_v40, %v8296_v51  ;;  %v13095_v51 = vrot.slane %v7731_v47, %v15099_v25  ;;  %v13098_v21 = vrot.slane %v7732_v20, %v15099_v25  ;;  %v15296_v47 = vld [vmem:[#allocation62_spill] sm:$0xff] }
 0x3be   :  { %v5778_v17 = vadd.f32 %v5650_v7, %v5522_v18  ;;  %v4752_v8 = vsub.f32 %v15287_v0, %v4446_v12  ;;  %5103 = vrot.lane.b32.xlu0 %v15288_v29, %s10385_s2  ;;  %v8465_v12 = vsel %vm473_vm0, %v8461_v6, %v8312_v3  ;;  %v13092_v18 = vpop.f32.mrb[215].mxu1  ;;  %v15293_v0 = vld [vmem:[#allocation73_spill] sm:$0xff] }
 0x3bf   :  { %v15295_v63 = vcombine.low %v15293_v0, %v15294_v19  ;;  %v13130_v0 = vpop.f32.mrb[216].mxu1 }
 0x3c0   :  { %8297 = vrot.lane.b32.xlu1 %v15292_v38, %s10388_s23  ;;  %v7747_v7 = vcombine.low %v12959_v33, %v5778_v17  ;;  %v7748_v32 = vcombine.high %v12959_v33, %v5778_v17  ;;  %v5520_v39 = vmul.f32 %v4752_v8, %v4752_v8  ;;  %v8328_v30 = vpop.permute.xlu0 %8327  ;;  %15298 = vst [vmem:[#allocation57_spill] sm:$0xff] %v13130_v0 }
 0x3c1   :  { %v8473_v40 = vsel %vm8387_vm1, %v15295_v63, %v8344_v23  ;;  %v8469_v3 = vsel %vm8396_vm2, %v8465_v12, %v8328_v30  ;;  %v5098_v6 = vpop.permute.xlu1 %5097  ;;  %v15297_v23 = vcombine.high %v12619_v59, %v12824_v62  ;;  %v15306_v62 = vld [vmem:[#allocation56_spill] sm:$0xff] }
 0x3c2   :  { %v13106_v33 = vrot.slane %v7747_v7, %v15099_v25  ;;  %v13109_v8 = vrot.slane %v7748_v32, %v15099_v25  ;;  %v5776_v17 = vadd.f32 %v5648_v44, %v5520_v39  ;;  %10216 = vrsqrt.f32 %v8469_v3  ;;  %5099 = vrot.lane.b32.xlu0 %v15296_v47, %s10385_s2 }
 0x3c3   :  { %v8477_v20 = vsel %vm473_vm0, %v8473_v40, %v8360_v55  ;;  %v13125_v39 = vrot.slane %v6643_v1, %v15099_v25  ;;  %vm8529_vm11 = vcmp.eq.f32.partialorder %v8469_v3, inf  ;;  %vm8531_vm12 = vcmp.eq.f32.partialorder %v8469_v3, 0.0 }
 0x3c4   :  { %8345 = vrot.lane.b32.xlu1 %v15297_v23, %s10388_s23  ;;  %v6659_v7 = vcombine.low %v12977_v13, %v5776_v17  ;;  %v6660_v44 = vcombine.high %v12977_v13, %v5776_v17  ;;  %v8376_v32 = vpop.permute.xlu0 %8375  ;;  %v15299_v13 = vcombine.high %v12848_v53, %v13039_v45  ;;  %v13151_v23 = vpop.f32.mrb[217].mxu1  ;;  %v15311_v45 = vld [vmem:[#allocation65_spill] sm:$0xff] }
 0x3c5   :  { %v13128_v55 = vsel %vm8396_vm2, %v8477_v20, %v8376_v32  ;;  %v5094_v30 = vpop.permute.xlu1 %5093  ;;  %v15300_v20 = vld [vmem:[#allocation70_spill] sm:$0xff]  ;;  %15301 = vst [vmem:[#allocation60_spill] sm:$0xff] %v13151_v23  ;;  %v15302_v32 = vcombine.low %v12628_v22, %v12856_v61  ;;  %v13157_v53 = vpop.f32.mrb[218].mxu1  ;;  %v15312_v23 = vld [vmem:[#allocation21_spill] sm:$0xff] }
 0x3c6   :  { %v13140_v40 = vrot.slane %v15299_v13, %v15099_v25  ;;  %v13143_v1 = vrot.slane %v6659_v7, %v15099_v25  ;;  %v13146_v17 = vrot.slane %v6660_v44, %v15099_v25  ;;  %10218 = vrsqrt.f32 %v13128_v55  ;;  %4463 = vrot.lane.b32.xlu0 %v15300_v20, %s10385_s2  ;;  %15303 = vst [vmem:[#allocation59_spill] sm:$0xff] %v13157_v53  ;;  %v15304_v44 = vld [vmem:[#allocation63_spill] sm:$0xff]  ;;  %v13164_v19 = vpop.f32.mrb[219].mxu1 }
 0x3c7   :  { %v5398_v13 = vadd.f32 %v15304_v44, %v5098_v6  ;;  %15305 = vst [vmem:[#allocation72_spill] sm:$0xff] %v13164_v19  ;;  %v15308_v7 = vcombine.low %v12634_v56, %v12886_v41  ;;  %v5396_v14 = vadd.f32 %v5094_v30, %v15309_v46  ;;  %v15314_v46 = vld [vmem:[#allocation75_spill] sm:$0xff]  ;;  %vm8536_vm13 = vcmp.eq.f32.partialorder %v13128_v55, inf }
 0x3c8   :  { %8313 = vrot.lane.b32.xlu1 %v15302_v32, %s10379_s22  ;;  %v8104_v63 = vpop.permute.xlu0 %8103  ;;  %v15307_v32 = vld [vmem:[#allocation13_spill] sm:$0xff]  ;;  %vm8538_vm14 = vcmp.eq.f32.partialorder %v13128_v55, 0.0 }
 0x3c9   :  { %v4458_v12 = vpop.permute.xlu1 %4457  ;;  %v5654_v44 = vmul.f32 %v5398_v13, %v5398_v13 }
 0x3ca   :  { %v4758_v59 = vsub.f32 %v15306_v62, %v4458_v12  ;;  %4459 = vrot.lane.b32.xlu0 %v15307_v32, %s10385_s2  ;;  %v13178_v62 = vpop.f32.mrb[220].mxu1  ;;  %v8532_v12 = vand.u32 2147483648, %v8469_v3 }
 0x3cb   :  { %15310 = vst [vmem:[#allocation84_spill] sm:$0xff] %v13178_v62  ;;  %v15317_v62 = vcombine.high %v12628_v22, %v12856_v61  ;;  %v8539_v22 = vand.u32 2147483648, %v13128_v55 }
 0x3cc   :  { %8361 = vrot.lane.b32.xlu1 %v15308_v7, %s10379_s22  ;;  %v10217_v6 = vpop.eup %10216  ;;  %v5526_v47 = vmul.f32 %v4758_v59, %v4758_v59  ;;  %v8120_v29 = vpop.permute.xlu0 %8119  ;;  %v15315_v59 = vld [vmem:[#allocation43_spill] sm:$0xff] }
 0x3cd   :  { %v8528_v38 = vmul.f32 %v10217_v6, %v8469_v3  ;;  %v4454_v20 = vpop.permute.xlu1 %4453  ;;  %v13185_v7 = vpop.f32.mrb[221].mxu1  ;;  %v15316_v30 = vcombine.low %v15314_v46, %v15315_v59 }
 0x3ce   :  { %v13180_v32 = vadd.f32 %v5654_v44, %v5526_v47  ;;  %v4756_v19 = vsub.f32 %v15311_v45, %v4454_v20  ;;  %5111 = vrot.lane.b32.xlu0 %v15312_v23, %s10385_s2  ;;  %15313 = vst [vmem:[#allocation73_spill] sm:$0xff] %v13185_v7  ;;  %v13195_v47 = vpop.f32.mrb[222].mxu1  ;;  %v5652_v44 = vmul.f32 %v5396_v14, %v5396_v14  ;;  %v15320_v14 = vld [vmem:[#allocation15_spill] sm:$0xff] }
 0x3cf   :  { %v8530_v13 = vsel %vm8529_vm11, %v8469_v3, %v8528_v38  ;;  %v8413_v6 = vsel %vm8387_vm1, %v15316_v30, %v8104_v63  ;;  %15318 = vst [vmem:[#allocation85_spill] sm:$0xff] %v13195_v47  ;;  %v13198_v3 = vpop.f32.mrb[223].mxu1 }
 0x3d0   :  { %8329 = vrot.lane.b32.xlu1 %v15317_v62, %s10385_s2  ;;  %v10219_v20 = vpop.eup %10218  ;;  %v8533_v45 = vsel %vm8531_vm12, %v8532_v12, %v8530_v13  ;;  %v8417_v23 = vsel %vm473_vm0, %v8413_v6, %v8120_v29  ;;  %v5524_v7 = vmul.f32 %v4756_v19, %v4756_v19  ;;  %v8136_v38 = vpop.permute.xlu0 %8135  ;;  %15319 = vst [vmem:[#allocation63_spill] sm:$0xff] %v13198_v3 }
 0x3d1   :  { %8715 = vst [vmem:[#allocation8 + $0x30] sm:$0xff] %v8533_v45  ;;  %v8535_v46 = vmul.f32 %v10219_v20, %v13128_v55  ;;  %v8421_v63 = vsel %vm8396_vm2, %v8417_v23, %v8136_v38  ;;  %v5106_v59 = vpop.permute.xlu1 %5105  ;;  %v15321_v19 = vcombine.high %v12634_v56, %v12886_v41  ;;  %v15323_v13 = vcombine.high %v12640_v26, %v12865_v31 }
 0x3d2   :  { %v13204_v61 = vadd.f32 %v5652_v44, %v5524_v7  ;;  %10220 = vrsqrt.f32 %v8421_v63  ;;  %5107 = vrot.lane.b32.xlu0 %v15320_v14, %s10385_s2  ;;  %v15322_v7 = vld [vmem:[#allocation74_spill] sm:$0xff]  ;;  %v15328_v44 = vld [vmem:[#allocation64_spill] sm:$0xff]  ;;  %vm8501_vm15 = vcmp.eq.f32.partialorder %v8421_v63, inf  ;;  %vm8503_vm3 = vcmp.eq.f32.partialorder %v8421_v63, 0.0 }
 0x3d3   :  { %v8537_v29 = vsel %vm8536_vm13, %v13128_v55, %v8535_v46  ;;  %v15325_v55 = vld [vmem:[#allocation16_spill] sm:$0xff]  ;;  %v15329_v46 = vld [vmem:[#allocation23_spill] sm:$0xff] }
 0x3d4   :  { %8377 = vrot.lane.b32.xlu1 %v15321_v19, %s10385_s2  ;;  %v8540_v23 = vsel %vm8538_vm14, %v8539_v22, %v8537_v29  ;;  %v8152_v62 = vpop.permute.xlu0 %8151  ;;  %v5402_v6 = vadd.f32 %v15325_v55, %v5106_v59  ;;  %v15331_v29 = vld [vmem:[#allocation77_spill] sm:$0xff]  ;;  %v15332_v19 = vld [vmem:[#allocation87_spill] sm:$0xff]  ;;  %v15334_v59 = vcombine.low %v12774_v27, %v12914_v58 }
 0x3d5   :  { %8716 = vst [vmem:[#allocation8 + $0x38] sm:$0xff] %v8540_v23  ;;  %v5102_v12 = vpop.permute.xlu1 %5101  ;;  %v13220_v30 = vpop.f32.mrb[224].mxu1  ;;  %v15333_v23 = vcombine.low %v15331_v29, %v15332_v19  ;;  %v8504_v29 = vand.u32 2147483648, %v8421_v63  ;;  %v15336_v19 = vld [vmem:[#allocation26_spill] sm:$0xff] }
 0x3d6   :  { %4471 = vrot.lane.b32.xlu0 %v15322_v7, %s10385_s2  ;;  %15324 = vst [vmem:[#allocation56_spill] sm:$0xff] %v13220_v30  ;;  %v13223_v45 = vpop.f32.mrb[225].mxu1  ;;  %v5658_v31 = vmul.f32 %v5402_v6, %v5402_v6  ;;  %v15337_v6 = vld [vmem:[#allocation14_spill] sm:$0xff] }
 0x3d7   :  { %15326 = vst [vmem:[#allocation66_spill] sm:$0xff] %v13223_v45  ;;  %v13225_v41 = vpop.f32.mrb[226].mxu1 }
 0x3d8   :  { %8105 = vrot.lane.b32.xlu1 %v15323_v13, %s10388_s23  ;;  %v8168_v20 = vpop.permute.xlu0 %8167  ;;  %15327 = vst [vmem:[#allocation65_spill] sm:$0xff] %v13225_v41  ;;  %v13230_v22 = vpop.f32.mrb[227].mxu1  ;;  %v8425_v13 = vsel %vm8387_vm1, %v15333_v23, %v8152_v62 }
 0x3d9   :  { %v4466_v56 = vpop.permute.xlu1 %4465  ;;  %15330 = vst [vmem:[#allocation75_spill] sm:$0xff] %v13230_v22  ;;  %v8429_v26 = vsel %vm473_vm0, %v8425_v13, %v8168_v20 }
 0x3da   :  { %v4762_v38 = vsub.f32 %v15328_v44, %v4466_v56  ;;  %4467 = vrot.lane.b32.xlu0 %v15329_v46, %s10385_s2  ;;  %v15335_v46 = vld [vmem:[#allocation69_spill] sm:$0xff] }
 0x3db   :  { %v5400_v7 = vadd.f32 %v5102_v12, %v15335_v46 }
 0x3dc   :  { %8121 = vrot.lane.b32.xlu1 %v15334_v59, %s10379_s22  ;;  %v10221_v55 = vpop.eup %10220  ;;  %v5530_v56 = vmul.f32 %v4762_v38, %v4762_v38  ;;  %v8184_v44 = vpop.permute.xlu0 %8183  ;;  %v15338_v38 = vcombine.high %v12774_v27, %v12914_v58  ;;  %v15339_v59 = vld [vmem:[#allocation78_spill] sm:$0xff] }
 0x3dd   :  { %v8500_v14 = vmul.f32 %v10221_v55, %v8421_v63  ;;  %v8433_v22 = vsel %vm8396_vm2, %v8429_v26, %v8184_v44  ;;  %v4462_v45 = vpop.permute.xlu1 %4461  ;;  %v5656_v46 = vmul.f32 %v5400_v7, %v5400_v7  ;;  %v15344_v7 = vld [vmem:[#allocation30_spill] sm:$0xff] }
 0x3de   :  { %v13243_v62 = vadd.f32 %v5658_v31, %v5530_v56  ;;  %10222 = vrsqrt.f32 %v8433_v22  ;;  %5119 = vrot.lane.b32.xlu0 %v15336_v19, %s10385_s2  ;;  %v4760_v20 = vsub.f32 %v15337_v6, %v4462_v45  ;;  %v15347_v6 = vcombine.low %v12899_v5, %v12919_v36  ;;  %v15350_v19 = vld [vmem:[#allocation12_spill] sm:$0xff] }
 0x3df   :  { %v8502_v23 = vsel %vm8501_vm15, %v8421_v63, %v8500_v14  ;;  %v15340_v63 = vcombine.high %v12780_v52, %v12877_v37  ;;  %vm8508_vm4 = vcmp.eq.f32.partialorder %v8433_v22, inf  ;;  %vm8510_vm5 = vcmp.eq.f32.partialorder %v8433_v22, 0.0 }
 0x3e0   :  { %8137 = vrot.lane.b32.xlu1 %v15338_v38, %s10385_s2  ;;  %v8505_v12 = vsel %vm8503_vm3, %v8504_v29, %v8502_v23  ;;  %v5064_v26 = vpop.permute.xlu0 %5063  ;;  %v5528_v13 = vmul.f32 %v4760_v20, %v4760_v20  ;;  %v15346_v29 = vld [vmem:[#allocation41_spill] sm:$0xff]  ;;  %v15348_v38 = vld [vmem:[#allocation22_spill] sm:$0xff]  ;;  %v8511_v52 = vand.u32 2147483648, %v8433_v22 }
 0x3e1   :  { %8711 = vst [vmem:[#allocation8 + $0x10] sm:$0xff] %v8505_v12  ;;  %v5114_v31 = vpop.permute.xlu1 %5113  ;;  %v5381_v23 = vadd.f32 %v15346_v29, %v5064_v26  ;;  %v15351_v26 = vld [vmem:[#allocation44_spill] sm:$0xff] }
 0x3e2   :  { %5115 = vrot.lane.b32.xlu0 %v15339_v59, %s10385_s2  ;;  %v13254_v55 = vadd.f32 %v5656_v46, %v5528_v13  ;;  %v5406_v12 = vadd.f32 %v15348_v38, %v5114_v31  ;;  %v15353_v31 = vcombine.high %v12899_v5, %v12919_v36  ;;  %v15357_v36 = vld [vmem:[#allocation20_spill] sm:$0xff] }
 0x3e3   :  { %v13260_v14 = vpop.f32.mrb[228].mxu1 }
 0x3e4   :  { %8153 = vrot.lane.b32.xlu1 %v15340_v63, %s10388_s23  ;;  %15341 = vst [vmem:[#allocation43_spill] sm:$0xff] %v13260_v14  ;;  %v5060_v27 = vpop.permute.xlu0 %5059  ;;  %v13262_v58 = vpop.f32.mrb[229].mxu1  ;;  %v15349_v63 = vld [vmem:[#allocation80_spill] sm:$0xff] }
 0x3e5   :  { %15342 = vst [vmem:[#allocation16_spill] sm:$0xff] %v13262_v58  ;;  %v5110_v45 = vpop.permute.xlu1 %5109  ;;  %v13264_v56 = vpop.f32.mrb[230].mxu1  ;;  %v15352_v58 = vld [vmem:[#allocation42_spill] sm:$0xff] }
 0x3e6   :  { %15343 = vst [vmem:[#allocation64_spill] sm:$0xff] %v13264_v56  ;;  %4479 = vrot.lane.b32.xlu0 %v15344_v7, %s10385_s2  ;;  %v13268_v44 = vpop.f32.mrb[231].mxu1 }
 0x3e7   :  { %15345 = vst [vmem:[#allocation77_spill] sm:$0xff] %v13268_v44  ;;  %v5637_v44 = vmul.f32 %v5381_v23, %v5381_v23 }
 0x3e8   :  { %8169 = vrot.lane.b32.xlu1 %v15347_v6, %s10379_s22  ;;  %v10223_v20 = vpop.eup %10222  ;;  %v4424_v46 = vpop.permute.xlu0 %4423  ;;  %v5379_v6 = vadd.f32 %v5060_v27, %v15352_v58  ;;  %v15356_v27 = vld [vmem:[#allocation32_spill] sm:$0xff] }
 0x3e9   :  { %v8507_v13 = vmul.f32 %v10223_v20, %v8433_v22  ;;  %v4741_v59 = vsub.f32 %v15349_v63, %v4424_v46  ;;  %v4474_v37 = vpop.permute.xlu1 %4473  ;;  %v5662_v46 = vmul.f32 %v5406_v12, %v5406_v12  ;;  %v15354_v63 = vld [vmem:[#allocation29_spill] sm:$0xff] }
 0x3ea   :  { %v4766_v7 = vsub.f32 %v15350_v19, %v4474_v37  ;;  %4475 = vrot.lane.b32.xlu0 %v15351_v26, %s10385_s2  ;;  %v5404_v14 = vadd.f32 %v5110_v45, %v15354_v63  ;;  %v5635_v45 = vmul.f32 %v5379_v6, %v5379_v6 }
 0x3eb   :  { %v8509_v29 = vsel %vm8508_vm4, %v8433_v22, %v8507_v13  ;;  %v5509_v56 = vmul.f32 %v4741_v59, %v4741_v59  ;;  %v13285_v20 = vpop.f32.mrb[232].mxu1 }
 0x3ec   :  { %8185 = vrot.lane.b32.xlu1 %v15353_v31, %s10385_s2  ;;  %v8512_v38 = vsel %vm8510_vm5, %v8511_v52, %v8509_v29  ;;  %v5534_v37 = vmul.f32 %v4766_v7, %v4766_v7  ;;  %v4420_v19 = vpop.permute.xlu0 %4419  ;;  %v13288_v41 = vpop.f32.mrb[233].mxu1 }
 0x3ed   :  { %15355 = vst [vmem:[#allocation87_spill] sm:$0xff] %v13288_v41  ;;  %8712 = vst [vmem:[#allocation8 + $0x18] sm:$0xff] %v8512_v38  ;;  %v13290_v22 = vadd.f32 %v5637_v44, %v5509_v56  ;;  %v4739_v59 = vsub.f32 %v15356_v27, %v4420_v19  ;;  %v4470_v58 = vpop.permute.xlu1 %4469  ;;  %v13293_v23 = vpop.f32.mrb[234].mxu1  ;;  %v5660_v56 = vmul.f32 %v5404_v14, %v5404_v14 }
 0x3ee   :  { %v13295_v5 = vadd.f32 %v5662_v46, %v5534_v37  ;;  %v4764_v13 = vsub.f32 %v15357_v36, %v4470_v58  ;;  %5127 = vrot.lane.b32.xlu0 %v12826_v60, %s10385_s2  ;;  %v13300_v52 = vpop.f32.mrb[235].mxu1 }
 0x3ef   :  { %15358 = vst [vmem:[#allocation69_spill] sm:$0xff] %v13300_v52  ;;  %v5507_v7 = vmul.f32 %v4739_v59, %v4739_v59 }
 0x3f0   :  { %5129 = vrot.lane.b32.xlu1 %v12846_v16, %s10385_s2  ;;  %v7763_v44 = vcombine.low %v13180_v32, %v13295_v5  ;;  %v7764_v12 = vcombine.high %v13180_v32, %v13295_v5  ;;  %v5532_v29 = vmul.f32 %v4764_v13, %v4764_v13  ;;  %v5072_v31 = vpop.permute.xlu0 %5071  ;;  %v15359_v5 = vld [vmem:[#allocation88_spill] sm:$0xff]  ;;  %v15360_v13 = vld [vmem:[#allocation91_spill] sm:$0xff]  ;;  %v15363_v16 = vld [vmem:[#allocation89_spill] sm:$0xff] }
 0x3f1   :  { %v13308_v38 = vadd.f32 %v5635_v45, %v5507_v7  ;;  %v5122_v46 = vpop.permute.xlu1 %5121  ;;  %v5385_v36 = vadd.f32 %v15359_v5, %v5072_v31 }
 0x3f2   :  { %v5788_v63 = vadd.f32 %v5660_v56, %v5532_v29  ;;  %5123 = vrot.lane.b32.xlu0 %v12834_v4, %s10385_s2  ;;  %v5410_v45 = vadd.f32 %v15360_v13, %v5122_v46  ;;  %v15365_v46 = vld [vmem:[#allocation92_spill] sm:$0xff] }
 0x3f3   :  { %v13314_v6 = vpop.f32.mrb[236].mxu1  ;;  %v5641_v4 = vmul.f32 %v5385_v36, %v5385_v36 }
 0x3f4   :  { %5125 = vrot.lane.b32.xlu1 %v12858_v10, %s10385_s2  ;;  %v6675_v14 = vcombine.low %v13204_v61, %v5788_v63  ;;  %v6676_v37 = vcombine.high %v13204_v61, %v5788_v63  ;;  %v5068_v19 = vpop.permute.xlu0 %5067  ;;  %v13318_v32 = vpop.f32.mrb[237].mxu1  ;;  %v15361_v61 = vld [vmem:[#allocation37_spill] sm:$0xff]  ;;  %v15362_v63 = vld [vmem:[#allocation36_spill] sm:$0xff]  ;;  %v5666_v5 = vmul.f32 %v5410_v45, %v5410_v45 }
 0x3f5   :  { %v5118_v27 = vpop.permute.xlu1 %5117  ;;  %v13320_v59 = vpop.f32.mrb[238].mxu1  ;;  %v5383_v60 = vadd.f32 %v5068_v19, %v15363_v16  ;;  %v15368_v19 = vld [vmem:[#allocation27_spill] sm:$0xff] }
 0x3f6   :  { %4487 = vrot.lane.b32.xlu0 %v12911_v49, %s10385_s2  ;;  %v13324_v58 = vpop.f32.mrb[239].mxu1  ;;  %v5408_v13 = vadd.f32 %v5118_v27, %v15365_v46 }
 0x3f7   :  { %v5639_v27 = vmul.f32 %v5383_v60, %v5383_v60 }
 0x3f8   :  { %4489 = vrot.lane.b32.xlu1 %v12924_v28, %s10385_s2  ;;  %v4432_v7 = vpop.permute.xlu0 %4431  ;;  %v5664_v46 = vmul.f32 %v5408_v13, %v5408_v13  ;;  %v15376_v13 = vcombine.high %v13098_v21, %v13109_v8 }
 0x3f9   :  { %v4745_v56 = vsub.f32 %v15361_v61, %v4432_v7  ;;  %v4482_v29 = vpop.permute.xlu1 %4481 }
 0x3fa   :  { %v4770_v10 = vsub.f32 %v15362_v63, %v4482_v29  ;;  %4483 = vrot.lane.b32.xlu0 %v12921_v48, %s10385_s2  ;;  %v15367_v63 = vld [vmem:[#allocation39_spill] sm:$0xff] }
 0x3fb   :  { %v5513_v49 = vmul.f32 %v4745_v56, %v4745_v56  ;;  %v13337_v31 = vpop.f32.mrb[240].mxu1 }
 0x3fc   :  { %4485 = vrot.lane.b32.xlu1 %v12939_v35, %s10385_s2  ;;  %15364 = vst [vmem:[#allocation14_spill] sm:$0xff] %v13337_v31  ;;  %v5538_v28 = vmul.f32 %v4770_v10, %v4770_v10  ;;  %v4428_v7 = vpop.permute.xlu0 %4427  ;;  %v13340_v61 = vpop.f32.mrb[241].mxu1 }
 0x3fd   :  { %15366 = vst [vmem:[#allocation41_spill] sm:$0xff] %v13340_v61  ;;  %v13342_v29 = vadd.f32 %v5641_v4, %v5513_v49  ;;  %v4743_v48 = vsub.f32 %v15367_v63, %v4428_v7  ;;  %v4478_v36 = vpop.permute.xlu1 %4477  ;;  %v13345_v26 = vpop.f32.mrb[242].mxu1  ;;  %v15370_v4 = vcombine.low %v13095_v51, %v13106_v33 }
 0x3fe   :  { %v5794_v16 = vadd.f32 %v5666_v5, %v5538_v28  ;;  %v4768_v56 = vsub.f32 %v15368_v19, %v4478_v36  ;;  %5135 = vrot.lane.b32.xlu0 %v12987_v9, %s10385_s2  ;;  %v13350_v45 = vpop.f32.mrb[243].mxu1  ;;  %v15372_v28 = vcombine.low %v13098_v21, %v13109_v8  ;;  %v7771_v36 = vrot.slane %v7763_v44, %v15099_v25 }
 0x3ff   :  { %15369 = vst [vmem:[#allocation22_spill] sm:$0xff] %v13350_v45  ;;  %v5511_v10 = vmul.f32 %v4743_v48, %v4743_v48  ;;  %v13358_v49 = vrot.slane %v15370_v4, %v11516_v2  ;;  %v15374_v4 = vcombine.high %v13095_v51, %v13106_v33  ;;  %v6683_v51 = vrot.slane %v6675_v14, %v15099_v25 }
 0x400   :  { %5137 = vrot.lane.b32.xlu1 %v12997_v11, %s10385_s2  ;;  %v13364_v5 = vrot.slane %v15372_v28, %v11516_v2  ;;  %v7779_v7 = vcombine.low %v13243_v62, %v5794_v16  ;;  %v7780_v60 = vcombine.high %v13243_v62, %v5794_v16  ;;  %v5536_v48 = vmul.f32 %v4768_v56, %v4768_v56  ;;  %v5080_v63 = vpop.permute.xlu0 %5079 }
 0x401   :  { %15371 = vst [vmem:[#allocation80_spill] sm:$0xff] %v13358_v49  ;;  %v13369_v19 = vadd.f32 %v5639_v27, %v5511_v10  ;;  %v8202_v11 = vpop.permute.xlu1 %8201  ;;  %v13375_v9 = vrot.slane %v15374_v4, %v11516_v2  ;;  %v13381_v28 = vrot.slane %v15376_v13, %v11516_v2  ;;  %v7778_v62 = vrot.slane %v7764_v12, %v15099_v25  ;;  %v15418_v49 = vld [vmem:[#allocation82_spill] sm:$0xff] }
 0x402   :  { %15373 = vst [vmem:[#allocation12_spill] sm:$0xff] %v13364_v5  ;;  %v7787_v16 = vrot.slane %v7779_v7, %v15099_v25  ;;  %v7794_v44 = vrot.slane %v7780_v60, %v15099_v25  ;;  %v5792_v56 = vadd.f32 %v5664_v46, %v5536_v48  ;;  %5131 = vrot.lane.b32.xlu0 %v12991_v54, %s10385_s2  ;;  %v15417_v5 = vld [vmem:[#allocation55_spill] sm:$0xff] }
 0x403   :  { %15375 = vst [vmem:[#allocation42_spill] sm:$0xff] %v13375_v9  ;;  %15377 = vst [vmem:[#allocation29_spill] sm:$0xff] %v13381_v28  ;;  %v13390_v33 = vrot.slane %v6676_v37, %v15099_v25  ;;  %v13394_v21 = vpop.f32.mrb[244].mxu1  ;;  %v15378_v8 = vcombine.low %v13125_v39, %v13143_v1  ;;  %v15380_v27 = vcombine.high %v13125_v39, %v13143_v1 }
 0x404   :  { %5133 = vrot.lane.b32.xlu1 %v13000_v15, %s10385_s2  ;;  %v7827_v14 = vcombine.low %v7771_v36, %v7787_v16  ;;  %v7843_v37 = vcombine.low %v7778_v62, %v7794_v44  ;;  %v6691_v46 = vcombine.low %v13254_v55, %v5792_v56  ;;  %v6692_v7 = vcombine.high %v13254_v55, %v5792_v56  ;;  %v5076_v60 = vpop.permute.xlu0 %5075  ;;  %v13410_v48 = vpop.f32.mrb[245].mxu1  ;;  %v15384_v55 = vld [vmem:[#allocation51_spill] sm:$0xff] }
 0x405   :  { %v13400_v12 = vrot.slane %v15378_v8, %v11516_v2  ;;  %v13406_v10 = vrot.slane %v15380_v27, %v11516_v2  ;;  %15382 = vst [vmem:[#allocation88_spill] sm:$0xff] %v13410_v48  ;;  %v5389_v4 = vadd.f32 %v12207_v42, %v5080_v63  ;;  %v15383_v13 = vcombine.low %v12558_v34, %v12739_v24  ;;  %v8218_v15 = vpop.permute.xlu1 %8217  ;;  %v13417_v39 = vpop.f32.mrb[246].mxu1  ;;  %v15385_v48 = vld [vmem:[#allocation47_spill] sm:$0xff] }
 0x406   :  { %v7828_v1 = vcombine.high %v7771_v36, %v7787_v16  ;;  %v7844_v27 = vcombine.high %v7778_v62, %v7794_v44  ;;  %v6699_v54 = vrot.slane %v6691_v46, %v15099_v25  ;;  %v6706_v35 = vrot.slane %v6692_v7, %v15099_v25  ;;  %4495 = vrot.lane.b32.xlu0 %v15385_v48, %s10385_s2  ;;  %v13424_v42 = vpop.f32.mrb[247].mxu1  ;;  %v15392_v7 = vld [vmem:[#allocation49_spill] sm:$0xff] }
 0x407   :  { %15379 = vst [vmem:[#allocation32_spill] sm:$0xff] %v13400_v12  ;;  %15381 = vst [vmem:[#allocation20_spill] sm:$0xff] %v13406_v10  ;;  %v8438_v8 = vsel %vm8387_vm1, %v15383_v13, %v8202_v11  ;;  %v5387_v56 = vadd.f32 %v5076_v60, %v15384_v55  ;;  %v13427_v34 = vrot.slane %v7827_v14, %v11516_v2  ;;  %v15388_v11 = vld [vmem:[#allocation33_spill] sm:$0xff]  ;;  %v15393_v55 = vld [vmem:[#allocation71_spill] sm:$0xff] }
 0x408   :  { %15386 = vst [vmem:[#allocation91_spill] sm:$0xff] %v13424_v42  ;;  %v8442_v24 = vsel %vm473_vm0, %v8438_v8, %v8218_v15  ;;  %4497 = vrot.lane.b32.xlu1 %v15388_v11, %s10385_s2  ;;  %v13433_v63 = vrot.slane %v7843_v37, %v11516_v2  ;;  %v13436_v36 = vrot.slane %v7828_v1, %v11516_v2  ;;  %v4440_v46 = vpop.permute.xlu0 %4439  ;;  %v15396_v1 = vld [vmem:[#allocation48_spill] sm:$0xff] }
 0x409   :  { %15387 = vst [vmem:[#allocation37_spill] sm:$0xff] %v13427_v34  ;;  %v13439_v62 = vrot.slane %v7844_v27, %v11516_v2  ;;  %v6739_v16 = vcombine.low %v6683_v51, %v6699_v54  ;;  %v6755_v44 = vcombine.low %v13390_v33, %v6706_v35  ;;  %v6740_v15 = vcombine.high %v6683_v51, %v6699_v54 }
 0x40a   :  { %15389 = vst [vmem:[#allocation36_spill] sm:$0xff] %v13433_v63  ;;  %15390 = vst [vmem:[#allocation89_spill] sm:$0xff] %v13436_v36  ;;  %v4749_v60 = vsub.f32 %v15392_v7, %v4440_v46  ;;  %v8234_v13 = vpop.permute.xlu1 %8233  ;;  %4491 = vrot.lane.b32.xlu0 %v15393_v55, %s10385_s2  ;;  %v5645_v7 = vmul.f32 %v5389_v4, %v5389_v4  ;;  %v15401_v36 = vld [vmem:[#allocation45_spill] sm:$0xff]  ;;  %v5643_v11 = vmul.f32 %v5387_v56, %v5387_v56  ;;  %v15404_v4 = vld [vmem:[#allocation50_spill] sm:$0xff] }
 0x40b   :  { %15391 = vst [vmem:[#allocation92_spill] sm:$0xff] %v13439_v62  ;;  %v13452_v27 = vsel %vm8396_vm2, %v8442_v24, %v8234_v13  ;;  %v13459_v51 = vrot.slane %v6739_v16, %v11516_v2  ;;  %v13462_v46 = vrot.slane %v6740_v15, %v11516_v2  ;;  %v13467_v24 = vpop.f32.mrb[248].mxu1  ;;  %v15399_v15 = vcombine.low %v13140_v40, %v13146_v17  ;;  %v15406_v56 = vld [vmem:[#allocation103_spill] sm:$0xff] }
 0x40c   :  { %v5517_v8 = vmul.f32 %v4749_v60, %v4749_v60  ;;  %10224 = vrsqrt.f32 %v13452_v27  ;;  %4493 = vrot.lane.b32.xlu1 %v15396_v1, %s10385_s2  ;;  %15397 = vst [vmem:[#allocation51_spill] sm:$0xff] %v13467_v24  ;;  %v4436_v13 = vpop.permute.xlu0 %4435  ;;  %v13469_v37 = vpop.f32.mrb[249].mxu1  ;;  %v13489_v54 = vrot.slane %v6755_v44, %v11516_v2  ;;  %v6756_v16 = vcombine.high %v13390_v33, %v6706_v35 }
 0x40d   :  { %15394 = vst [vmem:[#allocation39_spill] sm:$0xff] %v13459_v51  ;;  %15395 = vst [vmem:[#allocation27_spill] sm:$0xff] %v13462_v46  ;;  %v13481_v60 = vrot.slane %v15399_v15, %v11516_v2  ;;  %v4747_v9 = vsub.f32 %v15401_v36, %v4436_v13  ;;  %v13486_v55 = vpop.f32.mrb[250].mxu1  ;;  %v15407_v36 = vcombine.high %v13140_v40, %v13146_v17  ;;  %v15410_v13 = vld [vmem:[#allocation102_spill] sm:$0xff]  ;;  %vm8571_vm6 = vcmp.eq.f32.partialorder %v13452_v27, inf }
 0x40e   :  { %15398 = vst [vmem:[#allocation47_spill] sm:$0xff] %v13469_v37  ;;  %v13483_v14 = vadd.f32 %v5645_v7, %v5517_v8  ;;  %v8250_v1 = vpop.permute.xlu1 %8249  ;;  %15402 = vst [vmem:[#allocation45_spill] sm:$0xff] %v13486_v55  ;;  %5143 = vrot.lane.b32.xlu0 %v15404_v4, %s10385_s2  ;;  %v13494_v46 = vpop.f32.mrb[251].mxu1  ;;  %v13517_v7 = vrot.slane %v6756_v16, %v11516_v2  ;;  %vm8573_vm7 = vcmp.eq.f32.partialorder %v13452_v27, 0.0 }
 0x40f   :  { %15400 = vst [vmem:[#allocation49_spill] sm:$0xff] %v13481_v60  ;;  %15403 = vst [vmem:[#allocation104_spill] sm:$0xff] %v13489_v54  ;;  %v5515_v33 = vmul.f32 %v4747_v9, %v4747_v9  ;;  %v13514_v8 = vrot.slane %v15407_v36, %v11516_v2  ;;  %v15411_v9 = vld [vmem:[#allocation58_spill] sm:$0xff] }
 0x410   :  { %15405 = vst [vmem:[#allocation50_spill] sm:$0xff] %v13494_v46  ;;  %v7187_v44 = vcombine.low %v13290_v22, %v13483_v14  ;;  %v7188_v35 = vcombine.high %v13290_v22, %v13483_v14  ;;  %5145 = vrot.lane.b32.xlu1 %v15406_v56, %s10385_s2  ;;  %v5088_v15 = vpop.permute.xlu0 %5087  ;;  %15409 = vst [vmem:[#allocation105_spill] sm:$0xff] %v13517_v7  ;;  %v15413_v22 = vld [vmem:[#allocation93_spill] sm:$0xff] }
 0x411   :  { %15408 = vst [vmem:[#allocation103_spill] sm:$0xff] %v13514_v8  ;;  %v13523_v14 = vadd.f32 %v5643_v11, %v5515_v33  ;;  %v15412_v33 = vld [vmem:[#allocation76_spill] sm:$0xff] }
 0x412   :  { %v8266_v10 = vpop.permute.xlu1 %8265  ;;  %5139 = vrot.lane.b32.xlu0 %v15410_v13, %s10385_s2  ;;  %v15414_v54 = vcombine.low %v15412_v33, %v15413_v22 }
 0x413   :  { %v6099_v16 = vcombine.low %v13308_v38, %v13523_v14  ;;  %v13537_v11 = vpop.f32.mrb[252].mxu1 }
 0x414   :  { %5141 = vrot.lane.b32.xlu1 %v15411_v9, %s10385_s2  ;;  %v8450_v60 = vsel %vm8387_vm1, %v15414_v54, %v8250_v1  ;;  %v5084_v40 = vpop.permute.xlu0 %5083  ;;  %v13543_v51 = vpop.f32.mrb[253].mxu1  ;;  %v8574_v1 = vand.u32 2147483648, %v13452_v27  ;;  %v15415_v54 = vld [vmem:[#allocation53_spill] sm:$0xff] }
 0x415   :  { %v8454_v7 = vsel %vm473_vm0, %v8450_v60, %v8266_v10  ;;  %v13546_v12 = vpop.f32.mrb[254].mxu1  ;;  %v5393_v22 = vadd.f32 %v15415_v54, %v5088_v15  ;;  %v5391_v15 = vadd.f32 %v5084_v40, %v15417_v5  ;;  %v13575_v5 = vrot.slane %v7187_v44, %v15099_v25 }
 0x416   :  { %v10225_v17 = vpop.eup %10224  ;;  %v8282_v8 = vpop.permute.xlu1 %8281  ;;  %4503 = vrot.lane.b32.xlu0 %v13072_v50, %s10385_s2 }
 0x417   :  { %v8570_v36 = vmul.f32 %v10225_v17, %v13452_v27  ;;  %v8458_v62 = vsel %vm8396_vm2, %v8454_v7, %v8282_v8  ;;  %v13552_v28 = vpop.f32.mrb[255].mxu1  ;;  %v15416_v7 = vld [vmem:[#allocation81_spill] sm:$0xff]  ;;  %v5649_v63 = vmul.f32 %v5393_v22, %v5393_v22 }
 0x418   :  { %10226 = vrsqrt.f32 %v8458_v62  ;;  %4505 = vrot.lane.b32.xlu1 %v13087_v43, %s10385_s2  ;;  %v4448_v60 = vpop.permute.xlu0 %4447  ;;  %vm8578_vm8 = vcmp.eq.f32.partialorder %v8458_v62, inf  ;;  %vm8580_vm9 = vcmp.eq.f32.partialorder %v8458_v62, 0.0 }
 0x419   :  { %v8572_v10 = vsel %vm8571_vm6, %v13452_v27, %v8570_v36  ;;  %v4753_v17 = vsub.f32 %v15416_v7, %v4448_v60 }
 0x41a   :  { %v8575_v8 = vsel %vm8573_vm7, %v8574_v1, %v8572_v10  ;;  %v8010_v33 = vpop.permute.xlu1 %8009  ;;  %4499 = vrot.lane.b32.xlu0 %v13077_v57, %s10385_s2  ;;  %v5647_v1 = vmul.f32 %v5391_v15, %v5391_v15 }
 0x41b   :  { %8721 = vst [vmem:[#allocation8 + $0x60] sm:$0xff] %v8575_v8  ;;  %v5521_v54 = vmul.f32 %v4753_v17, %v4753_v17 }
 0x41c   :  { %4501 = vrot.lane.b32.xlu1 %v13092_v18, %s10385_s2  ;;  %v4444_v34 = vpop.permute.xlu0 %4443 }
 0x41d   :  { %v5777_v36 = vadd.f32 %v5649_v63, %v5521_v54  ;;  %v4751_v27 = vsub.f32 %v15418_v49, %v4444_v34  ;;  %v13578_v63 = vrot.slane %v7188_v35, %v15099_v25  ;;  %v15419_v49 = vld [vmem:[#allocation17_spill] sm:$0xff]  ;;  %v15420_v34 = vld [vmem:[#allocation34_spill] sm:$0xff]  ;;  %v8581_v35 = vand.u32 2147483648, %v8458_v62 }
 0x41e   :  { %v8026_v9 = vpop.permute.xlu1 %8025  ;;  %5151 = vrot.lane.b32.xlu0 %v13130_v0, %s10385_s2  ;;  %v15421_v40 = vcombine.low %v15419_v49, %v15420_v34  ;;  %v15422_v49 = vld [vmem:[#allocation60_spill] sm:$0xff] }
 0x41f   :  { %v7203_v10 = vcombine.low %v13342_v29, %v5777_v36  ;;  %v7204_v60 = vcombine.high %v13342_v29, %v5777_v36  ;;  %v5519_v22 = vmul.f32 %v4751_v27, %v4751_v27 }
 0x420   :  { %5153 = vrot.lane.b32.xlu1 %v13157_v53, %s10385_s2  ;;  %v8389_v8 = vsel %vm8387_vm1, %v15421_v40, %v8010_v33  ;;  %v5096_v7 = vpop.permute.xlu0 %5095 }
 0x421   :  { %v13585_v15 = vrot.slane %v7203_v10, %v15099_v25  ;;  %v13588_v29 = vrot.slane %v7204_v60, %v15099_v25  ;;  %v5775_v54 = vadd.f32 %v5647_v1, %v5519_v22  ;;  %v8393_v44 = vsel %vm473_vm0, %v8389_v8, %v8026_v9  ;;  %v15423_v9 = vld [vmem:[#allocation72_spill] sm:$0xff]  ;;  %v15429_v10 = vld [vmem:[#allocation61_spill] sm:$0xff] }
 0x422   :  { %v10227_v17 = vpop.eup %10226  ;;  %v8042_v36 = vpop.permute.xlu1 %8041  ;;  %5147 = vrot.lane.b32.xlu0 %v15422_v49, %s10385_s2  ;;  %v13603_v22 = vrot.slane %v6099_v16, %v15099_v25  ;;  %v15424_v8 = vcombine.high %v13308_v38, %v13523_v14  ;;  %v15425_v16 = vld [vmem:[#allocation84_spill] sm:$0xff]  ;;  %v15426_v14 = vld [vmem:[#allocation67_spill] sm:$0xff] }
 0x423   :  { %v8577_v27 = vmul.f32 %v10227_v17, %v8458_v62  ;;  %v8398_v53 = vsel %vm8396_vm2, %v8393_v44, %v8042_v36  ;;  %v6115_v60 = vcombine.low %v13369_v19, %v5775_v54  ;;  %v6116_v1 = vcombine.high %v13369_v19, %v5775_v54 }
 0x424   :  { %5149 = vrot.lane.b32.xlu1 %v15423_v9, %s10385_s2  ;;  %10228 = vrsqrt.f32 %v8398_v53  ;;  %v5092_v40 = vpop.permute.xlu0 %5091  ;;  %v13609_v17 = vrot.slane %v15424_v8, %v15099_v25  ;;  %v15431_v9 = vld [vmem:[#allocation94_spill] sm:$0xff]  ;;  %vm8543_vm10 = vcmp.eq.f32.partialorder %v8398_v53, inf  ;;  %vm8545_vm11 = vcmp.eq.f32.partialorder %v8398_v53, 0.0 }
 0x425   :  { %v8579_v34 = vsel %vm8578_vm8, %v8458_v62, %v8577_v27  ;;  %v13612_v36 = vrot.slane %v6115_v60, %v15099_v25  ;;  %v13615_v19 = vrot.slane %v6116_v1, %v15099_v25  ;;  %v5397_v27 = vadd.f32 %v15426_v14, %v5096_v7  ;;  %v15428_v7 = vld [vmem:[#allocation73_spill] sm:$0xff]  ;;  %v15430_v1 = vld [vmem:[#allocation24_spill] sm:$0xff] }
 0x426   :  { %v8582_v44 = vsel %vm8580_vm9, %v8581_v35, %v8579_v34  ;;  %v8058_v54 = vpop.permute.xlu1 %8057  ;;  %4511 = vrot.lane.b32.xlu0 %v15425_v16, %s10385_s2  ;;  %v5395_v33 = vadd.f32 %v5092_v40, %v15429_v10  ;;  %v15432_v49 = vcombine.low %v15430_v1, %v15431_v9  ;;  %v8546_v9 = vand.u32 2147483648, %v8398_v53 }
 0x427   :  { %8722 = vst [vmem:[#allocation8 + $0x68] sm:$0xff] %v8582_v44  ;;  %v15427_v44 = vld [vmem:[#allocation54_spill] sm:$0xff]  ;;  %v5653_v14 = vmul.f32 %v5397_v27, %v5397_v27 }
 0x428   :  { %4513 = vrot.lane.b32.xlu1 %v13195_v47, %s10385_s2  ;;  %v4456_v60 = vpop.permute.xlu0 %4455  ;;  %v8402_v34 = vsel %vm8387_vm1, %v15432_v49, %v8058_v54  ;;  %v15434_v49 = vld [vmem:[#allocation65_spill] sm:$0xff] }
 0x429   :  { %v4757_v38 = vsub.f32 %v15427_v44, %v4456_v60  ;;  %v15433_v44 = vld [vmem:[#allocation52_spill] sm:$0xff] }
 0x42a   :  { %v8074_v62 = vpop.permute.xlu1 %8073  ;;  %4507 = vrot.lane.b32.xlu0 %v15428_v7, %s10385_s2 }
 0x42b   :  { %v5525_v35 = vmul.f32 %v4757_v38, %v4757_v38  ;;  %v8406_v60 = vsel %vm473_vm0, %v8402_v34, %v8074_v62  ;;  %v5651_v38 = vmul.f32 %v5395_v33, %v5395_v33  ;;  %v15435_v34 = vld [vmem:[#allocation66_spill] sm:$0xff]  ;;  %v15436_v33 = vld [vmem:[#allocation75_spill] sm:$0xff] }
 0x42c   :  { %4509 = vrot.lane.b32.xlu1 %v13198_v3, %s10385_s2  ;;  %v4452_v0 = vpop.permute.xlu0 %4451 }
 0x42d   :  { %v13644_v8 = vadd.f32 %v5653_v14, %v5525_v35  ;;  %v4755_v47 = vsub.f32 %v15433_v44, %v4452_v0  ;;  %v15437_v14 = vld [vmem:[#allocation43_spill] sm:$0xff] }
 0x42e   :  { %v8090_v7 = vpop.permute.xlu1 %8089  ;;  %v10229_v27 = vpop.eup %10228  ;;  %5159 = vrot.lane.b32.xlu0 %v13220_v30, %s10385_s2 }
 0x42f   :  { %v8410_v10 = vsel %vm8396_vm2, %v8406_v60, %v8090_v7  ;;  %v8542_v40 = vmul.f32 %v10229_v27, %v8398_v53  ;;  %v5523_v3 = vmul.f32 %v4755_v47, %v4755_v47  ;;  %v15438_v60 = vld [vmem:[#allocation70_spill] sm:$0xff] }
 0x430   :  { %10230 = vrsqrt.f32 %v8410_v10  ;;  %5161 = vrot.lane.b32.xlu1 %v15434_v49, %s10385_s2  ;;  %v5104_v54 = vpop.permute.xlu0 %5103  ;;  %vm8550_vm12 = vcmp.eq.f32.partialorder %v8410_v10, inf  ;;  %v15442_v49 = vld [vmem:[#allocation13_spill] sm:$0xff]  ;;  %vm8552_vm13 = vcmp.eq.f32.partialorder %v8410_v10, 0.0 }
 0x431   :  { %v8544_v62 = vsel %vm8543_vm10, %v8398_v53, %v8542_v40  ;;  %v13653_v0 = vadd.f32 %v5651_v38, %v5523_v3  ;;  %v5401_v44 = vadd.f32 %v15438_v60, %v5104_v54  ;;  %v15439_v53 = vld [vmem:[#allocation64_spill] sm:$0xff]  ;;  %v15443_v54 = vld [vmem:[#allocation77_spill] sm:$0xff] }
 0x432   :  { %v8298_v35 = vpop.permute.xlu1 %8297  ;;  %v8547_v1 = vsel %vm8545_vm11, %v8546_v9, %v8544_v62  ;;  %5155 = vrot.lane.b32.xlu0 %v15435_v34, %s10385_s2  ;;  %v15440_v40 = vld [vmem:[#allocation68_spill] sm:$0xff] }
 0x433   :  { %8717 = vst [vmem:[#allocation8 + $0x40] sm:$0xff] %v8547_v1  ;;  %v15441_v1 = vld [vmem:[#allocation16_spill] sm:$0xff]  ;;  %v5657_v34 = vmul.f32 %v5401_v44, %v5401_v44 }
 0x434   :  { %5157 = vrot.lane.b32.xlu1 %v15436_v33, %s10385_s2  ;;  %v5100_v47 = vpop.permute.xlu0 %5099  ;;  %v8553_v33 = vand.u32 2147483648, %v8410_v10 }
 0x435   :  { %v5399_v30 = vadd.f32 %v5100_v47, %v15442_v49  ;;  %v15445_v49 = vld [vmem:[#allocation28_spill] sm:$0xff]  ;;  %v15446_v47 = vld [vmem:[#allocation83_spill] sm:$0xff] }
 0x436   :  { %v8346_v7 = vpop.permute.xlu1 %8345  ;;  %4519 = vrot.lane.b32.xlu0 %v15437_v14, %s10385_s2 }
 0x437   :  { %v5655_v44 = vmul.f32 %v5399_v30, %v5399_v30  ;;  %v15448_v30 = vld [vmem:[#allocation35_spill] sm:$0xff] }
 0x438   :  { %4521 = vrot.lane.b32.xlu1 %v15439_v53, %s10385_s2  ;;  %v4464_v3 = vpop.permute.xlu0 %4463 }
 0x439   :  { %v4761_v38 = vsub.f32 %v15440_v40, %v4464_v3  ;;  %v15444_v3 = vld [vmem:[#allocation62_spill] sm:$0xff] }
 0x43a   :  { %v10231_v27 = vpop.eup %10230  ;;  %v8314_v9 = vpop.permute.xlu1 %8313  ;;  %4515 = vrot.lane.b32.xlu0 %v15441_v1, %s10385_s2 }
 0x43b   :  { %v8549_v62 = vmul.f32 %v10231_v27, %v8410_v10  ;;  %v5529_v14 = vmul.f32 %v4761_v38, %v4761_v38  ;;  %v15447_v38 = vcombine.low %v15445_v49, %v15446_v47 }
 0x43c   :  { %4517 = vrot.lane.b32.xlu1 %v15443_v54, %s10385_s2  ;;  %v4460_v53 = vpop.permute.xlu0 %4459 }
 0x43d   :  { %v8551_v60 = vsel %vm8550_vm12, %v8410_v10, %v8549_v62  ;;  %v13670_v13 = vadd.f32 %v5657_v34, %v5529_v14  ;;  %v4759_v27 = vsub.f32 %v15444_v3, %v4460_v53  ;;  %v8462_v10 = vsel %vm8387_vm1, %v15447_v38, %v8298_v35  ;;  %v15449_v62 = vld [vmem:[#allocation95_spill] sm:$0xff]  ;;  %v15452_v38 = vld [vmem:[#allocation21_spill] sm:$0xff] }
 0x43e   :  { %v8554_v16 = vsel %vm8552_vm13, %v8553_v33, %v8551_v60  ;;  %v8362_v40 = vpop.permute.xlu1 %8361  ;;  %5167 = vrot.lane.b32.xlu0 %v13285_v20, %s10385_s2  ;;  %v8466_v34 = vsel %vm473_vm0, %v8462_v10, %v8314_v9  ;;  %v15450_v60 = vcombine.low %v15448_v30, %v15449_v62 }
 0x43f   :  { %8718 = vst [vmem:[#allocation8 + $0x48] sm:$0xff] %v8554_v16  ;;  %v5527_v1 = vmul.f32 %v4759_v27, %v4759_v27 }
 0x440   :  { %5169 = vrot.lane.b32.xlu1 %v13293_v23, %s10385_s2  ;;  %v5112_v33 = vpop.permute.xlu0 %5111  ;;  %v8474_v35 = vsel %vm8387_vm1, %v15450_v60, %v8346_v7 }
 0x441   :  { %v13682_v14 = vadd.f32 %v5655_v44, %v5527_v1  ;;  %v8478_v9 = vsel %vm473_vm0, %v8474_v35, %v8362_v40  ;;  %v15451_v44 = vld [vmem:[#allocation74_spill] sm:$0xff]  ;;  %v15453_v40 = vld [vmem:[#allocation23_spill] sm:$0xff] }
 0x442   :  { %v8330_v53 = vpop.permute.xlu1 %8329  ;;  %5163 = vrot.lane.b32.xlu0 %v13288_v41, %s10385_s2  ;;  %v5405_v49 = vadd.f32 %v15451_v44, %v5112_v33  ;;  %v15454_v35 = vld [vmem:[#allocation15_spill] sm:$0xff] }
 0x443   :  { %v8470_v16 = vsel %vm8396_vm2, %v8466_v34, %v8330_v53 }
 0x444   :  { %10232 = vrsqrt.f32 %v8470_v16  ;;  %5165 = vrot.lane.b32.xlu1 %v13300_v52, %s10385_s2  ;;  %v5108_v3 = vpop.permute.xlu0 %5107  ;;  %v5661_v7 = vmul.f32 %v5405_v49, %v5405_v49  ;;  %vm8585_vm14 = vcmp.eq.f32.partialorder %v8470_v16, inf  ;;  %vm8587_vm15 = vcmp.eq.f32.partialorder %v8470_v16, 0.0 }
 0x445   :  { %v5403_v53 = vadd.f32 %v5108_v3, %v15453_v40  ;;  %v15455_v40 = vld [vmem:[#allocation25_spill] sm:$0xff] }
 0x446   :  { %v8378_v1 = vpop.permute.xlu1 %8377  ;;  %4527 = vrot.lane.b32.xlu0 %v13314_v6, %s10385_s2 }
 0x447   :  { %v8482_v27 = vsel %vm8396_vm2, %v8478_v9, %v8378_v1  ;;  %v5659_v49 = vmul.f32 %v5403_v53, %v5403_v53 }
 0x448   :  { %10234 = vrsqrt.f32 %v8482_v27  ;;  %4529 = vrot.lane.b32.xlu1 %v13320_v59, %s10385_s2  ;;  %v4472_v47 = vpop.permute.xlu0 %4471  ;;  %vm8592_vm3 = vcmp.eq.f32.partialorder %v8482_v27, inf  ;;  %vm8594_vm4 = vcmp.eq.f32.partialorder %v8482_v27, 0.0 }
 0x449   :  { %v4765_v10 = vsub.f32 %v15452_v38, %v4472_v47  ;;  %v8588_v47 = vand.u32 2147483648, %v8470_v16 }
 0x44a   :  { %v8106_v34 = vpop.permute.xlu1 %8105  ;;  %4523 = vrot.lane.b32.xlu0 %v13318_v32, %s10385_s2 }
 0x44b   :  { %v5533_v30 = vmul.f32 %v4765_v10, %v4765_v10 }
 0x44c   :  { %4525 = vrot.lane.b32.xlu1 %v13324_v58, %s10385_s2  ;;  %v4468_v62 = vpop.permute.xlu0 %4467 }
 0x44d   :  { %v13706_v60 = vadd.f32 %v5661_v7, %v5533_v30  ;;  %v4763_v9 = vsub.f32 %v15454_v35, %v4468_v62  ;;  %v15456_v30 = vld [vmem:[#allocation90_spill] sm:$0xff] }
 0x44e   :  { %v10233_v33 = vpop.eup %10232  ;;  %v8122_v1 = vpop.permute.xlu1 %8121  ;;  %5175 = vrot.lane.b32.xlu0 %v13337_v31, %s10385_s2  ;;  %v15457_v62 = vcombine.low %v15455_v40, %v15456_v30  ;;  %v15460_v40 = vld [vmem:[#allocation44_spill] sm:$0xff] }
 0x44f   :  { %v8584_v44 = vmul.f32 %v10233_v33, %v8470_v16  ;;  %v5531_v10 = vmul.f32 %v4763_v9, %v4763_v9 }
 0x450   :  { %5177 = vrot.lane.b32.xlu1 %v13345_v26, %s10385_s2  ;;  %v8414_v33 = vsel %vm8387_vm1, %v15457_v62, %v8106_v34  ;;  %v5120_v35 = vpop.permute.xlu0 %5119  ;;  %v15462_v62 = vcombine.low %v13575_v5, %v13585_v15 }
 0x451   :  { %v8586_v7 = vsel %vm8585_vm14, %v8470_v16, %v8584_v44  ;;  %v13721_v52 = vadd.f32 %v5659_v49, %v5531_v10  ;;  %v8418_v3 = vsel %vm473_vm0, %v8414_v33, %v8122_v1  ;;  %v8595_v16 = vand.u32 2147483648, %v8482_v27 }
 0x452   :  { %v10235_v31 = vpop.eup %10234  ;;  %v8589_v53 = vsel %vm8587_vm15, %v8588_v47, %v8586_v7  ;;  %v8138_v41 = vpop.permute.xlu1 %8137  ;;  %5171 = vrot.lane.b32.xlu0 %v13340_v61, %s10385_s2  ;;  %v13746_v33 = vrot.slane %v15462_v62, %v11516_v2  ;;  %v15472_v62 = vcombine.high %v13578_v63, %v13588_v29 }
 0x453   :  { %8723 = vst [vmem:[#allocation8 + $0x70] sm:$0xff] %v8589_v53  ;;  %v8591_v9 = vmul.f32 %v10235_v31, %v8482_v27  ;;  %v8422_v38 = vsel %vm8396_vm2, %v8418_v3, %v8138_v41  ;;  %v6131_v34 = vcombine.low %v13653_v0, %v13721_v52  ;;  %v6132_v44 = vcombine.high %v13653_v0, %v13721_v52  ;;  %v15458_v41 = vld [vmem:[#allocation30_spill] sm:$0xff] }
 0x454   :  { %10236 = vrsqrt.f32 %v8422_v38  ;;  %5173 = vrot.lane.b32.xlu1 %v13350_v45, %s10385_s2  ;;  %v5116_v31 = vpop.permute.xlu0 %5115  ;;  %v5409_v3 = vadd.f32 %v15458_v41, %v5120_v35  ;;  %v15459_v52 = vld [vmem:[#allocation26_spill] sm:$0xff]  ;;  %15463 = vst [vmem:[#allocation76_spill] sm:$0xff] %v13746_v33  ;;  %v15464_v35 = vcombine.high %v13575_v5, %v13585_v15  ;;  %v15468_v5 = vcombine.low %v13609_v17, %v13615_v19 }
 0x455   :  { %v8593_v1 = vsel %vm8592_vm3, %v8482_v27, %v8591_v9  ;;  %v5407_v30 = vadd.f32 %v5116_v31, %v15460_v40  ;;  %v15461_v27 = vld [vmem:[#allocation88_spill] sm:$0xff]  ;;  %v15465_v9 = vcombine.low %v13578_v63, %v13588_v29  ;;  %vm8557_vm5 = vcmp.eq.f32.partialorder %v8422_v38, inf  ;;  %v15475_v63 = vld [vmem:[#allocation78_spill] sm:$0xff] }
 0x456   :  { %v8596_v47 = vsel %vm8594_vm4, %v8595_v16, %v8593_v1  ;;  %v8154_v49 = vpop.permute.xlu1 %8153  ;;  %4535 = vrot.lane.b32.xlu0 %v13394_v21, %s10385_s2  ;;  %v13752_v53 = vrot.slane %v15464_v35, %v11516_v2  ;;  %v5665_v1 = vmul.f32 %v5409_v3, %v5409_v3  ;;  %v13772_v15 = vrot.slane %v15468_v5, %v11516_v2 }
 0x457   :  { %8724 = vst [vmem:[#allocation8 + $0x78] sm:$0xff] %v8596_v47  ;;  %v13758_v16 = vrot.slane %v15465_v9, %v11516_v2  ;;  %v15467_v47 = vcombine.low %v13603_v22, %v13612_v36  ;;  %v13782_v35 = vrot.slane %v15472_v62, %v11516_v2  ;;  %v15473_v9 = vcombine.high %v13603_v22, %v13612_v36 }
 0x458   :  { %4537 = vrot.lane.b32.xlu1 %v13417_v39, %s10385_s2  ;;  %v4480_v10 = vpop.permute.xlu0 %4479  ;;  %v15474_v5 = vcombine.high %v13609_v17, %v13615_v19  ;;  %v8560_v61 = vand.u32 2147483648, %v8422_v38  ;;  %vm8559_vm6 = vcmp.eq.f32.partialorder %v8422_v38, 0.0 }
 0x459   :  { %v4769_v0 = vsub.f32 %v15459_v52, %v4480_v10  ;;  %15466 = vst [vmem:[#allocation93_spill] sm:$0xff] %v13758_v16  ;;  %v13766_v41 = vrot.slane %v15467_v47, %v11516_v2  ;;  %v15469_v10 = vld [vmem:[#allocation86_spill] sm:$0xff]  ;;  %v13788_v47 = vrot.slane %v15473_v9, %v11516_v2 }
 0x45a   :  { %v8170_v7 = vpop.permute.xlu1 %8169  ;;  %4531 = vrot.lane.b32.xlu0 %v15461_v27, %s10385_s2  ;;  %v15470_v52 = vld [vmem:[#allocation98_spill] sm:$0xff] }
 0x45b   :  { %v5537_v31 = vmul.f32 %v4769_v0, %v4769_v0  ;;  %v15471_v40 = vcombine.low %v15469_v10, %v15470_v52  ;;  %v13794_v10 = vrot.slane %v15474_v5, %v11516_v2 }
 0x45c   :  { %4533 = vrot.lane.b32.xlu1 %v13424_v42, %s10385_s2  ;;  %v4476_v0 = vpop.permute.xlu0 %4475  ;;  %v5663_v42 = vmul.f32 %v5407_v30, %v5407_v30 }
 0x45d   :  { %v8426_v3 = vsel %vm8387_vm1, %v15471_v40, %v8154_v49  ;;  %v5793_v52 = vadd.f32 %v5665_v1, %v5537_v31  ;;  %v4767_v29 = vsub.f32 %v15475_v63, %v4476_v0  ;;  %v15477_v1 = vcombine.high %v13644_v8, %v13706_v60 }
 0x45e   :  { %v10237_v49 = vpop.eup %10236  ;;  %v8430_v40 = vsel %vm473_vm0, %v8426_v3, %v8170_v7  ;;  %v8186_v62 = vpop.permute.xlu1 %8185  ;;  %5183 = vrot.lane.b32.xlu0 %v13467_v24, %s10385_s2  ;;  %v15476_v7 = vcombine.low %v13644_v8, %v13706_v60  ;;  %v13821_v63 = vrot.slane %v6132_v44, %v15099_v25  ;;  %v15479_v60 = vld [vmem:[#allocation101_spill] sm:$0xff] }
 0x45f   :  { %v8556_v45 = vmul.f32 %v10237_v49, %v8422_v38  ;;  %v13799_v22 = vsel %vm8396_vm2, %v8430_v40, %v8186_v62  ;;  %v7235_v17 = vcombine.low %v13670_v13, %v5793_v52  ;;  %v7236_v36 = vcombine.high %v13670_v13, %v5793_v52 }
 0x460   :  { %v5535_v19 = vmul.f32 %v4767_v29, %v4767_v29  ;;  %10238 = vrsqrt.f32 %v13799_v22  ;;  %5185 = vrot.lane.b32.xlu1 %v13486_v55, %s10385_s2  ;;  %v7227_v30 = vrot.slane %v15476_v7, %v15099_v25  ;;  %v7234_v31 = vrot.slane %v15477_v1, %v15099_v25  ;;  %v5128_v13 = vpop.permute.xlu0 %5127  ;;  %v15478_v29 = vld [vmem:[#allocation99_spill] sm:$0xff] }
 0x461   :  { %v8558_v3 = vsel %vm8557_vm5, %v8422_v38, %v8556_v45  ;;  %v7243_v9 = vrot.slane %v7235_v17, %v15099_v25  ;;  %v7250_v5 = vrot.slane %v7236_v36, %v15099_v25  ;;  %v6139_v40 = vrot.slane %v6131_v34, %v15099_v25 }
 0x462   :  { %v8561_v0 = vsel %vm8559_vm6, %v8560_v61, %v8558_v3  ;;  %v5791_v49 = vadd.f32 %v5663_v42, %v5535_v19  ;;  %v5130_v52 = vpop.permute.xlu1 %5129  ;;  %v5413_v8 = vadd.f32 %v15478_v29, %v5128_v13  ;;  %5179 = vrot.lane.b32.xlu0 %v13469_v37, %s10385_s2  ;;  %vm8564_vm7 = vcmp.eq.f32.partialorder %v13799_v22, inf  ;;  %v15480_v3 = vld [vmem:[#allocation100_spill] sm:$0xff]  ;;  %v15483_v29 = vld [vmem:[#allocation38_spill] sm:$0xff]  ;;  %v15485_v37 = vld [vmem:[#allocation19_spill] sm:$0xff] }
 0x463   :  { %8719 = vst [vmem:[#allocation8 + $0x50] sm:$0xff] %v8561_v0  ;;  %v5414_v62 = vadd.f32 %v15479_v60, %v5130_v52  ;;  %v7283_v61 = vcombine.low %v7227_v30, %v7243_v9  ;;  %v7299_v45 = vcombine.low %v7234_v31, %v7250_v5  ;;  %vm8566_vm8 = vcmp.eq.f32.partialorder %v13799_v22, 0.0 }
 0x464   :  { %v6147_v38 = vcombine.low %v13682_v14, %v5791_v49  ;;  %v6148_v42 = vcombine.high %v13682_v14, %v5791_v49  ;;  %5181 = vrot.lane.b32.xlu1 %v13494_v46, %s10385_s2  ;;  %v8567_v34 = vand.u32 2147483648, %v13799_v22  ;;  %v5669_v44 = vmul.f32 %v5413_v8, %v5413_v8  ;;  %v5124_v17 = vpop.permute.xlu0 %5123 }
 0x465   :  { %v7284_v36 = vcombine.high %v7227_v30, %v7243_v9  ;;  %v7300_v19 = vcombine.high %v7234_v31, %v7250_v5  ;;  %v5411_v13 = vadd.f32 %v5124_v17, %v15480_v3  ;;  %v13838_v0 = vrot.slane %v7283_v61, %v11516_v2 }
 0x466   :  { %v6155_v7 = vrot.slane %v6147_v38, %v15099_v25  ;;  %v6162_v1 = vrot.slane %v6148_v42, %v15099_v25  ;;  %v5126_v14 = vpop.permute.xlu1 %5125  ;;  %v5670_v49 = vmul.f32 %v5414_v62, %v5414_v62  ;;  %4543 = vrot.lane.b32.xlu0 %v13537_v11, %s10385_s2  ;;  %v13846_v30 = vrot.slane %v7299_v45, %v11516_v2 }
 0x467   :  { %15481 = vst [vmem:[#allocation53_spill] sm:$0xff] %v13838_v0  ;;  %v13843_v52 = vrot.slane %v7284_v36, %v11516_v2  ;;  %v13849_v31 = vrot.slane %v7300_v19, %v11516_v2  ;;  %v5412_v8 = vadd.f32 %v5126_v14, %v15483_v29  ;;  %v7316_v60 = vcombine.high %v13746_v33, %v13838_v0  ;;  %v15484_v36 = vld [vmem:[#allocation96_spill] sm:$0xff] }
 0x468   :  { %15482 = vst [vmem:[#allocation81_spill] sm:$0xff] %v13846_v30  ;;  %v6195_v9 = vcombine.low %v6139_v40, %v6155_v7  ;;  %v6211_v5 = vcombine.low %v13821_v63, %v6162_v1  ;;  %4545 = vrot.lane.b32.xlu1 %v13546_v12, %s10385_s2  ;;  %v5667_v62 = vmul.f32 %v5411_v13, %v5411_v13  ;;  %v4488_v61 = vpop.permute.xlu0 %4487 }
 0x469   :  { %v7317_v45 = vcombine.low %v13752_v53, %v13843_v52  ;;  %v7320_v38 = vcombine.high %v13758_v16, %v13846_v30  ;;  %v7321_v42 = vcombine.low %v13782_v35, %v13849_v31  ;;  %v4773_v19 = vsub.f32 %v15484_v36, %v4488_v61  ;;  %v15492_v16 = vld [vmem:[#allocation48_spill] sm:$0xff] }
 0x46a   :  { %v10239_v17 = vpop.eup %10238  ;;  %v4490_v3 = vpop.permute.xlu1 %4489  ;;  %v13869_v29 = vrot.slane %v6195_v9, %v11516_v2  ;;  %4539 = vrot.lane.b32.xlu0 %v13543_v51, %s10385_s2  ;;  %v6196_v24 = vcombine.high %v6139_v40, %v6155_v7  ;;  %v13876_v61 = vrot.slane %v6211_v5, %v11516_v2  ;;  %v6212_v9 = vcombine.high %v13821_v63, %v6162_v1  ;;  %v15486_v63 = vld [vmem:[#allocation97_spill] sm:$0xff] }
 0x46b   :  { %v8563_v46 = vmul.f32 %v10239_v17, %v13799_v22  ;;  %v4774_v55 = vsub.f32 %v15485_v37, %v4490_v3  ;;  %v5541_v36 = vmul.f32 %v4773_v19, %v4773_v19 }
 0x46c   :  { %4541 = vrot.lane.b32.xlu1 %v13552_v28, %s10385_s2  ;;  %v4484_v7 = vpop.permute.xlu0 %4483  ;;  %v13889_v5 = vrot.slane %v6196_v24, %v11516_v2  ;;  %v13899_v14 = vrot.slane %v6212_v9, %v11516_v2  ;;  %v5668_v9 = vmul.f32 %v5412_v8, %v5412_v8 }
 0x46d   :  { %v8565_v37 = vsel %vm8564_vm7, %v13799_v22, %v8563_v46  ;;  %v5542_v40 = vmul.f32 %v4774_v55, %v4774_v55  ;;  %v13895_v13 = vadd.f32 %v5669_v44, %v5541_v36  ;;  %v4771_v1 = vsub.f32 %v15486_v63, %v4484_v7  ;;  %v15487_v46 = vld [vmem:[#allocation79_spill] sm:$0xff] }
 0x46e   :  { %v8568_v3 = vsel %vm8566_vm8, %v8567_v34, %v8565_v37  ;;  %v4486_v17 = vpop.permute.xlu1 %4485  ;;  %8203 = vrot.lane.b32.xlu0 %v7316_v60, %s10388_s23  ;;  %v6229_v19 = vcombine.low %v13788_v47, %v13889_v5  ;;  %v15489_v60 = vld [vmem:[#allocation40_spill] sm:$0xff] }
 0x46f   :  { %8720 = vst [vmem:[#allocation8 + $0x58] sm:$0xff] %v8568_v3  ;;  %v13901_v55 = vadd.f32 %v5670_v49, %v5542_v40  ;;  %v4772_v24 = vsub.f32 %v15487_v46, %v4486_v17  ;;  %v5539_v34 = vmul.f32 %v4771_v1, %v4771_v1  ;;  %v15490_v40 = vld [vmem:[#allocation31_spill] sm:$0xff] }
 0x470   :  { %v5136_v37 = vpop.permute.xlu0 %5135 }
 0x471   :  { %v5540_v17 = vmul.f32 %v4772_v24, %v4772_v24  ;;  %v13919_v7 = vadd.f32 %v5667_v62, %v5539_v34  ;;  %v5417_v8 = vadd.f32 %v15385_v48, %v5136_v37  ;;  %v15488_v24 = vld [vmem:[#allocation33_spill] sm:$0xff]  ;;  %v15493_v37 = vld [vmem:[#allocation18_spill] sm:$0xff] }
 0x472   :  { %v5138_v3 = vpop.permute.xlu1 %5137  ;;  %8219 = vrot.lane.b32.xlu0 %v7317_v45, %s10379_s22 }
 0x473   :  { %v13921_v63 = vadd.f32 %v5668_v9, %v5540_v17  ;;  %v5418_v49 = vadd.f32 %v15488_v24, %v5138_v3  ;;  %v5673_v34 = vmul.f32 %v5417_v8, %v5417_v8  ;;  %v15491_v9 = vld [vmem:[#allocation71_spill] sm:$0xff] }
 0x474   :  { %v5132_v1 = vpop.permute.xlu0 %5131 }
 0x475   :  { %v5415_v17 = vadd.f32 %v5132_v1, %v15491_v9  ;;  %v5674_v30 = vmul.f32 %v5418_v49, %v5418_v49 }
 0x476   :  { %v5134_v46 = vpop.permute.xlu1 %5133  ;;  %8251 = vrot.lane.b32.xlu0 %v7320_v38, %s10388_s23 }
 0x477   :  { %v5416_v0 = vadd.f32 %v5134_v46, %v15492_v16 }
 0x478   :  { %v4496_v36 = vpop.permute.xlu0 %4495 }
 0x479   :  { %v4777_v44 = vsub.f32 %v15489_v60, %v4496_v36  ;;  %v15494_v60 = vld [vmem:[#allocation46_spill] sm:$0xff] }
 0x47a   :  { %v4498_v22 = vpop.permute.xlu1 %4497  ;;  %8267 = vrot.lane.b32.xlu0 %v7321_v42, %s10379_s22  ;;  %v15495_v42 = vcombine.high %v13752_v53, %v13843_v52 }
 0x47b   :  { %v4778_v62 = vsub.f32 %v15490_v40, %v4498_v22  ;;  %v5545_v45 = vmul.f32 %v4777_v44, %v4777_v44  ;;  %v5671_v44 = vmul.f32 %v5415_v17, %v5415_v17  ;;  %v5672_v40 = vmul.f32 %v5416_v0, %v5416_v0 }
 0x47c   :  { %v4492_v33 = vpop.permute.xlu0 %4491 }
 0x47d   :  { %v5546_v38 = vmul.f32 %v4778_v62, %v4778_v62  ;;  %v13932_v48 = vadd.f32 %v5673_v34, %v5545_v45  ;;  %v4775_v3 = vsub.f32 %v15493_v37, %v4492_v33  ;;  %v15496_v34 = vcombine.high %v13782_v35, %v13849_v31 }
 0x47e   :  { %v4494_v24 = vpop.permute.xlu1 %4493  ;;  %8235 = vrot.lane.b32.xlu0 %v15495_v42, %s10385_s2 }
 0x47f   :  { %v13935_v36 = vadd.f32 %v5674_v30, %v5546_v38  ;;  %v4776_v22 = vsub.f32 %v15494_v60, %v4494_v24  ;;  %v5543_v49 = vmul.f32 %v4775_v3, %v4775_v3 }
 0x480   :  { %v5144_v1 = vpop.permute.xlu0 %5143 }
 0x481   :  { %v5544_v16 = vmul.f32 %v4776_v22, %v4776_v22  ;;  %v13942_v46 = vadd.f32 %v5671_v44, %v5543_v49  ;;  %v5421_v8 = vadd.f32 %v13072_v50, %v5144_v1  ;;  %v15497_v50 = vcombine.high %v13766_v41, %v13869_v29  ;;  %v15499_v44 = vld [vmem:[#allocation58_spill] sm:$0xff] }
 0x482   :  { %v5146_v33 = vpop.permute.xlu1 %5145  ;;  %8283 = vrot.lane.b32.xlu0 %v15496_v34, %s10385_s2 }
 0x483   :  { %v13945_v62 = vadd.f32 %v5672_v40, %v5544_v16  ;;  %v5422_v30 = vadd.f32 %v13087_v43, %v5146_v33  ;;  %v5677_v35 = vmul.f32 %v5421_v8, %v5421_v8 }
 0x484   :  { %v5140_v53 = vpop.permute.xlu0 %5139 }
 0x485   :  { %v5419_v52 = vadd.f32 %v5140_v53, %v13077_v57  ;;  %v5678_v37 = vmul.f32 %v5422_v30, %v5422_v30 }
 0x486   :  { %v5142_v0 = vpop.permute.xlu1 %5141  ;;  %8011 = vrot.lane.b32.xlu0 %v15497_v50, %s10388_s23 }
 0x487   :  { %v5420_v9 = vadd.f32 %v5142_v0, %v13092_v18  ;;  %v15498_v18 = vld [vmem:[#allocation102_spill] sm:$0xff]  ;;  %v15501_v0 = vld [vmem:[#allocation84_spill] sm:$0xff] }
 0x488   :  { %v4504_v17 = vpop.permute.xlu0 %4503 }
 0x489   :  { %v4781_v45 = vsub.f32 %v15404_v4, %v4504_v17  ;;  %v15500_v4 = vcombine.high %v13788_v47, %v13889_v5  ;;  %v5676_v1 = vmul.f32 %v5420_v9, %v5420_v9  ;;  %v15502_v47 = vld [vmem:[#allocation85_spill] sm:$0xff] }
 0x48a   :  { %v4506_v43 = vpop.permute.xlu1 %4505  ;;  %8027 = vrot.lane.b32.xlu0 %v6229_v19, %s10379_s22 }
 0x48b   :  { %v4782_v38 = vsub.f32 %v15406_v56, %v4506_v43  ;;  %v5549_v31 = vmul.f32 %v4781_v45, %v4781_v45  ;;  %v5675_v56 = vmul.f32 %v5419_v52, %v5419_v52  ;;  %v15503_v52 = vcombine.high %v13772_v15, %v13876_v61 }
 0x48c   :  { %v4500_v3 = vpop.permute.xlu0 %4499 }
 0x48d   :  { %v5550_v57 = vmul.f32 %v4782_v38, %v4782_v38  ;;  %v5805_v24 = vadd.f32 %v5677_v35, %v5549_v31  ;;  %v4779_v60 = vsub.f32 %v15498_v18, %v4500_v3  ;;  %v15504_v35 = vld [vmem:[#allocation73_spill] sm:$0xff] }
 0x48e   :  { %v4502_v22 = vpop.permute.xlu1 %4501  ;;  %8043 = vrot.lane.b32.xlu0 %v15500_v4, %s10385_s2 }
 0x48f   :  { %v5806_v42 = vadd.f32 %v5678_v37, %v5550_v57  ;;  %v4780_v49 = vsub.f32 %v15499_v44, %v4502_v22  ;;  %v7323_v19 = vcombine.low %v13895_v13, %v5805_v24  ;;  %v7324_v40 = vcombine.high %v13895_v13, %v5805_v24  ;;  %v15505_v57 = vld [vmem:[#allocation63_spill] sm:$0xff] }
 0x490   :  { %v5547_v16 = vmul.f32 %v4779_v60, %v4779_v60  ;;  %v5152_v34 = vpop.permute.xlu0 %5151  ;;  %v15506_v24 = vcombine.low %v13794_v10, %v13899_v14  ;;  %v15507_v60 = vld [vmem:[#allocation57_spill] sm:$0xff] }
 0x491   :  { %v7867_v8 = vcombine.low %v13901_v55, %v5806_v42  ;;  %v7868_v33 = vcombine.high %v13901_v55, %v5806_v42  ;;  %v5548_v30 = vmul.f32 %v4780_v49, %v4780_v49  ;;  %v5425_v50 = vadd.f32 %v15501_v0, %v5152_v34  ;;  %v15510_v0 = vld [vmem:[#allocation60_spill] sm:$0xff] }
 0x492   :  { %v5803_v53 = vadd.f32 %v5675_v56, %v5547_v16  ;;  %v5154_v17 = vpop.permute.xlu1 %5153  ;;  %8059 = vrot.lane.b32.xlu0 %v15503_v52, %s10388_s23  ;;  %v13997_v34 = vrot.slane %v7324_v40, %v15099_v25  ;;  %v15512_v52 = vld [vmem:[#allocation80_spill] sm:$0xff] }
 0x493   :  { %v5804_v45 = vadd.f32 %v5676_v1, %v5548_v30  ;;  %v5426_v5 = vadd.f32 %v15502_v47, %v5154_v17  ;;  %v5681_v49 = vmul.f32 %v5425_v50, %v5425_v50  ;;  %v13994_v30 = vrot.slane %v7323_v19, %v15099_v25  ;;  %v15511_v50 = vld [vmem:[#allocation72_spill] sm:$0xff]  ;;  %v15513_v19 = vld [vmem:[#allocation37_spill] sm:$0xff] }
 0x494   :  { %v6235_v13 = vcombine.low %v13919_v7, %v5803_v53  ;;  %v6236_v9 = vcombine.high %v13919_v7, %v5803_v53  ;;  %v5148_v38 = vpop.permute.xlu0 %5147  ;;  %v15508_v7 = vld [vmem:[#allocation59_spill] sm:$0xff]  ;;  %v14001_v47 = vrot.slane %v7867_v8, %v15099_v25 }
 0x495   :  { %v6779_v55 = vcombine.low %v13921_v63, %v5804_v45  ;;  %v6780_v43 = vcombine.high %v13921_v63, %v5804_v45  ;;  %v5423_v31 = vadd.f32 %v5148_v38, %v15504_v35  ;;  %v15509_v63 = vcombine.high %v13794_v10, %v13899_v14 }
 0x496   :  { %v5150_v37 = vpop.permute.xlu1 %5149  ;;  %8075 = vrot.lane.b32.xlu0 %v15506_v24, %s10379_s22  ;;  %v5682_v56 = vmul.f32 %v5426_v5, %v5426_v5  ;;  %v14004_v10 = vrot.slane %v7868_v33, %v15099_v25  ;;  %v15514_v38 = vcombine.high %v15512_v52, %v15513_v19 }
 0x497   :  { %v5424_v3 = vadd.f32 %v5150_v37, %v15505_v57  ;;  %v5679_v40 = vmul.f32 %v5423_v31, %v5423_v31 }
 0x498   :  { %v4512_v18 = vpop.permute.xlu0 %4511 }
 0x499   :  { %v4785_v22 = vsub.f32 %v15507_v60, %v4512_v18  ;;  %v5680_v24 = vmul.f32 %v5424_v3, %v5424_v3 }
 0x49a   :  { %v4514_v42 = vpop.permute.xlu1 %4513  ;;  %8091 = vrot.lane.b32.xlu0 %v15509_v63, %s10385_s2 }
 0x49b   :  { %v4786_v44 = vsub.f32 %v15508_v7, %v4514_v42  ;;  %v5553_v4 = vmul.f32 %v4785_v22, %v4785_v22  ;;  %v14016_v22 = vrot.slane %v6235_v13, %v15099_v25  ;;  %v15515_v13 = vld [vmem:[#allocation12_spill] sm:$0xff] }
 0x49c   :  { %v4508_v1 = vpop.permute.xlu0 %4507 }
 0x49d   :  { %v5554_v16 = vmul.f32 %v4786_v44, %v4786_v44  ;;  %v5809_v53 = vadd.f32 %v5681_v49, %v5553_v4  ;;  %v4783_v17 = vsub.f32 %v15510_v0, %v4508_v1  ;;  %v15516_v49 = vld [vmem:[#allocation36_spill] sm:$0xff]  ;;  %v15525_v0 = vld [vmem:[#allocation65_spill] sm:$0xff] }
 0x49e   :  { %v4510_v45 = vpop.permute.xlu1 %4509  ;;  %8299 = vrot.lane.b32.xlu0 %v15514_v38, %s10388_s23  ;;  %v15517_v4 = vcombine.high %v15515_v13, %v15516_v49 }
 0x49f   :  { %v5810_v14 = vadd.f32 %v5682_v56, %v5554_v16  ;;  %v4784_v5 = vsub.f32 %v15511_v50, %v4510_v45  ;;  %v7339_v35 = vcombine.low %v13932_v48, %v5809_v53  ;;  %v7340_v37 = vcombine.high %v13932_v48, %v5809_v53  ;;  %v15527_v53 = vld [vmem:[#allocation92_spill] sm:$0xff] }
 0x4a0   :  { %v5551_v57 = vmul.f32 %v4783_v17, %v4783_v17  ;;  %v5160_v60 = vpop.permute.xlu0 %5159  ;;  %v14025_v48 = vrot.slane %v6236_v9, %v15099_v25  ;;  %v14050_v50 = vrot.slane %v6779_v55, %v15099_v25 }
 0x4a1   :  { %v7883_v8 = vcombine.low %v13935_v36, %v5810_v14  ;;  %v7884_v33 = vcombine.high %v13935_v36, %v5810_v14  ;;  %v5552_v18 = vmul.f32 %v4784_v5, %v4784_v5  ;;  %v14019_v42 = vrot.slane %v7339_v35, %v15099_v25 }
 0x4a2   :  { %v14022_v31 = vrot.slane %v7340_v37, %v15099_v25  ;;  %v5807_v7 = vadd.f32 %v5679_v40, %v5551_v57  ;;  %v5162_v44 = vpop.permute.xlu1 %5161  ;;  %8347 = vrot.lane.b32.xlu0 %v15517_v4, %s10388_s23  ;;  %v14053_v5 = vrot.slane %v6780_v43, %v15099_v25  ;;  %v15519_v43 = vld [vmem:[#allocation42_spill] sm:$0xff] }
 0x4a3   :  { %v14028_v3 = vrot.slane %v7883_v8, %v15099_v25  ;;  %v14031_v36 = vrot.slane %v7884_v33, %v15099_v25  ;;  %v5808_v63 = vadd.f32 %v5680_v24, %v5552_v18  ;;  %v15520_v24 = vld [vmem:[#allocation89_spill] sm:$0xff] }
 0x4a4   :  { %v6251_v9 = vcombine.low %v13942_v46, %v5807_v7  ;;  %v6252_v1 = vcombine.high %v13942_v46, %v5807_v7  ;;  %v5156_v14 = vpop.permute.xlu0 %5155  ;;  %v15521_v8 = vcombine.low %v15519_v43, %v15520_v24  ;;  %v15522_v7 = vld [vmem:[#allocation43_spill] sm:$0xff] }
 0x4a5   :  { %v6795_v17 = vcombine.low %v13945_v62, %v5808_v63  ;;  %v6796_v45 = vcombine.high %v13945_v62, %v5808_v63  ;;  %v15518_v62 = vld [vmem:[#allocation16_spill] sm:$0xff]  ;;  %v5429_v63 = vadd.f32 %v15522_v7, %v5160_v60  ;;  %v15526_v7 = vld [vmem:[#allocation29_spill] sm:$0xff] }
 0x4a6   :  { %v14056_v38 = vrot.slane %v6251_v9, %v15099_v25  ;;  %v14059_v46 = vrot.slane %v6252_v1, %v15099_v25  ;;  %v5158_v40 = vpop.permute.xlu1 %5157  ;;  %v5427_v57 = vadd.f32 %v5156_v14, %v15518_v62  ;;  %8315 = vrot.lane.b32.xlu0 %v15521_v8, %s10379_s22  ;;  %v15523_v1 = vld [vmem:[#allocation64_spill] sm:$0xff]  ;;  %v15528_v18 = vcombine.low %v15526_v7, %v15527_v53 }
 0x4a7   :  { %v14062_v35 = vrot.slane %v6795_v17, %v15099_v25  ;;  %v14065_v37 = vrot.slane %v6796_v45, %v15099_v25  ;;  %v5428_v55 = vadd.f32 %v5158_v40, %v15443_v54  ;;  %v5430_v17 = vadd.f32 %v15523_v1, %v5162_v44  ;;  %v15524_v14 = vld [vmem:[#allocation56_spill] sm:$0xff] }
 0x4a8   :  { %v4520_v45 = vpop.permute.xlu0 %4519  ;;  %v5685_v54 = vmul.f32 %v5429_v63, %v5429_v63  ;;  %v15530_v63 = vld [vmem:[#allocation75_spill] sm:$0xff] }
 0x4a9   :  { %v4789_v40 = vsub.f32 %v15524_v14, %v4520_v45  ;;  %v5686_v1 = vmul.f32 %v5430_v17, %v5430_v17  ;;  %v15531_v17 = vcombine.high %v15519_v43, %v15520_v24  ;;  %v15533_v43 = vld [vmem:[#allocation39_spill] sm:$0xff] }
 0x4aa   :  { %v4522_v62 = vpop.permute.xlu1 %4521  ;;  %8363 = vrot.lane.b32.xlu0 %v15528_v18, %s10379_s22 }
 0x4ab   :  { %v4790_v60 = vsub.f32 %v15525_v0, %v4522_v62  ;;  %v5557_v33 = vmul.f32 %v4789_v40, %v4789_v40  ;;  %v15529_v62 = vld [vmem:[#allocation66_spill] sm:$0xff] }
 0x4ac   :  { %v4516_v14 = vpop.permute.xlu0 %4515 }
 0x4ad   :  { %v5558_v45 = vmul.f32 %v4790_v60, %v4790_v60  ;;  %v14099_v0 = vadd.f32 %v5685_v54, %v5557_v33  ;;  %v4787_v16 = vsub.f32 %v15529_v62, %v4516_v14  ;;  %v5683_v60 = vmul.f32 %v5427_v57, %v5427_v57 }
 0x4ae   :  { %v4518_v4 = vpop.permute.xlu1 %4517  ;;  %8331 = vrot.lane.b32.xlu0 %v15531_v17, %s10385_s2  ;;  %v5684_v54 = vmul.f32 %v5428_v55, %v5428_v55  ;;  %v15535_v17 = vld [vmem:[#allocation20_spill] sm:$0xff]  ;;  %v15536_v55 = vld [vmem:[#allocation27_spill] sm:$0xff] }
 0x4af   :  { %v14104_v9 = vadd.f32 %v5686_v1, %v5558_v45  ;;  %v4788_v40 = vsub.f32 %v15530_v63, %v4518_v4  ;;  %v5555_v44 = vmul.f32 %v4787_v16, %v4787_v16  ;;  %v15532_v63 = vld [vmem:[#allocation32_spill] sm:$0xff] }
 0x4b0   :  { %v5168_v62 = vpop.permute.xlu0 %5167  ;;  %v15534_v24 = vcombine.high %v15532_v63, %v15533_v43 }
 0x4b1   :  { %v5556_v14 = vmul.f32 %v4788_v40, %v4788_v40  ;;  %v14115_v1 = vadd.f32 %v5683_v60, %v5555_v44  ;;  %v15537_v40 = vcombine.low %v15535_v17, %v15536_v55  ;;  %v5433_v33 = vadd.f32 %v13314_v6, %v5168_v62 }
 0x4b2   :  { %v5170_v45 = vpop.permute.xlu1 %5169  ;;  %8107 = vrot.lane.b32.xlu0 %v15534_v24, %s10388_s23  ;;  %v15538_v24 = vcombine.high %v15535_v17, %v15536_v55  ;;  %v15541_v17 = vld [vmem:[#allocation49_spill] sm:$0xff] }
 0x4b3   :  { %v14117_v4 = vadd.f32 %v5684_v54, %v5556_v14  ;;  %v5434_v44 = vadd.f32 %v13320_v59, %v5170_v45  ;;  %v5689_v8 = vmul.f32 %v5433_v33, %v5433_v33  ;;  %v15542_v33 = vld [vmem:[#allocation104_spill] sm:$0xff] }
 0x4b4   :  { %v5164_v16 = vpop.permute.xlu0 %5163  ;;  %v15543_v55 = vcombine.high %v15541_v17, %v15542_v33 }
 0x4b5   :  { %v5431_v56 = vadd.f32 %v5164_v16, %v13318_v32 }
 0x4b6   :  { %v5166_v57 = vpop.permute.xlu1 %5165  ;;  %8123 = vrot.lane.b32.xlu0 %v15537_v40, %s10379_s22  ;;  %v5690_v40 = vmul.f32 %v5434_v44, %v5434_v44 }
 0x4b7   :  { %v5432_v6 = vadd.f32 %v5166_v57, %v13324_v58  ;;  %v5687_v32 = vmul.f32 %v5431_v56, %v5431_v56 }
 0x4b8   :  { %v4528_v60 = vpop.permute.xlu0 %4527 }
 0x4b9   :  { %v4793_v54 = vsub.f32 %v13285_v20, %v4528_v60  ;;  %v15539_v20 = vld [vmem:[#allocation87_spill] sm:$0xff]  ;;  %v5688_v44 = vmul.f32 %v5432_v6, %v5432_v6 }
 0x4ba   :  { %v4530_v14 = vpop.permute.xlu1 %4529  ;;  %8139 = vrot.lane.b32.xlu0 %v15538_v24, %s10385_s2  ;;  %v15545_v24 = vld [vmem:[#allocation105_spill] sm:$0xff] }
 0x4bb   :  { %v4794_v18 = vsub.f32 %v13293_v23, %v4530_v14  ;;  %v5561_v49 = vmul.f32 %v4793_v54, %v4793_v54  ;;  %v15540_v14 = vld [vmem:[#allocation69_spill] sm:$0xff]  ;;  %v15544_v54 = vld [vmem:[#allocation103_spill] sm:$0xff] }
 0x4bc   :  { %v4524_v59 = vpop.permute.xlu0 %4523  ;;  %v15547_v56 = vcombine.high %v15544_v54, %v15545_v24 }
 0x4bd   :  { %v5562_v62 = vmul.f32 %v4794_v18, %v4794_v18  ;;  %v14137_v45 = vadd.f32 %v5689_v8, %v5561_v49  ;;  %v4791_v60 = vsub.f32 %v15539_v20, %v4524_v59  ;;  %v15548_v20 = vld [vmem:[#allocation14_spill] sm:$0xff] }
 0x4be   :  { %v4526_v13 = vpop.permute.xlu1 %4525  ;;  %8155 = vrot.lane.b32.xlu0 %v15543_v55, %s10388_s23 }
 0x4bf   :  { %v14140_v23 = vadd.f32 %v5690_v40, %v5562_v62  ;;  %v4792_v43 = vsub.f32 %v15540_v14, %v4526_v13  ;;  %v5559_v16 = vmul.f32 %v4791_v60, %v4791_v60  ;;  %v15546_v40 = vcombine.low %v15544_v54, %v15545_v24  ;;  %v15550_v24 = vld [vmem:[#allocation91_spill] sm:$0xff] }
 0x4c0   :  { %v5176_v18 = vpop.permute.xlu0 %5175 }
 0x4c1   :  { %v5560_v58 = vmul.f32 %v4792_v43, %v4792_v43  ;;  %v14147_v57 = vadd.f32 %v5687_v32, %v5559_v16  ;;  %v5437_v43 = vadd.f32 %v13394_v21, %v5176_v18  ;;  %v15549_v32 = vcombine.high %v15526_v7, %v15527_v53 }
 0x4c2   :  { %v5178_v49 = vpop.permute.xlu1 %5177  ;;  %8171 = vrot.lane.b32.xlu0 %v15546_v40, %s10379_s22  ;;  %v15551_v40 = vld [vmem:[#allocation41_spill] sm:$0xff] }
 0x4c3   :  { %v14149_v8 = vadd.f32 %v5688_v44, %v5560_v58  ;;  %v5438_v6 = vadd.f32 %v13417_v39, %v5178_v49  ;;  %v5693_v16 = vmul.f32 %v5437_v43, %v5437_v43 }
 0x4c4   :  { %v5172_v13 = vpop.permute.xlu0 %5171 }
 0x4c5   :  { %v5435_v44 = vadd.f32 %v5172_v13, %v15461_v27  ;;  %v5694_v54 = vmul.f32 %v5438_v6, %v5438_v6 }
 0x4c6   :  { %v5174_v62 = vpop.permute.xlu1 %5173  ;;  %8187 = vrot.lane.b32.xlu0 %v15547_v56, %s10385_s2 }
 0x4c7   :  { %v5436_v21 = vadd.f32 %v5174_v62, %v15550_v24  ;;  %v5691_v33 = vmul.f32 %v5435_v44, %v5435_v44 }
 0x4c8   :  { %v4536_v59 = vpop.permute.xlu0 %4535 }
 0x4c9   :  { %v4797_v60 = vsub.f32 %v15548_v20, %v4536_v59  ;;  %v5692_v27 = vmul.f32 %v5436_v21, %v5436_v21  ;;  %v15553_v21 = vcombine.low %v13994_v30, %v14019_v42 }
 0x4ca   :  { %v4538_v14 = vpop.permute.xlu1 %4537  ;;  %8379 = vrot.lane.b32.xlu0 %v15549_v32, %s10385_s2 }
 0x4cb   :  { %v4798_v55 = vsub.f32 %v13345_v26, %v4538_v14  ;;  %v5565_v58 = vmul.f32 %v4797_v60, %v4797_v60  ;;  %v15552_v26 = vld [vmem:[#allocation22_spill] sm:$0xff] }
 0x4cc   :  { %v4532_v39 = vpop.permute.xlu0 %4531 }
 0x4cd   :  { %v5566_v18 = vmul.f32 %v4798_v55, %v4798_v55  ;;  %v5821_v49 = vadd.f32 %v5693_v16, %v5565_v58  ;;  %v4795_v56 = vsub.f32 %v15551_v40, %v4532_v39  ;;  %v15556_v40 = vcombine.low %v14016_v22, %v14056_v38 }
 0x4ce   :  { %v4534_v59 = vpop.permute.xlu1 %4533 }
 0x4cf   :  { %v5822_v20 = vadd.f32 %v5694_v54, %v5566_v18  ;;  %v4796_v14 = vsub.f32 %v15552_v26, %v4534_v59  ;;  %v7355_v53 = vcombine.low %v14099_v0, %v5821_v49  ;;  %v7356_v7 = vcombine.high %v14099_v0, %v5821_v49 }
 0x4d0   :  { %v5563_v43 = vmul.f32 %v4795_v56, %v4795_v56  ;;  %v5184_v60 = vpop.permute.xlu0 %5183  ;;  %v14202_v56 = vrot.slane %v15556_v40, %v11516_v2 }
 0x4d1   :  { %v7899_v13 = vcombine.low %v14104_v9, %v5822_v20  ;;  %v7900_v62 = vcombine.high %v14104_v9, %v5822_v20  ;;  %v5564_v6 = vmul.f32 %v4796_v14, %v4796_v14  ;;  %v14183_v9 = vrot.slane %v15553_v21, %v11516_v2  ;;  %v15565_v21 = vld [vmem:[#allocation45_spill] sm:$0xff] }
 0x4d2   :  { %v5819_v55 = vadd.f32 %v5691_v33, %v5563_v43  ;;  %v5186_v32 = vpop.permute.xlu1 %5185  ;;  %v15554_v33 = vcombine.high %v13994_v30, %v14019_v42  ;;  %v15557_v30 = vcombine.low %v14025_v48, %v14059_v46  ;;  %v15558_v20 = vcombine.high %v13997_v34, %v14022_v31 }
 0x4d3   :  { %v5820_v16 = vadd.f32 %v5692_v27, %v5564_v6  ;;  %v15559_v14 = vcombine.high %v14016_v22, %v14056_v38  ;;  %v15560_v27 = vcombine.low %v14001_v47, %v14028_v3  ;;  %v15563_v22 = vcombine.low %v14004_v10, %v14031_v36 }
 0x4d4   :  { %v6267_v58 = vcombine.low %v14115_v1, %v5819_v55  ;;  %v6268_v54 = vcombine.high %v14115_v1, %v5819_v55  ;;  %v5180_v0 = vpop.permute.xlu0 %5179  ;;  %v14189_v39 = vrot.slane %v15554_v33, %v11516_v2  ;;  %v5441_v1 = vadd.f32 %v13537_v11, %v5184_v60 }
 0x4d5   :  { %v6811_v44 = vcombine.low %v14117_v4, %v5820_v16  ;;  %v6812_v24 = vcombine.high %v14117_v4, %v5820_v16  ;;  %v15555_v4 = vcombine.low %v13997_v34, %v14022_v31  ;;  %v14208_v42 = vrot.slane %v15557_v30, %v11516_v2 }
 0x4d6   :  { %v5182_v18 = vpop.permute.xlu1 %5181  ;;  %v5442_v11 = vadd.f32 %v13546_v12, %v5186_v32  ;;  %v14215_v26 = vrot.slane %v15558_v20, %v11516_v2  ;;  %v14221_v43 = vrot.slane %v15559_v14, %v11516_v2  ;;  %v14227_v6 = vrot.slane %v15560_v27, %v11516_v2  ;;  %v15561_v12 = vld [vmem:[#allocation51_spill] sm:$0xff] }
 0x4d7   :  { %v14196_v49 = vrot.slane %v15555_v4, %v11516_v2  ;;  %v15562_v34 = vcombine.high %v14025_v48, %v14059_v46  ;;  %v14240_v38 = vrot.slane %v15563_v22, %v11516_v2  ;;  %v15564_v32 = vcombine.high %v14001_v47, %v14028_v3 }
 0x4d8   :  { %v4544_v59 = vpop.permute.xlu0 %4543  ;;  %v15566_v48 = vcombine.high %v14004_v10, %v14031_v36  ;;  %v15567_v4 = vcombine.low %v14050_v50, %v14062_v35  ;;  %v15568_v47 = vcombine.low %v14053_v5, %v14065_v37  ;;  %v7363_v30 = vrot.slane %v7355_v53, %v15099_v25 }
 0x4d9   :  { %v4801_v60 = vsub.f32 %v15561_v12, %v4544_v59  ;;  %v14234_v31 = vrot.slane %v15562_v34, %v11516_v2  ;;  %v14246_v16 = vrot.slane %v15564_v32, %v11516_v2  ;;  %v5697_v59 = vmul.f32 %v5441_v1, %v5441_v1 }
 0x4da   :  { %v4546_v55 = vpop.permute.xlu1 %4545  ;;  %v14253_v46 = vrot.slane %v15566_v48, %v11516_v2  ;;  %v14259_v40 = vrot.slane %v15567_v4, %v11516_v2  ;;  %v14265_v3 = vrot.slane %v15568_v47, %v11516_v2  ;;  %v5439_v20 = vadd.f32 %v5180_v0, %v13543_v51 }
 0x4db   :  { %v4802_v33 = vsub.f32 %v15565_v21, %v4546_v55  ;;  %v5569_v10 = vmul.f32 %v4801_v60, %v4801_v60  ;;  %v7370_v36 = vrot.slane %v7356_v7, %v15099_v25  ;;  %v5698_v14 = vmul.f32 %v5442_v11, %v5442_v11  ;;  %v15569_v21 = vld [vmem:[#allocation47_spill] sm:$0xff]  ;;  %v15570_v11 = vld [vmem:[#allocation50_spill] sm:$0xff] }
 0x4dc   :  { %v5440_v27 = vadd.f32 %v5182_v18, %v13552_v28  ;;  %v4540_v55 = vpop.permute.xlu0 %4539  ;;  %v14272_v34 = vrot.slane %v7899_v13, %v15099_v25  ;;  %v14275_v22 = vrot.slane %v7900_v62, %v15099_v25  ;;  %v6275_v51 = vrot.slane %v6267_v58, %v15099_v25 }
 0x4dd   :  { %v5570_v12 = vmul.f32 %v4802_v33, %v4802_v33  ;;  %v5825_v32 = vadd.f32 %v5697_v59, %v5569_v10  ;;  %v4799_v53 = vsub.f32 %v15569_v21, %v4540_v55  ;;  %v6282_v0 = vrot.slane %v6268_v54, %v15099_v25 }
 0x4de   :  { %v4542_v1 = vpop.permute.xlu1 %4541  ;;  %v5695_v28 = vmul.f32 %v5439_v20, %v5439_v20  ;;  %v5696_v48 = vmul.f32 %v5440_v27, %v5440_v27  ;;  %v14286_v58 = vrot.slane %v6811_v44, %v15099_v25 }
 0x4df   :  { %v5826_v7 = vadd.f32 %v5698_v14, %v5570_v12  ;;  %v4800_v60 = vsub.f32 %v15570_v11, %v4542_v1  ;;  %v7371_v18 = vcombine.low %v14137_v45, %v5825_v32  ;;  %v7372_v13 = vcombine.high %v14137_v45, %v5825_v32 }
 0x4e0   :  { %v5567_v33 = vmul.f32 %v4799_v53, %v4799_v53  ;;  %v8204_v59 = vpop.permute.xlu0 %8203  ;;  %v14291_v14 = vrot.slane %v6812_v24, %v15099_v25 }
 0x4e1   :  { %v7915_v62 = vcombine.low %v14140_v23, %v5826_v7  ;;  %v7916_v4 = vcombine.high %v14140_v23, %v5826_v7  ;;  %v5568_v47 = vmul.f32 %v4800_v60, %v4800_v60  ;;  %v7379_v54 = vrot.slane %v7371_v18, %v15099_v25  ;;  %v15572_v18 = vld [vmem:[#allocation53_spill] sm:$0xff] }
 0x4e2   :  { %v7386_v10 = vrot.slane %v7372_v13, %v15099_v25  ;;  %v5823_v20 = vadd.f32 %v5695_v28, %v5567_v33  ;;  %v15571_v28 = vld [vmem:[#allocation76_spill] sm:$0xff] }
 0x4e3   :  { %v7923_v45 = vrot.slane %v7915_v62, %v15099_v25  ;;  %v14295_v27 = vrot.slane %v7916_v4, %v15099_v25  ;;  %v5824_v12 = vadd.f32 %v5696_v48, %v5568_v47  ;;  %v7419_v23 = vcombine.low %v7363_v30, %v7379_v54 }
 0x4e4   :  { %v7435_v55 = vcombine.low %v7370_v36, %v7386_v10  ;;  %v6283_v32 = vcombine.low %v14147_v57, %v5823_v20  ;;  %v6284_v44 = vcombine.high %v14147_v57, %v5823_v20  ;;  %v8220_v7 = vpop.permute.xlu0 %8219  ;;  %v15573_v13 = vcombine.low %v15571_v28, %v15572_v18 }
 0x4e5   :  { %v7963_v21 = vcombine.low %v14272_v34, %v7923_v45  ;;  %v7979_v53 = vcombine.low %v14275_v22, %v14295_v27  ;;  %v6827_v24 = vcombine.low %v14149_v8, %v5824_v12  ;;  %v6828_v1 = vcombine.high %v14149_v8, %v5824_v12 }
 0x4e6   :  { %v6291_v11 = vrot.slane %v6283_v32, %v15099_v25  ;;  %v6298_v60 = vrot.slane %v6284_v44, %v15099_v25  ;;  %v8439_v33 = vsel %vm8387_vm1, %v15573_v13, %v8204_v59  ;;  %v14311_v57 = vrot.slane %v7419_v23, %v11516_v2 }
 0x4e7   :  { %v6835_v48 = vrot.slane %v6827_v24, %v15099_v25  ;;  %v14315_v62 = vrot.slane %v6828_v1, %v15099_v25  ;;  %v7420_v4 = vcombine.high %v7363_v30, %v7379_v54  ;;  %v14318_v8 = vrot.slane %v7435_v55, %v11516_v2 }
 0x4e8   :  { %v6331_v47 = vcombine.low %v6275_v51, %v6291_v11  ;;  %v6347_v20 = vcombine.low %v6282_v0, %v6298_v60  ;;  %v7452_v12 = vcombine.high %v14183_v9, %v14311_v57  ;;  %v7436_v32 = vcombine.high %v7370_v36, %v7386_v10  ;;  %v8252_v44 = vpop.permute.xlu0 %8251 }
 0x4e9   :  { %v6875_v59 = vcombine.low %v14286_v58, %v6835_v48  ;;  %v6891_v23 = vcombine.low %v14291_v14, %v14315_v62  ;;  %v14326_v24 = vrot.slane %v7420_v4, %v11516_v2  ;;  %v7456_v25 = vcombine.high %v14196_v49, %v14318_v8 }
 0x4ea   :  { %v8443_v30 = vsel %vm473_vm0, %v8439_v33, %v8220_v7  ;;  %8205 = vrot.lane.b32.xlu1 %v7452_v12, %s10388_s23  ;;  %v14333_v54 = vrot.slane %v7436_v32, %v11516_v2  ;;  %v14336_v36 = vrot.slane %v6331_v47, %v11516_v2  ;;  %v6332_v10 = vcombine.high %v6275_v51, %v6291_v11  ;;  %v15575_v47 = vld [vmem:[#allocation81_spill] sm:$0xff] }
 0x4eb   :  { %v7453_v55 = vcombine.low %v14189_v39, %v14326_v24  ;;  %v7454_v1 = vcombine.high %v14189_v39, %v14326_v24  ;;  %v14343_v28 = vrot.slane %v6347_v20, %v11516_v2  ;;  %v6348_v18 = vcombine.high %v6282_v0, %v6298_v60 }
 0x4ec   :  { %v7457_v7 = vcombine.low %v14215_v26, %v14333_v54  ;;  %v7458_v13 = vcombine.high %v14215_v26, %v14333_v54  ;;  %v6364_v33 = vcombine.high %v14202_v56, %v14336_v36  ;;  %v14352_v51 = vrot.slane %v6332_v10, %v11516_v2  ;;  %v8268_v11 = vpop.permute.xlu0 %8267  ;;  %v15574_v26 = vld [vmem:[#allocation93_spill] sm:$0xff] }
 0x4ed   :  { %v6368_v39 = vcombine.high %v14208_v42, %v14343_v28  ;;  %v14357_v4 = vrot.slane %v6348_v18, %v11516_v2  ;;  %v14360_v0 = vrot.slane %v7963_v21, %v11516_v2  ;;  %v14363_v60 = vrot.slane %v7979_v53, %v11516_v2 }
 0x4ee   :  { %v15576_v20 = vcombine.low %v15574_v26, %v15575_v47  ;;  %8221 = vrot.lane.b32.xlu1 %v7453_v55, %s10379_s22  ;;  %v6365_v32 = vcombine.low %v14221_v43, %v14352_v51  ;;  %v6366_v24 = vcombine.high %v14221_v43, %v14352_v51  ;;  %v7964_v54 = vcombine.high %v14272_v34, %v7923_v45 }
 0x4ef   :  { %v6369_v21 = vcombine.low %v14234_v31, %v14357_v4  ;;  %v6370_v53 = vcombine.high %v14234_v31, %v14357_v4  ;;  %v7996_v10 = vcombine.high %v14227_v6, %v14360_v0  ;;  %v7980_v18 = vcombine.high %v14275_v22, %v14295_v27 }
 0x4f0   :  { %v8451_v12 = vsel %vm8387_vm1, %v15576_v20, %v8252_v44  ;;  %v14384_v55 = vrot.slane %v7964_v54, %v11516_v2  ;;  %v14389_v34 = vrot.slane %v6875_v59, %v11516_v2  ;;  %v6876_v45 = vcombine.high %v14286_v58, %v6835_v48  ;;  %v8236_v26 = vpop.permute.xlu0 %8235 }
 0x4f1   :  { %v14393_v47 = vrot.slane %v6891_v23, %v11516_v2  ;;  %v6892_v20 = vcombine.high %v14291_v14, %v14315_v62  ;;  %v8447_v22 = vsel %vm8396_vm2, %v8443_v30, %v8236_v26  ;;  %v14406_v27 = vrot.slane %v7980_v18, %v11516_v2 }
 0x4f2   :  { %8253 = vrot.lane.b32.xlu1 %v7456_v25, %s10388_s23  ;;  %v7997_v58 = vcombine.low %v14246_v16, %v14384_v55  ;;  %v7998_v48 = vcombine.high %v14246_v16, %v14384_v55  ;;  %v8455_v14 = vsel %vm473_vm0, %v8451_v12, %v8268_v11  ;;  %10240 = vrsqrt.f32 %v8447_v22 }
 0x4f3   :  { %v15577_v62 = vcombine.high %v14050_v50, %v14062_v35  ;;  %v15578_v23 = vcombine.high %v14053_v5, %v14065_v37  ;;  %v8001_v30 = vcombine.low %v14253_v46, %v14406_v27  ;;  %v6908_v18 = vcombine.high %v14259_v40, %v14389_v34 }
 0x4f4   :  { %v14428_v11 = vrot.slane %v6876_v45, %v11516_v2  ;;  %v8284_v35 = vpop.permute.xlu0 %8283  ;;  %v14433_v12 = vrot.slane %v6892_v20, %v11516_v2  ;;  %vm8627_vm9 = vcmp.eq.f32.partialorder %v8447_v22, inf  ;;  %v8630_v5 = vand.u32 2147483648, %v8447_v22 }
 0x4f5   :  { %v14415_v59 = vrot.slane %v15577_v62, %v11516_v2  ;;  %v14421_v25 = vrot.slane %v15578_v23, %v11516_v2  ;;  %v8459_v62 = vsel %vm8396_vm2, %v8455_v14, %v8284_v35  ;;  %vm8629_vm10 = vcmp.eq.f32.partialorder %v8447_v22, 0.0 }
 0x4f6   :  { %8269 = vrot.lane.b32.xlu1 %v7457_v7, %s10379_s22  ;;  %10242 = vrsqrt.f32 %v8459_v62  ;;  %v15579_v14 = vcombine.low %v13766_v41, %v13869_v29  ;;  %vm8634_vm11 = vcmp.eq.f32.partialorder %v8459_v62, inf  ;;  %vm8636_vm12 = vcmp.eq.f32.partialorder %v8459_v62, 0.0 }
 0x4f7   :  { %v6909_v45 = vcombine.low %v14415_v59, %v14428_v11  ;;  %v15581_v31 = vcombine.high %v14240_v38, %v14363_v60  ;;  %v15582_v4 = vcombine.low %v15512_v52, %v15513_v19  ;;  %v15583_v19 = vld [vmem:[#allocation39_spill] sm:$0xff] }
 0x4f8   :  { %v8012_v35 = vpop.permute.xlu0 %8011 }
 0x4f9   :  { %v8390_v7 = vsel %vm8387_vm1, %v15579_v14, %v8012_v35 }
 0x4fa   :  { %8237 = vrot.lane.b32.xlu1 %v7454_v1, %s10385_s2 }
 0x4fc   :  { %v10241_v20 = vpop.eup %10240  ;;  %v8028_v54 = vpop.permute.xlu0 %8027 }
 0x4fd   :  { %v8626_v44 = vmul.f32 %v10241_v20, %v8447_v22  ;;  %v8394_v37 = vsel %vm473_vm0, %v8390_v7, %v8028_v54 }
 0x4fe   :  { %8285 = vrot.lane.b32.xlu1 %v7458_v13, %s10385_s2  ;;  %v8637_v13 = vand.u32 2147483648, %v8459_v62 }
 0x4ff   :  { %v8628_v26 = vsel %vm8627_vm9, %v8447_v22, %v8626_v44 }
 0x500   :  { %v10243_v23 = vpop.eup %10242  ;;  %v8631_v50 = vsel %vm8629_vm10, %v8630_v5, %v8628_v26  ;;  %v8044_v2 = vpop.permute.xlu0 %8043 }
 0x501   :  { %8729 = vst [vmem:[#allocation8 + $0xa0] sm:$0xff] %v8631_v50  ;;  %v8633_v1 = vmul.f32 %v10243_v23, %v8459_v62  ;;  %v8399_v20 = vsel %vm8396_vm2, %v8394_v37, %v8044_v2 }
 0x502   :  { %8013 = vrot.lane.b32.xlu1 %v6364_v33, %s10388_s23  ;;  %10244 = vrsqrt.f32 %v8399_v20  ;;  %v15580_v33 = vcombine.low %v13772_v15, %v13876_v61  ;;  %vm8599_vm13 = vcmp.eq.f32.partialorder %v8399_v20, inf  ;;  %v8602_v43 = vand.u32 2147483648, %v8399_v20 }
 0x503   :  { %v8635_v41 = vsel %vm8634_vm11, %v8459_v62, %v8633_v1  ;;  %vm8601_vm14 = vcmp.eq.f32.partialorder %v8399_v20, 0.0 }
 0x504   :  { %v8638_v29 = vsel %vm8636_vm12, %v8637_v13, %v8635_v41  ;;  %v8060_v44 = vpop.permute.xlu0 %8059  ;;  %v15584_v13 = vcombine.low %v15532_v63, %v15583_v19 }
 0x505   :  { %8730 = vst [vmem:[#allocation8 + $0xa8] sm:$0xff] %v8638_v29  ;;  %v8403_v22 = vsel %vm8387_vm1, %v15580_v33, %v8060_v44 }
 0x506   :  { %8029 = vrot.lane.b32.xlu1 %v6365_v32, %s10379_s22 }
 0x508   :  { %v8076_v54 = vpop.permute.xlu0 %8075 }
 0x509   :  { %v8407_v5 = vsel %vm473_vm0, %v8403_v22, %v8076_v54  ;;  %v15585_v22 = vcombine.high %v14415_v59, %v14428_v11  ;;  %v15589_v11 = vld [vmem:[#allocation12_spill] sm:$0xff] }
 0x50a   :  { %8045 = vrot.lane.b32.xlu1 %v6366_v24, %s10385_s2 }
 0x50c   :  { %v10245_v50 = vpop.eup %10244  ;;  %v8092_v37 = vpop.permute.xlu0 %8091 }
 0x50d   :  { %v8598_v26 = vmul.f32 %v10245_v50, %v8399_v20  ;;  %v8411_v62 = vsel %vm8396_vm2, %v8407_v5, %v8092_v37 }
 0x50e   :  { %8061 = vrot.lane.b32.xlu1 %v6368_v39, %s10388_s23  ;;  %10246 = vrsqrt.f32 %v8411_v62  ;;  %vm8606_vm15 = vcmp.eq.f32.partialorder %v8411_v62, inf  ;;  %v8609_v23 = vand.u32 2147483648, %v8411_v62  ;;  %vm8608_vm3 = vcmp.eq.f32.partialorder %v8411_v62, 0.0 }
 0x50f   :  { %v8600_v51 = vsel %vm8599_vm13, %v8399_v20, %v8598_v26 }
 0x510   :  { %v8603_v15 = vsel %vm8601_vm14, %v8602_v43, %v8600_v51  ;;  %v8300_v61 = vpop.permute.xlu0 %8299 }
 0x511   :  { %8725 = vst [vmem:[#allocation8 + $0x80] sm:$0xff] %v8603_v15  ;;  %v15590_v15 = vld [vmem:[#allocation36_spill] sm:$0xff] }
 0x512   :  { %8077 = vrot.lane.b32.xlu1 %v6369_v21, %s10379_s22 }
 0x514   :  { %v8348_v32 = vpop.permute.xlu0 %8347 }
 0x516   :  { %8093 = vrot.lane.b32.xlu1 %v6370_v53, %s10385_s2  ;;  %v8463_v53 = vsel %vm8387_vm1, %v15582_v4, %v8300_v61 }
 0x518   :  { %v10247_v39 = vpop.eup %10246  ;;  %v8316_v24 = vpop.permute.xlu0 %8315 }
 0x519   :  { %v8605_v2 = vmul.f32 %v10247_v39, %v8411_v62  ;;  %v8467_v35 = vsel %vm473_vm0, %v8463_v53, %v8316_v24 }
 0x51a   :  { %8301 = vrot.lane.b32.xlu1 %v7996_v10, %s10388_s23 }
 0x51b   :  { %v8607_v14 = vsel %vm8606_vm15, %v8411_v62, %v8605_v2 }
 0x51c   :  { %v8610_v7 = vsel %vm8608_vm3, %v8609_v23, %v8607_v14  ;;  %v8364_v21 = vpop.permute.xlu0 %8363 }
 0x51d   :  { %8726 = vst [vmem:[#allocation8 + $0x88] sm:$0xff] %v8610_v7  ;;  %v15592_v7 = vcombine.low %v14421_v25, %v14433_v12 }
 0x51e   :  { %8349 = vrot.lane.b32.xlu1 %v15581_v31, %s10388_s23  ;;  %v15593_v31 = vcombine.high %v14421_v25, %v14433_v12 }
 0x520   :  { %v8332_v10 = vpop.permute.xlu0 %8331 }
 0x521   :  { %v8471_v1 = vsel %vm8396_vm2, %v8467_v35, %v8332_v10 }
 0x522   :  { %8317 = vrot.lane.b32.xlu1 %v7997_v58, %s10379_s22  ;;  %10248 = vrsqrt.f32 %v8471_v1  ;;  %vm8641_vm4 = vcmp.eq.f32.partialorder %v8471_v1, inf  ;;  %v8644_v16 = vand.u32 2147483648, %v8471_v1  ;;  %vm8643_vm5 = vcmp.eq.f32.partialorder %v8471_v1, 0.0 }
 0x524   :  { %v8108_v20 = vpop.permute.xlu0 %8107 }
 0x525   :  { %v8415_v41 = vsel %vm8387_vm1, %v15584_v13, %v8108_v20 }
 0x526   :  { %8365 = vrot.lane.b32.xlu1 %v8001_v30, %s10379_s22 }
 0x528   :  { %v8124_v52 = vpop.permute.xlu0 %8123 }
 0x529   :  { %v8419_v58 = vsel %vm473_vm0, %v8415_v41, %v8124_v52 }
 0x52a   :  { %8333 = vrot.lane.b32.xlu1 %v7998_v48, %s10385_s2 }
 0x52c   :  { %v10249_v29 = vpop.eup %10248  ;;  %v8140_v44 = vpop.permute.xlu0 %8139 }
 0x52d   :  { %v8640_v54 = vmul.f32 %v10249_v29, %v8471_v1  ;;  %v8423_v33 = vsel %vm8396_vm2, %v8419_v58, %v8140_v44 }
 0x52e   :  { %8109 = vrot.lane.b32.xlu1 %v6908_v18, %s10388_s23  ;;  %10250 = vrsqrt.f32 %v8423_v33  ;;  %v15586_v18 = vld [vmem:[#allocation104_spill] sm:$0xff]  ;;  %vm8613_vm6 = vcmp.eq.f32.partialorder %v8423_v33, inf  ;;  %v8616_v59 = vand.u32 2147483648, %v8423_v33  ;;  %vm8615_vm7 = vcmp.eq.f32.partialorder %v8423_v33, 0.0 }
 0x52f   :  { %v8642_v55 = vsel %vm8641_vm4, %v8471_v1, %v8640_v54  ;;  %v15587_v50 = vcombine.low %v15541_v17, %v15586_v18  ;;  %v15591_v17 = vcombine.low %v15589_v11, %v15590_v15 }
 0x530   :  { %v8645_v63 = vsel %vm8643_vm5, %v8644_v16, %v8642_v55  ;;  %v8156_v48 = vpop.permute.xlu0 %8155 }
 0x531   :  { %8731 = vst [vmem:[#allocation8 + $0xb0] sm:$0xff] %v8645_v63  ;;  %v8427_v5 = vsel %vm8387_vm1, %v15587_v50, %v8156_v48  ;;  %v8475_v61 = vsel %vm8387_vm1, %v15591_v17, %v8348_v32 }
 0x532   :  { %8125 = vrot.lane.b32.xlu1 %v6909_v45, %s10379_s22  ;;  %v15588_v45 = vcombine.high %v14265_v3, %v14393_v47  ;;  %v8479_v24 = vsel %vm473_vm0, %v8475_v61, %v8364_v21  ;;  %v15594_v21 = vcombine.high %v14253_v46, %v14406_v27  ;;  %v15595_v46 = vcombine.low %v14183_v9, %v14311_v57 }
 0x534   :  { %v8172_v30 = vpop.permute.xlu0 %8171 }
 0x535   :  { %v8431_v26 = vsel %vm473_vm0, %v8427_v5, %v8172_v30  ;;  %v15597_v5 = vcombine.low %v14202_v56, %v14336_v36  ;;  %v15598_v36 = vcombine.low %v14208_v42, %v14343_v28 }
 0x536   :  { %8141 = vrot.lane.b32.xlu1 %v15585_v22, %s10385_s2 }
 0x538   :  { %v10251_v37 = vpop.eup %10250  ;;  %v8188_v62 = vpop.permute.xlu0 %8187 }
 0x539   :  { %v8612_v43 = vmul.f32 %v10251_v37, %v8423_v33  ;;  %v8435_v51 = vsel %vm8396_vm2, %v8431_v26, %v8188_v62 }
 0x53a   :  { %8157 = vrot.lane.b32.xlu1 %v15588_v45, %s10388_s23  ;;  %10252 = vrsqrt.f32 %v8435_v51  ;;  %vm8620_vm8 = vcmp.eq.f32.partialorder %v8435_v51, inf  ;;  %v8623_v53 = vand.u32 2147483648, %v8435_v51  ;;  %vm8622_vm9 = vcmp.eq.f32.partialorder %v8435_v51, 0.0 }
 0x53b   :  { %v8614_v39 = vsel %vm8613_vm6, %v8423_v33, %v8612_v43  ;;  %v15596_v33 = vcombine.low %v14196_v49, %v14318_v8 }
 0x53c   :  { %v8617_v2 = vsel %vm8615_vm7, %v8616_v59, %v8614_v39  ;;  %v8380_v23 = vpop.permute.xlu0 %8379 }
 0x53d   :  { %8727 = vst [vmem:[#allocation8 + $0x90] sm:$0xff] %v8617_v2  ;;  %v8483_v14 = vsel %vm8396_vm2, %v8479_v24, %v8380_v23 }
 0x53e   :  { %8173 = vrot.lane.b32.xlu1 %v15592_v7, %s10379_s22  ;;  %10254 = vrsqrt.f32 %v8483_v14  ;;  %vm8648_vm10 = vcmp.eq.f32.partialorder %v8483_v14, inf  ;;  %v8651_v52 = vand.u32 2147483648, %v8483_v14  ;;  %vm8650_vm11 = vcmp.eq.f32.partialorder %v8483_v14, 0.0 }
 0x542   :  { %8189 = vrot.lane.b32.xlu1 %v15593_v31, %s10385_s2 }
 0x544   :  { %v10253_v32 = vpop.eup %10252 }
 0x545   :  { %v8619_v4 = vmul.f32 %v10253_v32, %v8435_v51 }
 0x546   :  { %8381 = vrot.lane.b32.xlu1 %v15594_v21, %s10385_s2 }
 0x547   :  { %v8621_v35 = vsel %vm8620_vm8, %v8435_v51, %v8619_v4 }
 0x548   :  { %v10255_v10 = vpop.eup %10254  ;;  %v8624_v1 = vsel %vm8622_vm9, %v8623_v53, %v8621_v35 }
 0x549   :  { %8728 = vst [vmem:[#allocation8 + $0x98] sm:$0xff] %v8624_v1  ;;  %v8647_v20 = vmul.f32 %v10255_v10, %v8483_v14 }
 0x54b   :  { %v8649_v19 = vsel %vm8648_vm10, %v8483_v14, %v8647_v20  ;;  %v15599_v20 = vcombine.low %v14227_v6, %v14360_v0 }
 0x54c   :  { %v8652_v25 = vsel %vm8650_vm11, %v8651_v52, %v8649_v19 }
 0x54d   :  { %8732 = vst [vmem:[#allocation8 + $0xb8] sm:$0xff] %v8652_v25 }
 0x55c   :  { %v8206_v12 = vpop.permute.xlu1 %8205 }
 0x55d   :  { %v8440_v27 = vsel %vm8387_vm1, %v15595_v46, %v8206_v12 }
 0x560   :  { %v8222_v13 = vpop.permute.xlu1 %8221 }
 0x561   :  { %v8444_v58 = vsel %vm473_vm0, %v8440_v27, %v8222_v13 }
 0x564   :  { %v8254_v41 = vpop.permute.xlu1 %8253 }
 0x565   :  { %v8452_v16 = vsel %vm8387_vm1, %v15596_v33, %v8254_v41 }
 0x568   :  { %v8270_v29 = vpop.permute.xlu1 %8269 }
 0x569   :  { %v8456_v55 = vsel %vm473_vm0, %v8452_v16, %v8270_v29  ;;  %v15600_v29 = vcombine.low %v14259_v40, %v14389_v34  ;;  %v15601_v40 = vcombine.low %v14265_v3, %v14393_v47 }
 0x56c   :  { %v8238_v44 = vpop.permute.xlu1 %8237 }
 0x56d   :  { %v8448_v54 = vsel %vm8396_vm2, %v8444_v58, %v8238_v44 }
 0x56e   :  { %10256 = vrsqrt.f32 %v8448_v54  ;;  %vm8683_vm12 = vcmp.eq.f32.partialorder %v8448_v54, inf  ;;  %v8686_v18 = vand.u32 2147483648, %v8448_v54  ;;  %vm8685_vm13 = vcmp.eq.f32.partialorder %v8448_v54, 0.0 }
 0x570   :  { %v8286_v63 = vpop.permute.xlu1 %8285 }
 0x571   :  { %v8460_v48 = vsel %vm8396_vm2, %v8456_v55, %v8286_v63 }
 0x572   :  { %10258 = vrsqrt.f32 %v8460_v48  ;;  %vm8690_vm14 = vcmp.eq.f32.partialorder %v8460_v48, inf  ;;  %v8693_v45 = vand.u32 2147483648, %v8460_v48  ;;  %vm8692_vm15 = vcmp.eq.f32.partialorder %v8460_v48, 0.0 }
 0x574   :  { %v8014_v9 = vpop.permute.xlu1 %8013 }
 0x575   :  { %v8391_v49 = vsel %vm8387_vm1, %v15597_v5, %v8014_v9 }
 0x578   :  { %v10257_v57 = vpop.eup %10256  ;;  %v8030_v30 = vpop.permute.xlu1 %8029 }
 0x579   :  { %v8682_v22 = vmul.f32 %v10257_v57, %v8448_v54  ;;  %v8395_v26 = vsel %vm473_vm0, %v8391_v49, %v8030_v30 }
 0x57b   :  { %v8684_v50 = vsel %vm8683_vm12, %v8448_v54, %v8682_v22 }
 0x57c   :  { %v10259_v8 = vpop.eup %10258  ;;  %v8687_v37 = vsel %vm8685_vm13, %v8686_v18, %v8684_v50  ;;  %v8046_v62 = vpop.permute.xlu1 %8045  ;;  %v15602_v50 = vcombine.low %v14240_v38, %v14363_v60 }
 0x57d   :  { %8737 = vst [vmem:[#allocation8 + $0xe0] sm:$0xff] %v8687_v37  ;;  %v8689_v43 = vmul.f32 %v10259_v8, %v8460_v48  ;;  %v8400_v51 = vsel %vm8396_vm2, %v8395_v26, %v8046_v62 }
 0x57e   :  { %10260 = vrsqrt.f32 %v8400_v51  ;;  %vm8655_vm3 = vcmp.eq.f32.partialorder %v8400_v51, inf  ;;  %v8658_v14 = vand.u32 2147483648, %v8400_v51  ;;  %vm8657_vm4 = vcmp.eq.f32.partialorder %v8400_v51, 0.0 }
 0x57f   :  { %v8691_v59 = vsel %vm8690_vm14, %v8460_v48, %v8689_v43 }
 0x580   :  { %v8694_v11 = vsel %vm8692_vm15, %v8693_v45, %v8691_v59  ;;  %v8062_v15 = vpop.permute.xlu1 %8061 }
 0x581   :  { %8738 = vst [vmem:[#allocation8 + $0xe8] sm:$0xff] %v8694_v11  ;;  %v8404_v17 = vsel %vm8387_vm1, %v15598_v36, %v8062_v15 }
 0x584   :  { %v8078_v56 = vpop.permute.xlu1 %8077 }
 0x585   :  { %v8408_v39 = vsel %vm473_vm0, %v8404_v17, %v8078_v56 }
 0x588   :  { %v10261_v61 = vpop.eup %10260  ;;  %v8094_v24 = vpop.permute.xlu1 %8093 }
 0x589   :  { %v8654_v2 = vmul.f32 %v10261_v61, %v8400_v51  ;;  %v8412_v23 = vsel %vm8396_vm2, %v8408_v39, %v8094_v24 }
 0x58a   :  { %10262 = vrsqrt.f32 %v8412_v23  ;;  %vm8662_vm5 = vcmp.eq.f32.partialorder %v8412_v23, inf  ;;  %v8665_v53 = vand.u32 2147483648, %v8412_v23  ;;  %vm8664_vm6 = vcmp.eq.f32.partialorder %v8412_v23, 0.0 }
 0x58b   :  { %v8656_v7 = vsel %vm8655_vm3, %v8400_v51, %v8654_v2 }
 0x58c   :  { %v8659_v31 = vsel %vm8657_vm4, %v8658_v14, %v8656_v7  ;;  %v8302_v32 = vpop.permute.xlu1 %8301 }
 0x58d   :  { %8733 = vst [vmem:[#allocation8 + $0xc0] sm:$0xff] %v8659_v31  ;;  %v8464_v52 = vsel %vm8387_vm1, %v15599_v20, %v8302_v32 }
 0x590   :  { %v8350_v4 = vpop.permute.xlu1 %8349 }
 0x591   :  { %v8476_v5 = vsel %vm8387_vm1, %v15602_v50, %v8350_v4 }
 0x594   :  { %v10263_v21 = vpop.eup %10262  ;;  %v8318_v42 = vpop.permute.xlu1 %8317 }
 0x595   :  { %v8661_v28 = vmul.f32 %v10263_v21, %v8412_v23  ;;  %v8468_v19 = vsel %vm473_vm0, %v8464_v52, %v8318_v42 }
 0x597   :  { %v8663_v35 = vsel %vm8662_vm5, %v8412_v23, %v8661_v28 }
 0x598   :  { %v8666_v10 = vsel %vm8664_vm6, %v8665_v53, %v8663_v35  ;;  %v8366_v1 = vpop.permute.xlu1 %8365 }
 0x599   :  { %8734 = vst [vmem:[#allocation8 + $0xc8] sm:$0xff] %v8666_v10  ;;  %v8480_v3 = vsel %vm473_vm0, %v8476_v5, %v8366_v1 }
 0x59c   :  { %v8334_v25 = vpop.permute.xlu1 %8333 }
 0x59d   :  { %v8472_v12 = vsel %vm8396_vm2, %v8468_v19, %v8334_v25 }
 0x59e   :  { %10264 = vrsqrt.f32 %v8472_v12  ;;  %vm8697_vm7 = vcmp.eq.f32.partialorder %v8472_v12, inf  ;;  %v8700_v54 = vand.u32 2147483648, %v8472_v12  ;;  %vm8699_vm8 = vcmp.eq.f32.partialorder %v8472_v12, 0.0 }
 0x5a0   :  { %v8110_v13 = vpop.permute.xlu1 %8109 }
 0x5a1   :  { %v8416_v46 = vsel %vm8387_vm1, %v15600_v29, %v8110_v13 }
 0x5a4   :  { %v8126_v41 = vpop.permute.xlu1 %8125 }
 0x5a5   :  { %v8420_v58 = vsel %vm473_vm0, %v8416_v46, %v8126_v41 }
 0x5a8   :  { %v10265_v27 = vpop.eup %10264  ;;  %v8142_v44 = vpop.permute.xlu1 %8141 }
 0x5a9   :  { %v8696_v6 = vmul.f32 %v10265_v27, %v8472_v12  ;;  %v8424_v0 = vsel %vm8396_vm2, %v8420_v58, %v8142_v44 }
 0x5aa   :  { %10266 = vrsqrt.f32 %v8424_v0  ;;  %vm8669_vm9 = vcmp.eq.f32.partialorder %v8424_v0, inf  ;;  %v8672_v18 = vand.u32 2147483648, %v8424_v0  ;;  %vm8671_vm10 = vcmp.eq.f32.partialorder %v8424_v0, 0.0 }
 0x5ab   :  { %v8698_v33 = vsel %vm8697_vm7, %v8472_v12, %v8696_v6 }
 0x5ac   :  { %v8701_v16 = vsel %vm8699_vm8, %v8700_v54, %v8698_v33  ;;  %v8158_v55 = vpop.permute.xlu1 %8157 }
 0x5ad   :  { %8739 = vst [vmem:[#allocation8 + $0xf0] sm:$0xff] %v8701_v16  ;;  %v8428_v34 = vsel %vm8387_vm1, %v15601_v40, %v8158_v55 }
 0x5b0   :  { %v8174_v63 = vpop.permute.xlu1 %8173 }
 0x5b1   :  { %v8432_v9 = vsel %vm473_vm0, %v8428_v34, %v8174_v63 }
 0x5b4   :  { %v10267_v48 = vpop.eup %10266  ;;  %v8190_v57 = vpop.permute.xlu1 %8189 }
 0x5b5   :  { %v8668_v30 = vmul.f32 %v10267_v48, %v8424_v0  ;;  %v8436_v22 = vsel %vm8396_vm2, %v8432_v9, %v8190_v57 }
 0x5b6   :  { %10268 = vrsqrt.f32 %v8436_v22  ;;  %vm8676_vm11 = vcmp.eq.f32.partialorder %v8436_v22, inf  ;;  %v8679_v43 = vand.u32 2147483648, %v8436_v22  ;;  %vm8678_vm12 = vcmp.eq.f32.partialorder %v8436_v22, 0.0 }
 0x5b7   :  { %v8670_v49 = vsel %vm8669_vm9, %v8424_v0, %v8668_v30 }
 0x5b8   :  { %v8673_v47 = vsel %vm8671_vm10, %v8672_v18, %v8670_v49  ;;  %v8382_v8 = vpop.permute.xlu1 %8381 }
 0x5b9   :  { %8735 = vst [vmem:[#allocation8 + $0xd0] sm:$0xff] %v8673_v47  ;;  %v8484_v37 = vsel %vm8396_vm2, %v8480_v3, %v8382_v8 }
 0x5ba   :  { %10270 = vrsqrt.f32 %v8484_v37  ;;  %vm8704_vm1 = vcmp.eq.f32.partialorder %v8484_v37, inf  ;;  %v8707_v59 = vand.u32 2147483648, %v8484_v37  ;;  %vm8706_vm0 = vcmp.eq.f32.partialorder %v8484_v37, 0.0 }
 0x5c0   :  { %v10269_v26 = vpop.eup %10268 }
 0x5c1   :  { %v8675_v62 = vmul.f32 %v10269_v26, %v8436_v22 }
 0x5c3   :  { %v8677_v51 = vsel %vm8676_vm11, %v8436_v22, %v8675_v62 }
 0x5c4   :  { %v10271_v45 = vpop.eup %10270  ;;  %v8680_v38 = vsel %vm8678_vm12, %v8679_v43, %v8677_v51 }
 0x5c5   :  { %8736 = vst [vmem:[#allocation8 + $0xd8] sm:$0xff] %v8680_v38  ;;  %v8703_v60 = vmul.f32 %v10271_v45, %v8484_v37 }
 0x5c7   :  { %v8705_v11 = vsel %vm8704_vm1, %v8484_v37, %v8703_v60 }
 0x5c8   :  { %v8708_v15 = vsel %vm8706_vm0, %v8707_v59, %v8705_v11 }
 0x5c9   :  { %8740 = vst [vmem:[#allocation8 + $0xf8] sm:$0xff] %v8708_v15 }
 0x5ca   :  { %10361 = shalt.err (!%p10358_p0)
}
 0x5cb   :  { %s10362_s30 = scalar_lea.hbm %s14633_s3, 4096 }
 0x5cc   :  { %p10363_p1 = scmp.ne.s32.totalorder %s14633_s3, %s10362_s30  ;;  %p10366_p2 = scmp.lt.u32.totalorder %s10362_s30, %s14633_s3 }
 0x5ce   :  { %p10368_p3 = pnand %p10366_p2, %p10363_p1 }
 0x5d0   :  { %10371 = shalt.err (!%p10368_p3)
}
 0x5d1   :  { %s10390_s8 = smov 1024  }
 0x5d2   :  { %8752 = dma.vmem_to_hbm [thread:$0]  %s8747_s26, 4096, %s14633_s3, [#allocation4], %s10390_s8, %s10390_s8, %s10379_s22  }
 0x5d3   :  { %10376 = dma.done.wait [#allocation4], 4096  }
 0x5d4   :  { %10377 = vsyncadd [#allocation4], 4294963200 }
 0x5d5   :  { %8756 = vsyncpa [#allocation3], 1 }
 0x5d6   :  { %8757 = vsyncpa [#allocation6], 1 }
 0x5d7   :  { %8758 = vsyncpa [#allocation4], 1 }

</bundles_post_ra>
